<compile_context>
chip_gen: v5e
topology: v5e:2x2
jax: 0.10.0
libtpu: 0.0.40
codegen_flags: <defaults>
</compile_context>

<pallas_src>
import math

import jax
import jax.numpy as jnp
from jax.experimental import pallas as pl
from jax.experimental.pallas import tpu as pltpu


# ----------------------------------------------------------------------------
# Kernel A: conv1(norm-folded, im2col) + ReLU -> conv2 + ReLU -> maxpool2x2
# ----------------------------------------------------------------------------
def block1_kernel(cols_ref, w1_ref, b1_ref, w2_ref, b2_ref, o_ref,
                  c1_ref, c2_ref, hp_ref):
    # cols_ref: (1, H*W, 27) bf16   im2col of the mean-padded RGB frame
    # w1_ref:   (27, 64)    bf16    normalization folded in
    # b1_ref:   (1, 64)     f32
    # w2_ref:   (3, 3, 64, 64) bf16, b2_ref: (1, 64) f32
    # o_ref:    (1, H2+2, W2+2, 64) bf16  pooled output with zero ring (conv3 pad)
    # scratch:  c1 (H+2, W+2, 64) bf16, c2 (H, W, 64) f32, hp (H2, W, 64) f32
    Hp2, Wp2, C1 = c1_ref.shape
    H, W = Hp2 - 2, Wp2 - 2
    H2, W2 = H // 2, W // 2

    # conv1 + ReLU: one (H*W, 27) x (27, 64) matmul, f32 accumulation.
    a1 = jnp.dot(cols_ref[0], w1_ref[...], preferred_element_type=jnp.float32)
    a1 = jnp.maximum(a1 + b1_ref[...], 0.0)

    # Stage into a zero-ringed VMEM scratch (the ring is conv2's zero padding).
    c1_ref[...] = jnp.zeros_like(c1_ref)
    c1_ref[pl.ds(1, H), pl.ds(1, W), :] = (
        a1.reshape(H, W, C1).astype(c1_ref.dtype))

    # conv2 + ReLU: nine (H*W, 64) x (64, 64) taps.
    acc = jnp.zeros((H * W, C1), jnp.float32)
    for dy in range(3):
        for dx in range(3):
            patch = c1_ref[pl.ds(dy, H), pl.ds(dx, W), :]
            acc = acc + jnp.dot(patch.reshape(H * W, C1), w2_ref[dy, dx],
                                preferred_element_type=jnp.float32)
    c2_ref[...] = jnp.maximum(acc + b2_ref[...], 0.0).reshape(H, W, C1)

    # Fused 2x2 max-pool, entirely in VMEM (stride-2 reads, no extra HBM pass).
    hp_ref[...] = jnp.maximum(c2_ref[pl.ds(0, H2, 2), :, :],
                              c2_ref[pl.ds(1, H2, 2), :, :])
    pooled = jnp.maximum(hp_ref[:, pl.ds(0, W2, 2), :],
                         hp_ref[:, pl.ds(1, W2, 2), :])

    # Emit with a zero ring so conv3 needs no separate padding pass.
    o_ref[...] = jnp.zeros_like(o_ref)
    o_ref[0, pl.ds(1, H2), pl.ds(1, W2), :] = pooled.astype(o_ref.dtype)


def block1(cols, w1f, b1, w2, b2, H, W):
    NB, HW, K = cols.shape
    C1 = w1f.shape[-1]
    H2, W2 = H // 2, W // 2
    return pl.pallas_call(
        block1_kernel,
        out_shape=jax.ShapeDtypeStruct((NB, H2 + 2, W2 + 2, C1), jnp.bfloat16),
        grid=(NB,),
        in_specs=[
            pl.BlockSpec((1, HW, K), lambda n: (n, 0, 0)),
            pl.BlockSpec((K, C1), lambda n: (0, 0)),
            pl.BlockSpec((1, C1), lambda n: (0, 0)),
            pl.BlockSpec((3, 3, C1, C1), lambda n: (0, 0, 0, 0)),
            pl.BlockSpec((1, C1), lambda n: (0, 0)),
        ],
        out_specs=pl.BlockSpec((1, H2 + 2, W2 + 2, C1),
                               lambda n: (n, 0, 0, 0)),
        scratch_shapes=[
            pltpu.VMEM((H + 2, W + 2, C1), jnp.bfloat16),
            pltpu.VMEM((H, W, C1), jnp.float32),
            pltpu.VMEM((H2, W, C1), jnp.float32),
        ],
        compiler_params=pltpu.CompilerParams(
            dimension_semantics=("parallel",)),
    )(cols, w1f, b1, w2, b2)


# ----------------------------------------------------------------------------
# Kernel B: conv3(64->128) + ReLU fused with the MSE reduction (accumulator)
# ----------------------------------------------------------------------------
def conv3_mse_kernel(g_ref, t_ref, w_ref, b_ref, o_ref):
    # g_ref/t_ref: (1, H2+2, W2+2, 64) bf16 pooled features with zero ring
    # w_ref: (3, 3, 64, 128) bf16, b_ref: (1, 128) f32
    # o_ref: (1, 1) f32 resident accumulator (same block for every grid step)
    _, Hp, Wp, Cin = g_ref.shape
    H2, W2 = Hp - 2, Wp - 2
    Cout = w_ref.shape[-1]

    def feat(x_ref):
        acc = jnp.zeros((H2 * W2, Cout), jnp.float32)
        for dy in range(3):
            for dx in range(3):
                patch = x_ref[0, pl.ds(dy, H2), pl.ds(dx, W2), :]
                acc = acc + jnp.dot(patch.reshape(H2 * W2, Cin), w_ref[dy, dx],
                                    preferred_element_type=jnp.float32)
        return jnp.maximum(acc + b_ref[...], 0.0)

    d = feat(g_ref) - feat(t_ref)

    @pl.when(pl.program_id(0) == 0)
    def _init():
        o_ref[...] = jnp.zeros_like(o_ref)

    o_ref[...] += jnp.sum(d * d).reshape(1, 1)

    @pl.when(pl.program_id(0) == pl.num_programs(0) - 1)
    def _finalize():
        n_elem = pl.num_programs(0) * H2 * W2 * Cout
        o_ref[...] = o_ref[...] * (1.0 / n_elem)


def conv3_mse(feat_pad, w3, b3, n_pairs):
    _, Hp, Wp, Cin = feat_pad.shape
    Cout = w3.shape[-1]
    img_spec = pl.BlockSpec((1, Hp, Wp, Cin), lambda n: (n, 0, 0, 0))
    img_spec_t = pl.BlockSpec((1, Hp, Wp, Cin),
                              lambda n: (n + n_pairs, 0, 0, 0))
    out = pl.pallas_call(
        conv3_mse_kernel,
        out_shape=jax.ShapeDtypeStruct((1, 1), jnp.float32),
        grid=(n_pairs,),
        in_specs=[
            img_spec, img_spec_t,
            pl.BlockSpec((3, 3, Cin, Cout), lambda n: (0, 0, 0, 0)),
            pl.BlockSpec((1, Cout), lambda n: (0, 0)),
        ],
        out_specs=pl.BlockSpec((1, 1), lambda n: (0, 0)),
        compiler_params=pltpu.CompilerParams(
            dimension_semantics=("arbitrary",)),
    )(feat_pad, feat_pad, w3, b3)
    return out[0, 0]


# ----------------------------------------------------------------------------
# VGGPerceptualLoss forward
# ----------------------------------------------------------------------------
IMAGENET_MEAN = jnp.array([0.485, 0.456, 0.406], jnp.float32)
IMAGENET_STD = jnp.array([0.229, 0.224, 0.225], jnp.float32)


def init_vgg_params(key):
    """Deterministic synthetic weights with the vgg19.features[:7] shapes."""
    shapes = [
        ("w1", (3, 3, 3, 64)), ("b1", (64,)),
        ("w2", (3, 3, 64, 64)), ("b2", (64,)),
        ("w3", (3, 3, 64, 128)), ("b3", (128,)),
    ]
    params = {}
    keys = jax.random.split(key, len(shapes))
    for (name, shape), k in zip(shapes, keys):
        if name.startswith("w"):
            fan_in = shape[0] * shape[1] * shape[2]
            params[name] = (jax.random.normal(k, shape, jnp.float32)
                            * (1.0 / math.sqrt(fan_in)))
        else:
            params[name] = jax.random.normal(k, shape, jnp.float32) * 0.01
    return params


def vgg_perceptual_loss(truth_frame_nchw, gen_frame_nchw, params):
    # NCHW -> NHWC; gen & truth concatenated so the extractor runs once.
    x = jnp.concatenate([gen_frame_nchw, truth_frame_nchw], axis=0)
    x = jnp.transpose(x, (0, 2, 3, 1)).astype(jnp.float32)      # (2N, H, W, 3)
    NB, H, W, _ = x.shape
    N = NB // 2
    assert H % 2 == 0 and W % 2 == 0, "MaxPool2d(2,2) path assumes even H, W"

    mean = IMAGENET_MEAN.reshape(1, 1, 1, 3)

    # Fold normalization into conv1 at trace time; pad the raw frame with the
    # per-channel mean so the folded conv sees exact zeros at the border in
    # normalized space.
    w1, b1 = params["w1"], params["b1"]
    w1f = w1 * (1.0 / IMAGENET_STD)[None, None, :, None]
    b1f = b1 - jnp.sum(
        w1 * (IMAGENET_MEAN / IMAGENET_STD)[None, None, :, None],
        axis=(0, 1, 2))
    xp = jnp.pad(x - mean, ((0, 0), (1, 1), (1, 1), (0, 0))) + mean

    # im2col for conv1: one K = 3*3*3 = 27 matmul per image instead of 9 K=3.
    cols = jnp.concatenate(
        [xp[:, dy:dy + H, dx:dx + W, :] for dy in range(3) for dx in range(3)],
        axis=-1).reshape(NB, H * W, 27).astype(jnp.bfloat16)
    w1f_flat = w1f.reshape(27, -1).astype(jnp.bfloat16)

    pooled_pad = block1(cols, w1f_flat, b1f.reshape(1, -1),
                        params["w2"].astype(jnp.bfloat16),
                        params["b2"].reshape(1, -1), H, W)

    return conv3_mse(pooled_pad,
                     params["w3"].astype(jnp.bfloat16),
                     params["b3"].reshape(1, -1), N)


# ----------------------------------------------------------------------------
# Main
# ----------------------------------------------------------------------------
if __name__ == "__main__":
    key = jax.random.PRNGKey(0)
    k_params, k_truth, k_gen = jax.random.split(key, 3)

    params = init_vgg_params(k_params)

    # batch=2, channels=3 (RGB required by ImageNet mean/std), spatial=16
    truth_frame = jax.random.uniform(k_truth, (2, 3, 16, 16), jnp.float32)
    gen_frame = jax.random.uniform(k_gen, (2, 3, 16, 16), jnp.float32)

    loss_fn = jax.jit(vgg_perceptual_loss)
    loss = jax.block_until_ready(loss_fn(truth_frame, gen_frame, params))

    assert loss.shape == () and bool(jnp.isfinite(loss))
    print("KERNEL_OK")
</pallas_src>

<mosaic_0001>
module attributes {stable_mosaic.version = 11 : i64} {
  func.func @block1_kernel(%arg0: i32, %arg1: memref<1x256x27xbf16, #tpu.memory_space<vmem>>, %arg2: memref<27x64xbf16, #tpu.memory_space<vmem>>, %arg3: memref<1x64xf32, #tpu.memory_space<vmem>>, %arg4: memref<3x3x64x64xbf16, #tpu.memory_space<vmem>>, %arg5: memref<1x64xf32, #tpu.memory_space<vmem>>, %arg6: memref<1x10x10x64xbf16, #tpu.memory_space<vmem>>, %arg7: memref<18x18x64xbf16, #tpu.memory_space<vmem>>, %arg8: memref<16x16x64xf32, #tpu.memory_space<vmem>>, %arg9: memref<8x16x64xf32, #tpu.memory_space<vmem>>) attributes {dimension_semantics = [#tpu.dimension_semantics<parallel>], iteration_bounds = array<i64: 4>, scalar_prefetch = 0 : i64, scratch_operands = 3 : i64, tpu.core_type = #tpu.core_type<tc>, window_params = [{transform_indices = @transform_0, window_bounds = array<i64: 1, 256, 27>}, {pipeline_mode = #tpu.pipeline_mode<synchronous>, transform_indices = @transform_1, window_bounds = array<i64: 27, 64>}, {pipeline_mode = #tpu.pipeline_mode<synchronous>, transform_indices = @transform_2, window_bounds = array<i64: 1, 64>}, {pipeline_mode = #tpu.pipeline_mode<synchronous>, transform_indices = @transform_3, window_bounds = array<i64: 3, 3, 64, 64>}, {pipeline_mode = #tpu.pipeline_mode<synchronous>, transform_indices = @transform_4, window_bounds = array<i64: 1, 64>}, {transform_indices = @transform_5, window_bounds = array<i64: 1, 10, 10, 64>}]} {
    %c0 = arith.constant 0 : index
    %c0_0 = arith.constant 0 : index
    %c0_1 = arith.constant 0 : index
    %0 = vector.load %arg1[%c0, %c0_0, %c0_1] : memref<1x256x27xbf16, #tpu.memory_space<vmem>>, vector<1x256x27xbf16>
    %1 = vector.shape_cast %0 : vector<1x256x27xbf16> to vector<256x27xbf16>
    %c0_2 = arith.constant 0 : index
    %c0_3 = arith.constant 0 : index
    %2 = vector.load %arg2[%c0_2, %c0_3] : memref<27x64xbf16, #tpu.memory_space<vmem>>, vector<27x64xbf16>
    %cst = arith.constant dense<0.000000e+00> : vector<256x64xf32>
    %3 = tpu.matmul %1, %2, %cst {dimension_numbers = #tpu.dot_dimension_numbers<[1], [0], [0], [1], [0, 0, 1, 1], [], []>} : vector<256x27xbf16>, vector<27x64xbf16>, vector<256x64xf32> -> vector<256x64xf32>
    %c0_4 = arith.constant 0 : index
    %c0_5 = arith.constant 0 : index
    %4 = vector.load %arg3[%c0_4, %c0_5] : memref<1x64xf32, #tpu.memory_space<vmem>>, vector<1x64xf32>
    %5 = vector.broadcast %4 : vector<1x64xf32> to vector<256x64xf32>
    %6 = arith.addf %3, %5 : vector<256x64xf32>
    %cst_6 = arith.constant 0.000000e+00 : f32
    %7 = vector.broadcast %cst_6 : f32 to vector<256x64xf32>
    %8 = arith.maximumf %6, %7 : vector<256x64xf32>
    %cst_7 = arith.constant 0.000000e+00 : bf16
    %9 = vector.broadcast %cst_7 : bf16 to vector<18x18x64xbf16>
    %c0_8 = arith.constant 0 : index
    %c0_9 = arith.constant 0 : index
    %c0_10 = arith.constant 0 : index
    %10 = vector.load %arg7[%c0_8, %c0_9, %c0_10] : memref<18x18x64xbf16, #tpu.memory_space<vmem>>, vector<18x18x64xbf16>
    tpu.vector_store %arg7[%c0_8, %c0_9, %c0_10], %9 {strides = array<i32>} : memref<18x18x64xbf16, #tpu.memory_space<vmem>>, vector<18x18x64xbf16>,
    %11 = vector.shape_cast %8 : vector<256x64xf32> to vector<16x16x64xf32>
    %12 = arith.truncf %11 : vector<16x16x64xf32> to vector<16x16x64xbf16>
    %c1 = arith.constant 1 : index
    %c1_11 = arith.constant 1 : index
    %c0_12 = arith.constant 0 : index
    %13 = vector.load %arg7[%c1, %c1_11, %c0_12] : memref<18x18x64xbf16, #tpu.memory_space<vmem>>, vector<16x16x64xbf16>
    tpu.vector_store %arg7[%c1, %c1_11, %c0_12], %12 {strides = array<i32>} : memref<18x18x64xbf16, #tpu.memory_space<vmem>>, vector<16x16x64xbf16>,
    %cst_13 = arith.constant 0.000000e+00 : f32
    %14 = vector.broadcast %cst_13 : f32 to vector<256x64xf32>
    %c0_14 = arith.constant 0 : index
    %c0_15 = arith.constant 0 : index
    %c0_16 = arith.constant 0 : index
    %15 = vector.load %arg7[%c0_14, %c0_15, %c0_16] : memref<18x18x64xbf16, #tpu.memory_space<vmem>>, vector<16x16x64xbf16>
    %16 = vector.shape_cast %15 : vector<16x16x64xbf16> to vector<256x64xbf16>
    %c0_17 = arith.constant 0 : index
    %c0_18 = arith.constant 0 : index
    %c0_19 = arith.constant 0 : index
    %c0_20 = arith.constant 0 : index
    %17 = vector.load %arg4[%c0_17, %c0_18, %c0_19, %c0_20] : memref<3x3x64x64xbf16, #tpu.memory_space<vmem>>, vector<1x1x64x64xbf16>
    %18 = vector.shape_cast %17 : vector<1x1x64x64xbf16> to vector<64x64xbf16>
    %cst_21 = arith.constant dense<0.000000e+00> : vector<256x64xf32>
    %19 = tpu.matmul %16, %18, %cst_21 {dimension_numbers = #tpu.dot_dimension_numbers<[1], [0], [0], [1], [0, 0, 1, 1], [], []>} : vector<256x64xbf16>, vector<64x64xbf16>, vector<256x64xf32> -> vector<256x64xf32>
    %20 = arith.addf %14, %19 : vector<256x64xf32>
    %c0_22 = arith.constant 0 : index
    %c1_23 = arith.constant 1 : index
    %c0_24 = arith.constant 0 : index
    %21 = vector.load %arg7[%c0_22, %c1_23, %c0_24] : memref<18x18x64xbf16, #tpu.memory_space<vmem>>, vector<16x16x64xbf16>
    %22 = vector.shape_cast %21 : vector<16x16x64xbf16> to vector<256x64xbf16>
    %c0_25 = arith.constant 0 : index
    %c1_26 = arith.constant 1 : index
    %c0_27 = arith.constant 0 : index
    %c0_28 = arith.constant 0 : index
    %23 = vector.load %arg4[%c0_25, %c1_26, %c0_27, %c0_28] : memref<3x3x64x64xbf16, #tpu.memory_space<vmem>>, vector<1x1x64x64xbf16>
    %24 = vector.shape_cast %23 : vector<1x1x64x64xbf16> to vector<64x64xbf16>
    %cst_29 = arith.constant dense<0.000000e+00> : vector<256x64xf32>
    %25 = tpu.matmul %22, %24, %cst_29 {dimension_numbers = #tpu.dot_dimension_numbers<[1], [0], [0], [1], [0, 0, 1, 1], [], []>} : vector<256x64xbf16>, vector<64x64xbf16>, vector<256x64xf32> -> vector<256x64xf32>
    %26 = arith.addf %20, %25 : vector<256x64xf32>
    %c0_30 = arith.constant 0 : index
    %c2 = arith.constant 2 : index
    %c0_31 = arith.constant 0 : index
    %27 = vector.load %arg7[%c0_30, %c2, %c0_31] : memref<18x18x64xbf16, #tpu.memory_space<vmem>>, vector<16x16x64xbf16>
    %28 = vector.shape_cast %27 : vector<16x16x64xbf16> to vector<256x64xbf16>
    %c0_32 = arith.constant 0 : index
    %c2_33 = arith.constant 2 : index
    %c0_34 = arith.constant 0 : index
    %c0_35 = arith.constant 0 : index
    %29 = vector.load %arg4[%c0_32, %c2_33, %c0_34, %c0_35] : memref<3x3x64x64xbf16, #tpu.memory_space<vmem>>, vector<1x1x64x64xbf16>
    %30 = vector.shape_cast %29 : vector<1x1x64x64xbf16> to vector<64x64xbf16>
    %cst_36 = arith.constant dense<0.000000e+00> : vector<256x64xf32>
    %31 = tpu.matmul %28, %30, %cst_36 {dimension_numbers = #tpu.dot_dimension_numbers<[1], [0], [0], [1], [0, 0, 1, 1], [], []>} : vector<256x64xbf16>, vector<64x64xbf16>, vector<256x64xf32> -> vector<256x64xf32>
    %32 = arith.addf %26, %31 : vector<256x64xf32>
    %c1_37 = arith.constant 1 : index
    %c0_38 = arith.constant 0 : index
    %c0_39 = arith.constant 0 : index
    %33 = vector.load %arg7[%c1_37, %c0_38, %c0_39] : memref<18x18x64xbf16, #tpu.memory_space<vmem>>, vector<16x16x64xbf16>
    %34 = vector.shape_cast %33 : vector<16x16x64xbf16> to vector<256x64xbf16>
    %c1_40 = arith.constant 1 : index
    %c0_41 = arith.constant 0 : index
    %c0_42 = arith.constant 0 : index
    %c0_43 = arith.constant 0 : index
    %35 = vector.load %arg4[%c1_40, %c0_41, %c0_42, %c0_43] : memref<3x3x64x64xbf16, #tpu.memory_space<vmem>>, vector<1x1x64x64xbf16>
    %36 = vector.shape_cast %35 : vector<1x1x64x64xbf16> to vector<64x64xbf16>
    %cst_44 = arith.constant dense<0.000000e+00> : vector<256x64xf32>
    %37 = tpu.matmul %34, %36, %cst_44 {dimension_numbers = #tpu.dot_dimension_numbers<[1], [0], [0], [1], [0, 0, 1, 1], [], []>} : vector<256x64xbf16>, vector<64x64xbf16>, vector<256x64xf32> -> vector<256x64xf32>
    %38 = arith.addf %32, %37 : vector<256x64xf32>
    %c1_45 = arith.constant 1 : index
    %c1_46 = arith.constant 1 : index
    %c0_47 = arith.constant 0 : index
    %39 = vector.load %arg7[%c1_45, %c1_46, %c0_47] : memref<18x18x64xbf16, #tpu.memory_space<vmem>>, vector<16x16x64xbf16>
    %40 = vector.shape_cast %39 : vector<16x16x64xbf16> to vector<256x64xbf16>
    %c1_48 = arith.constant 1 : index
    %c1_49 = arith.constant 1 : index
    %c0_50 = arith.constant 0 : index
    %c0_51 = arith.constant 0 : index
    %41 = vector.load %arg4[%c1_48, %c1_49, %c0_50, %c0_51] : memref<3x3x64x64xbf16, #tpu.memory_space<vmem>>, vector<1x1x64x64xbf16>
    %42 = vector.shape_cast %41 : vector<1x1x64x64xbf16> to vector<64x64xbf16>
    %cst_52 = arith.constant dense<0.000000e+00> : vector<256x64xf32>
    %43 = tpu.matmul %40, %42, %cst_52 {dimension_numbers = #tpu.dot_dimension_numbers<[1], [0], [0], [1], [0, 0, 1, 1], [], []>} : vector<256x64xbf16>, vector<64x64xbf16>, vector<256x64xf32> -> vector<256x64xf32>
    %44 = arith.addf %38, %43 : vector<256x64xf32>
    %c1_53 = arith.constant 1 : index
    %c2_54 = arith.constant 2 : index
    %c0_55 = arith.constant 0 : index
    %45 = vector.load %arg7[%c1_53, %c2_54, %c0_55] : memref<18x18x64xbf16, #tpu.memory_space<vmem>>, vector<16x16x64xbf16>
    %46 = vector.shape_cast %45 : vector<16x16x64xbf16> to vector<256x64xbf16>
    %c1_56 = arith.constant 1 : index
    %c2_57 = arith.constant 2 : index
    %c0_58 = arith.constant 0 : index
    %c0_59 = arith.constant 0 : index
    %47 = vector.load %arg4[%c1_56, %c2_57, %c0_58, %c0_59] : memref<3x3x64x64xbf16, #tpu.memory_space<vmem>>, vector<1x1x64x64xbf16>
    %48 = vector.shape_cast %47 : vector<1x1x64x64xbf16> to vector<64x64xbf16>
    %cst_60 = arith.constant dense<0.000000e+00> : vector<256x64xf32>
    %49 = tpu.matmul %46, %48, %cst_60 {dimension_numbers = #tpu.dot_dimension_numbers<[1], [0], [0], [1], [0, 0, 1, 1], [], []>} : vector<256x64xbf16>, vector<64x64xbf16>, vector<256x64xf32> -> vector<256x64xf32>
    %50 = arith.addf %44, %49 : vector<256x64xf32>
    %c2_61 = arith.constant 2 : index
    %c0_62 = arith.constant 0 : index
    %c0_63 = arith.constant 0 : index
    %51 = vector.load %arg7[%c2_61, %c0_62, %c0_63] : memref<18x18x64xbf16, #tpu.memory_space<vmem>>, vector<16x16x64xbf16>
    %52 = vector.shape_cast %51 : vector<16x16x64xbf16> to vector<256x64xbf16>
    %c2_64 = arith.constant 2 : index
    %c0_65 = arith.constant 0 : index
    %c0_66 = arith.constant 0 : index
    %c0_67 = arith.constant 0 : index
    %53 = vector.load %arg4[%c2_64, %c0_65, %c0_66, %c0_67] : memref<3x3x64x64xbf16, #tpu.memory_space<vmem>>, vector<1x1x64x64xbf16>
    %54 = vector.shape_cast %53 : vector<1x1x64x64xbf16> to vector<64x64xbf16>
    %cst_68 = arith.constant dense<0.000000e+00> : vector<256x64xf32>
    %55 = tpu.matmul %52, %54, %cst_68 {dimension_numbers = #tpu.dot_dimension_numbers<[1], [0], [0], [1], [0, 0, 1, 1], [], []>} : vector<256x64xbf16>, vector<64x64xbf16>, vector<256x64xf32> -> vector<256x64xf32>
    %56 = arith.addf %50, %55 : vector<256x64xf32>
    %c2_69 = arith.constant 2 : index
    %c1_70 = arith.constant 1 : index
    %c0_71 = arith.constant 0 : index
    %57 = vector.load %arg7[%c2_69, %c1_70, %c0_71] : memref<18x18x64xbf16, #tpu.memory_space<vmem>>, vector<16x16x64xbf16>
    %58 = vector.shape_cast %57 : vector<16x16x64xbf16> to vector<256x64xbf16>
    %c2_72 = arith.constant 2 : index
    %c1_73 = arith.constant 1 : index
    %c0_74 = arith.constant 0 : index
    %c0_75 = arith.constant 0 : index
    %59 = vector.load %arg4[%c2_72, %c1_73, %c0_74, %c0_75] : memref<3x3x64x64xbf16, #tpu.memory_space<vmem>>, vector<1x1x64x64xbf16>
    %60 = vector.shape_cast %59 : vector<1x1x64x64xbf16> to vector<64x64xbf16>
    %cst_76 = arith.constant dense<0.000000e+00> : vector<256x64xf32>
    %61 = tpu.matmul %58, %60, %cst_76 {dimension_numbers = #tpu.dot_dimension_numbers<[1], [0], [0], [1], [0, 0, 1, 1], [], []>} : vector<256x64xbf16>, vector<64x64xbf16>, vector<256x64xf32> -> vector<256x64xf32>
    %62 = arith.addf %56, %61 : vector<256x64xf32>
    %c2_77 = arith.constant 2 : index
    %c2_78 = arith.constant 2 : index
    %c0_79 = arith.constant 0 : index
    %63 = vector.load %arg7[%c2_77, %c2_78, %c0_79] : memref<18x18x64xbf16, #tpu.memory_space<vmem>>, vector<16x16x64xbf16>
    %64 = vector.shape_cast %63 : vector<16x16x64xbf16> to vector<256x64xbf16>
    %c2_80 = arith.constant 2 : index
    %c2_81 = arith.constant 2 : index
    %c0_82 = arith.constant 0 : index
    %c0_83 = arith.constant 0 : index
    %65 = vector.load %arg4[%c2_80, %c2_81, %c0_82, %c0_83] : memref<3x3x64x64xbf16, #tpu.memory_space<vmem>>, vector<1x1x64x64xbf16>
    %66 = vector.shape_cast %65 : vector<1x1x64x64xbf16> to vector<64x64xbf16>
    %cst_84 = arith.constant dense<0.000000e+00> : vector<256x64xf32>
    %67 = tpu.matmul %64, %66, %cst_84 {dimension_numbers = #tpu.dot_dimension_numbers<[1], [0], [0], [1], [0, 0, 1, 1], [], []>} : vector<256x64xbf16>, vector<64x64xbf16>, vector<256x64xf32> -> vector<256x64xf32>
    %68 = arith.addf %62, %67 : vector<256x64xf32>
    %c0_85 = arith.constant 0 : index
    %c0_86 = arith.constant 0 : index
    %69 = vector.load %arg5[%c0_85, %c0_86] : memref<1x64xf32, #tpu.memory_space<vmem>>, vector<1x64xf32>
    %70 = vector.broadcast %69 : vector<1x64xf32> to vector<256x64xf32>
    %71 = arith.addf %68, %70 : vector<256x64xf32>
    %cst_87 = arith.constant 0.000000e+00 : f32
    %72 = vector.broadcast %cst_87 : f32 to vector<256x64xf32>
    %73 = arith.maximumf %71, %72 : vector<256x64xf32>
    %74 = vector.shape_cast %73 : vector<256x64xf32> to vector<16x16x64xf32>
    %c0_88 = arith.constant 0 : index
    %c0_89 = arith.constant 0 : index
    %c0_90 = arith.constant 0 : index
    %75 = vector.load %arg8[%c0_88, %c0_89, %c0_90] : memref<16x16x64xf32, #tpu.memory_space<vmem>>, vector<16x16x64xf32>
    tpu.vector_store %arg8[%c0_88, %c0_89, %c0_90], %74 {strides = array<i32>} : memref<16x16x64xf32, #tpu.memory_space<vmem>>, vector<16x16x64xf32>,
    %c0_91 = arith.constant 0 : index
    %c0_92 = arith.constant 0 : index
    %c0_93 = arith.constant 0 : index
    %76 = tpu.strided_load %arg8[%c0_91, %c0_92, %c0_93] {strides = array<i32: 2, 1, 1>} : memref<16x16x64xf32, #tpu.memory_space<vmem>>, vector<8x16x64xf32>
    %c1_94 = arith.constant 1 : index
    %c0_95 = arith.constant 0 : index
    %c0_96 = arith.constant 0 : index
    %77 = tpu.strided_load %arg8[%c1_94, %c0_95, %c0_96] {strides = array<i32: 2, 1, 1>} : memref<16x16x64xf32, #tpu.memory_space<vmem>>, vector<8x16x64xf32>
    %78 = arith.maximumf %76, %77 : vector<8x16x64xf32>
    %c0_97 = arith.constant 0 : index
    %c0_98 = arith.constant 0 : index
    %c0_99 = arith.constant 0 : index
    %79 = vector.load %arg9[%c0_97, %c0_98, %c0_99] : memref<8x16x64xf32, #tpu.memory_space<vmem>>, vector<8x16x64xf32>
    tpu.vector_store %arg9[%c0_97, %c0_98, %c0_99], %78 {strides = array<i32>} : memref<8x16x64xf32, #tpu.memory_space<vmem>>, vector<8x16x64xf32>,
    %c0_100 = arith.constant 0 : index
    %c0_101 = arith.constant 0 : index
    %c0_102 = arith.constant 0 : index
    %80 = tpu.strided_load %arg9[%c0_100, %c0_101, %c0_102] {strides = array<i32: 1, 2, 1>} : memref<8x16x64xf32, #tpu.memory_space<vmem>>, vector<8x8x64xf32>
    %c0_103 = arith.constant 0 : index
    %c1_104 = arith.constant 1 : index
    %c0_105 = arith.constant 0 : index
    %81 = tpu.strided_load %arg9[%c0_103, %c1_104, %c0_105] {strides = array<i32: 1, 2, 1>} : memref<8x16x64xf32, #tpu.memory_space<vmem>>, vector<8x8x64xf32>
    %82 = arith.maximumf %80, %81 : vector<8x8x64xf32>
    %cst_106 = arith.constant 0.000000e+00 : bf16
    %83 = vector.broadcast %cst_106 : bf16 to vector<1x10x10x64xbf16>
    %c0_107 = arith.constant 0 : index
    %c0_108 = arith.constant 0 : index
    %c0_109 = arith.constant 0 : index
    %c0_110 = arith.constant 0 : index
    %84 = vector.load %arg6[%c0_107, %c0_108, %c0_109, %c0_110] : memref<1x10x10x64xbf16, #tpu.memory_space<vmem>>, vector<1x10x10x64xbf16>
    tpu.vector_store %arg6[%c0_107, %c0_108, %c0_109, %c0_110], %83 {strides = array<i32>} : memref<1x10x10x64xbf16, #tpu.memory_space<vmem>>, vector<1x10x10x64xbf16>,
    %85 = arith.truncf %82 : vector<8x8x64xf32> to vector<8x8x64xbf16>
    %c0_111 = arith.constant 0 : index
    %c1_112 = arith.constant 1 : index
    %c1_113 = arith.constant 1 : index
    %c0_114 = arith.constant 0 : index
    %86 = vector.load %arg6[%c0_111, %c1_112, %c1_113, %c0_114] : memref<1x10x10x64xbf16, #tpu.memory_space<vmem>>, vector<1x8x8x64xbf16>
    %87 = vector.shape_cast %86 : vector<1x8x8x64xbf16> to vector<8x8x64xbf16>
    %88 = vector.shape_cast %85 : vector<8x8x64xbf16> to vector<1x8x8x64xbf16>
    tpu.vector_store %arg6[%c0_111, %c1_112, %c1_113, %c0_114], %88 {strides = array<i32>} : memref<1x10x10x64xbf16, #tpu.memory_space<vmem>>, vector<1x8x8x64xbf16>,
    return
  }
  func.func @transform_0(%arg0: i32) -> (i32, i32, i32) {
    %c0_i32 = arith.constant 0 : i32
    %c0_i32_0 = arith.constant 0 : i32
    %c0_i32_1 = arith.constant 0 : i32
    return %arg0, %c0_i32, %c0_i32_0 : i32, i32, i32
  }
  func.func @transform_1(%arg0: i32) -> (i32, i32) {
    %c0_i32 = arith.constant 0 : i32
    %c0_i32_0 = arith.constant 0 : i32
    %c0_i32_1 = arith.constant 0 : i32
    return %c0_i32, %c0_i32_0 : i32, i32
  }
  func.func @transform_2(%arg0: i32) -> (i32, i32) {
    %c0_i32 = arith.constant 0 : i32
    %c0_i32_0 = arith.constant 0 : i32
    %c0_i32_1 = arith.constant 0 : i32
    return %c0_i32, %c0_i32_0 : i32, i32
  }
  func.func @transform_3(%arg0: i32) -> (i32, i32, i32, i32) {
    %c0_i32 = arith.constant 0 : i32
    %c0_i32_0 = arith.constant 0 : i32
    %c0_i32_1 = arith.constant 0 : i32
    %c0_i32_2 = arith.constant 0 : i32
    %c0_i32_3 = arith.constant 0 : i32
    return %c0_i32, %c0_i32_0, %c0_i32_1, %c0_i32_2 : i32, i32, i32, i32
  }
  func.func @transform_4(%arg0: i32) -> (i32, i32) {
    %c0_i32 = arith.constant 0 : i32
    %c0_i32_0 = arith.constant 0 : i32
    %c0_i32_1 = arith.constant 0 : i32
    return %c0_i32, %c0_i32_0 : i32, i32
  }
  func.func @transform_5(%arg0: i32) -> (i32, i32, i32, i32) {
    %c0_i32 = arith.constant 0 : i32
    %c0_i32_0 = arith.constant 0 : i32
    %c0_i32_1 = arith.constant 0 : i32
    %c0_i32_2 = arith.constant 0 : i32
    return %arg0, %c0_i32, %c0_i32_0, %c0_i32_1 : i32, i32, i32, i32
  }
}

module attributes {stable_mosaic.version = 11 : i64} {
  func.func @conv3_mse_kernel(%arg0: i32, %arg1: memref<1x10x10x64xbf16, #tpu.memory_space<vmem>>, %arg2: memref<1x10x10x64xbf16, #tpu.memory_space<vmem>>, %arg3: memref<3x3x64x128xbf16, #tpu.memory_space<vmem>>, %arg4: memref<1x128xf32, #tpu.memory_space<vmem>>, %arg5: memref<1x1xf32, #tpu.memory_space<vmem>>) attributes {dimension_semantics = [#tpu.dimension_semantics<arbitrary>], iteration_bounds = array<i64: 2>, scalar_prefetch = 0 : i64, scratch_operands = 0 : i64, tpu.core_type = #tpu.core_type<tc>, window_params = [{transform_indices = @transform_0, window_bounds = array<i64: 1, 10, 10, 64>}, {transform_indices = @transform_1, window_bounds = array<i64: 1, 10, 10, 64>}, {pipeline_mode = #tpu.pipeline_mode<synchronous>, transform_indices = @transform_2, window_bounds = array<i64: 3, 3, 64, 128>}, {pipeline_mode = #tpu.pipeline_mode<synchronous>, transform_indices = @transform_3, window_bounds = array<i64: 1, 128>}, {pipeline_mode = #tpu.pipeline_mode<synchronous>, transform_indices = @transform_4, window_bounds = array<i64: 1, 1>}]} {
    %cst = arith.constant 0.000000e+00 : f32
    %0 = vector.broadcast %cst : f32 to vector<64x128xf32>
    %c0 = arith.constant 0 : index
    %c0_0 = arith.constant 0 : index
    %c0_1 = arith.constant 0 : index
    %c0_2 = arith.constant 0 : index
    %1 = vector.load %arg1[%c0, %c0_0, %c0_1, %c0_2] : memref<1x10x10x64xbf16, #tpu.memory_space<vmem>>, vector<1x8x8x64xbf16>
    %2 = vector.shape_cast %1 : vector<1x8x8x64xbf16> to vector<8x8x64xbf16>
    %3 = vector.shape_cast %2 : vector<8x8x64xbf16> to vector<64x64xbf16>
    %c0_3 = arith.constant 0 : index
    %c0_4 = arith.constant 0 : index
    %c0_5 = arith.constant 0 : index
    %c0_6 = arith.constant 0 : index
    %4 = vector.load %arg3[%c0_3, %c0_4, %c0_5, %c0_6] : memref<3x3x64x128xbf16, #tpu.memory_space<vmem>>, vector<1x1x64x128xbf16>
    %5 = vector.shape_cast %4 : vector<1x1x64x128xbf16> to vector<64x128xbf16>
    %cst_7 = arith.constant dense<0.000000e+00> : vector<64x128xf32>
    %6 = tpu.matmul %3, %5, %cst_7 {dimension_numbers = #tpu.dot_dimension_numbers<[1], [0], [0], [1], [0, 0, 1, 1], [], []>} : vector<64x64xbf16>, vector<64x128xbf16>, vector<64x128xf32> -> vector<64x128xf32>
    %7 = arith.addf %0, %6 : vector<64x128xf32>
    %c0_8 = arith.constant 0 : index
    %c0_9 = arith.constant 0 : index
    %c1 = arith.constant 1 : index
    %c0_10 = arith.constant 0 : index
    %8 = vector.load %arg1[%c0_8, %c0_9, %c1, %c0_10] : memref<1x10x10x64xbf16, #tpu.memory_space<vmem>>, vector<1x8x8x64xbf16>
    %9 = vector.shape_cast %8 : vector<1x8x8x64xbf16> to vector<8x8x64xbf16>
    %10 = vector.shape_cast %9 : vector<8x8x64xbf16> to vector<64x64xbf16>
    %c0_11 = arith.constant 0 : index
    %c1_12 = arith.constant 1 : index
    %c0_13 = arith.constant 0 : index
    %c0_14 = arith.constant 0 : index
    %11 = vector.load %arg3[%c0_11, %c1_12, %c0_13, %c0_14] : memref<3x3x64x128xbf16, #tpu.memory_space<vmem>>, vector<1x1x64x128xbf16>
    %12 = vector.shape_cast %11 : vector<1x1x64x128xbf16> to vector<64x128xbf16>
    %cst_15 = arith.constant dense<0.000000e+00> : vector<64x128xf32>
    %13 = tpu.matmul %10, %12, %cst_15 {dimension_numbers = #tpu.dot_dimension_numbers<[1], [0], [0], [1], [0, 0, 1, 1], [], []>} : vector<64x64xbf16>, vector<64x128xbf16>, vector<64x128xf32> -> vector<64x128xf32>
    %14 = arith.addf %7, %13 : vector<64x128xf32>
    %c0_16 = arith.constant 0 : index
    %c0_17 = arith.constant 0 : index
    %c2 = arith.constant 2 : index
    %c0_18 = arith.constant 0 : index
    %15 = vector.load %arg1[%c0_16, %c0_17, %c2, %c0_18] : memref<1x10x10x64xbf16, #tpu.memory_space<vmem>>, vector<1x8x8x64xbf16>
    %16 = vector.shape_cast %15 : vector<1x8x8x64xbf16> to vector<8x8x64xbf16>
    %17 = vector.shape_cast %16 : vector<8x8x64xbf16> to vector<64x64xbf16>
    %c0_19 = arith.constant 0 : index
    %c2_20 = arith.constant 2 : index
    %c0_21 = arith.constant 0 : index
    %c0_22 = arith.constant 0 : index
    %18 = vector.load %arg3[%c0_19, %c2_20, %c0_21, %c0_22] : memref<3x3x64x128xbf16, #tpu.memory_space<vmem>>, vector<1x1x64x128xbf16>
    %19 = vector.shape_cast %18 : vector<1x1x64x128xbf16> to vector<64x128xbf16>
    %cst_23 = arith.constant dense<0.000000e+00> : vector<64x128xf32>
    %20 = tpu.matmul %17, %19, %cst_23 {dimension_numbers = #tpu.dot_dimension_numbers<[1], [0], [0], [1], [0, 0, 1, 1], [], []>} : vector<64x64xbf16>, vector<64x128xbf16>, vector<64x128xf32> -> vector<64x128xf32>
    %21 = arith.addf %14, %20 : vector<64x128xf32>
    %c0_24 = arith.constant 0 : index
    %c1_25 = arith.constant 1 : index
    %c0_26 = arith.constant 0 : index
    %c0_27 = arith.constant 0 : index
    %22 = vector.load %arg1[%c0_24, %c1_25, %c0_26, %c0_27] : memref<1x10x10x64xbf16, #tpu.memory_space<vmem>>, vector<1x8x8x64xbf16>
    %23 = vector.shape_cast %22 : vector<1x8x8x64xbf16> to vector<8x8x64xbf16>
    %24 = vector.shape_cast %23 : vector<8x8x64xbf16> to vector<64x64xbf16>
    %c1_28 = arith.constant 1 : index
    %c0_29 = arith.constant 0 : index
    %c0_30 = arith.constant 0 : index
    %c0_31 = arith.constant 0 : index
    %25 = vector.load %arg3[%c1_28, %c0_29, %c0_30, %c0_31] : memref<3x3x64x128xbf16, #tpu.memory_space<vmem>>, vector<1x1x64x128xbf16>
    %26 = vector.shape_cast %25 : vector<1x1x64x128xbf16> to vector<64x128xbf16>
    %cst_32 = arith.constant dense<0.000000e+00> : vector<64x128xf32>
    %27 = tpu.matmul %24, %26, %cst_32 {dimension_numbers = #tpu.dot_dimension_numbers<[1], [0], [0], [1], [0, 0, 1, 1], [], []>} : vector<64x64xbf16>, vector<64x128xbf16>, vector<64x128xf32> -> vector<64x128xf32>
    %28 = arith.addf %21, %27 : vector<64x128xf32>
    %c0_33 = arith.constant 0 : index
    %c1_34 = arith.constant 1 : index
    %c1_35 = arith.constant 1 : index
    %c0_36 = arith.constant 0 : index
    %29 = vector.load %arg1[%c0_33, %c1_34, %c1_35, %c0_36] : memref<1x10x10x64xbf16, #tpu.memory_space<vmem>>, vector<1x8x8x64xbf16>
    %30 = vector.shape_cast %29 : vector<1x8x8x64xbf16> to vector<8x8x64xbf16>
    %31 = vector.shape_cast %30 : vector<8x8x64xbf16> to vector<64x64xbf16>
    %c1_37 = arith.constant 1 : index
    %c1_38 = arith.constant 1 : index
    %c0_39 = arith.constant 0 : index
    %c0_40 = arith.constant 0 : index
    %32 = vector.load %arg3[%c1_37, %c1_38, %c0_39, %c0_40] : memref<3x3x64x128xbf16, #tpu.memory_space<vmem>>, vector<1x1x64x128xbf16>
    %33 = vector.shape_cast %32 : vector<1x1x64x128xbf16> to vector<64x128xbf16>
    %cst_41 = arith.constant dense<0.000000e+00> : vector<64x128xf32>
    %34 = tpu.matmul %31, %33, %cst_41 {dimension_numbers = #tpu.dot_dimension_numbers<[1], [0], [0], [1], [0, 0, 1, 1], [], []>} : vector<64x64xbf16>, vector<64x128xbf16>, vector<64x128xf32> -> vector<64x128xf32>
    %35 = arith.addf %28, %34 : vector<64x128xf32>
    %c0_42 = arith.constant 0 : index
    %c1_43 = arith.constant 1 : index
    %c2_44 = arith.constant 2 : index
    %c0_45 = arith.constant 0 : index
    %36 = vector.load %arg1[%c0_42, %c1_43, %c2_44, %c0_45] : memref<1x10x10x64xbf16, #tpu.memory_space<vmem>>, vector<1x8x8x64xbf16>
    %37 = vector.shape_cast %36 : vector<1x8x8x64xbf16> to vector<8x8x64xbf16>
    %38 = vector.shape_cast %37 : vector<8x8x64xbf16> to vector<64x64xbf16>
    %c1_46 = arith.constant 1 : index
    %c2_47 = arith.constant 2 : index
    %c0_48 = arith.constant 0 : index
    %c0_49 = arith.constant 0 : index
    %39 = vector.load %arg3[%c1_46, %c2_47, %c0_48, %c0_49] : memref<3x3x64x128xbf16, #tpu.memory_space<vmem>>, vector<1x1x64x128xbf16>
    %40 = vector.shape_cast %39 : vector<1x1x64x128xbf16> to vector<64x128xbf16>
    %cst_50 = arith.constant dense<0.000000e+00> : vector<64x128xf32>
    %41 = tpu.matmul %38, %40, %cst_50 {dimension_numbers = #tpu.dot_dimension_numbers<[1], [0], [0], [1], [0, 0, 1, 1], [], []>} : vector<64x64xbf16>, vector<64x128xbf16>, vector<64x128xf32> -> vector<64x128xf32>
    %42 = arith.addf %35, %41 : vector<64x128xf32>
    %c0_51 = arith.constant 0 : index
    %c2_52 = arith.constant 2 : index
    %c0_53 = arith.constant 0 : index
    %c0_54 = arith.constant 0 : index
    %43 = vector.load %arg1[%c0_51, %c2_52, %c0_53, %c0_54] : memref<1x10x10x64xbf16, #tpu.memory_space<vmem>>, vector<1x8x8x64xbf16>
    %44 = vector.shape_cast %43 : vector<1x8x8x64xbf16> to vector<8x8x64xbf16>
    %45 = vector.shape_cast %44 : vector<8x8x64xbf16> to vector<64x64xbf16>
    %c2_55 = arith.constant 2 : index
    %c0_56 = arith.constant 0 : index
    %c0_57 = arith.constant 0 : index
    %c0_58 = arith.constant 0 : index
    %46 = vector.load %arg3[%c2_55, %c0_56, %c0_57, %c0_58] : memref<3x3x64x128xbf16, #tpu.memory_space<vmem>>, vector<1x1x64x128xbf16>
    %47 = vector.shape_cast %46 : vector<1x1x64x128xbf16> to vector<64x128xbf16>
    %cst_59 = arith.constant dense<0.000000e+00> : vector<64x128xf32>
    %48 = tpu.matmul %45, %47, %cst_59 {dimension_numbers = #tpu.dot_dimension_numbers<[1], [0], [0], [1], [0, 0, 1, 1], [], []>} : vector<64x64xbf16>, vector<64x128xbf16>, vector<64x128xf32> -> vector<64x128xf32>
    %49 = arith.addf %42, %48 : vector<64x128xf32>
    %c0_60 = arith.constant 0 : index
    %c2_61 = arith.constant 2 : index
    %c1_62 = arith.constant 1 : index
    %c0_63 = arith.constant 0 : index
    %50 = vector.load %arg1[%c0_60, %c2_61, %c1_62, %c0_63] : memref<1x10x10x64xbf16, #tpu.memory_space<vmem>>, vector<1x8x8x64xbf16>
    %51 = vector.shape_cast %50 : vector<1x8x8x64xbf16> to vector<8x8x64xbf16>
    %52 = vector.shape_cast %51 : vector<8x8x64xbf16> to vector<64x64xbf16>
    %c2_64 = arith.constant 2 : index
    %c1_65 = arith.constant 1 : index
    %c0_66 = arith.constant 0 : index
    %c0_67 = arith.constant 0 : index
    %53 = vector.load %arg3[%c2_64, %c1_65, %c0_66, %c0_67] : memref<3x3x64x128xbf16, #tpu.memory_space<vmem>>, vector<1x1x64x128xbf16>
    %54 = vector.shape_cast %53 : vector<1x1x64x128xbf16> to vector<64x128xbf16>
    %cst_68 = arith.constant dense<0.000000e+00> : vector<64x128xf32>
    %55 = tpu.matmul %52, %54, %cst_68 {dimension_numbers = #tpu.dot_dimension_numbers<[1], [0], [0], [1], [0, 0, 1, 1], [], []>} : vector<64x64xbf16>, vector<64x128xbf16>, vector<64x128xf32> -> vector<64x128xf32>
    %56 = arith.addf %49, %55 : vector<64x128xf32>
    %c0_69 = arith.constant 0 : index
    %c2_70 = arith.constant 2 : index
    %c2_71 = arith.constant 2 : index
    %c0_72 = arith.constant 0 : index
    %57 = vector.load %arg1[%c0_69, %c2_70, %c2_71, %c0_72] : memref<1x10x10x64xbf16, #tpu.memory_space<vmem>>, vector<1x8x8x64xbf16>
    %58 = vector.shape_cast %57 : vector<1x8x8x64xbf16> to vector<8x8x64xbf16>
    %59 = vector.shape_cast %58 : vector<8x8x64xbf16> to vector<64x64xbf16>
    %c2_73 = arith.constant 2 : index
    %c2_74 = arith.constant 2 : index
    %c0_75 = arith.constant 0 : index
    %c0_76 = arith.constant 0 : index
    %60 = vector.load %arg3[%c2_73, %c2_74, %c0_75, %c0_76] : memref<3x3x64x128xbf16, #tpu.memory_space<vmem>>, vector<1x1x64x128xbf16>
    %61 = vector.shape_cast %60 : vector<1x1x64x128xbf16> to vector<64x128xbf16>
    %cst_77 = arith.constant dense<0.000000e+00> : vector<64x128xf32>
    %62 = tpu.matmul %59, %61, %cst_77 {dimension_numbers = #tpu.dot_dimension_numbers<[1], [0], [0], [1], [0, 0, 1, 1], [], []>} : vector<64x64xbf16>, vector<64x128xbf16>, vector<64x128xf32> -> vector<64x128xf32>
    %63 = arith.addf %56, %62 : vector<64x128xf32>
    %c0_78 = arith.constant 0 : index
    %c0_79 = arith.constant 0 : index
    %64 = vector.load %arg4[%c0_78, %c0_79] : memref<1x128xf32, #tpu.memory_space<vmem>>, vector<1x128xf32>
    %65 = vector.broadcast %64 : vector<1x128xf32> to vector<64x128xf32>
    %66 = arith.addf %63, %65 : vector<64x128xf32>
    %cst_80 = arith.constant 0.000000e+00 : f32
    %67 = vector.broadcast %cst_80 : f32 to vector<64x128xf32>
    %68 = arith.maximumf %66, %67 : vector<64x128xf32>
    %cst_81 = arith.constant 0.000000e+00 : f32
    %69 = vector.broadcast %cst_81 : f32 to vector<64x128xf32>
    %c0_82 = arith.constant 0 : index
    %c0_83 = arith.constant 0 : index
    %c0_84 = arith.constant 0 : index
    %c0_85 = arith.constant 0 : index
    %70 = vector.load %arg2[%c0_82, %c0_83, %c0_84, %c0_85] : memref<1x10x10x64xbf16, #tpu.memory_space<vmem>>, vector<1x8x8x64xbf16>
    %71 = vector.shape_cast %70 : vector<1x8x8x64xbf16> to vector<8x8x64xbf16>
    %72 = vector.shape_cast %71 : vector<8x8x64xbf16> to vector<64x64xbf16>
    %c0_86 = arith.constant 0 : index
    %c0_87 = arith.constant 0 : index
    %c0_88 = arith.constant 0 : index
    %c0_89 = arith.constant 0 : index
    %73 = vector.load %arg3[%c0_86, %c0_87, %c0_88, %c0_89] : memref<3x3x64x128xbf16, #tpu.memory_space<vmem>>, vector<1x1x64x128xbf16>
    %74 = vector.shape_cast %73 : vector<1x1x64x128xbf16> to vector<64x128xbf16>
    %cst_90 = arith.constant dense<0.000000e+00> : vector<64x128xf32>
    %75 = tpu.matmul %72, %74, %cst_90 {dimension_numbers = #tpu.dot_dimension_numbers<[1], [0], [0], [1], [0, 0, 1, 1], [], []>} : vector<64x64xbf16>, vector<64x128xbf16>, vector<64x128xf32> -> vector<64x128xf32>
    %76 = arith.addf %69, %75 : vector<64x128xf32>
    %c0_91 = arith.constant 0 : index
    %c0_92 = arith.constant 0 : index
    %c1_93 = arith.constant 1 : index
    %c0_94 = arith.constant 0 : index
    %77 = vector.load %arg2[%c0_91, %c0_92, %c1_93, %c0_94] : memref<1x10x10x64xbf16, #tpu.memory_space<vmem>>, vector<1x8x8x64xbf16>
    %78 = vector.shape_cast %77 : vector<1x8x8x64xbf16> to vector<8x8x64xbf16>
    %79 = vector.shape_cast %78 : vector<8x8x64xbf16> to vector<64x64xbf16>
    %c0_95 = arith.constant 0 : index
    %c1_96 = arith.constant 1 : index
    %c0_97 = arith.constant 0 : index
    %c0_98 = arith.constant 0 : index
    %80 = vector.load %arg3[%c0_95, %c1_96, %c0_97, %c0_98] : memref<3x3x64x128xbf16, #tpu.memory_space<vmem>>, vector<1x1x64x128xbf16>
    %81 = vector.shape_cast %80 : vector<1x1x64x128xbf16> to vector<64x128xbf16>
    %cst_99 = arith.constant dense<0.000000e+00> : vector<64x128xf32>
    %82 = tpu.matmul %79, %81, %cst_99 {dimension_numbers = #tpu.dot_dimension_numbers<[1], [0], [0], [1], [0, 0, 1, 1], [], []>} : vector<64x64xbf16>, vector<64x128xbf16>, vector<64x128xf32> -> vector<64x128xf32>
    %83 = arith.addf %76, %82 : vector<64x128xf32>
    %c0_100 = arith.constant 0 : index
    %c0_101 = arith.constant 0 : index
    %c2_102 = arith.constant 2 : index
    %c0_103 = arith.constant 0 : index
    %84 = vector.load %arg2[%c0_100, %c0_101, %c2_102, %c0_103] : memref<1x10x10x64xbf16, #tpu.memory_space<vmem>>, vector<1x8x8x64xbf16>
    %85 = vector.shape_cast %84 : vector<1x8x8x64xbf16> to vector<8x8x64xbf16>
    %86 = vector.shape_cast %85 : vector<8x8x64xbf16> to vector<64x64xbf16>
    %c0_104 = arith.constant 0 : index
    %c2_105 = arith.constant 2 : index
    %c0_106 = arith.constant 0 : index
    %c0_107 = arith.constant 0 : index
    %87 = vector.load %arg3[%c0_104, %c2_105, %c0_106, %c0_107] : memref<3x3x64x128xbf16, #tpu.memory_space<vmem>>, vector<1x1x64x128xbf16>
    %88 = vector.shape_cast %87 : vector<1x1x64x128xbf16> to vector<64x128xbf16>
    %cst_108 = arith.constant dense<0.000000e+00> : vector<64x128xf32>
    %89 = tpu.matmul %86, %88, %cst_108 {dimension_numbers = #tpu.dot_dimension_numbers<[1], [0], [0], [1], [0, 0, 1, 1], [], []>} : vector<64x64xbf16>, vector<64x128xbf16>, vector<64x128xf32> -> vector<64x128xf32>
    %90 = arith.addf %83, %89 : vector<64x128xf32>
    %c0_109 = arith.constant 0 : index
    %c1_110 = arith.constant 1 : index
    %c0_111 = arith.constant 0 : index
    %c0_112 = arith.constant 0 : index
    %91 = vector.load %arg2[%c0_109, %c1_110, %c0_111, %c0_112] : memref<1x10x10x64xbf16, #tpu.memory_space<vmem>>, vector<1x8x8x64xbf16>
    %92 = vector.shape_cast %91 : vector<1x8x8x64xbf16> to vector<8x8x64xbf16>
    %93 = vector.shape_cast %92 : vector<8x8x64xbf16> to vector<64x64xbf16>
    %c1_113 = arith.constant 1 : index
    %c0_114 = arith.constant 0 : index
    %c0_115 = arith.constant 0 : index
    %c0_116 = arith.constant 0 : index
    %94 = vector.load %arg3[%c1_113, %c0_114, %c0_115, %c0_116] : memref<3x3x64x128xbf16, #tpu.memory_space<vmem>>, vector<1x1x64x128xbf16>
    %95 = vector.shape_cast %94 : vector<1x1x64x128xbf16> to vector<64x128xbf16>
    %cst_117 = arith.constant dense<0.000000e+00> : vector<64x128xf32>
    %96 = tpu.matmul %93, %95, %cst_117 {dimension_numbers = #tpu.dot_dimension_numbers<[1], [0], [0], [1], [0, 0, 1, 1], [], []>} : vector<64x64xbf16>, vector<64x128xbf16>, vector<64x128xf32> -> vector<64x128xf32>
    %97 = arith.addf %90, %96 : vector<64x128xf32>
    %c0_118 = arith.constant 0 : index
    %c1_119 = arith.constant 1 : index
    %c1_120 = arith.constant 1 : index
    %c0_121 = arith.constant 0 : index
    %98 = vector.load %arg2[%c0_118, %c1_119, %c1_120, %c0_121] : memref<1x10x10x64xbf16, #tpu.memory_space<vmem>>, vector<1x8x8x64xbf16>
    %99 = vector.shape_cast %98 : vector<1x8x8x64xbf16> to vector<8x8x64xbf16>
    %100 = vector.shape_cast %99 : vector<8x8x64xbf16> to vector<64x64xbf16>
    %c1_122 = arith.constant 1 : index
    %c1_123 = arith.constant 1 : index
    %c0_124 = arith.constant 0 : index
    %c0_125 = arith.constant 0 : index
    %101 = vector.load %arg3[%c1_122, %c1_123, %c0_124, %c0_125] : memref<3x3x64x128xbf16, #tpu.memory_space<vmem>>, vector<1x1x64x128xbf16>
    %102 = vector.shape_cast %101 : vector<1x1x64x128xbf16> to vector<64x128xbf16>
    %cst_126 = arith.constant dense<0.000000e+00> : vector<64x128xf32>
    %103 = tpu.matmul %100, %102, %cst_126 {dimension_numbers = #tpu.dot_dimension_numbers<[1], [0], [0], [1], [0, 0, 1, 1], [], []>} : vector<64x64xbf16>, vector<64x128xbf16>, vector<64x128xf32> -> vector<64x128xf32>
    %104 = arith.addf %97, %103 : vector<64x128xf32>
    %c0_127 = arith.constant 0 : index
    %c1_128 = arith.constant 1 : index
    %c2_129 = arith.constant 2 : index
    %c0_130 = arith.constant 0 : index
    %105 = vector.load %arg2[%c0_127, %c1_128, %c2_129, %c0_130] : memref<1x10x10x64xbf16, #tpu.memory_space<vmem>>, vector<1x8x8x64xbf16>
    %106 = vector.shape_cast %105 : vector<1x8x8x64xbf16> to vector<8x8x64xbf16>
    %107 = vector.shape_cast %106 : vector<8x8x64xbf16> to vector<64x64xbf16>
    %c1_131 = arith.constant 1 : index
    %c2_132 = arith.constant 2 : index
    %c0_133 = arith.constant 0 : index
    %c0_134 = arith.constant 0 : index
    %108 = vector.load %arg3[%c1_131, %c2_132, %c0_133, %c0_134] : memref<3x3x64x128xbf16, #tpu.memory_space<vmem>>, vector<1x1x64x128xbf16>
    %109 = vector.shape_cast %108 : vector<1x1x64x128xbf16> to vector<64x128xbf16>
    %cst_135 = arith.constant dense<0.000000e+00> : vector<64x128xf32>
    %110 = tpu.matmul %107, %109, %cst_135 {dimension_numbers = #tpu.dot_dimension_numbers<[1], [0], [0], [1], [0, 0, 1, 1], [], []>} : vector<64x64xbf16>, vector<64x128xbf16>, vector<64x128xf32> -> vector<64x128xf32>
    %111 = arith.addf %104, %110 : vector<64x128xf32>
    %c0_136 = arith.constant 0 : index
    %c2_137 = arith.constant 2 : index
    %c0_138 = arith.constant 0 : index
    %c0_139 = arith.constant 0 : index
    %112 = vector.load %arg2[%c0_136, %c2_137, %c0_138, %c0_139] : memref<1x10x10x64xbf16, #tpu.memory_space<vmem>>, vector<1x8x8x64xbf16>
    %113 = vector.shape_cast %112 : vector<1x8x8x64xbf16> to vector<8x8x64xbf16>
    %114 = vector.shape_cast %113 : vector<8x8x64xbf16> to vector<64x64xbf16>
    %c2_140 = arith.constant 2 : index
    %c0_141 = arith.constant 0 : index
    %c0_142 = arith.constant 0 : index
    %c0_143 = arith.constant 0 : index
    %115 = vector.load %arg3[%c2_140, %c0_141, %c0_142, %c0_143] : memref<3x3x64x128xbf16, #tpu.memory_space<vmem>>, vector<1x1x64x128xbf16>
    %116 = vector.shape_cast %115 : vector<1x1x64x128xbf16> to vector<64x128xbf16>
    %cst_144 = arith.constant dense<0.000000e+00> : vector<64x128xf32>
    %117 = tpu.matmul %114, %116, %cst_144 {dimension_numbers = #tpu.dot_dimension_numbers<[1], [0], [0], [1], [0, 0, 1, 1], [], []>} : vector<64x64xbf16>, vector<64x128xbf16>, vector<64x128xf32> -> vector<64x128xf32>
    %118 = arith.addf %111, %117 : vector<64x128xf32>
    %c0_145 = arith.constant 0 : index
    %c2_146 = arith.constant 2 : index
    %c1_147 = arith.constant 1 : index
    %c0_148 = arith.constant 0 : index
    %119 = vector.load %arg2[%c0_145, %c2_146, %c1_147, %c0_148] : memref<1x10x10x64xbf16, #tpu.memory_space<vmem>>, vector<1x8x8x64xbf16>
    %120 = vector.shape_cast %119 : vector<1x8x8x64xbf16> to vector<8x8x64xbf16>
    %121 = vector.shape_cast %120 : vector<8x8x64xbf16> to vector<64x64xbf16>
    %c2_149 = arith.constant 2 : index
    %c1_150 = arith.constant 1 : index
    %c0_151 = arith.constant 0 : index
    %c0_152 = arith.constant 0 : index
    %122 = vector.load %arg3[%c2_149, %c1_150, %c0_151, %c0_152] : memref<3x3x64x128xbf16, #tpu.memory_space<vmem>>, vector<1x1x64x128xbf16>
    %123 = vector.shape_cast %122 : vector<1x1x64x128xbf16> to vector<64x128xbf16>
    %cst_153 = arith.constant dense<0.000000e+00> : vector<64x128xf32>
    %124 = tpu.matmul %121, %123, %cst_153 {dimension_numbers = #tpu.dot_dimension_numbers<[1], [0], [0], [1], [0, 0, 1, 1], [], []>} : vector<64x64xbf16>, vector<64x128xbf16>, vector<64x128xf32> -> vector<64x128xf32>
    %125 = arith.addf %118, %124 : vector<64x128xf32>
    %c0_154 = arith.constant 0 : index
    %c2_155 = arith.constant 2 : index
    %c2_156 = arith.constant 2 : index
    %c0_157 = arith.constant 0 : index
    %126 = vector.load %arg2[%c0_154, %c2_155, %c2_156, %c0_157] : memref<1x10x10x64xbf16, #tpu.memory_space<vmem>>, vector<1x8x8x64xbf16>
    %127 = vector.shape_cast %126 : vector<1x8x8x64xbf16> to vector<8x8x64xbf16>
    %128 = vector.shape_cast %127 : vector<8x8x64xbf16> to vector<64x64xbf16>
    %c2_158 = arith.constant 2 : index
    %c2_159 = arith.constant 2 : index
    %c0_160 = arith.constant 0 : index
    %c0_161 = arith.constant 0 : index
    %129 = vector.load %arg3[%c2_158, %c2_159, %c0_160, %c0_161] : memref<3x3x64x128xbf16, #tpu.memory_space<vmem>>, vector<1x1x64x128xbf16>
    %130 = vector.shape_cast %129 : vector<1x1x64x128xbf16> to vector<64x128xbf16>
    %cst_162 = arith.constant dense<0.000000e+00> : vector<64x128xf32>
    %131 = tpu.matmul %128, %130, %cst_162 {dimension_numbers = #tpu.dot_dimension_numbers<[1], [0], [0], [1], [0, 0, 1, 1], [], []>} : vector<64x64xbf16>, vector<64x128xbf16>, vector<64x128xf32> -> vector<64x128xf32>
    %132 = arith.addf %125, %131 : vector<64x128xf32>
    %c0_163 = arith.constant 0 : index
    %c0_164 = arith.constant 0 : index
    %133 = vector.load %arg4[%c0_163, %c0_164] : memref<1x128xf32, #tpu.memory_space<vmem>>, vector<1x128xf32>
    %134 = vector.broadcast %133 : vector<1x128xf32> to vector<64x128xf32>
    %135 = arith.addf %132, %134 : vector<64x128xf32>
    %cst_165 = arith.constant 0.000000e+00 : f32
    %136 = vector.broadcast %cst_165 : f32 to vector<64x128xf32>
    %137 = arith.maximumf %135, %136 : vector<64x128xf32>
    %138 = arith.subf %68, %137 : vector<64x128xf32>
    %c0_i32 = arith.constant 0 : i32
    %139 = arith.cmpi eq, %arg0, %c0_i32 : i32
    %140 = arith.extui %139 : i1 to i32
    %c0_i32_166 = arith.constant 0 : i32
    %141 = arith.cmpi ne, %140, %c0_i32_166 : i32
    scf.if %141 {
      %cst_173 = arith.constant 0.000000e+00 : f32
      %154 = vector.broadcast %cst_173 : f32 to vector<1x1xf32>
      %c0_174 = arith.constant 0 : index
      %c0_175 = arith.constant 0 : index
      %155 = vector.load %arg5[%c0_174, %c0_175] : memref<1x1xf32, #tpu.memory_space<vmem>>, vector<1x1xf32>
      tpu.vector_store %arg5[%c0_174, %c0_175], %154 {strides = array<i32>} : memref<1x1xf32, #tpu.memory_space<vmem>>, vector<1x1xf32>,
    } else {
    }
    %c0_167 = arith.constant 0 : index
    %c0_168 = arith.constant 0 : index
    %142 = vector.load %arg5[%c0_167, %c0_168] : memref<1x1xf32, #tpu.memory_space<vmem>>, vector<1x1xf32>
    %143 = arith.mulf %138, %138 : vector<64x128xf32>
    %144 = vector.shape_cast %143 : vector<64x128xf32> to vector<1x64x128xf32>
    %cst_169 = arith.constant dense<0.000000e+00> : vector<1xf32>
    %145 = vector.multi_reduction <add>, %144, %cst_169 [1, 2] : vector<1x64x128xf32> to vector<1xf32>
    %146 = vector.shape_cast %145 : vector<1xf32> to vector<1x1x1xf32>
    %147 = vector.extract %146[0, 0, 0] : f32 from vector<1x1x1xf32>
    %148 = vector.broadcast %147 : f32 to vector<1x1xf32>
    %149 = arith.addf %142, %148 : vector<1x1xf32>
    %c0_170 = arith.constant 0 : index
    %c0_171 = arith.constant 0 : index
    %150 = vector.load %arg5[%c0_170, %c0_171] : memref<1x1xf32, #tpu.memory_space<vmem>>, vector<1x1xf32>
    tpu.vector_store %arg5[%c0_170, %c0_171], %149 {strides = array<i32>} : memref<1x1xf32, #tpu.memory_space<vmem>>, vector<1x1xf32>,
    %c1_i32 = arith.constant 1 : i32
    %151 = arith.cmpi eq, %arg0, %c1_i32 : i32
    %152 = arith.extui %151 : i1 to i32
    %c0_i32_172 = arith.constant 0 : i32
    %153 = arith.cmpi ne, %152, %c0_i32_172 : i32
    scf.if %153 {
      %c0_173 = arith.constant 0 : index
      %c0_174 = arith.constant 0 : index
      %154 = vector.load %arg5[%c0_173, %c0_174] : memref<1x1xf32, #tpu.memory_space<vmem>>, vector<1x1xf32>
      %cst_175 = arith.constant 6.10351563E-5 : f32
      %155 = vector.broadcast %cst_175 : f32 to vector<1x1xf32>
      %156 = arith.mulf %154, %155 : vector<1x1xf32>
      %c0_176 = arith.constant 0 : index
      %c0_177 = arith.constant 0 : index
      %157 = vector.load %arg5[%c0_176, %c0_177] : memref<1x1xf32, #tpu.memory_space<vmem>>, vector<1x1xf32>
      tpu.vector_store %arg5[%c0_176, %c0_177], %156 {strides = array<i32>} : memref<1x1xf32, #tpu.memory_space<vmem>>, vector<1x1xf32>,
    } else {
    }
    return
  }
  func.func @transform_0(%arg0: i32) -> (i32, i32, i32, i32) {
    %c0_i32 = arith.constant 0 : i32
    %c0_i32_0 = arith.constant 0 : i32
    %c0_i32_1 = arith.constant 0 : i32
    %c0_i32_2 = arith.constant 0 : i32
    return %arg0, %c0_i32, %c0_i32_0, %c0_i32_1 : i32, i32, i32, i32
  }
  func.func @transform_1(%arg0: i32) -> (i32, i32, i32, i32) {
    %c2_i32 = arith.constant 2 : i32
    %0 = arith.addi %arg0, %c2_i32 : i32
    %c0_i32 = arith.constant 0 : i32
    %c0_i32_0 = arith.constant 0 : i32
    %c0_i32_1 = arith.constant 0 : i32
    %c0_i32_2 = arith.constant 0 : i32
    return %0, %c0_i32, %c0_i32_0, %c0_i32_1 : i32, i32, i32, i32
  }
  func.func @transform_2(%arg0: i32) -> (i32, i32, i32, i32) {
    %c0_i32 = arith.constant 0 : i32
    %c0_i32_0 = arith.constant 0 : i32
    %c0_i32_1 = arith.constant 0 : i32
    %c0_i32_2 = arith.constant 0 : i32
    %c0_i32_3 = arith.constant 0 : i32
    return %c0_i32, %c0_i32_0, %c0_i32_1, %c0_i32_2 : i32, i32, i32, i32
  }
  func.func @transform_3(%arg0: i32) -> (i32, i32) {
    %c0_i32 = arith.constant 0 : i32
    %c0_i32_0 = arith.constant 0 : i32
    %c0_i32_1 = arith.constant 0 : i32
    return %c0_i32, %c0_i32_0 : i32, i32
  }
  func.func @transform_4(%arg0: i32) -> (i32, i32) {
    %c0_i32 = arith.constant 0 : i32
    %c0_i32_0 = arith.constant 0 : i32
    %c0_i32_1 = arith.constant 0 : i32
    return %c0_i32, %c0_i32_0 : i32, i32
  }
}

</mosaic_0001>

<bundles_post_ra>
// kernel: vgg_perceptual_loss.3
= control target key start
LH: loop header
LB: loop body
LE: loop exit
PB: predicated region body
PF: predicated region fallthrough
CT: control target
= control target key end

     0   :  { %9 = vsyncpa [#allocation3], 0  ;;  %s3637_s15 = smov 0   ;;  %s4738_s0 = inlined_call_operand.vmem [shape: bf16[4,10,10,64], index: 0, kind: input, shape index: {}, may-alias: {0,1}]   ;;  %s4739_s1 = inlined_call_operand.vmem [shape: bf16[4,10,10,64], index: 1, kind: input, shape index: {}, may-alias: {0,1}]   ;;  %s4740_s2 = inlined_call_operand.vmem [shape: bf16[3,3,64,128], index: 2, kind: input, shape index: {}]   ;;  %s4741_s3 = inlined_call_operand.vmem [shape: f32[1,128], index: 3, kind: input, shape index: {}]   ;;  %s4742_s4 = inlined_call_operand.hbm [shape: f32[1,1], index: 4, kind: output, shape index: {}]  }
   0x1 LB: > { %s3643_s16 = sadd.s32 4294967295, %s3608_s15   ;;  %p2918_p0 = scmp.ge.s32.totalorder %s3608_s15, 1  ;;  %s3608_s15 = sphi %s3637_s15, %s15_s15  }
   0x2   : > { %p172_p1 = scmp.lt.s32.totalorder %s3608_s15, 3 }
   0x4   : > { %p173_p2 = pnand %p2918_p0, %p172_p1 }
   0x5   : > { %p199_p3 = scmp.lt.s32.totalorder (!%p173_p2), %s3643_s16, 3  ;;  %s204_s18 = sadd.s32 (!%p173_p2), 2, %s3643_s16 }
   0x6   : > { %176 = sbr.rel (%p173_p2) target bundleno = 674 (0x2a2), region = 36  ;;  %p4028_p4 = scmp.lt.s32.totalorder (!%p173_p2), %s204_s18, 3 }
   0x7   : > { %p3473_p5 = scmp.ne.s32.totalorder (!%p173_p2), %s3643_s16, 0 }
   0xb   : > { %v3650_v0 = vld [vmem:[%s4740_s2 + $0x18] sm:$0xff]  ;;  %v3663_v2 = vld [vmem:[%s4740_s2 + $0x10] sm:$0xff]  ;;  %s200_s25 = scalar_select %p199_p3, %s3643_s16, 3  ;;  %v3678_v4 = vld [vmem:[%s4740_s2 + $0x8] sm:$0xff]  ;;  %vm396_vm0 = vcmask 523264   ;;  %vm547_vm4 = vcmask 1042432  }
   0xc   : > { %v3655_v1 = vld [vmem:[%s4740_s2 + $0x38] sm:$0xff]  ;;  %3543 = vmatpush.bf16.msra.mxu3 %v3650_v0  ;;  %v3668_v3 = vld [vmem:[%s4740_s2 + $0x30] sm:$0xff]  ;;  %498 = vmatpush.bf16.msra.mxu1 %v3650_v0  ;;  %v3683_v5 = vld [vmem:[%s4740_s2 + $0x28] sm:$0xff]  ;;  %vm236_vm1 = vsmask.f32 3328  ;;  %vm548_vm5 = vcmask 1046532  }
   0xd   : > { %3539 = vmatpush.bf16.msra.mxu2 %v3655_v1  ;;  %413 = vmatpush.bf16.msra.mxu0 %v3655_v1  ;;  %s3547_s26 = smul.u32 80, %s200_s25  ;;  %vm237_vm2 = vsmask.f32 7440  ;;  %v3698_v9 = vld [vmem:[%s4740_s2] sm:$0xff]  ;;  %v3729_v31 = vld [vmem:[%s4740_s2 + $0x58] sm:$0xff]  ;;  %v3763_v54 = vld [vmem:[%s4740_s2 + $0x50] sm:$0xff] }
   0xe   : > { %v3703_v10 = vld [vmem:[%s4740_s2 + $0x20] sm:$0xff]  ;;  %v3734_v34 = vld [vmem:[%s4740_s2 + $0x78] sm:$0xff]  ;;  %vm3747_vm3 = vmor %vm236_vm1, %vm237_vm2  ;;  %s4749_s18 = smov (!%p4028_p4, %s204_s18), 3 }
   0xf   : > { %s3688_s7 = scalar_lea.vmem %s4738_s0, %s3547_s26  ;;  %v3741_v40 = vld [vmem:[%s4740_s2 + $0x98] sm:$0xff]  ;;  %v3768_v55 = vld [vmem:[%s4740_s2 + $0x70] sm:$0xff]  ;;  %vm3907_vm6 = vmor %vm547_vm4, %vm548_vm5  ;;  %s3548_s26 = smul.u32 80, %s4749_s18 }
  0x10   : > { %3544 = vmatpush.bf16.msra.mxu3 %v3663_v2  ;;  %499 = vmatpush.bf16.msra.mxu1 %v3663_v2  ;;  %v2959_v6 = vld [vmem:[%s3688_s7 + $0x20] sm:$0xf]  ;;  %v3481_v7 = vld [vmem:[%s3688_s7 + $0x24] sm:$0xf0]  ;;  %v3707_v12 = vld [vmem:[%s3688_s7 + $0x24] sm:$0x1] }
  0x11   : > { %3540 = vmatpush.bf16.msra.mxu2 %v3668_v3  ;;  %414 = vmatpush.bf16.msra.mxu0 %v3668_v3  ;;  %v216_v8 = vld [vmem:[%s3688_s7 + $0x20] sm:$0xf]  ;;  %v217_v11 = vld [vmem:[%s3688_s7 + $0x28] sm:$0xf]  ;;  %v3710_v13 = vld [vmem:[%s3688_s7 + $0x2c] sm:$0x1]  ;;  %v2960_v19 = vor.u32 %v3481_v7, %v2959_v6  ;;  %s4082_s29 = scalar_lea.vmem %s4739_s1, %s3548_s26 }
  0x12   : > { %v296_v14 = vshrl.u32 %v216_v8, 16  ;;  %v299_v15 = vshll.u32 %v216_v8, 16  ;;  %v305_v16 = vshll.u32 %v3707_v12, 16  ;;  %v310_v17 = vshrl.u32 %v217_v11, 16  ;;  %v212_v18 = vld [vmem:[%s3688_s7] sm:$0xf] }
  0x13   : > { %v313_v20 = vshll.u32 %v217_v11, 16  ;;  %v319_v21 = vshll.u32 %v3710_v13, 16  ;;  %v213_v22 = vld [vmem:[%s3688_s7 + $0x8] sm:$0xf]  ;;  %v3719_v23 = vld [vmem:[%s3688_s7 + $0x4] sm:$0x1] }
  0x14   : > { %3545 = vmatpush.bf16.msra.mxu3 %v3678_v4  ;;  %500 = vmatpush.bf16.msra.mxu1 %v3678_v4  ;;  %v298_v24 = vrot.slane %v296_v14, 4  ;;  %v301_v25 = vrot.slane %v299_v15, 5  ;;  %v307_v26 = vrot.slane %v305_v16, 5  ;;  %v312_v27 = vrot.slane %v310_v17, 4  ;;  %v3724_v28 = vld [vmem:[%s3688_s7 + $0xc] sm:$0x1] }
  0x15   : > { %3541 = vmatpush.bf16.msra.mxu2 %v3683_v5  ;;  %415 = vmatpush.bf16.msra.mxu0 %v3683_v5  ;;  %v315_v29 = vrot.slane %v313_v20, 5  ;;  %v321_v30 = vrot.slane %v319_v21, 5  ;;  %v240_v32 = vshrl.u32 %v212_v18, 16  ;;  %v243_v33 = vshll.u32 %v212_v18, 16  ;;  %v2951_v39 = vld [vmem:[%s3688_s7] sm:$0xf] }
  0x16   : > { %v302_v35 = vor.u32 %v301_v25, %v298_v24  ;;  %v249_v36 = vshll.u32 %v3719_v23, 16  ;;  %v254_v37 = vshrl.u32 %v213_v22, 16  ;;  %v257_v38 = vshll.u32 %v213_v22, 16  ;;  %v3479_v46 = vld [vmem:[%s3688_s7 + $0x4] sm:$0xf0]  ;;  %v3510_v47 = vld [vmem:[%s4740_s2 + $0xb8] sm:$0xff] }
  0x17   : > { %v316_v42 = vor.u32 %v315_v29, %v312_v27  ;;  %v242_v43 = vrot.slane %v240_v32, 4  ;;  %v245_v44 = vrot.slane %v243_v33, 5  ;;  %v263_v45 = vshll.u32 %v3724_v28, 16  ;;  %v218_v56 = vld [vmem:[%s3688_s7 + $0x30] sm:$0xf] }
  0x18   : > { %3546 = vmatpush.bf16.msra.mxu3 %v3698_v9  ;;  %501 = vmatpush.bf16.msra.mxu1 %v3698_v9  ;;  %v303_v48 = vrot.slane %v302_v35, 4  ;;  %v256_v49 = vrot.slane %v254_v37, 4  ;;  %v259_v50 = vrot.slane %v257_v38, 5  ;;  %v251_v53 = vrot.slane %v249_v36, 5  ;;  %v219_v61 = vld [vmem:[%s3688_s7 + $0x38] sm:$0xf] }
  0x19   : > { %3542 = vmatpush.bf16.msra.mxu2 %v3703_v10  ;;  %416 = vmatpush.bf16.msra.mxu0 %v3703_v10  ;;  %v317_v51 = vrot.slane %v316_v42, 4  ;;  %v246_v52 = vor.u32 %v245_v44, %v242_v43  ;;  %v265_v59 = vrot.slane %v263_v45, 5  ;;  %v2952_v60 = vor.u32 %v3479_v46, %v2951_v39  ;;  %v3777_v62 = vld [vmem:[%s3688_s7 + $0x34] sm:$0x1]  ;;  %v3791_v16 = vld [vmem:[%s3688_s7 + $0x3c] sm:$0x1] }
  0x1a   : > { %v308_v57 = vsel %vm3747_vm3, %v303_v48, %v307_v26  ;;  %v260_v58 = vor.u32 %v259_v50, %v256_v49  ;;  %v3782_v63 = vld [vmem:[%s4740_s2 + $0x90] sm:$0xff]  ;;  %v324_v17 = vshrl.u32 %v218_v56, 16  ;;  %v327_v18 = vshll.u32 %v218_v56, 16  ;;  %v3807_v26 = vld [vmem:[%s4740_s2 + $0x68] sm:$0xff]  ;;  %v215_v33 = vld [vmem:[%s3688_s7 + $0x18] sm:$0xf] }
  0x1b   : > { %2983 = vmatmul.msk.bf16.vlgmr.msra.gmra.mxu3 %vm396_vm0, %v2960_v19  ;;  %v322_v6 = vsel %vm3747_vm3, %v317_v51, %v321_v30  ;;  %v364_v7 = vunpack.c.l.b16 %v308_v57  ;;  %v247_v8 = vrot.slane %v246_v52, 4  ;;  %v3509_v11 = vld [vmem:[%s4740_s2 + $0xb0] sm:$0xff]  ;;  %2981 = vmatmul.msk.bf16.vlgmr.msra.gmra.mxu1 %vm396_vm0, %v2952_v60  ;;  %v3796_v19 = vld [vmem:[%s4740_s2 + $0x48] sm:$0xff]  ;;  %v333_v21 = vshll.u32 %v3777_v62, 16  ;;  %v3482_v50 = vld [vmem:[%s3688_s7 + $0x34] sm:$0xf0] }
  0x1c   : > { %754 = vmatpush.bf16.msrb.mxu3 %v3734_v34  ;;  %1126 = vmatpush.bf16.msrb.mxu1 %v3510_v47  ;;  %v365_v14 = vunpack.c.l.b16 %v322_v6  ;;  %v261_v15 = vrot.slane %v260_v58, 4  ;;  %v338_v22 = vshrl.u32 %v219_v61, 16  ;;  %v341_v24 = vshll.u32 %v219_v61, 16  ;;  %v214_v25 = vld [vmem:[%s3688_s7 + $0x10] sm:$0xf]  ;;  %v3819_v36 = vld [vmem:[%s4740_s2 + $0x88] sm:$0xff] }
  0x1d   : > { %643 = vmatpush.bf16.msrb.mxu2 %v3729_v31  ;;  %976 = vmatpush.bf16.msrb.mxu0 %v3741_v40  ;;  %v252_v20 = vsel %vm3747_vm3, %v247_v8, %v251_v53  ;;  %v326_v32 = vrot.slane %v324_v17, 4  ;;  %v3813_v35 = vld [vmem:[%s3688_s7 + $0x14] sm:$0x1]  ;;  %v329_v38 = vrot.slane %v327_v18, 5  ;;  %v335_v39 = vrot.slane %v333_v21, 5  ;;  %v3824_v43 = vld [vmem:[%s4740_s2 + $0xa8] sm:$0xff] }
  0x1e   : > { %v370_v27 = vpack.c.b16 %v365_v14, %v364_v7  ;;  %v266_v29 = vsel %vm3747_vm3, %v261_v15, %v265_v59  ;;  %v360_v30 = vunpack.c.l.b16 %v252_v20  ;;  %v340_v42 = vrot.slane %v338_v22, 4  ;;  %v2963_v49 = vld [vmem:[%s3688_s7 + $0x30] sm:$0xf]  ;;  %v3832_v52 = vld [vmem:[%s3688_s7 + $0x1c] sm:$0x1]  ;;  %v3839_v57 = vld [vmem:[%s4740_s2 + $0x40] sm:$0xff] }
  0x1f   : > { %v361_v37 = vunpack.c.l.b16 %v266_v29  ;;  %v343_v44 = vrot.slane %v341_v24, 5  ;;  %v347_v45 = vshll.u32 %v3791_v16, 16  ;;  %v268_v46 = vshrl.u32 %v214_v25, 16  ;;  %v3844_v58 = vld [vmem:[%s4740_s2 + $0x60] sm:$0xff]  ;;  %v2955_v7 = vld [vmem:[%s3688_s7 + $0x10] sm:$0xf] }
  0x20   : > { %755 = vmatpush.bf16.msrb.mxu3 %v3768_v55  ;;  %1127 = vmatpush.bf16.msrb.mxu1 %v3509_v11  ;;  %v271_v47 = vshll.u32 %v214_v25, 16  ;;  %v330_v51 = vor.u32 %v329_v38, %v326_v32  ;;  %v277_v53 = vshll.u32 %v3813_v35, 16  ;;  %v282_v56 = vshrl.u32 %v215_v33, 16  ;;  %v3851_v8 = vld [vmem:[%s4740_s2 + $0x80] sm:$0xff]  ;;  %v3856_v11 = vld [vmem:[%s4740_s2 + $0xd8] sm:$0xff] }
  0x21   : > { %644 = vmatpush.bf16.msrb.mxu2 %v3763_v54  ;;  %977 = vmatpush.bf16.msrb.mxu0 %v3782_v63  ;;  %v368_v48 = vpack.c.b16 %v361_v37, %v360_v30  ;;  %v344_v59 = vor.u32 %v343_v44, %v340_v42  ;;  %v349_v60 = vrot.slane %v347_v45, 5  ;;  %v270_v61 = vrot.slane %v268_v46, 4  ;;  %v3863_v18 = vld [vmem:[%s4740_s2 + $0xa0] sm:$0xff]  ;;  %v3868_v20 = vld [vmem:[%s4740_s2 + $0xf8] sm:$0xff]  ;;  %v3073_v32 = vld [vmem:[%s3688_s7 + $0x8] sm:$0xf] }
  0x22   : > { %2947 = vmatmul.msk.bf16.vlgmr.msra.gmra.mxu2 %vm396_vm0, %v370_v27  ;;  %v273_v6 = vrot.slane %v271_v47, 5  ;;  %v331_v14 = vrot.slane %v330_v51, 4  ;;  %v284_v15 = vrot.slane %v282_v56, 4  ;;  %v285_v17 = vshll.u32 %v215_v33, 16  ;;  %v3480_v27 = vld [vmem:[%s3688_s7 + $0x14] sm:$0xf0] }
  0x23   : > { %2945 = vmatmul.msk.bf16.vlgmr.msra.gmra.mxu0 %vm396_vm0, %v368_v48  ;;  %v345_v21 = vrot.slane %v344_v59, 4  ;;  %v279_v24 = vrot.slane %v277_v53, 5  ;;  %v291_v25 = vshll.u32 %v3832_v52, 16  ;;  %v2964_v33 = vor.u32 %v3482_v50, %v2963_v49  ;;  %v3886_v46 = vld [vmem:[%s4740_s2 + $0x118] sm:$0xff]  ;;  %v3075_v49 = vld [vmem:[%s3688_s7 + $0x10] sm:$0xf] }
  0x24   : > { %756 = vmatpush.bf16.msrb.mxu3 %v3807_v26  ;;  %1128 = vmatpush.bf16.msrb.mxu1 %v3824_v43  ;;  %v274_v22 = vor.u32 %v273_v6, %v270_v61  ;;  %v336_v29 = vsel %vm3747_vm3, %v331_v14, %v335_v39  ;;  %v287_v30 = vrot.slane %v285_v17, 5  ;;  %v2956_v45 = vor.u32 %v3480_v27, %v2955_v7  ;;  %v523_v59 = vld [vmem:[%s3688_s7] sm:$0xe]  ;;  %v3117_v6 = vld [vmem:[%s3688_s7 + $0x8] sm:$0xe] }
  0x25   : > { %645 = vmatpush.bf16.msrb.mxu2 %v3796_v19  ;;  %978 = vmatpush.bf16.msrb.mxu0 %v3819_v36  ;;  %v350_v37 = vsel %vm3747_vm3, %v345_v21, %v349_v60  ;;  %v366_v42 = vunpack.c.l.b16 %v336_v29  ;;  %v293_v39 = vrot.slane %v291_v25, 5  ;;  %v804_v50 = vshrl.u32 %v3073_v32, 16  ;;  %v3076_v29 = vld [vmem:[%s3688_s7 + $0x14] sm:$0x1] }
  0x26   : > { %v275_v38 = vrot.slane %v274_v22, 4  ;;  %v288_v44 = vor.u32 %v287_v30, %v284_v15  ;;  %v367_v47 = vunpack.c.l.b16 %v350_v37  ;;  %v807_v51 = vshll.u32 %v3073_v32, 16  ;;  %v524_v15 = vld [vmem:[%s3688_s7 + $0x8] sm:$0xe] }
  0x27   : > { %v552_v53 = vrot.slane %v3719_v23, 5  ;;  %v806_v60 = vrot.slane %v804_v50, 4  ;;  %v818_v17 = vshrl.u32 %v3075_v49, 16  ;;  %v821_v22 = vshll.u32 %v3075_v49, 16  ;;  %v3915_v49 = vld [vmem:[%s4740_s2 + $0xd0] sm:$0xff] }
  0x28   : > { %757 = vmatpush.bf16.msrb.mxu3 %v3844_v58  ;;  %1129 = vmatpush.bf16.msrb.mxu1 %v3863_v18  ;;  %v280_v48 = vsel %vm3747_vm3, %v275_v38, %v279_v24  ;;  %v289_v56 = vrot.slane %v288_v44, 4  ;;  %v809_v61 = vrot.slane %v807_v51, 5  ;;  %v371_v23 = vpack.c.b16 %v367_v47, %v366_v42  ;;  %v3118_v24 = vld [vmem:[%s3688_s7 + $0x10] sm:$0xe] }
  0x29   : > { %646 = vmatpush.bf16.msrb.mxu2 %v3839_v57  ;;  %979 = vmatpush.bf16.msrb.mxu0 %v3851_v8  ;;  %v362_v14 = vunpack.c.l.b16 %v280_v48  ;;  %v556_v25 = vrot.slane %v3724_v28, 5  ;;  %v2985_v27 = vrot.slane %v523_v59, 9  ;;  %v820_v30 = vrot.slane %v818_v17, 4  ;;  %v3495_v59 = vld [vmem:[%s3688_s7 + $0xc] sm:$0xf0] }
  0x2a   : > { %v294_v7 = vsel %vm3747_vm3, %v289_v56, %v293_v39  ;;  %v3125_v32 = vrot.slane %v3117_v6, 9  ;;  %v810_v37 = vor.u32 %v809_v61, %v806_v60  ;;  %v823_v42 = vrot.slane %v821_v22, 5  ;;  %v3039_v56 = vld [vmem:[%s3688_s7 + $0x8] sm:$0xf] }
  0x2b   : > { %2984 = vmatmul.msk.bf16.gmra.mxu3 %vm396_vm0, %v2964_v33  ;;  %v363_v21 = vunpack.c.l.b16 %v294_v7  ;;  %2982 = vmatmul.msk.bf16.gmra.mxu1 %vm396_vm0, %v2956_v45  ;;  %v2986_v33 = vrot.slane %v524_v15, 9  ;;  %v3126_v28 = vrot.slane %v3118_v24, 9  ;;  %v1039_v47 = vrot.slane %v3076_v29, 5  ;;  %v3079_v24 = vld [vmem:[%s3688_s7 + $0x20] sm:$0xf] }
  0x2c   : > { %1459 = vmatpush.bf16.msra.mxu3 %v3868_v20  ;;  %1818 = vmatpush.bf16.msra.mxu1 %v3655_v1  ;;  %v3074_v1 = vld [vmem:[%s3688_s7 + $0xc] sm:$0x1]  ;;  %v824_v48 = vor.u32 %v823_v42, %v820_v30  ;;  %v553_v60 = vsel %vm3907_vm6, %v2985_v27, %v552_v53  ;;  %v811_v6 = vrot.slane %v810_v37, 4  ;;  %v3939_v53 = vld [vmem:[%s4740_s2 + $0x110] sm:$0xff]  ;;  %v846_v42 = vshrl.u32 %v3079_v24, 16 }
  0x2d   : > { %1237 = vmatpush.bf16.msra.mxu2 %v3856_v11  ;;  %1609 = vmatpush.bf16.msra.mxu0 %v3886_v46  ;;  %v813_v38 = vshll.u32 %v3074_v1, 16  ;;  %v369_v44 = vpack.c.b16 %v363_v21, %v362_v14  ;;  %v1035_v45 = vrot.slane %v3074_v1, 5  ;;  %v1040_v51 = vsel %vm3907_vm6, %v3126_v28, %v1039_v47  ;;  %v3077_v14 = vld [vmem:[%s3688_s7 + $0x18] sm:$0xf]  ;;  %v525_v27 = vld [vmem:[%s3688_s7 + $0x10] sm:$0xe] }
  0x2e   : > { %v557_v61 = vsel %vm3907_vm6, %v2986_v33, %v556_v25  ;;  %v825_v15 = vrot.slane %v824_v48, 4  ;;  %v591_v21 = vunpack.c.l.b16 %v553_v60  ;;  %v3040_v25 = vor.u32 %v3495_v59, %v3039_v56  ;;  %v528_v56 = vld [vmem:[%s3688_s7 + $0x28] sm:$0xe] }
  0x2f   : > { %v1036_v50 = vsel %vm3907_vm6, %v3125_v32, %v1035_v45  ;;  %v815_v7 = vrot.slane %v813_v38, 5  ;;  %v592_v22 = vunpack.c.l.b16 %v557_v61  ;;  %v835_v30 = vshll.u32 %v3077_v14, 16  ;;  %v526_v38 = vld [vmem:[%s3688_s7 + $0x18] sm:$0xe] }
  0x30   : > { %1819 = vmatpush.bf16.msra.mxu1 %v3668_v3  ;;  %v827_v3 = vshll.u32 %v3076_v29, 16  ;;  %v1074_v17 = vunpack.c.l.b16 %v1036_v50  ;;  %v832_v29 = vshrl.u32 %v3077_v14, 16  ;;  %v3119_v45 = vld [vmem:[%s3688_s7 + $0x18] sm:$0xe]  ;;  %v2987_v47 = vrot.slane %v525_v27, 9 }
  0x31   : > { %1238 = vmatpush.bf16.msra.mxu2 %v3915_v49  ;;  %1610 = vmatpush.bf16.msra.mxu0 %v3939_v53  ;;  %v816_v32 = vsel %vm3747_vm3, %v811_v6, %v815_v7  ;;  %v599_v28 = vpack.c.b16 %v592_v22, %v591_v21  ;;  %v560_v48 = vrot.slane %v3813_v35, 5  ;;  %v568_v60 = vrot.slane %v3707_v12, 5  ;;  %v3078_v14 = vld [vmem:[%s3688_s7 + $0x1c] sm:$0x1] }
  0x32   : > { %2948 = vmatmul.msk.bf16.gmra.mxu2 %vm396_vm0, %v371_v23  ;;  %v829_v1 = vrot.slane %v827_v3, 5  ;;  %v1075_v23 = vunpack.c.l.b16 %v1040_v51  ;;  %v3120_v3 = vld [vmem:[%s3688_s7 + $0x20] sm:$0xe]  ;;  %v834_v50 = vrot.slane %v832_v29, 4  ;;  %v837_v51 = vrot.slane %v835_v30, 5 }
  0x33   : > { %2946 = vmatmul.msk.bf16.gmra.mxu0 %vm396_vm0, %v369_v44  ;;  %v849_v44 = vshll.u32 %v3079_v24, 16  ;;  %v924_v61 = vunpack.c.l.b16 %v816_v32  ;;  %v2988_v7 = vrot.slane %v526_v38, 9  ;;  %v1043_v22 = vrot.slane %v3078_v14, 5 }
  0x34   : > { %1820 = vmatpush.bf16.msra.mxu1 %v3683_v5  ;;  %v3934_v5 = vld [vmem:[%s4740_s2 + $0xf0] sm:$0xff]  ;;  %v830_v33 = vsel %vm3747_vm3, %v825_v15, %v829_v1  ;;  %v1082_v37 = vpack.c.b16 %v1075_v23, %v1074_v17  ;;  %v2990_v15 = vrot.slane %v528_v56, 9  ;;  %v3080_v1 = vld [vmem:[%s3688_s7 + $0x24] sm:$0x1]  ;;  %v848_v17 = vrot.slane %v846_v42, 4 }
  0x35   : > { %1460 = vmatpush.bf16.msra.mxu3 %v3934_v5  ;;  %v925_v6 = vunpack.c.l.b16 %v830_v33  ;;  %v851_v35 = vrot.slane %v849_v44, 5  ;;  %v3127_v23 = vrot.slane %v3119_v45, 9  ;;  %v3128_v24 = vrot.slane %v3120_v3, 9  ;;  %v3043_v3 = vld [vmem:[%s3688_s7 + $0x18] sm:$0xf] }
  0x36   : > { %v572_v12 = vrot.slane %v3710_v13, 5  ;;  %v564_v27 = vrot.slane %v3832_v52, 5  ;;  %v838_v29 = vor.u32 %v837_v51, %v834_v50  ;;  %v841_v30 = vshll.u32 %v3078_v14, 16  ;;  %v3972_v13 = vld [vmem:[%s4740_s2 + $0xc8] sm:$0xff] }
  0x37   : > { %v932_v33 = vpack.c.b16 %v925_v6, %v924_v61  ;;  %v852_v38 = vor.u32 %v851_v35, %v848_v17  ;;  %v855_v42 = vshll.u32 %v3080_v1, 16  ;;  %v561_v52 = vsel %vm3907_vm6, %v2987_v47, %v560_v48  ;;  %1239 = vmatpush.bf16.msra.mxu2 %v3972_v13  ;;  %v3083_v47 = vld [vmem:[%s3688_s7 + $0x30] sm:$0xf]  ;;  %v3496_v48 = vld [vmem:[%s3688_s7 + $0x1c] sm:$0xf0]  ;;  %v3999_v61 = vld [vmem:[%s4740_s2 + $0x108] sm:$0xff] }
  0x38   : > { %1821 = vmatpush.bf16.msra.mxu1 %v3703_v10  ;;  %v527_v10 = vld [vmem:[%s3688_s7 + $0x20] sm:$0xe]  ;;  %v1044_v45 = vsel %vm3907_vm6, %v3127_v23, %v1043_v22  ;;  %v839_v50 = vrot.slane %v838_v29, 4  ;;  %v843_v51 = vrot.slane %v841_v30, 5  ;;  %v3082_v35 = vld [vmem:[%s3688_s7 + $0x2c] sm:$0x1]  ;;  %1611 = vmatpush.bf16.msra.mxu0 %v3999_v61  ;;  %v3044_v22 = vor.u32 %v3496_v48, %v3043_v3 }
  0x39   : > { %v2989_v59 = vrot.slane %v527_v10, 9  ;;  %v565_v10 = vsel %vm3907_vm6, %v2988_v7, %v564_v27  ;;  %v853_v6 = vrot.slane %v852_v38, 4  ;;  %v857_v7 = vrot.slane %v855_v42, 5 }
  0x3a   : > { %v1076_v14 = vunpack.c.l.b16 %v1044_v45  ;;  %v594_v17 = vunpack.c.l.b16 %v565_v10  ;;  %v874_v23 = vshrl.u32 %v3083_v47, 16  ;;  %v530_v45 = vld [vmem:[%s3688_s7 + $0x38] sm:$0xe]  ;;  %v580_v10 = vrot.slane %v3791_v16, 5 }
  0x3b   : > { %3069 = vmatmul.msk.bf16.vlgmr.msrb.gmra.mxu3 %vm396_vm0, %v3040_v25  ;;  %3157 = vmatmul.msk.bf16.vlgmr.msrb.gmra.mxu1 %vm396_vm0, %v1082_v37  ;;  %v569_v21 = vsel %vm3907_vm6, %v2989_v59, %v568_v60  ;;  %v1047_v25 = vrot.slane %v3080_v1, 5  ;;  %v573_v37 = vsel %vm3907_vm6, %v2990_v15, %v572_v12  ;;  %v593_v1 = vunpack.c.l.b16 %v561_v52  ;;  %v529_v52 = vld [vmem:[%s3688_s7 + $0x30] sm:$0xe] }
  0x3c   : > { %2255 = vmatpush.bf16.msrb.mxu1 %v3741_v40  ;;  %v595_v32 = vunpack.c.l.b16 %v569_v21  ;;  %v596_v44 = vunpack.c.l.b16 %v573_v37  ;;  %v3081_v40 = vld [vmem:[%s3688_s7 + $0x28] sm:$0xf]  ;;  %v877_v21 = vshll.u32 %v3083_v47, 16  ;;  %v858_v29 = vsel %vm3747_vm3, %v853_v6, %v857_v7  ;;  %v3122_v37 = vld [vmem:[%s3688_s7 + $0x30] sm:$0xe] }
  0x3d   : > { %v860_v59 = vshrl.u32 %v3081_v40, 16  ;;  %v863_v60 = vshll.u32 %v3081_v40, 16  ;;  %v600_v38 = vpack.c.b16 %v594_v17, %v593_v1  ;;  %v2992_v3 = vrot.slane %v530_v45, 9  ;;  %v3085_v17 = vld [vmem:[%s3688_s7 + $0x38] sm:$0xf] }
  0x3e   : > { %v3985_v56 = vpack.c.b16 %v596_v44, %v595_v32  ;;  %v869_v32 = vshll.u32 %v3082_v35, 16  ;;  %v876_v44 = vrot.slane %v874_v23, 4  ;;  %v879_v40 = vrot.slane %v877_v21, 5  ;;  %v3087_v23 = vld [vmem:[%s3688_s7 + $0x40] sm:$0xf] }
  0x3f   : > { %v862_v12 = vrot.slane %v860_v59, 4  ;;  %v865_v27 = vrot.slane %v863_v60, 5  ;;  %v1051_v59 = vrot.slane %v3082_v35, 5  ;;  %v3130_v60 = vrot.slane %v3122_v37, 9 }
  0x40   : > { %2256 = vmatpush.bf16.msrb.mxu1 %v3782_v63  ;;  %v3994_v63 = vld [vmem:[%s4740_s2 + $0xe8] sm:$0xff]  ;;  %v880_v16 = vor.u32 %v879_v40, %v876_v44  ;;  %v871_v21 = vrot.slane %v869_v32, 5  ;;  %v891_v32 = vshll.u32 %v3085_v17, 16  ;;  %v902_v37 = vshrl.u32 %v3087_v23, 16  ;;  %v4054_v44 = vld [vmem:[%s4740_s2 + $0x100] sm:$0xff] }
  0x41   : > { %1461 = vmatpush.bf16.msra.mxu3 %v3994_v63  ;;  %1612 = vmatpush.bf16.msra.mxu0 %v4054_v44 }
  0x42   : > { %3017 = vmatmul.msk.bf16.vlgmr.msrb.gmra.mxu2 %vm396_vm0, %v599_v28  ;;  %v1048_v28 = vsel %vm3907_vm6, %v3128_v24, %v1047_v25  ;;  %v844_v24 = vsel %vm3747_vm3, %v839_v50, %v843_v51  ;;  %v3084_v25 = vld [vmem:[%s3688_s7 + $0x34] sm:$0x1]  ;;  %v927_v50 = vunpack.c.l.b16 %v858_v29  ;;  %v866_v51 = vor.u32 %v865_v27, %v862_v12 }
  0x43   : > { %3113 = vmatmul.msk.bf16.vlgmr.msrb.gmra.mxu0 %vm396_vm0, %v932_v33  ;;  %v1077_v15 = vunpack.c.l.b16 %v1048_v28  ;;  %v3121_v33 = vld [vmem:[%s3688_s7 + $0x28] sm:$0xe]  ;;  %v926_v42 = vunpack.c.l.b16 %v844_v24  ;;  %v576_v28 = vrot.slane %v3777_v62, 5  ;;  %v883_v47 = vshll.u32 %v3084_v25, 16 }
  0x44   : > { %2257 = vmatpush.bf16.msrb.mxu1 %v3819_v36  ;;  %v2991_v36 = vrot.slane %v529_v52, 9  ;;  %v3129_v48 = vrot.slane %v3121_v33, 9  ;;  %v581_v62 = vsel %vm3907_vm6, %v2992_v3, %v580_v10  ;;  %v867_v35 = vrot.slane %v866_v51, 4  ;;  %v3047_v24 = vld [vmem:[%s3688_s7 + $0x28] sm:$0xf] }
  0x45   : > { %v1083_v30 = vpack.c.b16 %v1077_v15, %v1076_v14  ;;  %v598_v14 = vunpack.c.l.b16 %v581_v62  ;;  %v933_v15 = vpack.c.b16 %v927_v50, %v926_v42  ;;  %v885_v12 = vrot.slane %v883_v47, 5  ;;  %v4049_v42 = vld [vmem:[%s4740_s2 + $0xe0] sm:$0xff]  ;;  %2066 = vmatpush.bf16.msrb.mxu0 %v3734_v34  ;;  %v3086_v51 = vld [vmem:[%s3688_s7 + $0x3c] sm:$0x1] }
  0x46   : > { %v577_v6 = vsel %vm3907_vm6, %v2991_v36, %v576_v28  ;;  %v1052_v27 = vsel %vm3907_vm6, %v3129_v48, %v1051_v59  ;;  %v888_v33 = vshrl.u32 %v3085_v17, 16  ;;  %v872_v36 = vsel %vm3747_vm3, %v867_v35, %v871_v21  ;;  %1462 = vmatpush.bf16.msra.mxu3 %v4049_v42  ;;  %v3088_v47 = vld [vmem:[%s3688_s7 + $0x44] sm:$0x1]  ;;  %v3123_v59 = vld [vmem:[%s3688_s7 + $0x38] sm:$0xe] }
  0x47   : > { %v597_v7 = vunpack.c.l.b16 %v577_v6  ;;  %v1078_v40 = vunpack.c.l.b16 %v1052_v27  ;;  %v893_v3 = vrot.slane %v891_v32, 5  ;;  %v904_v10 = vrot.slane %v902_v37, 4  ;;  %v4099_v37 = vld [vmem:[%s3688_s7 + $0x14] sm:$0x1] }
  0x48   : > { %2258 = vmatpush.bf16.msrb.mxu1 %v3851_v8  ;;  %v1055_v8 = vrot.slane %v3084_v25, 5  ;;  %v881_v25 = vrot.slane %v880_v16, 4  ;;  %v928_v6 = vunpack.c.l.b16 %v872_v36  ;;  %v3213_v16 = vld [vmem:[%s3688_s7 + $0x10] sm:$0xf]  ;;  %v3131_v34 = vrot.slane %v3123_v59, 9 }
  0x49   : > { %v4024_v1 = vpack.c.b16 %v598_v14, %v597_v7  ;;  %v897_v14 = vshll.u32 %v3086_v51, 16  ;;  %2067 = vmatpush.bf16.msrb.mxu0 %v3768_v55  ;;  %v1059_v17 = vrot.slane %v3086_v51, 5  ;;  %v1063_v35 = vrot.slane %v3088_v47, 5 }
  0x4a   : > { %v1056_v29 = vsel %vm3907_vm6, %v3130_v60, %v1055_v8  ;;  %v886_v28 = vsel %vm3747_vm3, %v881_v25, %v885_v12  ;;  %1988 = vmatpush.bf16.msrb.mxu3 %v3729_v31  ;;  %v3124_v60 = vld [vmem:[%s3688_s7 + $0x40] sm:$0xe]  ;;  %v3215_v8 = vld [vmem:[%s3688_s7 + $0x18] sm:$0xf]  ;;  %v911_v31 = vshll.u32 %v3088_v47, 16  ;;  %v1290_v21 = vshll.u32 %v3213_v16, 16 }
  0x4b   : > { %3070 = vmatmul.msk.bf16.gmra.mxu3 %vm396_vm0, %v3044_v22  ;;  %3158 = vmatmul.msk.bf16.gmra.mxu1 %vm396_vm0, %v1083_v30  ;;  %v4036_v22 = vld [vmem:[%s4740_s2 + $0xc0] sm:$0xff]  ;;  %v3497_v30 = vld [vmem:[%s3688_s7 + $0x2c] sm:$0xf0]  ;;  %v1079_v52 = vunpack.c.l.b16 %v1056_v29  ;;  %v929_v62 = vunpack.c.l.b16 %v886_v28  ;;  %v1301_v55 = vshrl.u32 %v3215_v8, 16  ;;  %v899_v12 = vrot.slane %v897_v14, 5 }
  0x4c   : > { %1240 = vmatpush.bf16.msra.mxu2 %v4036_v22  ;;  %v3048_v45 = vor.u32 %v3497_v30, %v3047_v24  ;;  %v1304_v24 = vshll.u32 %v3215_v8, 16  ;;  %v913_v27 = vrot.slane %v911_v31, 5  ;;  %v1662_v29 = vld [vmem:[%s4082_s29] sm:$0xf]  ;;  %v1663_v30 = vld [vmem:[%s4082_s29 + $0x8] sm:$0xf] }
  0x4d   : > { %v1084_v48 = vpack.c.b16 %v1079_v52, %v1078_v40  ;;  %v934_v25 = vpack.c.b16 %v929_v62, %v928_v6  ;;  %2068 = vmatpush.bf16.msrb.mxu0 %v3807_v26  ;;  %v1303_v40 = vrot.slane %v1301_v55, 4  ;;  %v1679_v36 = vshrl.u32 %v1662_v29, 16  ;;  %v4119_v14 = vld [vmem:[%s4082_s29 + $0xc] sm:$0x1] }
  0x4e   : > { %1989 = vmatpush.bf16.msrb.mxu3 %v3763_v54  ;;  %v1306_v52 = vrot.slane %v1304_v24, 5  ;;  %v1682_v28 = vshll.u32 %v1662_v29, 16 }
  0x50   : > { %1879 = vmatpush.bf16.msrb.mxu2 %v3650_v0  ;;  %v890_v0 = vrot.slane %v888_v33, 4  ;;  %v1684_v6 = vrot.slane %v1682_v28, 5 }
  0x51   : > { %2069 = vmatpush.bf16.msrb.mxu0 %v3844_v58  ;;  %v1307_v58 = vor.u32 %v1306_v52, %v1303_v40 }
  0x52   : > { %3018 = vmatmul.msk.bf16.gmra.mxu2 %vm396_vm0, %v600_v38  ;;  %v905_v38 = vshll.u32 %v3087_v23, 16  ;;  %v894_v7 = vor.u32 %v893_v3, %v890_v0  ;;  %v3132_v23 = vrot.slane %v3124_v60, 9  ;;  %1990 = vmatpush.bf16.msrb.mxu3 %v3796_v19  ;;  %v1693_v0 = vshrl.u32 %v1663_v30, 16  ;;  %v3498_v19 = vld [vmem:[%s3688_s7 + $0x3c] sm:$0xf0] }
  0x53   : > { %3114 = vmatmul.msk.bf16.gmra.mxu0 %vm396_vm0, %v933_v15  ;;  %v1696_v3 = vshll.u32 %v1663_v30, 16  ;;  %v1681_v60 = vrot.slane %v1679_v36, 4  ;;  %v1664_v30 = vld [vmem:[%s4082_s29 + $0x10] sm:$0xf] }
  0x54   : > { %v907_v50 = vrot.slane %v905_v38, 5  ;;  %1880 = vmatpush.bf16.msrb.mxu2 %v3663_v2  ;;  %v1287_v2 = vshrl.u32 %v3213_v16, 16  ;;  %v895_v33 = vrot.slane %v894_v7, 4  ;;  %v1064_v54 = vsel %vm3907_vm6, %v3132_v23, %v1063_v35  ;;  %v4116_v7 = vld [vmem:[%s4082_s29 + $0x4] sm:$0x1] }
  0x55   : > { %v1292_v38 = vrot.slane %v1290_v21, 5  ;;  %v1081_v51 = vunpack.c.l.b16 %v1064_v54  ;;  %v1695_v62 = vrot.slane %v1693_v0, 4  ;;  %v1698_v16 = vrot.slane %v1696_v3, 5  ;;  %v3257_v54 = vld [vmem:[%s3688_s7 + $0x10] sm:$0xe] }
  0x56   : > { %v908_v15 = vor.u32 %v907_v50, %v904_v10  ;;  %v1289_v26 = vrot.slane %v1287_v2, 4  ;;  %1991 = vmatpush.bf16.msrb.mxu3 %v3839_v57  ;;  %v1308_v23 = vrot.slane %v1307_v58, 4  ;;  %v3217_v2 = vld [vmem:[%s3688_s7 + $0x20] sm:$0xf]  ;;  %v1685_v21 = vor.u32 %v1684_v6, %v1681_v60  ;;  %v1665_v3 = vld [vmem:[%s4082_s29 + $0x18] sm:$0xf] }
  0x57   : > { %v1688_v55 = vshll.u32 %v4116_v7, 16  ;;  %v1699_v24 = vor.u32 %v1698_v16, %v1695_v62  ;;  %v1318_v29 = vshll.u32 %v3217_v2, 16  ;;  %v4140_v60 = vld [vmem:[%s3688_s7 + $0x24] sm:$0x1]  ;;  %v1721_v16 = vshrl.u32 %v1665_v3, 16 }
  0x58   : > { %1881 = vmatpush.bf16.msrb.mxu2 %v3678_v4  ;;  %v909_v32 = vrot.slane %v908_v15, 4  ;;  %v1060_v4 = vsel %vm3907_vm6, %v3131_v34, %v1059_v17  ;;  %v1293_v47 = vor.u32 %v1292_v38, %v1289_v26  ;;  %v3258_v26 = vld [vmem:[%s3688_s7 + $0x18] sm:$0xe]  ;;  %v1686_v38 = vrot.slane %v1685_v21, 4 }
  0x59   : > { %v1080_v50 = vunpack.c.l.b16 %v1060_v4  ;;  %v1690_v40 = vrot.slane %v1688_v55, 5  ;;  %v1700_v52 = vrot.slane %v1699_v24, 4  ;;  %v3266_v58 = vrot.slane %v3258_v26, 9 }
  0x5a   : > { %v914_v10 = vsel %vm3747_vm3, %v909_v32, %v913_v27  ;;  %v1294_v34 = vrot.slane %v1293_v47, 4  ;;  %v1315_v27 = vshrl.u32 %v3217_v2, 16  ;;  %v1723_v24 = vrot.slane %v1721_v16, 4 }
  0x5b   : > { %3071 = vmatmul.msk.bf16.gmra.mxu3 %vm396_vm0, %v3048_v45  ;;  %3159 = vmatmul.msk.bf16.gmra.mxu1 %vm396_vm0, %v1084_v48  ;;  %v4102_v45 = vld [vmem:[%s3688_s7 + $0x1c] sm:$0x1]  ;;  %v1296_v48 = vshll.u32 %v4099_v37, 16  ;;  %v931_v57 = vunpack.c.l.b16 %v914_v10  ;;  %v1085_v31 = vpack.c.b16 %v1081_v51, %v1080_v50  ;;  %v3265_v10 = vrot.slane %v3257_v54, 9  ;;  %v3179_v54 = vld [vmem:[%s3688_s7 + $0x10] sm:$0xf] }
  0x5c   : > { %1882 = vmatpush.bf16.msrb.mxu2 %v3698_v9  ;;  %v3051_v9 = vld [vmem:[%s3688_s7 + $0x38] sm:$0xf]  ;;  %v1310_v59 = vshll.u32 %v4102_v45, 16  ;;  %v1317_v50 = vrot.slane %v1315_v27, 4  ;;  %v1320_v51 = vrot.slane %v1318_v29, 5  ;;  %v1691_v6 = vsel %vm3747_vm3, %v1686_v38, %v1690_v40 }
  0x5d   : > { %v3052_v8 = vor.u32 %v3498_v19, %v3051_v9  ;;  %v1298_v17 = vrot.slane %v1296_v48, 5  ;;  %v1707_v9 = vshrl.u32 %v1664_v30, 16  ;;  %v1710_v19 = vshll.u32 %v1664_v30, 16  ;;  %v4160_v29 = vld [vmem:[%s4082_s29 + $0x1c] sm:$0x1] }
  0x5e   : > { %v1312_v35 = vrot.slane %v1310_v59, 5  ;;  %v1518_v48 = vrot.slane %v4099_v37, 5  ;;  %v1522_v59 = vrot.slane %v4102_v45, 5  ;;  %v4148_v37 = vld [vmem:[%s3688_s7 + $0x2c] sm:$0x1]  ;;  %v1321_v45 = vor.u32 %v1320_v51, %v1317_v50 }
  0x5f   : > { %v1299_v32 = vsel %vm3747_vm3, %v1294_v34, %v1298_v17  ;;  %v1324_v34 = vshll.u32 %v4140_v60, 16  ;;  %v4152_v17 = vld [vmem:[%s4082_s29 + $0x14] sm:$0x1]  ;;  %v1338_v27 = vshll.u32 %v4148_v37, 16  ;;  %v3221_v38 = vld [vmem:[%s3688_s7 + $0x30] sm:$0xf] }
  0x60   : > { %v1313_v4 = vsel %vm3747_vm3, %v1308_v23, %v1312_v35  ;;  %v1519_v23 = vsel %vm3907_vm6, %v3265_v10, %v1518_v48  ;;  %v1790_v35 = vunpack.c.l.b16 %v1691_v6  ;;  %v1523_v55 = vsel %vm3907_vm6, %v3266_v58, %v1522_v59  ;;  %v3511_v40 = vld [vmem:[%s3688_s7 + $0x14] sm:$0xf0]  ;;  %v1666_v6 = vld [vmem:[%s4082_s29 + $0x20] sm:$0xf] }
  0x61   : > { %v1408_v47 = vunpack.c.l.b16 %v1313_v4  ;;  %v1326_v4 = vrot.slane %v1324_v34, 5  ;;  %v1343_v51 = vshrl.u32 %v3221_v38, 16  ;;  %v3180_v48 = vor.u32 %v3511_v40, %v3179_v54  ;;  %v4185_v34 = vld [vmem:[%s3688_s7 + $0x34] sm:$0x1] }
  0x62   : > { %3019 = vmatmul.msk.bf16.gmra.mxu2 %vm396_vm0, %v3985_v56  ;;  %v900_v56 = vsel %vm3747_vm3, %v895_v33, %v899_v12  ;;  %v3219_v12 = vld [vmem:[%s3688_s7 + $0x28] sm:$0xf]  ;;  %v1530_v54 = vrot.slane %v4148_v37, 5 }
  0x63   : > { %3115 = vmatmul.msk.bf16.gmra.mxu0 %vm396_vm0, %v934_v25  ;;  %v930_v15 = vunpack.c.l.b16 %v900_v56  ;;  %v1702_v25 = vshll.u32 %v4119_v14, 16  ;;  %v1329_v28 = vshrl.u32 %v3219_v12, 16  ;;  %v1332_v0 = vshll.u32 %v3219_v12, 16 }
  0x64   : > { %v1407_v56 = vunpack.c.l.b16 %v1299_v32  ;;  %v1322_v32 = vrot.slane %v1321_v45, 4 }
  0x65   : > { %v935_v33 = vpack.c.b16 %v931_v57, %v930_v15  ;;  %v1704_v36 = vrot.slane %v1702_v25, 5  ;;  %v1331_v15 = vrot.slane %v1329_v28, 4  ;;  %v1334_v57 = vrot.slane %v1332_v0, 5 }
  0x66   : > { %v1415_v21 = vpack.c.b16 %v1408_v47, %v1407_v56  ;;  %v1730_v0 = vshll.u32 %v4160_v29, 16  ;;  %v1327_v50 = vsel %vm3747_vm3, %v1322_v32, %v1326_v4  ;;  %v1346_v47 = vshll.u32 %v3221_v38, 16 }
  0x67   : > { %v1705_v62 = vsel %vm3747_vm3, %v1700_v52, %v1704_v36  ;;  %v1335_v12 = vor.u32 %v1334_v57, %v1331_v15  ;;  %v1557_v52 = vunpack.c.l.b16 %v1519_v23  ;;  %v1558_v36 = vunpack.c.l.b16 %v1523_v55 }
  0x68   : > { %v1791_v2 = vunpack.c.l.b16 %v1705_v62  ;;  %v1732_v16 = vrot.slane %v1730_v0, 5  ;;  %v1345_v23 = vrot.slane %v1343_v51, 4  ;;  %v1352_v38 = vshll.u32 %v4185_v34, 16  ;;  %v4205_v0 = vld [vmem:[%s4082_s29 + $0x24] sm:$0x1] }
  0x69   : > { %v1565_v15 = vpack.c.b16 %v1558_v36, %v1557_v52  ;;  %v3512_v51 = vld [vmem:[%s3688_s7 + $0x24] sm:$0xf0] }
  0x6a   : > { %v1798_v26 = vpack.c.b16 %v1791_v2, %v1790_v35  ;;  %v1348_v35 = vrot.slane %v1346_v47, 5  ;;  %v1735_v2 = vshrl.u32 %v1666_v6, 16 }
  0x6b   : > { %3072 = vmatmul.msk.bf16.gmra.mxu3 %vm396_vm0, %v3052_v8  ;;  %3160 = vmatmul.msk.bf16.gmra.mxu1 %vm396_vm0, %v1085_v31  ;;  %v1724_v8 = vshll.u32 %v1665_v3, 16  ;;  %v1712_v31 = vrot.slane %v1710_v19, 5  ;;  %v3223_v3 = vld [vmem:[%s3688_s7 + $0x38] sm:$0xf]  ;;  %v1340_v19 = vrot.slane %v1338_v27, 5 }
  0x6c   : > { %v1357_v58 = vshrl.u32 %v3223_v3, 16  ;;  %v1360_v59 = vshll.u32 %v3223_v3, 16  ;;  %v1737_v52 = vrot.slane %v1735_v2, 4 }
  0x6d   : > { %v1726_v25 = vrot.slane %v1724_v8, 5  ;;  %v1667_v8 = vld [vmem:[%s4082_s29 + $0x28] sm:$0xf] }
  0x6e   : > { %v1359_v55 = vrot.slane %v1357_v58, 4 }
  0x6f   : > { %v1727_v28 = vor.u32 %v1726_v25, %v1723_v24  ;;  %v1362_v24 = vrot.slane %v1360_v59, 5  ;;  %v1749_v25 = vshrl.u32 %v1667_v8, 16  ;;  %v1744_v59 = vshll.u32 %v4205_v0, 16 }
  0x71   : > { %v1728_v62 = vrot.slane %v1727_v28, 4  ;;  %v1751_v3 = vrot.slane %v1749_v25, 4  ;;  %v1669_v25 = vld [vmem:[%s4082_s29 + $0x38] sm:$0xf] }
  0x72   : > { %3020 = vmatmul.msk.bf16.gmra.mxu2 %vm396_vm0, %v4024_v1  ;;  %v1709_v1 = vrot.slane %v1707_v9, 4  ;;  %v1336_v9 = vrot.slane %v1335_v12, 4  ;;  %v1752_v12 = vshll.u32 %v1667_v8, 16  ;;  %v3225_v8 = vld [vmem:[%s3688_s7 + $0x40] sm:$0xf] }
  0x73   : > { %3116 = vmatmul.msk.bf16.gmra.mxu0 %vm396_vm0, %v935_v33  ;;  %v1716_v33 = vshll.u32 %v4152_v17, 16  ;;  %v1733_v32 = vsel %vm3747_vm3, %v1728_v62, %v1732_v16 }
  0x74   : > { %v1713_v30 = vor.u32 %v1712_v31, %v1709_v1  ;;  %v1341_v57 = vsel %vm3747_vm3, %v1336_v9, %v1340_v19  ;;  %v4178_v1 = vunpack.c.l.b16 %v1327_v50  ;;  %v3260_v31 = vld [vmem:[%s3688_s7 + $0x28] sm:$0xe]  ;;  %v1793_v28 = vunpack.c.l.b16 %v1733_v32  ;;  %v4209_v9 = vld [vmem:[%s4082_s29 + $0x2c] sm:$0x1]  ;;  %v3569_v19 = vld [vmem:[%s4740_s2 + $0xb0] sm:$0xff] }
  0x75   : > { %v1718_v10 = vrot.slane %v1716_v33, 5  ;;  %v1410_v27 = vunpack.c.l.b16 %v1341_v57  ;;  %v1526_v33 = vrot.slane %v4140_v60, 5  ;;  %v3268_v4 = vrot.slane %v3260_v31, 9 }
  0x76   : > { %v1714_v56 = vrot.slane %v1713_v30, 4  ;;  %v1349_v60 = vor.u32 %v1348_v35, %v1345_v23  ;;  %v1754_v37 = vrot.slane %v1752_v12, 5  ;;  %v1758_v16 = vshll.u32 %v4209_v9, 16 }
  0x77   : > { %v1531_v50 = vsel %vm3907_vm6, %v3268_v4, %v1530_v54  ;;  %v1371_v23 = vshrl.u32 %v3225_v8, 16  ;;  %v1374_v35 = vshll.u32 %v3225_v8, 16  ;;  %v4248_v4 = vld [vmem:[%s3688_s7 + $0x44] sm:$0x1]  ;;  %v1934_v8 = vrot.slane %v4119_v14, 5 }
  0x78   : > { %v1719_v45 = vsel %vm3747_vm3, %v1714_v56, %v1718_v10  ;;  %v3183_v56 = vld [vmem:[%s3688_s7 + $0x20] sm:$0xf]  ;;  %v1350_v47 = vrot.slane %v1349_v60, 4  ;;  %v1755_v62 = vor.u32 %v1754_v37, %v1751_v3 }
  0x79   : > { %v1376_v54 = vrot.slane %v1374_v35, 5 }
  0x7b   : > { %3253 = vmatmul.msk.bf16.vlgmr.msra.gmra.mxu3 %vm396_vm0, %v1415_v21  ;;  %3301 = vmatmul.msk.bf16.vlgmr.msra.gmra.mxu1 %vm396_vm0, %v1798_v26  ;;  %v1738_v21 = vshll.u32 %v1666_v6, 16  ;;  %v1792_v26 = vunpack.c.l.b16 %v1719_v45  ;;  %v1746_v45 = vrot.slane %v1744_v59, 5  ;;  %v1904_v59 = vld [vmem:[%s4082_s29] sm:$0xe] }
  0x7c   : > { %2450 = vmatpush.bf16.msra.mxu3 %v3856_v11  ;;  %2756 = vmatpush.bf16.msra.mxu1 %v3886_v46  ;;  %v3259_v11 = vld [vmem:[%s3688_s7 + $0x20] sm:$0xe]  ;;  %v4190_v46 = vld [vmem:[%s3688_s7 + $0x3c] sm:$0x1] }
  0x7d   : > { %v3267_v30 = vrot.slane %v3259_v11, 9  ;;  %v1366_v40 = vshll.u32 %v4190_v46, 16  ;;  %v1740_v36 = vrot.slane %v1738_v21, 5  ;;  %v3227_v11 = vld [vmem:[%s3688_s7 + $0x48] sm:$0xf] }
  0x7e   : > { %v1385_v2 = vshrl.u32 %v3227_v11, 16  ;;  %v1388_v21 = vshll.u32 %v3227_v11, 16 }
  0x7f   : > { %v1527_v10 = vsel %vm3907_vm6, %v3267_v30, %v1526_v33  ;;  %v1741_v58 = vor.u32 %v1740_v36, %v1737_v52  ;;  %v3261_v30 = vld [vmem:[%s3688_s7 + $0x30] sm:$0xe]  ;;  %v3262_v33 = vld [vmem:[%s3688_s7 + $0x38] sm:$0xe]  ;;  %v1777_v52 = vshrl.u32 %v1669_v25, 16  ;;  %v1780_v36 = vshll.u32 %v1669_v25, 16 }
  0x80   : > { %2451 = vmatpush.bf16.msra.mxu3 %v3915_v49  ;;  %v3568_v49 = vld [vmem:[%s4740_s2 + $0xb8] sm:$0xff]  ;;  %2757 = vmatpush.bf16.msra.mxu1 %v3939_v53  ;;  %v1363_v53 = vor.u32 %v1362_v24, %v1359_v55  ;;  %v1559_v57 = vunpack.c.l.b16 %v1527_v10  ;;  %v1668_v55 = vld [vmem:[%s4082_s29 + $0x30] sm:$0xf]  ;;  %v1387_v60 = vrot.slane %v1385_v2, 4  ;;  %v3270_v3 = vrot.slane %v3262_v33, 9 }
  0x81   : > { %v1742_v31 = vrot.slane %v1741_v58, 4  ;;  %v1782_v58 = vrot.slane %v1780_v36, 5  ;;  %v3263_v36 = vld [vmem:[%s3688_s7 + $0x40] sm:$0xe] }
  0x82   : > { %3209 = vmatmul.msk.bf16.vlgmr.msra.gmra.mxu2 %vm396_vm0, %v3180_v48  ;;  %v1368_v48 = vrot.slane %v1366_v40, 5  ;;  %v1364_v6 = vrot.slane %v1363_v53, 4  ;;  %v1390_v40 = vrot.slane %v1388_v21, 5  ;;  %v1534_v53 = vrot.slane %v4185_v34, 5 }
  0x83   : > { %2372 = vmatpush.bf16.msra.mxu2 %v3568_v49  ;;  %3297 = vmatmul.msk.bf16.vlgmr.msra.gmra.mxu0 %vm396_vm0, %v1565_v15  ;;  %v3184_v15 = vor.u32 %v3512_v51, %v3183_v56  ;;  %v1747_v32 = vsel %vm3747_vm3, %v1742_v31, %v1746_v45  ;;  %v1373_v49 = vrot.slane %v1371_v23, 4  ;;  %v1380_v56 = vshll.u32 %v4248_v4, 16  ;;  %v3187_v23 = vld [vmem:[%s3688_s7 + $0x30] sm:$0xf] }
  0x84   : > { %2452 = vmatpush.bf16.msra.mxu3 %v3972_v13  ;;  %2639 = vmatpush.bf16.msra.mxu0 %v3868_v20  ;;  %v1416_v13 = vpack.c.b16 %v1410_v27, %v4178_v1  ;;  %v1354_v20 = vrot.slane %v1352_v38, 5  ;;  %v1560_v1 = vunpack.c.l.b16 %v1531_v50  ;;  %v4252_v38 = vld [vmem:[%s3688_s7 + $0x4c] sm:$0x1]  ;;  %v4260_v50 = vld [vmem:[%s4082_s29 + $0x34] sm:$0x1] }
  0x85   : > { %2758 = vmatpush.bf16.msra.mxu1 %v3999_v61  ;;  %v1799_v61 = vpack.c.b16 %v1793_v28, %v1792_v26  ;;  %v1766_v26 = vshll.u32 %v1668_v55, 16  ;;  %v3269_v28 = vrot.slane %v3261_v30, 9  ;;  %v1394_v10 = vshll.u32 %v4252_v38, 16 }
  0x86   : > { %v1566_v24 = vpack.c.b16 %v1560_v1, %v1559_v57  ;;  %v1377_v34 = vor.u32 %v1376_v54, %v1373_v49  ;;  %v1382_v21 = vrot.slane %v1380_v56, 5  ;;  %v3365_v49 = vld [vmem:[%s4082_s29 + $0x8] sm:$0xf] }
  0x87   : > { %2373 = vmatpush.bf16.msra.mxu2 %v3569_v19  ;;  %v1538_v19 = vrot.slane %v4190_v46, 5  ;;  %v1768_v51 = vrot.slane %v1766_v26, 5  ;;  %v3325_v46 = vrot.slane %v1904_v59, 9  ;;  %v3367_v26 = vld [vmem:[%s4082_s29 + $0x10] sm:$0xf]  ;;  %v1546_v59 = vrot.slane %v4252_v38, 5 }
  0x88   : > { %2453 = vmatpush.bf16.msra.mxu3 %v4036_v22  ;;  %2640 = vmatpush.bf16.msra.mxu0 %v3934_v5  ;;  %v1355_v22 = vsel %vm3747_vm3, %v1350_v47, %v1354_v20  ;;  %v1756_v5 = vrot.slane %v1755_v62, 4  ;;  %v1391_v47 = vor.u32 %v1390_v40, %v1387_v60  ;;  %v1930_v62 = vrot.slane %v4116_v7, 5  ;;  %v1906_v38 = vld [vmem:[%s4082_s29 + $0x10] sm:$0xe] }
  0x89   : > { %2759 = vmatpush.bf16.msra.mxu1 %v4054_v44  ;;  %v1760_v44 = vrot.slane %v1758_v16, 5  ;;  %v1411_v12 = vunpack.c.l.b16 %v1355_v22  ;;  %v1539_v57 = vsel %vm3907_vm6, %v3270_v3, %v1538_v19  ;;  %v1772_v22 = vshll.u32 %v4260_v50, 16 }
  0x8a   : > { %v1931_v31 = vsel %vm3907_vm6, %v3325_v46, %v1930_v62  ;;  %v1378_v2 = vrot.slane %v1377_v34, 4  ;;  %v2119_v3 = vshll.u32 %v3365_v49, 16 }
  0x8b   : > { %2374 = vmatpush.bf16.msra.mxu2 %v3824_v43  ;;  %3254 = vmatmul.msk.bf16.gmra.mxu3 %vm396_vm0, %v1416_v13  ;;  %v1369_v43 = vsel %vm3747_vm3, %v1364_v6, %v1368_v48  ;;  %v1779_v48 = vrot.slane %v1777_v52, 4  ;;  %v4265_v6 = vld [vmem:[%s4082_s29 + $0x3c] sm:$0x1] }
  0x8c   : > { %3302 = vmatmul.msk.bf16.gmra.mxu1 %vm396_vm0, %v1799_v61  ;;  %2641 = vmatpush.bf16.msra.mxu0 %v3994_v63  ;;  %v1412_v27 = vunpack.c.l.b16 %v1369_v43  ;;  %v1761_v63 = vsel %vm3747_vm3, %v1756_v5, %v1760_v44  ;;  %v1905_v61 = vld [vmem:[%s4082_s29 + $0x8] sm:$0xe]  ;;  %v3513_v43 = vld [vmem:[%s3688_s7 + $0x34] sm:$0xf0]  ;;  %v1786_v5 = vshll.u32 %v4265_v6, 16  ;;  %v1960_v44 = vunpack.c.l.b16 %v1931_v31 }
  0x8d   : > { %v1795_v13 = vunpack.c.l.b16 %v1761_v63  ;;  %v3326_v16 = vrot.slane %v1905_v61, 9  ;;  %v1783_v14 = vor.u32 %v1782_v58, %v1779_v48  ;;  %v3188_v30 = vor.u32 %v3513_v43, %v3187_v23  ;;  %v4309_v31 = vld [vmem:[%s4082_s29 + $0x14] sm:$0x1] }
  0x8e   : > { %v1417_v37 = vpack.c.b16 %v1412_v27, %v1411_v12  ;;  %v1562_v12 = vunpack.c.l.b16 %v1539_v57  ;;  %v1383_v60 = vsel %vm3747_vm3, %v1378_v2, %v1382_v21  ;;  %v1542_v48 = vrot.slane %v4248_v4, 5  ;;  %v4306_v57 = vld [vmem:[%s4082_s29 + $0xc] sm:$0x1] }
  0x8f   : > { %2375 = vmatpush.bf16.msra.mxu2 %v3863_v18  ;;  %v1763_v18 = vshrl.u32 %v1668_v55, 16  ;;  %v1935_v45 = vsel %vm3907_vm6, %v3326_v16, %v1934_v8  ;;  %v1392_v55 = vrot.slane %v1391_v47, 4  ;;  %v1784_v54 = vrot.slane %v1783_v14, 4 }
  0x90   : > { %2642 = vmatpush.bf16.msra.mxu0 %v4049_v42  ;;  %v1794_v42 = vunpack.c.l.b16 %v1747_v32  ;;  %v1961_v35 = vunpack.c.l.b16 %v1935_v45  ;;  %v1774_v32 = vrot.slane %v1772_v22, 5  ;;  %v3271_v47 = vrot.slane %v3263_v36, 9  ;;  %v1907_v45 = vld [vmem:[%s4082_s29 + $0x18] sm:$0xe] }
  0x91   : > { %v1765_v20 = vrot.slane %v1763_v18, 4  ;;  %v1788_v18 = vrot.slane %v1786_v5, 5  ;;  %v2121_v16 = vrot.slane %v2119_v3, 5  ;;  %v3327_v14 = vrot.slane %v1906_v38, 9  ;;  %v4350_v38 = vld [vmem:[%s4082_s29 + $0x1c] sm:$0x1] }
  0x92   : > { %3210 = vmatmul.msk.bf16.gmra.mxu2 %vm396_vm0, %v3184_v15  ;;  %v1535_v15 = vsel %vm3907_vm6, %v3269_v28, %v1534_v53  ;;  %v1800_v1 = vpack.c.b16 %v1795_v13, %v1794_v42  ;;  %v4282_v27 = vpack.c.b16 %v1961_v35, %v1960_v44  ;;  %v3264_v28 = vld [vmem:[%s3688_s7 + $0x48] sm:$0xe]  ;;  %v2116_v53 = vshrl.u32 %v3365_v49, 16 }
  0x93   : > { %3298 = vmatmul.msk.bf16.gmra.mxu0 %vm396_vm0, %v1566_v24  ;;  %v1769_v11 = vor.u32 %v1768_v51, %v1765_v20  ;;  %v1396_v24 = vrot.slane %v1394_v10, 5  ;;  %v1561_v25 = vunpack.c.l.b16 %v1535_v15  ;;  %v2130_v42 = vshrl.u32 %v3367_v26, 16  ;;  %v3514_v44 = vld [vmem:[%s3688_s7 + $0x44] sm:$0xf0] }
  0x94   : > { %v2133_v13 = vshll.u32 %v3367_v26, 16  ;;  %v1413_v20 = vunpack.c.l.b16 %v1383_v60  ;;  %v1789_v34 = vsel %vm3747_vm3, %v1784_v54, %v1788_v18  ;;  %v3272_v58 = vrot.slane %v3264_v28, 9 }
  0x95   : > { %v1770_v33 = vrot.slane %v1769_v11, 4  ;;  %v1397_v40 = vsel %vm3747_vm3, %v1392_v55, %v1396_v24  ;;  %v1567_v52 = vpack.c.b16 %v1562_v12, %v1561_v25  ;;  %v2118_v62 = vrot.slane %v2116_v53, 4 }
  0x96   : > { %v1414_v51 = vunpack.c.l.b16 %v1397_v40  ;;  %v1797_v15 = vunpack.c.l.b16 %v1789_v34  ;;  %v2135_v4 = vrot.slane %v2133_v13, 5  ;;  %v1543_v23 = vsel %vm3907_vm6, %v3271_v47, %v1542_v48 }
  0x97   : > { %v1775_v19 = vsel %vm3747_vm3, %v1770_v33, %v1774_v32  ;;  %v1547_v43 = vsel %vm3907_vm6, %v3272_v58, %v1546_v59  ;;  %v1938_v5 = vrot.slane %v4152_v17, 5  ;;  %v2122_v35 = vor.u32 %v2121_v16, %v2118_v62 }
  0x98   : > { %v503_v7 = vpop.f32.mrf.mxu1  ;;  %v1796_v46 = vunpack.c.l.b16 %v1775_v19  ;;  %v1418_v22 = vpack.c.b16 %v1414_v51, %v1413_v20  ;;  %v2125_v2 = vshll.u32 %v4306_v57, 16  ;;  %v3328_v21 = vrot.slane %v1907_v45, 9 }
  0x99   : > { %v1942_v55 = vrot.slane %v4160_v29, 5  ;;  %v1939_v33 = vsel %vm3907_vm6, %v3327_v14, %v1938_v5  ;;  %v1563_v26 = vunpack.c.l.b16 %v1543_v23  ;;  %v1564_v60 = vunpack.c.l.b16 %v1547_v43  ;;  %v4353_v43 = vld [vmem:[%s4082_s29 + $0x24] sm:$0x1]  ;;  %v1909_v14 = vld [vmem:[%s4082_s29 + $0x28] sm:$0xe] }
  0x9a   : > { %v1801_v25 = vpack.c.b16 %v1797_v15, %v1796_v46  ;;  %v2123_v40 = vrot.slane %v2122_v35, 4  ;;  %v1946_v46 = vrot.slane %v4205_v0, 5  ;;  %v1908_v0 = vld [vmem:[%s4082_s29 + $0x20] sm:$0xe] }
  0x9b   : > { %3255 = vmatmul.msk.bf16.gmra.mxu3 %vm396_vm0, %v1417_v37  ;;  %v1943_v17 = vsel %vm3907_vm6, %v3328_v21, %v1942_v55  ;;  %v1568_v13 = vpack.c.b16 %v1564_v60, %v1563_v26  ;;  %v3329_v5 = vrot.slane %v1908_v0, 9  ;;  %v2153_v21 = vshll.u32 %v4350_v38, 16  ;;  %v3307_v55 = vld [vmem:[%s4082_s29] sm:$0xf]  ;;  %v3347_v26 = vld [vmem:[%s4082_s29 + $0x8] sm:$0xf] }
  0x9c   : > { %3303 = vmatmul.msk.bf16.gmra.mxu1 %vm396_vm0, %v1800_v1  ;;  %v2132_v1 = vrot.slane %v2130_v42, 4  ;;  %v1963_v54 = vunpack.c.l.b16 %v1943_v17  ;;  %v3371_v42 = vld [vmem:[%s4082_s29 + $0x20] sm:$0xf] }
  0x9d   : > { %v2158_v48 = vshrl.u32 %v3371_v42, 16  ;;  %v2161_v58 = vshll.u32 %v3371_v42, 16 }
  0x9e   : > { %v513_v63 = vpop.f32.mrf.mxu3  ;;  %v2136_v12 = vor.u32 %v2135_v4, %v2132_v1 }
  0x9f   : > { %v2160_v45 = vrot.slane %v2158_v48, 4 }
  0xa0   : > { %v418_v37 = vpop.f32.mrf.mxu0  ;;  %v505_v10 = vpop.f32.mrf.mxu1  ;;  %v2137_v28 = vrot.slane %v2136_v12, 4  ;;  %v2167_v12 = vshll.u32 %v4353_v43, 16 }
  0xa1   : > { %v4296_v56 = vadd.f32 %v503_v7, %v418_v37  ;;  %v3191_v7 = vld [vmem:[%s3688_s7 + $0x40] sm:$0xf]  ;;  %v3369_v37 = vld [vmem:[%s4082_s29 + $0x18] sm:$0xf] }
  0xa2   : > { %3211 = vmatmul.msk.bf16.gmra.mxu2 %vm396_vm0, %v3188_v30  ;;  %v2139_v30 = vshll.u32 %v4309_v31, 16  ;;  %v3192_v29 = vor.u32 %v3514_v44, %v3191_v7  ;;  %v2147_v20 = vshll.u32 %v3369_v37, 16  ;;  %v2163_v7 = vrot.slane %v2161_v58, 5 }
  0xa3   : > { %3299 = vmatmul.msk.bf16.gmra.mxu0 %vm396_vm0, %v1567_v52  ;;  %v2127_v52 = vrot.slane %v2125_v2, 5  ;;  %v3330_v44 = vrot.slane %v1909_v14, 9 }
  0xa4   : > { %v2141_v53 = vrot.slane %v2139_v30, 5  ;;  %v2149_v4 = vrot.slane %v2147_v20, 5  ;;  %v1947_v30 = vsel %vm3907_vm6, %v3329_v5, %v1946_v46 }
  0xa5   : > { %v428_v61 = vpop.f32.mrf.mxu2  ;;  %v2128_v34 = vsel %vm3747_vm3, %v2123_v40, %v2127_v52 }
  0xa6   : > { %v4303_v8 = vadd.f32 %v513_v63, %v428_v61  ;;  %v515_v11 = vpop.f32.mrf.mxu3  ;;  %v1962_v63 = vunpack.c.l.b16 %v1939_v33  ;;  %v2142_v47 = vsel %vm3747_vm3, %v2137_v28, %v2141_v53  ;;  %v2227_v16 = vunpack.c.l.b16 %v2128_v34  ;;  %v3531_v28 = vld [vmem:[%s4082_s29 + $0xc] sm:$0xf0] }
  0xa7   : > { %v2228_v15 = vunpack.c.l.b16 %v2142_v47  ;;  %v2155_v53 = vrot.slane %v2153_v21, 5  ;;  %v3348_v20 = vor.u32 %v3531_v28, %v3347_v26 }
  0xa8   : > { %v420_v24 = vpop.f32.mrf.mxu0  ;;  %v508_v49 = vpop.f32.mrf.mxu1  ;;  %v4333_v3 = vpack.c.b16 %v1963_v54, %v1962_v63  ;;  %v1964_v63 = vunpack.c.l.b16 %v1947_v30  ;;  %v3311_v30 = vld [vmem:[%s4082_s29 + $0x10] sm:$0xf] }
  0xa9   : > { %v4325_v32 = vadd.f32 %v505_v10, %v420_v24  ;;  %v2144_v10 = vshrl.u32 %v3369_v37, 16  ;;  %v2235_v35 = vpack.c.b16 %v2228_v15, %v2227_v16  ;;  %v3527_v24 = vld [vmem:[%s4082_s29 + $0x4] sm:$0xf0] }
  0xab   : > { %3256 = vmatmul.msk.bf16.gmra.mxu3 %vm396_vm0, %v1418_v22  ;;  %v2146_v1 = vrot.slane %v2144_v10, 4  ;;  %v3375_v10 = vld [vmem:[%s4082_s29 + $0x30] sm:$0xf] }
  0xac   : > { %3304 = vmatmul.msk.bf16.gmra.mxu1 %vm396_vm0, %v1801_v25  ;;  %v2164_v25 = vor.u32 %v2163_v7, %v2160_v45  ;;  %v2189_v46 = vshll.u32 %v3375_v10, 16  ;;  %v4392_v45 = vld [vmem:[%s4082_s29 + $0x2c] sm:$0x1] }
  0xad   : > { %v430_v18 = vpop.f32.mrf.mxu2  ;;  %v2150_v2 = vor.u32 %v2149_v4, %v2146_v1  ;;  %v1958_v4 = vrot.slane %v4265_v6, 5 }
  0xae   : > { %v4330_v36 = vadd.f32 %v515_v11, %v430_v18  ;;  %v518_v19 = vpop.f32.mrf.mxu3  ;;  %v1950_v11 = vrot.slane %v4209_v9, 5  ;;  %v3308_v18 = vor.u32 %v3527_v24, %v3307_v55  ;;  %v2165_v37 = vrot.slane %v2164_v25, 4 }
  0xaf   : > { %v2151_v60 = vrot.slane %v2150_v2, 4  ;;  %v2191_v5 = vrot.slane %v2189_v46, 5  ;;  %v4397_v2 = vld [vmem:[%s4082_s29 + $0x34] sm:$0x1]  ;;  %v2181_v24 = vshll.u32 %v4392_v45, 16 }
  0xb0   : > { %v423_v51 = vpop.f32.mrf.mxu0  ;;  %v510_v61 = vpop.f32.mrf.mxu1  ;;  %v1951_v33 = vsel %vm3907_vm6, %v3330_v44, %v1950_v11  ;;  %v1911_v44 = vld [vmem:[%s4082_s29 + $0x38] sm:$0xe] }
  0xb1   : > { %v4342_v59 = vadd.f32 %v508_v49, %v423_v51 }
  0xb2   : > { %3212 = vmatmul.msk.bf16.gmra.mxu2 %vm396_vm0, %v3192_v29  ;;  %v1965_v29 = vunpack.c.l.b16 %v1951_v33  ;;  %v3528_v33 = vld [vmem:[%s4082_s29 + $0x14] sm:$0xf0] }
  0xb3   : > { %3300 = vmatmul.msk.bf16.gmra.mxu0 %vm396_vm0, %v1568_v13  ;;  %v3373_v13 = vld [vmem:[%s4082_s29 + $0x28] sm:$0xf] }
  0xb4   : > { %v4372_v40 = vpack.c.b16 %v1965_v29, %v1964_v63  ;;  %v2172_v47 = vshrl.u32 %v3373_v13, 16  ;;  %v2175_v48 = vshll.u32 %v3373_v13, 16  ;;  %v3532_v13 = vld [vmem:[%s4082_s29 + $0x1c] sm:$0xf0] }
  0xb5   : > { %v433_v62 = vpop.f32.mrf.mxu2 }
  0xb6   : > { %v4347_v22 = vadd.f32 %v518_v19, %v433_v62  ;;  %v520_v23 = vpop.f32.mrf.mxu3  ;;  %v2169_v19 = vrot.slane %v2167_v12, 5  ;;  %v1954_v62 = vrot.slane %v4260_v50, 5  ;;  %v2174_v7 = vrot.slane %v2172_v47, 4  ;;  %v1910_v50 = vld [vmem:[%s4082_s29 + $0x30] sm:$0xe] }
  0xb7   : > { %v3331_v21 = vrot.slane %v1910_v50, 9 }
  0xb8   : > { %v425_v9 = vpop.f32.mrf.mxu0  ;;  %v4367_v17 = vpop.f32.mrf.mxu1  ;;  %v2170_v34 = vsel %vm3747_vm3, %v2165_v37, %v2169_v19 }
  0xb9   : > { %v4365_v49 = vadd.f32 %v510_v61, %v425_v9  ;;  %v2186_v61 = vshrl.u32 %v3375_v10, 16  ;;  %v2230_v1 = vunpack.c.l.b16 %v2170_v34  ;;  %v3332_v9 = vrot.slane %v1911_v44, 9 }
  0xba   : > { %v1955_v25 = vsel %vm3907_vm6, %v3331_v21, %v1954_v62  ;;  %v2183_v34 = vrot.slane %v2181_v24, 5  ;;  %v2314_v24 = vrot.slane %v4306_v57, 5 }
  0xbb   : > { %3333 = vmatmul.msk.bf16.vlgmr.msrb.gmra.mxu3 %vm396_vm0, %v4282_v27  ;;  %v2156_v27 = vsel %vm3747_vm3, %v2151_v60, %v2155_v53  ;;  %v2188_v14 = vrot.slane %v2186_v61, 4  ;;  %v1959_v12 = vsel %vm3907_vm6, %v3332_v9, %v1958_v4  ;;  %v3351_v53 = vld [vmem:[%s4082_s29 + $0x18] sm:$0xf]  ;;  %v3379_v61 = vld [vmem:[%s4082_s29 + $0x40] sm:$0xf] }
  0xbc   : > { %3381 = vmatmul.msk.bf16.vlgmr.msrb.gmra.mxu1 %vm396_vm0, %v2235_v35  ;;  %v2229_v15 = vunpack.c.l.b16 %v2156_v27  ;;  %v1967_v26 = vunpack.c.l.b16 %v1959_v12  ;;  %v3352_v46 = vor.u32 %v3532_v13, %v3351_v53  ;;  %v4435_v9 = vld [vmem:[%s4082_s29 + $0x3c] sm:$0x1]  ;;  %v2318_v12 = vrot.slane %v4309_v31, 5  ;;  %v3385_v53 = vld [vmem:[%s4082_s29 + $0x8] sm:$0xe] }
  0xbd   : > { %v435_v54 = vpop.f32.mrf.mxu2  ;;  %v2192_v29 = vor.u32 %v2191_v5, %v2188_v14  ;;  %v3393_v57 = vrot.slane %v3385_v53, 9 }
  0xbe   : > { %v4374_v52 = vadd.f32 %v520_v23, %v435_v54  ;;  %v759_v42 = vpop.f32.mrf.mxu3  ;;  %v2177_v23 = vrot.slane %v2175_v48, 5  ;;  %v2236_v55 = vpack.c.b16 %v2230_v1, %v2229_v15  ;;  %v2195_v54 = vshll.u32 %v4397_v2, 16 }
  0xbf   : > { %v2193_v47 = vrot.slane %v2192_v29, 4 }
  0xc0   : > { %v981_v51 = vpop.f32.mrf.mxu0  ;;  %v4385_v58 = vpop.f32.mrf.mxu1  ;;  %v2197_v48 = vrot.slane %v2195_v54, 5  ;;  %v2209_v54 = vshll.u32 %v4435_v9, 16 }
  0xc2   : > { %3321 = vmatmul.msk.bf16.vlgmr.msrb.gmra.mxu2 %vm396_vm0, %v3308_v18  ;;  %v1966_v18 = vunpack.c.l.b16 %v1955_v25 }
  0xc3   : > { %3361 = vmatmul.msk.bf16.vlgmr.msrb.gmra.mxu0 %vm396_vm0, %v3348_v20  ;;  %v3377_v20 = vld [vmem:[%s4082_s29 + $0x38] sm:$0xf] }
  0xc4   : > { %v4412_v37 = vpack.c.b16 %v1967_v26, %v1966_v18  ;;  %v2200_v62 = vshrl.u32 %v3377_v20, 16 }
  0xc5   : > { %v648_v16 = vpop.f32.mrf.mxu2 }
  0xc6   : > { %v668_v11 = vadd.f32 %v648_v16, %v4296_v56  ;;  %v761_v0 = vpop.f32.mrf.mxu3  ;;  %v2178_v56 = vor.u32 %v2177_v23, %v2174_v7  ;;  %v2203_v16 = vshll.u32 %v3377_v20, 16  ;;  %v2217_v7 = vshll.u32 %v3379_v61, 16 }
  0xc7   : > { %v2202_v14 = vrot.slane %v2200_v62, 4 }
  0xc8   : > { %v779_v35 = vadd.f32 %v759_v42, %v668_v11  ;;  %v983_v6 = vpop.f32.mrf.mxu0  ;;  %v4406_v63 = vpop.f32.mrf.mxu1  ;;  %v3312_v42 = vor.u32 %v3528_v33, %v3311_v30  ;;  %v2179_v10 = vrot.slane %v2178_v56, 4  ;;  %v2198_v11 = vsel %vm3747_vm3, %v2193_v47, %v2197_v48  ;;  %v4438_v56 = vld [vmem:[%s4082_s29 + $0x44] sm:$0x1]  ;;  %v3315_v33 = vld [vmem:[%s4082_s29 + $0x20] sm:$0xf] }
  0xc9   : > { %v2205_v5 = vrot.slane %v2203_v16, 5  ;;  %v3533_v47 = vld [vmem:[%s4082_s29 + $0x2c] sm:$0xf0]  ;;  %v2211_v48 = vrot.slane %v2209_v54, 5  ;;  %v2326_v54 = vrot.slane %v4353_v43, 5 }
  0xca   : > { %v1001_v60 = vadd.f32 %v981_v51, %v779_v35  ;;  %v2184_v4 = vsel %vm3747_vm3, %v2179_v10, %v2183_v34  ;;  %v2232_v35 = vunpack.c.l.b16 %v2198_v11  ;;  %v3355_v34 = vld [vmem:[%s4082_s29 + $0x28] sm:$0xf]  ;;  %v3388_v43 = vld [vmem:[%s4082_s29 + $0x20] sm:$0xe] }
  0xcb   : > { %3334 = vmatmul.msk.bf16.gmra.mxu3 %vm396_vm0, %v4333_v3  ;;  %v2231_v44 = vunpack.c.l.b16 %v2184_v4  ;;  %v2206_v25 = vor.u32 %v2205_v5, %v2202_v14  ;;  %v3433_v5 = vld [vmem:[%s4082_s29 + $0x10] sm:$0xf] }
  0xcc   : > { %3382 = vmatmul.msk.bf16.gmra.mxu1 %vm396_vm0, %v2236_v55  ;;  %v4419_v3 = vadd.f32 %v4367_v17, %v1001_v60  ;;  %v2214_v17 = vshrl.u32 %v3379_v61, 16 }
  0xcd   : > { %v650_v28 = vpop.f32.mrf.mxu2  ;;  %v2237_v29 = vpack.c.b16 %v2232_v35, %v2231_v44  ;;  %v2207_v20 = vrot.slane %v2206_v25, 4  ;;  %v2503_v25 = vshll.u32 %v3433_v5, 16 }
  0xce   : > { %v669_v19 = vadd.f32 %v650_v28, %v4325_v32  ;;  %v764_v27 = vpop.f32.mrf.mxu3  ;;  %v2216_v55 = vrot.slane %v2214_v17, 4  ;;  %v2223_v28 = vshll.u32 %v4438_v56, 16 }
  0xcf   : > { %v2212_v17 = vsel %vm3747_vm3, %v2207_v20, %v2211_v48 }
  0xd0   : > { %v780_v51 = vadd.f32 %v761_v0, %v669_v19  ;;  %v986_v15 = vpop.f32.mrf.mxu0  ;;  %v4423_v1 = vpop.f32.mrf.mxu1  ;;  %v3386_v19 = vld [vmem:[%s4082_s29 + $0x10] sm:$0xe]  ;;  %v2233_v35 = vunpack.c.l.b16 %v2212_v17 }
  0xd1   : > { %v3394_v31 = vrot.slane %v3386_v19, 9 }
  0xd2   : > { %3322 = vmatmul.msk.bf16.gmra.mxu2 %vm396_vm0, %v3312_v42  ;;  %v1002_v32 = vadd.f32 %v983_v6, %v780_v51  ;;  %v2219_v6 = vrot.slane %v2217_v7, 5  ;;  %v2315_v51 = vsel %vm3907_vm6, %v3393_v57, %v2314_v24  ;;  %v2500_v24 = vshrl.u32 %v3433_v5, 16 }
  0xd3   : > { %3362 = vmatmul.msk.bf16.gmra.mxu0 %vm396_vm0, %v3352_v46  ;;  %v2225_v46 = vrot.slane %v2223_v28, 5  ;;  %v2344_v62 = vunpack.c.l.b16 %v2315_v51  ;;  %v3534_v28 = vld [vmem:[%s4082_s29 + $0x3c] sm:$0xf0]  ;;  %v2505_v57 = vrot.slane %v2503_v25, 5  ;;  %v3415_v25 = vld [vmem:[%s4082_s29 + $0x10] sm:$0xf] }
  0xd4   : > { %v4430_v23 = vadd.f32 %v4385_v58, %v1002_v32  ;;  %v2220_v60 = vor.u32 %v2219_v6, %v2216_v55  ;;  %v3435_v55 = vld [vmem:[%s4082_s29 + $0x18] sm:$0xf]  ;;  %v2502_v19 = vrot.slane %v2500_v24, 4 }
  0xd5   : > { %v653_v0 = vpop.f32.mrf.mxu2 }
  0xd6   : > { %v670_v50 = vadd.f32 %v653_v0, %v4342_v59  ;;  %v766_v21 = vpop.f32.mrf.mxu3  ;;  %v3529_v59 = vld [vmem:[%s4082_s29 + $0x24] sm:$0xf0]  ;;  %v2506_v17 = vor.u32 %v2505_v57, %v2502_v19 }
  0xd7   : > { %v3316_v10 = vor.u32 %v3529_v59, %v3315_v33  ;;  %v3319_v59 = vld [vmem:[%s4082_s29 + $0x30] sm:$0xf] }
  0xd8   : > { %v781_v58 = vadd.f32 %v764_v27, %v670_v50  ;;  %v988_v30 = vpop.f32.mrf.mxu0  ;;  %v4445_v26 = vpop.f32.mrf.mxu1 }
  0xda   : > { %v1003_v18 = vadd.f32 %v986_v15, %v781_v58 }
  0xdb   : > { %3335 = vmatmul.msk.bf16.gmra.mxu3 %vm396_vm0, %v4372_v40  ;;  %v2319_v40 = vsel %vm3907_vm6, %v3394_v31, %v2318_v12  ;;  %v2514_v12 = vshrl.u32 %v3435_v55, 16  ;;  %v3453_v31 = vld [vmem:[%s4082_s29 + $0x10] sm:$0xe] }
  0xdc   : > { %v4453_v42 = vadd.f32 %v4406_v63, %v1003_v18  ;;  %3383 = vmatmul.msk.bf16.gmra.mxu1 %vm396_vm0, %v2237_v29  ;;  %v2221_v63 = vrot.slane %v2220_v60, 4  ;;  %v2345_v16 = vunpack.c.l.b16 %v2319_v40  ;;  %v3530_v29 = vld [vmem:[%s4082_s29 + $0x34] sm:$0xf0]  ;;  %v3436_v40 = vld [vmem:[%s4082_s29 + $0x1c] sm:$0x1] }
  0xdd   : > { %v655_v13 = vpop.f32.mrf.mxu2  ;;  %v3359_v60 = vld [vmem:[%s4082_s29 + $0x38] sm:$0xf]  ;;  %v3320_v20 = vor.u32 %v3530_v29, %v3319_v59 }
  0xde   : > { %v671_v27 = vadd.f32 %v655_v13, %v4365_v49  ;;  %v769_v61 = vpop.f32.mrf.mxu3  ;;  %v3356_v49 = vor.u32 %v3533_v47, %v3355_v34  ;;  %v4463_v32 = vpack.c.b16 %v2345_v16, %v2344_v62  ;;  %v2226_v7 = vsel %vm3747_vm3, %v2221_v63, %v2225_v46  ;;  %v3454_v13 = vld [vmem:[%s4082_s29 + $0x18] sm:$0xe] }
  0xdf   : > { %v3387_v34 = vld [vmem:[%s4082_s29 + $0x18] sm:$0xe]  ;;  %v3360_v51 = vor.u32 %v3534_v28, %v3359_v60  ;;  %v3396_v63 = vrot.slane %v3388_v43, 9  ;;  %v3461_v62 = vrot.slane %v3453_v31, 9 }
  0xe0   : > { %v782_v15 = vadd.f32 %v766_v21, %v671_v27  ;;  %v991_v4 = vpop.f32.mrf.mxu0  ;;  %v4466_v11 = vpop.f32.mrf.mxu1  ;;  %v2234_v21 = vunpack.c.l.b16 %v2226_v7  ;;  %v3535_v29 = vld [vmem:[%s4082_s29 + $0x14] sm:$0xf0] }
  0xe2   : > { %3323 = vmatmul.msk.bf16.gmra.mxu2 %vm396_vm0, %v3316_v10  ;;  %v1004_v0 = vadd.f32 %v988_v30, %v782_v15  ;;  %v2517_v30 = vshll.u32 %v3435_v55, 16  ;;  %v3462_v15 = vrot.slane %v3454_v13, 9 }
  0xe3   : > { %3363 = vmatmul.msk.bf16.gmra.mxu0 %vm396_vm0, %v3356_v49  ;;  %v2702_v49 = vrot.slane %v3436_v40, 5 }
  0xe4   : > { %v4475_v50 = vadd.f32 %v4423_v1, %v1004_v0  ;;  %v2238_v1 = vpack.c.b16 %v2234_v21, %v2233_v35  ;;  %v2519_v27 = vrot.slane %v2517_v30, 5  ;;  %v2523_v35 = vshll.u32 %v3436_v40, 16  ;;  %v3439_v30 = vld [vmem:[%s4082_s29 + $0x28] sm:$0xf] }
  0xe5   : > { %v658_v14 = vpop.f32.mrf.mxu2 }
  0xe6   : > { %v672_v44 = vadd.f32 %v658_v14, %v4303_v8  ;;  %v771_v6 = vpop.f32.mrf.mxu3  ;;  %v2322_v8 = vrot.slane %v4350_v38, 5  ;;  %v2516_v38 = vrot.slane %v2514_v12, 4  ;;  %v3437_v12 = vld [vmem:[%s4082_s29 + $0x20] sm:$0xf] }
  0xe7   : > { %v2528_v31 = vshrl.u32 %v3437_v12, 16  ;;  %v2531_v13 = vshll.u32 %v3437_v12, 16 }
  0xe8   : > { %v783_v58 = vadd.f32 %v769_v61, %v672_v44  ;;  %v993_v33 = vpop.f32.mrf.mxu0  ;;  %v4483_v18 = vpop.f32.mrf.mxu1  ;;  %v3395_v61 = vrot.slane %v3387_v34, 9  ;;  %v2520_v0 = vor.u32 %v2519_v27, %v2516_v38  ;;  %v3416_v38 = vor.u32 %v3535_v29, %v3415_v25 }
  0xe9   : > { %v2545_v27 = vshll.u32 %v3439_v30, 16  ;;  %v2530_v40 = vrot.slane %v2528_v31, 4 }
  0xea   : > { %v1005_v53 = vadd.f32 %v991_v4, %v783_v58 }
  0xeb   : > { %3336 = vmatmul.msk.bf16.gmra.mxu3 %vm396_vm0, %v4412_v37  ;;  %v3434_v37 = vld [vmem:[%s4082_s29 + $0x14] sm:$0x1] }
  0xec   : > { %v4494_v47 = vadd.f32 %v4445_v26, %v1005_v53  ;;  %3384 = vmatmul.msk.bf16.gmra.mxu1 %vm396_vm0, %v2238_v1  ;;  %v2698_v16 = vrot.slane %v3434_v37, 5  ;;  %v2323_v26 = vsel %vm3907_vm6, %v3395_v61, %v2322_v8  ;;  %v2509_v7 = vshll.u32 %v3434_v37, 16 }
  0xed   : > { %v660_v10 = vpop.f32.mrf.mxu2  ;;  %v2346_v14 = vunpack.c.l.b16 %v2323_v26  ;;  %v2507_v1 = vrot.slane %v2506_v17, 4  ;;  %v2525_v53 = vrot.slane %v2523_v35, 5  ;;  %v2533_v61 = vrot.slane %v2531_v13, 5 }
  0xee   : > { %v673_v48 = vadd.f32 %v660_v10, %v4330_v36  ;;  %v774_v46 = vpop.f32.mrf.mxu3  ;;  %v2327_v36 = vsel %vm3907_vm6, %v3396_v63, %v2326_v54  ;;  %v2699_v55 = vsel %vm3907_vm6, %v3461_v62, %v2698_v16  ;;  %v2511_v8 = vrot.slane %v2509_v7, 5  ;;  %v3438_v16 = vld [vmem:[%s4082_s29 + $0x24] sm:$0x1] }
  0xef   : > { %v2347_v5 = vunpack.c.l.b16 %v2327_v36  ;;  %v2521_v54 = vrot.slane %v2520_v0, 4  ;;  %v2728_v19 = vunpack.c.l.b16 %v2699_v55  ;;  %v2542_v10 = vshrl.u32 %v3439_v30, 16  ;;  %v3389_v0 = vld [vmem:[%s4082_s29 + $0x28] sm:$0xe] }
  0xf0   : > { %v784_v4 = vadd.f32 %v771_v6, %v673_v48  ;;  %v996_v44 = vpop.f32.mrf.mxu0  ;;  %v4505_v21 = vpop.f32.mrf.mxu1  ;;  %v2703_v6 = vsel %vm3907_vm6, %v3462_v15, %v2702_v49  ;;  %v2512_v34 = vsel %vm3747_vm3, %v2507_v1, %v2511_v8  ;;  %v3440_v15 = vld [vmem:[%s4082_s29 + $0x2c] sm:$0x1]  ;;  %v2547_v49 = vrot.slane %v2545_v27, 5 }
  0xf1   : > { %v4511_v58 = vpack.c.b16 %v2347_v5, %v2346_v14  ;;  %v2544_v63 = vrot.slane %v2542_v10, 4  ;;  %v2611_v62 = vunpack.c.l.b16 %v2512_v34  ;;  %v2706_v36 = vrot.slane %v3438_v16, 5  ;;  %v3390_v14 = vld [vmem:[%s4082_s29 + $0x30] sm:$0xe]  ;;  %v3443_v10 = vld [vmem:[%s4082_s29 + $0x38] sm:$0xf] }
  0xf2   : > { %3324 = vmatmul.msk.bf16.gmra.mxu2 %vm396_vm0, %v3320_v20  ;;  %v1006_v24 = vadd.f32 %v993_v33, %v784_v4  ;;  %v2729_v33 = vunpack.c.l.b16 %v2703_v6  ;;  %v3397_v55 = vrot.slane %v3389_v0, 9  ;;  %v2330_v6 = vrot.slane %v4392_v45, 5 }
  0xf3   : > { %3364 = vmatmul.msk.bf16.gmra.mxu0 %vm396_vm0, %v3360_v51  ;;  %v3456_v51 = vld [vmem:[%s4082_s29 + $0x28] sm:$0xe]  ;;  %v2534_v25 = vor.u32 %v2533_v61, %v2530_v40  ;;  %v2537_v12 = vshll.u32 %v3438_v16, 16  ;;  %v3398_v30 = vrot.slane %v3390_v14, 9  ;;  %v2548_v1 = vor.u32 %v2547_v49, %v2544_v63  ;;  %v3442_v14 = vld [vmem:[%s4082_s29 + $0x34] sm:$0x1] }
  0xf4   : > { %v4519_v60 = vadd.f32 %v4466_v11, %v1006_v24  ;;  %v3455_v11 = vld [vmem:[%s4082_s29 + $0x20] sm:$0xe]  ;;  %v2736_v48 = vpack.c.b16 %v2729_v33, %v2728_v19  ;;  %v3464_v7 = vrot.slane %v3456_v51, 9  ;;  %v3441_v33 = vld [vmem:[%s4082_s29 + $0x30] sm:$0xf] }
  0xf5   : > { %v663_v59 = vpop.f32.mrf.mxu2  ;;  %v3463_v4 = vrot.slane %v3455_v11, 9  ;;  %v2535_v31 = vrot.slane %v2534_v25, 4  ;;  %v2539_v13 = vrot.slane %v2537_v12, 5  ;;  %v3419_v11 = vld [vmem:[%s4082_s29 + $0x20] sm:$0xf]  ;;  %v2556_v40 = vshrl.u32 %v3441_v33, 16 }
  0xf6   : > { %v674_v28 = vadd.f32 %v663_v59, %v4347_v22  ;;  %v776_v57 = vpop.f32.mrf.mxu3  ;;  %v2526_v22 = vsel %vm3747_vm3, %v2521_v54, %v2525_v53  ;;  %v2334_v59 = vrot.slane %v4397_v2, 5  ;;  %v2559_v61 = vshll.u32 %v3441_v33, 16 }
  0xf7   : > { %v2612_v26 = vunpack.c.l.b16 %v2526_v22  ;;  %v2707_v2 = vsel %vm3907_vm6, %v3463_v4, %v2706_v36  ;;  %v3536_v22 = vld [vmem:[%s4082_s29 + $0x24] sm:$0xf0]  ;;  %v2540_v4 = vsel %vm3747_vm3, %v2535_v31, %v2539_v13 }
  0xf8   : > { %v785_v20 = vadd.f32 %v774_v46, %v674_v28  ;;  %v998_v43 = vpop.f32.mrf.mxu0  ;;  %v4528_v37 = vpop.f32.mrf.mxu1  ;;  %v2335_v54 = vsel %vm3907_vm6, %v3398_v30, %v2334_v59  ;;  %v3420_v49 = vor.u32 %v3536_v22, %v3419_v11  ;;  %v2561_v36 = vrot.slane %v2559_v61, 5  ;;  %v3423_v22 = vld [vmem:[%s4082_s29 + $0x30] sm:$0xf] }
  0xf9   : > { %v2619_v8 = vpack.c.b16 %v2612_v26, %v2611_v62  ;;  %v2349_v19 = vunpack.c.l.b16 %v2335_v54  ;;  %v2573_v62 = vshll.u32 %v3443_v10, 16  ;;  %v2558_v26 = vrot.slane %v2556_v40, 4 }
  0xfa   : > { %v1007_v46 = vadd.f32 %v996_v44, %v785_v20  ;;  %v2710_v44 = vrot.slane %v3440_v15, 5  ;;  %v2549_v20 = vrot.slane %v2548_v1, 4  ;;  %v2613_v12 = vunpack.c.l.b16 %v2540_v4 }
  0xfb   : > { %3429 = vmatmul.msk.bf16.vlgmr.msra.gmra.mxu3 %vm396_vm0, %v3416_v38  ;;  %v2562_v59 = vor.u32 %v2561_v36, %v2558_v26 }
  0xfc   : > { %v4536_v5 = vadd.f32 %v4483_v18, %v1007_v46  ;;  %3469 = vmatmul.msk.bf16.vlgmr.msra.gmra.mxu1 %vm396_vm0, %v2736_v48  ;;  %v2551_v18 = vshll.u32 %v3440_v15, 16  ;;  %v2711_v53 = vsel %vm3907_vm6, %v3464_v7, %v2710_v44  ;;  %v2730_v48 = vunpack.c.l.b16 %v2707_v2 }
  0xfd   : > { %v665_v17 = vpop.f32.mrf.mxu2  ;;  %v2731_v51 = vunpack.c.l.b16 %v2711_v53  ;;  %v2570_v46 = vshrl.u32 %v3443_v10, 16  ;;  %v2563_v33 = vrot.slane %v2562_v59, 4  ;;  %v3392_v59 = vld [vmem:[%s4082_s29 + $0x40] sm:$0xe] }
  0xfe   : > { %v675_v35 = vadd.f32 %v665_v17, %v4374_v52  ;;  %v1464_v24 = vpop.f32.mrf.mxu3  ;;  %v2331_v52 = vsel %vm3907_vm6, %v3397_v55, %v2330_v6  ;;  %v2553_v38 = vrot.slane %v2551_v18, 5  ;;  %v3444_v55 = vld [vmem:[%s4082_s29 + $0x3c] sm:$0x1]  ;;  %v3457_v6 = vld [vmem:[%s4082_s29 + $0x30] sm:$0xe] }
  0xff   : > { %v2348_v28 = vunpack.c.l.b16 %v2331_v52  ;;  %v2737_v0 = vpack.c.b16 %v2731_v51, %v2730_v48  ;;  %v2579_v52 = vshll.u32 %v3444_v55, 16  ;;  %v3465_v54 = vrot.slane %v3457_v6, 9  ;;  %v3537_v48 = vld [vmem:[%s4082_s29 + $0x34] sm:$0xf0] }
 0x100   : > { %v786_v29 = vadd.f32 %v776_v57, %v675_v35  ;;  %v1614_v45 = vpop.f32.mrf.mxu0  ;;  %v4553_v57 = vpop.f32.mrf.mxu1  ;;  %v2554_v17 = vsel %vm3747_vm3, %v2549_v20, %v2553_v38  ;;  %v2575_v35 = vrot.slane %v2573_v62, 5  ;;  %v2718_v2 = vrot.slane %v3444_v55, 5 }
 0x101   : > { %v4556_v27 = vpack.c.b16 %v2349_v19, %v2348_v28  ;;  %v2614_v30 = vunpack.c.l.b16 %v2554_v17  ;;  %v2714_v28 = vrot.slane %v3442_v14, 5  ;;  %v2581_v20 = vrot.slane %v2579_v52, 5  ;;  %v3448_v52 = vld [vmem:[%s4082_s29 + $0x4c] sm:$0x1] }
 0x102   : > { %3401 = vmatmul.msk.bf16.vlgmr.msra.gmra.mxu2 %vm396_vm0, %v4463_v32  ;;  %v1008_v34 = vadd.f32 %v998_v43, %v786_v29  ;;  %v2565_v29 = vshll.u32 %v3442_v14, 16 }
 0x103   : > { %3449 = vmatmul.msk.bf16.vlgmr.msra.gmra.mxu0 %vm396_vm0, %v2619_v8  ;;  %v2620_v19 = vpack.c.b16 %v2614_v30, %v2613_v12  ;;  %v3391_v30 = vld [vmem:[%s4082_s29 + $0x38] sm:$0xe] }
 0x104   : > { %v4563_v16 = vadd.f32 %v4505_v21, %v1008_v34  ;;  %v2572_v21 = vrot.slane %v2570_v46, 4  ;;  %v2567_v31 = vrot.slane %v2565_v29, 5  ;;  %v2715_v34 = vsel %vm3907_vm6, %v3465_v54, %v2714_v28 }
 0x105   : > { %v1242_v32 = vpop.f32.mrf.mxu2 }
 0x106   : > { %v1262_v63 = vadd.f32 %v1242_v32, %v4419_v3  ;;  %v1466_v15 = vpop.f32.mrf.mxu3  ;;  %v2576_v18 = vor.u32 %v2575_v35, %v2572_v21  ;;  %v2568_v51 = vsel %vm3747_vm3, %v2563_v33, %v2567_v31  ;;  %v3399_v31 = vrot.slane %v3391_v30, 9 }
 0x107   : > { %v2615_v26 = vunpack.c.l.b16 %v2568_v51 }
 0x108   : > { %v1484_v43 = vadd.f32 %v1464_v24, %v1262_v63  ;;  %v1616_v7 = vpop.f32.mrf.mxu0  ;;  %v3458_v24 = vld [vmem:[%s4082_s29 + $0x38] sm:$0xe]  ;;  %v2732_v63 = vunpack.c.l.b16 %v2715_v34 }
 0x109   : > { %v4572_v44 = vpop.f32.mrf.mxu1 }
 0x10a   : > { %v4569_v3 = vadd.f32 %v1614_v45, %v1484_v43  ;;  %v3466_v45 = vrot.slane %v3458_v24, 9  ;;  %v3459_v24 = vld [vmem:[%s4082_s29 + $0x40] sm:$0xe] }
 0x10b   : > { %3430 = vmatmul.msk.bf16.gmra.mxu3 %vm396_vm0, %v3420_v49  ;;  %v3424_v49 = vor.u32 %v3537_v48, %v3423_v22 }
 0x10c   : > { %3470 = vmatmul.msk.bf16.gmra.mxu1 %vm396_vm0, %v2737_v0  ;;  %v2719_v32 = vsel %vm3907_vm6, %v3466_v45, %v2718_v2  ;;  %v3467_v45 = vrot.slane %v3459_v24, 9 }
 0x10d   : > { %v1244_v25 = vpop.f32.mrf.mxu2  ;;  %v2733_v46 = vunpack.c.l.b16 %v2719_v32  ;;  %v2607_v32 = vshll.u32 %v3448_v52, 16 }
 0x10e   : > { %v1263_v1 = vadd.f32 %v1244_v25, %v4430_v23  ;;  %v1469_v8 = vpop.f32.mrf.mxu3  ;;  %v2577_v23 = vrot.slane %v2576_v18, 4  ;;  %v3460_v25 = vld [vmem:[%s4082_s29 + $0x48] sm:$0xe]  ;;  %v3446_v18 = vld [vmem:[%s4082_s29 + $0x44] sm:$0x1] }
 0x10f   : > { %v2738_v0 = vpack.c.b16 %v2733_v46, %v2732_v63  ;;  %v2722_v2 = vrot.slane %v3446_v18, 5  ;;  %v2593_v34 = vshll.u32 %v3446_v18, 16  ;;  %v3538_v63 = vld [vmem:[%s4082_s29 + $0x44] sm:$0xf0] }
 0x110   : > { %v1485_v53 = vadd.f32 %v1466_v15, %v1263_v1  ;;  %v1619_v10 = vpop.f32.mrf.mxu0  ;;  %v2582_v61 = vsel %vm3747_vm3, %v2577_v23, %v2581_v20  ;;  %v3447_v15 = vld [vmem:[%s4082_s29 + $0x48] sm:$0xf]  ;;  %v2342_v20 = vrot.slane %v4438_v56, 5 }
 0x111   : > { %v4584_v38 = vpop.f32.mrf.mxu1  ;;  %v2616_v36 = vunpack.c.l.b16 %v2582_v61  ;;  %v2598_v14 = vshrl.u32 %v3447_v15, 16  ;;  %v2601_v21 = vshll.u32 %v3447_v15, 16  ;;  %v3427_v61 = vld [vmem:[%s4082_s29 + $0x40] sm:$0xf]  ;;  %v2609_v15 = vrot.slane %v2607_v32, 5 }
 0x112   : > { %v4580_v13 = vadd.f32 %v1616_v7, %v1485_v53  ;;  %3402 = vmatmul.msk.bf16.gmra.mxu2 %vm396_vm0, %v4511_v58  ;;  %v3445_v58 = vld [vmem:[%s4082_s29 + $0x40] sm:$0xf]  ;;  %v3468_v53 = vrot.slane %v3460_v25, 9 }
 0x113   : > { %3450 = vmatmul.msk.bf16.gmra.mxu0 %vm396_vm0, %v2620_v19  ;;  %v2584_v4 = vshrl.u32 %v3445_v58, 16  ;;  %v2587_v17 = vshll.u32 %v3445_v58, 16  ;;  %v2621_v1 = vpack.c.b16 %v2616_v36, %v2615_v26  ;;  %v2603_v54 = vrot.slane %v2601_v21, 5 }
 0x114   : > { %v2726_v19 = vrot.slane %v3448_v52, 5 }
 0x115   : > { %v1247_v11 = vpop.f32.mrf.mxu2  ;;  %v2586_v55 = vrot.slane %v2584_v4, 4  ;;  %v2589_v6 = vrot.slane %v2587_v17, 5 }
 0x116   : > { %v1264_v40 = vadd.f32 %v1247_v11, %v4453_v42  ;;  %v1471_v62 = vpop.f32.mrf.mxu3  ;;  %v2727_v58 = vsel %vm3907_vm6, %v3468_v53, %v2726_v19 }
 0x117   : > { %v2590_v23 = vor.u32 %v2589_v6, %v2586_v55  ;;  %v2735_v17 = vunpack.c.l.b16 %v2727_v58 }
 0x118   : > { %v1486_v43 = vadd.f32 %v1469_v8, %v1264_v40  ;;  %v1621_v42 = vpop.f32.mrf.mxu0  ;;  %v2600_v8 = vrot.slane %v2598_v14, 4 }
 0x119   : > { %v4602_v35 = vpop.f32.mrf.mxu1  ;;  %v2591_v40 = vrot.slane %v2590_v23, 4 }
 0x11a   : > { %v4600_v7 = vadd.f32 %v1619_v10, %v1486_v43  ;;  %v2338_v10 = vrot.slane %v4435_v9, 5  ;;  %v2604_v48 = vor.u32 %v2603_v54, %v2600_v8  ;;  %v2723_v9 = vsel %vm3907_vm6, %v3467_v45, %v2722_v2 }
 0x11b   : > { %3431 = vmatmul.msk.bf16.gmra.mxu3 %vm396_vm0, %v3424_v49  ;;  %v2734_v4 = vunpack.c.l.b16 %v2723_v9 }
 0x11c   : > { %3471 = vmatmul.msk.bf16.gmra.mxu1 %vm396_vm0, %v2738_v0  ;;  %v2339_v46 = vsel %vm3907_vm6, %v3399_v31, %v2338_v10  ;;  %v2605_v49 = vrot.slane %v2604_v48, 4 }
 0x11d   : > { %v1249_v12 = vpop.f32.mrf.mxu2  ;;  %v2350_v0 = vunpack.c.l.b16 %v2339_v46  ;;  %v2739_v24 = vpack.c.b16 %v2735_v17, %v2734_v4 }
 0x11e   : > { %v1265_v29 = vadd.f32 %v1249_v12, %v4475_v50  ;;  %v1474_v28 = vpop.f32.mrf.mxu3  ;;  %v3400_v50 = vrot.slane %v3392_v59, 9  ;;  %v2610_v39 = vsel %vm3747_vm3, %v2605_v49, %v2609_v15 }
 0x11f   : > { %v2618_v30 = vunpack.c.l.b16 %v2610_v39 }
 0x120   : > { %v1487_v33 = vadd.f32 %v1471_v62, %v1265_v29  ;;  %v1624_v22 = vpop.f32.mrf.mxu0  ;;  %v2595_v62 = vrot.slane %v2593_v34, 5 }
 0x121   : > { %v4619_v51 = vpop.f32.mrf.mxu1 }
 0x122   : > { %v4615_v11 = vadd.f32 %v1621_v42, %v1487_v33  ;;  %3403 = vmatmul.msk.bf16.gmra.mxu2 %vm396_vm0, %v4556_v27  ;;  %v2343_v27 = vsel %vm3907_vm6, %v3400_v50, %v2342_v20  ;;  %v3428_v42 = vor.u32 %v3538_v63, %v3427_v61  ;;  %v2596_v6 = vsel %vm3747_vm3, %v2591_v40, %v2595_v62 }
 0x123   : > { %3451 = vmatmul.msk.bf16.gmra.mxu0 %vm396_vm0, %v2621_v1  ;;  %v2351_v14 = vunpack.c.l.b16 %v2343_v27  ;;  %v2617_v12 = vunpack.c.l.b16 %v2596_v6 }
 0x125   : > { %v1252_v56 = vpop.f32.mrf.mxu2  ;;  %v2355_v29 = vpack.c.b16 %v2351_v14, %v2350_v0  ;;  %v2622_v52 = vpack.c.b16 %v2618_v30, %v2617_v12 }
 0x126   : > { %v1266_v43 = vadd.f32 %v1252_v56, %v4494_v47  ;;  %v1476_v26 = vpop.f32.mrf.mxu3 }
 0x128   : > { %v1488_v36 = vadd.f32 %v1474_v28, %v1266_v43  ;;  %v1626_v55 = vpop.f32.mrf.mxu0 }
 0x129   : > { %v4639_v25 = vpop.f32.mrf.mxu1 }
 0x12a   : > { %v4633_v21 = vadd.f32 %v1624_v22, %v1488_v36 }
 0x12b   : > { %3432 = vmatmul.msk.bf16.gmra.mxu3 %vm396_vm0, %v3428_v42 }
 0x12c   : > { %3472 = vmatmul.msk.bf16.gmra.mxu1 %vm396_vm0, %v2739_v24 }
 0x12d   : > { %v1254_v47 = vpop.f32.mrf.mxu2 }
 0x12e   : > { %v1267_v59 = vadd.f32 %v1254_v47, %v4519_v60  ;;  %v1479_v1 = vpop.f32.mrf.mxu3 }
 0x130   : > { %v1489_v18 = vadd.f32 %v1476_v26, %v1267_v59  ;;  %v1629_v41 = vpop.f32.mrf.mxu0 }
 0x131   : > { %v4647_v54 = vpop.f32.mrf.mxu1 }
 0x132   : > { %v4644_v8 = vadd.f32 %v1626_v55, %v1489_v18  ;;  %3404 = vmatmul.msk.bf16.gmra.mxu2 %vm396_vm0, %v2355_v29 }
 0x133   : > { %3452 = vmatmul.msk.bf16.gmra.mxu0 %vm396_vm0, %v2622_v52 }
 0x135   : > { %v1257_v28 = vpop.f32.mrf.mxu2 }
 0x136   : > { %v1268_v45 = vadd.f32 %v1257_v28, %v4536_v5  ;;  %v1481_v2 = vpop.f32.mrf.mxu3 }
 0x138   : > { %v1490_v60 = vadd.f32 %v1479_v1, %v1268_v45  ;;  %v1631_v19 = vpop.f32.mrf.mxu0 }
 0x139   : > { %v2260_v33 = vpop.f32.mrf.mxu1 }
 0x13a   : > { %v4651_v53 = vadd.f32 %v1629_v41, %v1490_v60 }
 0x13d   : > { %v1259_v31 = vpop.f32.mrf.mxu2 }
 0x13e   : > { %v1269_v10 = vadd.f32 %v1259_v31, %v4563_v16  ;;  %v1993_v23 = vpop.f32.mrf.mxu3 }
 0x140   : > { %v1491_v50 = vadd.f32 %v1481_v2, %v1269_v10  ;;  %v2071_v34 = vpop.f32.mrf.mxu0 }
 0x141   : > { %v2262_v32 = vpop.f32.mrf.mxu1 }
 0x142   : > { %v4654_v20 = vadd.f32 %v1631_v19, %v1491_v50 }
 0x145   : > { %v1884_v22 = vpop.f32.mrf.mxu2 }
 0x146   : > { %v1885_v48 = vadd.f32 %v1884_v22, %v4528_v37  ;;  %v1995_v9 = vpop.f32.mrf.mxu3 }
 0x148   : > { %v2013_v5 = vadd.f32 %v1993_v23, %v1885_v48  ;;  %v2073_v58 = vpop.f32.mrf.mxu0 }
 0x149   : > { %v2265_v56 = vpop.f32.mrf.mxu1 }
 0x14a   : > { %v2091_v40 = vadd.f32 %v2071_v34, %v2013_v5 }
 0x14c   : > { %v2280_v61 = vadd.f32 %v2260_v33, %v2091_v40 }
 0x14d   : > { %v1886_v63 = vpop.f32.mrf.mxu2 }
 0x14e   : > { %v1887_v46 = vadd.f32 %v1886_v63, %v4553_v57  ;;  %v1998_v27 = vpop.f32.mrf.mxu3 }
 0x150   : > { %v2014_v16 = vadd.f32 %v1995_v9, %v1887_v46  ;;  %v2076_v62 = vpop.f32.mrf.mxu0 }
 0x151   : > { %v2267_v43 = vpop.f32.mrf.mxu1 }
 0x152   : > { %v2092_v15 = vadd.f32 %v2073_v58, %v2014_v16 }
 0x154   : > { %v2281_v49 = vadd.f32 %v2262_v32, %v2092_v15 }
 0x155   : > { %v1889_v4 = vpop.f32.mrf.mxu2 }
 0x156   : > { %v1890_v17 = vadd.f32 %v1889_v4, %v4572_v44  ;;  %v2000_v26 = vpop.f32.mrf.mxu3 }
 0x158   : > { %v2015_v37 = vadd.f32 %v1998_v27, %v1890_v17  ;;  %v2078_v36 = vpop.f32.mrf.mxu0 }
 0x159   : > { %v2270_v0 = vpop.f32.mrf.mxu1 }
 0x15a   : > { %v2093_v42 = vadd.f32 %v2076_v62, %v2015_v37 }
 0x15c   : > { %v2282_v14 = vadd.f32 %v2265_v56, %v2093_v42 }
 0x15d   : > { %v1891_v55 = vpop.f32.mrf.mxu2 }
 0x15e   : > { %v1892_v6 = vadd.f32 %v1891_v55, %v4584_v38  ;;  %v2003_v39 = vpop.f32.mrf.mxu3 }
 0x160   : > { %v2016_v57 = vadd.f32 %v2000_v26, %v1892_v6  ;;  %v2081_v24 = vpop.f32.mrf.mxu0 }
 0x161   : > { %v2272_v12 = vpop.f32.mrf.mxu1 }
 0x162   : > { %v2094_v47 = vadd.f32 %v2078_v36, %v2016_v57 }
 0x164   : > { %v4660_v30 = vadd.f32 %v2267_v43, %v2094_v47 }
 0x165   : > { %v1894_v59 = vpop.f32.mrf.mxu2 }
 0x166   : > { %v1895_v29 = vadd.f32 %v1894_v59, %v4602_v35  ;;  %v2005_v44 = vpop.f32.mrf.mxu3 }
 0x168   : > { %v2017_v1 = vadd.f32 %v2003_v39, %v1895_v29  ;;  %v2083_v18 = vpop.f32.mrf.mxu0 }
 0x169   : > { %v2275_v41 = vpop.f32.mrf.mxu1 }
 0x16a   : > { %v2095_v52 = vadd.f32 %v2081_v24, %v2017_v1 }
 0x16c   : > { %v4663_v28 = vadd.f32 %v2270_v0, %v2095_v52 }
 0x16d   : > { %v1896_v45 = vpop.f32.mrf.mxu2 }
 0x16e   : > { %v1897_v38 = vadd.f32 %v1896_v45, %v4619_v51  ;;  %v2008_v2 = vpop.f32.mrf.mxu3 }
 0x170   : > { %v2018_v60 = vadd.f32 %v2005_v44, %v1897_v38  ;;  %v2086_v19 = vpop.f32.mrf.mxu0 }
 0x171   : > { %v4666_v31 = vpop.f32.mrf.mxu1 }
 0x172   : > { %v2096_v33 = vadd.f32 %v2083_v18, %v2018_v60 }
 0x174   : > { %v4668_v10 = vadd.f32 %v2272_v12, %v2096_v33 }
 0x175   : > { %v1899_v23 = vpop.f32.mrf.mxu2 }
 0x176   : > { %v1900_v35 = vadd.f32 %v1899_v23, %v4639_v25  ;;  %v4671_v50 = vpop.f32.mrf.mxu3  ;;  %v4682_v25 = vld [vmem:[%s4741_s3] ss:$0 sm:$0xff] }
 0x177   : > { %v1646_v15 = vadd.f32 %v4682_v25, %v4569_v3  ;;  %v1647_v57 = vadd.f32 %v4682_v25, %v4580_v13  ;;  %v1648_v45 = vadd.f32 %v4682_v25, %v4600_v7 }
 0x178   : > { %v2019_v34 = vadd.f32 %v2008_v2, %v1900_v35  ;;  %v4673_v32 = vpop.f32.mrf.mxu0 }
 0x179   : > { %v2761_v9 = vpop.f32.mrf.mxu1  ;;  %v1655_v29 = vmax.f32 %v1647_v57, 0.0 }
 0x17a   : > { %v2097_v22 = vadd.f32 %v2086_v19, %v2019_v34  ;;  %v1656_v19 = vmax.f32 %v1648_v45, 0.0 }
 0x17c   : > { %v4675_v48 = vadd.f32 %v2275_v41, %v2097_v22 }
 0x17d   : > { %v4677_v51 = vpop.f32.mrf.mxu2 }
 0x17e   : > { %v2455_v5 = vpop.f32.mrf.mxu3 }
 0x180   : > { %v2644_v58 = vpop.f32.mrf.mxu0 }
 0x181   : > { %v2763_v46 = vpop.f32.mrf.mxu1 }
 0x185   : > { %v2377_v40 = vpop.f32.mrf.mxu2 }
 0x186   : > { %v2397_v56 = vadd.f32 %v2377_v40, %v2280_v61  ;;  %v2457_v63 = vpop.f32.mrf.mxu3  ;;  %v1654_v61 = vmax.f32 %v1646_v15, 0.0  ;;  %v1650_v15 = vadd.f32 %v4682_v25, %v4633_v21 }
 0x188   : > { %v2475_v27 = vadd.f32 %v2455_v5, %v2397_v56  ;;  %v2646_v62 = vpop.f32.mrf.mxu0 }
 0x189   : > { %v2766_v0 = vpop.f32.mrf.mxu1 }
 0x18a   : > { %v2664_v16 = vadd.f32 %v2644_v58, %v2475_v27 }
 0x18c   : > { %v2781_v43 = vadd.f32 %v2761_v9, %v2664_v16  ;;  %v1649_v9 = vadd.f32 %v4682_v25, %v4615_v11 }
 0x18d   : > { %v2379_v4 = vpop.f32.mrf.mxu2 }
 0x18e   : > { %v2789_v17 = vadd.f32 %v4682_v25, %v2781_v43  ;;  %v2398_v26 = vadd.f32 %v2379_v4, %v2281_v49  ;;  %v2460_v37 = vpop.f32.mrf.mxu3 }
 0x190   : > { %v2797_v36 = vmax.f32 %v2789_v17, 0.0  ;;  %v2476_v42 = vadd.f32 %v2457_v63, %v2398_v26  ;;  %v2649_v39 = vpop.f32.mrf.mxu0  ;;  %v1657_v63 = vmax.f32 %v1649_v9, 0.0 }
 0x191   : > { %v2768_v41 = vpop.f32.mrf.mxu1 }
 0x192   : > { %v4687_v55 = vsub.f32 %v1654_v61, %v2797_v36  ;;  %v2665_v6 = vadd.f32 %v2646_v62, %v2476_v42  ;;  %v1658_v61 = vmax.f32 %v1650_v15, 0.0 }
 0x194   : > { %v2782_v24 = vadd.f32 %v2763_v46, %v2665_v6 }
 0x195   : > { %v2382_v47 = vpop.f32.mrf.mxu2 }
 0x196   : > { %v2790_v3 = vadd.f32 %v4682_v25, %v2782_v24  ;;  %v2399_v12 = vadd.f32 %v2382_v47, %v2282_v14  ;;  %v2462_v59 = vpop.f32.mrf.mxu3 }
 0x198   : > { %v2798_v49 = vmax.f32 %v2790_v3, 0.0  ;;  %v2477_v44 = vadd.f32 %v2460_v37, %v2399_v12  ;;  %v2651_v52 = vpop.f32.mrf.mxu0 }
 0x199   : > { %v2771_v58 = vpop.f32.mrf.mxu1 }
 0x19a   : > { %v4692_v1 = vsub.f32 %v1655_v29, %v2798_v49  ;;  %v2666_v18 = vadd.f32 %v2649_v39, %v2477_v44  ;;  %v1651_v39 = vadd.f32 %v4682_v25, %v4644_v8  ;;  %v1652_v8 = vadd.f32 %v4682_v25, %v4651_v53 }
 0x19c   : > { %v2783_v38 = vadd.f32 %v2766_v0, %v2666_v18 }
 0x19d   : > { %v2384_v2 = vpop.f32.mrf.mxu2 }
 0x19e   : > { %v2791_v13 = vadd.f32 %v4682_v25, %v2783_v38  ;;  %v2400_v60 = vadd.f32 %v2384_v2, %v4660_v30  ;;  %v2465_v23 = vpop.f32.mrf.mxu3  ;;  %v1660_v2 = vmax.f32 %v1652_v8, 0.0 }
 0x1a0   : > { %v2799_v14 = vmax.f32 %v2791_v13, 0.0  ;;  %v2478_v33 = vadd.f32 %v2462_v59, %v2400_v60  ;;  %v2654_v22 = vpop.f32.mrf.mxu0  ;;  %v1659_v59 = vmax.f32 %v1651_v39, 0.0 }
 0x1a1   : > { %v2773_v37 = vpop.f32.mrf.mxu1 }
 0x1a2   : > { %v4698_v35 = vsub.f32 %v1656_v19, %v2799_v14  ;;  %v2667_v34 = vadd.f32 %v2651_v52, %v2478_v33 }
 0x1a4   : > { %v2784_v5 = vadd.f32 %v2768_v41, %v2667_v34 }
 0x1a5   : > { %v2387_v7 = vpop.f32.mrf.mxu2 }
 0x1a6   : > { %v2792_v40 = vadd.f32 %v4682_v25, %v2784_v5  ;;  %v2401_v56 = vadd.f32 %v2387_v7, %v4663_v28  ;;  %v2467_v62 = vpop.f32.mrf.mxu3  ;;  %v1902_v28 = vadd.f32 %v4677_v51, %v4647_v54 }
 0x1a8   : > { %v2800_v30 = vmax.f32 %v2792_v40, 0.0  ;;  %v2479_v46 = vadd.f32 %v2465_v23, %v2401_v56  ;;  %v2656_v4 = vpop.f32.mrf.mxu0  ;;  %v2020_v21 = vadd.f32 %v4671_v50, %v1902_v28  ;;  %v1653_v23 = vadd.f32 %v4682_v25, %v4654_v20 }
 0x1a9   : > { %v2776_v49 = vpop.f32.mrf.mxu1 }
 0x1aa   : > { %v2808_v27 = vsub.f32 %v1657_v63, %v2800_v30  ;;  %v2668_v16 = vadd.f32 %v2654_v22, %v2479_v46  ;;  %v2098_v51 = vadd.f32 %v4673_v32, %v2020_v21  ;;  %v1661_v22 = vmax.f32 %v1653_v23, 0.0 }
 0x1ac   : > { %v2785_v43 = vadd.f32 %v2771_v58, %v2668_v16  ;;  %v2287_v52 = vadd.f32 %v4666_v31, %v2098_v51 }
 0x1ad   : > { %v2389_v17 = vpop.f32.mrf.mxu2 }
 0x1ae   : > { %v2793_v11 = vadd.f32 %v4682_v25, %v2785_v43  ;;  %v2402_v26 = vadd.f32 %v2389_v17, %v4668_v10  ;;  %v2470_v24 = vpop.f32.mrf.mxu3 }
 0x1b0   : > { %v2801_v36 = vmax.f32 %v2793_v11, 0.0  ;;  %v2480_v42 = vadd.f32 %v2467_v62, %v2402_v26  ;;  %v2659_v12 = vpop.f32.mrf.mxu0 }
 0x1b1   : > { %v2778_v33 = vpop.f32.mrf.mxu1 }
 0x1b2   : > { %v2809_v0 = vsub.f32 %v1658_v61, %v2801_v36  ;;  %v2669_v6 = vadd.f32 %v2656_v4, %v2480_v42 }
 0x1b4   : > { %v2786_v57 = vadd.f32 %v2773_v37, %v2669_v6 }
 0x1b5   : > { %v2392_v47 = vpop.f32.mrf.mxu2 }
 0x1b6   : > { %v2794_v3 = vadd.f32 %v4682_v25, %v2786_v57  ;;  %v2403_v10 = vadd.f32 %v2392_v47, %v4675_v48  ;;  %v2472_v48 = vpop.f32.mrf.mxu3 }
 0x1b8   : > { %v2802_v29 = vmax.f32 %v2794_v3, 0.0  ;;  %v2481_v54 = vadd.f32 %v2470_v24, %v2403_v10  ;;  %v2661_v19 = vpop.f32.mrf.mxu0 }
 0x1ba   : > { %v2810_v44 = vsub.f32 %v1659_v59, %v2802_v29  ;;  %v2670_v18 = vadd.f32 %v2659_v12, %v2481_v54 }
 0x1bc   : > { %v2787_v50 = vadd.f32 %v2776_v49, %v2670_v18 }
 0x1bd   : > { %v2394_v41 = vpop.f32.mrf.mxu2 }
 0x1be   : > { %v2795_v45 = vadd.f32 %v4682_v25, %v2787_v50  ;;  %v2404_v38 = vadd.f32 %v2394_v41, %v2287_v52 }
 0x1c0   : > { %v2803_v13 = vmax.f32 %v2795_v45, 0.0  ;;  %v2482_v60 = vadd.f32 %v2472_v48, %v2404_v38 }
 0x1c2   : > { %v2811_v14 = vsub.f32 %v1660_v2, %v2803_v13  ;;  %v2671_v32 = vadd.f32 %v2661_v19, %v2482_v60 }
 0x1c4   : > { %v2788_v34 = vadd.f32 %v2778_v33, %v2671_v32 }
 0x1c6   : > { %v2796_v53 = vadd.f32 %v4682_v25, %v2788_v34  ;;  %2816 = sbr.rel (%p3473_p5) target bundleno = 461 (0x1cd), region = 40 }
 0x1c8   : > { %v2804_v31 = vmax.f32 %v2796_v53, 0.0 }
 0x1ca   : > { %v2812_v9 = vsub.f32 %v1661_v22, %v2804_v31 }
 0x1cb   : > { %vm2817_vm7 = vcmask 0   ;;  %v3610_v5 = vmov 0.0  }
 0x1cc   : > { %2818 = vst.msk [vmem:[#allocation2] sm:$0x1] %vm2817_vm7, %v3610_v5 }
 0x1cd PF: > { %v2820_v58 = vmul.f32 %v4687_v55, %v4687_v55  ;;  %v2821_v7 = vmul.f32 %v4692_v1, %v4692_v1  ;;  %v2822_v20 = vmul.f32 %v4698_v35, %v4698_v35  ;;  %v2823_v25 = vmul.f32 %v2808_v27, %v2808_v27  ;;  %p3474_p6 = scmp.ne.s32.totalorder %s3643_s16, 1 }
 0x1ce   : > { %v2824_v56 = vmul.f32 %v2809_v0, %v2809_v0  ;;  %v2825_v30 = vmul.f32 %v2810_v44, %v2810_v44  ;;  %v2826_v16 = vmul.f32 %v2811_v14, %v2811_v14  ;;  %v2827_v15 = vmul.f32 %v2812_v9, %v2812_v9 }
 0x1cf   : > { %v2828_v40 = vadd.f32 %v2821_v7, %v2820_v58  ;;  %vm2846_vm8 = vcmask 0  }
 0x1d1   : > { %v2829_v63 = vadd.f32 %v2828_v40, %v2822_v20 }
 0x1d3   : > { %v2830_v46 = vadd.f32 %v2829_v63, %v2823_v25  ;;  %v2819_v27 = vld [vmem:[#allocation2] sm:$0x1] }
 0x1d5   : > { %v2831_v62 = vadd.f32 %v2830_v46, %v2824_v56 }
 0x1d7   : > { %v2832_v43 = vadd.f32 %v2831_v62, %v2825_v30 }
 0x1d9   : > { %v2833_v4 = vadd.f32 %v2832_v43, %v2826_v16 }
 0x1db   : > { %v2834_v17 = vadd.f32 %v2833_v4, %v2827_v15 }
 0x1dd   : > { %2835 = vadd.xlane.f32.xlu0 %v2834_v17 }
 0x250   : > { %v2836_v55 = vpop.xlane.xlu0 %2835 }
 0x251   : > { %v2837_v11 = vrot.slane %v2836_v55, 4 }
 0x253   : > { %v2838_v26 = vadd.f32 %v2837_v11, %v2836_v55 }
 0x255   : > { %v2839_v1 = vrot.slane %v2838_v26, 2 }
 0x257   : > { %v2840_v37 = vadd.f32 %v2839_v1, %v2838_v26 }
 0x259   : > { %v2841_v61 = vrot.slane %v2840_v37, 1 }
 0x25b   : > { %v2842_v35 = vadd.f32 %v2841_v61, %v2840_v37 }
 0x25d   : > { %3549 = vpush %v2842_v35 }
 0x28e   : > { %s3550_s10 = spop %3549  ;;  %2851 = sbr.rel (%p3474_p6) target bundleno = 669 (0x29d), region = 44 }
 0x28f   : > { %v2844_v28 = vstv %s3550_s10 }
 0x290   : > { %v2845_v36 = vadd.f32 %v2844_v28, %v2819_v27 }
 0x292   : > { %2847 = vst.msk [vmem:[#allocation2] sm:$0x1] %vm2846_vm8, %v2845_v36 }
 0x299   : > { %v2852_v42 = vld [vmem:[#allocation2] sm:$0x1] }
 0x29a   : > { %v2853_v0 = vmul.f32 6.1035156e-05, %v2852_v42 }
 0x29c   : > { %2854 = vst.msk [vmem:[#allocation2] sm:$0x1] %vm2846_vm8, %v2853_v0 }
 0x29d PF: > { %p3555_p7 = scmp.eq.s32.totalorder %s3643_s16, 1  ;;  %s3611_s11 = smov [#allocation2]  }
 0x29e   : > { %s2861_s12 = sshll.u32 %s3611_s11, 4  ;;  %s2863_s17 = sshll.u32 %s4742_s4, 4  ;;  %s2862_s12 = int_to_ptr.vmem [resolvable:$true] %s2861_s12  ;;  %s2864_s17 = int_to_ptr.hbm [resolvable:$true] %s2863_s17 }
 0x29f   : > { %3552 = dma.vmem_to_hbm [thread:$0]  (%p3555_p7), %s2862_s12, 16, %s2864_s17, [#allocation3]  }
 0x2a0   : > { %3603 = dma.done.wait (%p3555_p7), [#allocation3], 16  }
 0x2a1   : > { %3605 = vsyncadd (%p3555_p7), [#allocation3], 4294967280 }
 0x2a2 PF: > { %s15_s15 = sadd.s32 1, %s3608_s15  }
 0x2a3   : > { %p12_p8 = scmp.ge.s32.totalorder %s15_s15, 4  }
 0x2a5   :  { %14 = sbr.rel (!%p12_p8) target bundleno = 1 (0x1), region = 86 }
 0x2aa   :  { %2877 = vsyncpa [#allocation3], 1 }
 0x2ab   :  { %2879 = vsyncpa [#allocation3 + $0x1], 1 }

// kernel: vgg_perceptual_loss.2
= control target key start
LH: loop header
LB: loop body
LE: loop exit
PB: predicated region body
PF: predicated region fallthrough
CT: control target
= control target key end

     0   :  { %s6558_s18 = smov 0   ;;  %s8748_s0 = inlined_call_operand.vmem [shape: bf16[4,256,27], index: 0, kind: input, shape index: {}]   ;;  %s8749_s1 = inlined_call_operand.vmem [shape: bf16[27,64], index: 1, kind: input, shape index: {}]   ;;  %s8750_s2 = inlined_call_operand.vmem [shape: f32[1,64], index: 2, kind: input, shape index: {}]   ;;  %s8751_s3 = inlined_call_operand.vmem [shape: bf16[3,3,64,64], index: 3, kind: input, shape index: {}]   ;;  %s8752_s4 = inlined_call_operand.vmem [shape: f32[1,64], index: 4, kind: input, shape index: {}]   ;;  %s8753_s5 = inlined_call_operand.vmem [shape: bf16[4,10,10,64], index: 5, kind: output, shape index: {}]  }
   0x1 LB: > { %s5640_s19 = sadd.s32 4294967295, %s6524_s18   ;;  %p5644_p0 = scmp.ge.s32.totalorder %s6524_s18, 1  ;;  %s6524_s18 = sphi %s6558_s18, %s15_s18  }
   0x2   : > { %p187_p1 = scmp.lt.s32.totalorder %s6524_s18, 5 }
   0x4   : > { %p188_p2 = pnand %p5644_p0, %p187_p1 }
   0x6   : > { %191 = sbr.rel (%p188_p2) target bundleno = 1119 (0x45f), region = 40 }
   0xb   : > { %v5718_v0 = vld [vmem:[%s8749_s1 + $0x8] sm:$0xf]  ;;  %v6380_v1 = vld [vmem:[%s8749_s1 + $0x8] sm:$0x30]  ;;  %vm406_vm0 = vcmask 1044480   ;;  %vm407_vm1 = vcmask 1045504  }
   0xc   : > { %v5719_v2 = vor.u32 %v6380_v1, %v5718_v0  ;;  %p215_p3 = scmp.lt.s32.totalorder %s5640_s19, 3  ;;  %v6526_v3 = vmov 65535   ;;  %v6379_v7 = vld [vmem:[%s8749_s1] sm:$0xff]  ;;  %vm357_vm2 = vcmask 220160   ;;  %vm534_vm3 = vcmask 519168   ;;  %v6408_v24 = vld [vmem:[%s8751_s3 + $0x58] sm:$0xff] }
   0xd   : > { %v408_v4 = vsel %vm406_vm0, 4294967295, %v6526_v3  ;;  %v6527_v21 = vmov 0   ;;  %v6404_v25 = vld [vmem:[%s8751_s3 + $0x38] sm:$0xff]  ;;  %v6407_v26 = vld [vmem:[%s8751_s3 + $0x50] sm:$0xff]  ;;  %v6675_v27 = vld [vmem:[%s8750_s2] ss:$0 sm:$0xff] }
   0xe   : > { %v409_v5 = vsel %vm407_vm1, %v408_v4, 0  ;;  %s9035_s19 = smov (!%p215_p3, %s5640_s19), 3  ;;  %539 = vst.msk [vmem:[#allocation2 + $0xc] sm:$0xf] %vm534_vm3, %v6527_v21  ;;  %1640 = vmatpush.bf16.msra.mxu1 %v6404_v25  ;;  %6467 = vmatpush.bf16.msra.mxu2 %v6404_v25  ;;  %v6403_v31 = vld [vmem:[%s8751_s3 + $0x30] sm:$0xff]  ;;  %v6406_v32 = vld [vmem:[%s8751_s3 + $0x48] sm:$0xff] }
   0xf   : > { %v411_v6 = vand.u32 %v5719_v2, %v409_v5  ;;  %s6362_s24 = sshll.u32 %s9035_s19, 7  ;;  %535 = vst.msk [vmem:[#allocation2] sm:$0xf] %vm534_vm3, %v6527_v21  ;;  %v6428_v33 = vld [vmem:[%s8751_s3 + $0x78] sm:$0xff]  ;;  %s6471_s21 = smul.u32 80, %s9035_s19  ;;  %v6402_v36 = vld [vmem:[%s8751_s3 + $0x28] sm:$0xff] }
  0x10   : > { %s6581_s29 = scalar_lea.vmem %s8748_s0, %s6362_s24  ;;  %536 = vst.msk [vmem:[#allocation2 + $0x4] sm:$0xf] %vm534_vm3, %v6527_v21  ;;  %v6405_v37 = vld [vmem:[%s8751_s3 + $0x40] sm:$0xff]  ;;  %v6427_v38 = vld [vmem:[%s8751_s3 + $0x70] sm:$0xff]  ;;  %vm947_vm4 = vsmask.f32 7938 }
  0x11   : > { %419 = vmatpush.bf16.msra.mxu0 %v411_v6  ;;  %6465 = vmatpush.bf16.msra.mxu3 %v411_v6  ;;  %v6363_v8 = vld [vmem:[%s6581_s29] sm:$0xff]  ;;  %v6372_v9 = vld [vmem:[%s6581_s29 + $0x48] sm:$0xff]  ;;  %v6373_v11 = vld [vmem:[%s6581_s29 + $0x50] sm:$0xff]  ;;  %540 = vst.msk [vmem:[#allocation2 + $0x10] sm:$0xf] %vm534_vm3, %v6527_v21  ;;  %v8760_v47 = vmov 0 }
  0x12   : > { %v6364_v10 = vld [vmem:[%s6581_s29 + $0x8] sm:$0xff]  ;;  %v6365_v12 = vld [vmem:[%s6581_s29 + $0x10] sm:$0xff]  ;;  %v6374_v13 = vld [vmem:[%s6581_s29 + $0x58] sm:$0xff]  ;;  %542 = vst.msk [vmem:[#allocation2 + $0x18] sm:$0xf] %vm534_vm3, %v6527_v21  ;;  %1641 = vmatpush.bf16.msra.mxu1 %v6403_v31  ;;  %6468 = vmatpush.bf16.msra.mxu2 %v6403_v31  ;;  %vm537_vm8 = vcmask 516096  }
  0x13   : > { %v6366_v14 = vld [vmem:[%s6581_s29 + $0x18] sm:$0xff]  ;;  %v6375_v15 = vld [vmem:[%s6581_s29 + $0x60] sm:$0xff]  ;;  %v6376_v17 = vld [vmem:[%s6581_s29 + $0x68] sm:$0xff]  ;;  %543 = vst.msk [vmem:[#allocation2 + $0x1c] sm:$0xf] %vm534_vm3, %v6527_v21  ;;  %vm2014_vm10 = vcmask 1042432  }
  0x14   : > { %v6367_v16 = vld [vmem:[%s6581_s29 + $0x20] sm:$0xff]  ;;  %v6368_v18 = vld [vmem:[%s6581_s29 + $0x28] sm:$0xff]  ;;  %v6377_v19 = vld [vmem:[%s6581_s29 + $0x70] sm:$0xff]  ;;  %545 = vst.msk [vmem:[#allocation2 + $0x24] sm:$0xf] %vm534_vm3, %v6527_v21  ;;  %vm2015_vm11 = vcmask 1046532  }
  0x15   : > { %420 = vmatpush.bf16.msra.mxu0 %v6379_v7  ;;  %6466 = vmatpush.bf16.msra.mxu3 %v6379_v7  ;;  %v6369_v20 = vld [vmem:[%s6581_s29 + $0x30] sm:$0xff]  ;;  %v6378_v22 = vld [vmem:[%s6581_s29 + $0x78] sm:$0xff]  ;;  %546 = vst.msk [vmem:[#allocation2 + $0x28] sm:$0xf] %vm534_vm3, %v6527_v21  ;;  %v6371_v28 = vld [vmem:[%s6581_s29 + $0x40] sm:$0xff]  ;;  %vm1587_vm1 = vcmask 523264  }
  0x16   : > { %548 = vst.msk [vmem:[#allocation2 + $0x30] sm:$0xf] %vm534_vm3, %v6527_v21  ;;  %v6370_v23 = vld [vmem:[%s6581_s29 + $0x38] sm:$0xff]  ;;  %s6720_s29 = scalar_lea.vmem %s8753_s5, %s6471_s21  ;;  %1642 = vmatpush.bf16.msra.mxu1 %v6402_v36  ;;  %v1063_v40 = vld [vmem:[#allocation2] sm:$0xf]  ;;  %v6426_v46 = vld [vmem:[%s8751_s3 + $0x68] sm:$0xff]  ;;  %6469 = vmatpush.bf16.msra.mxu2 %v6402_v36 }
  0x17   : > { %549 = vst.msk [vmem:[#allocation2 + $0x34] sm:$0xf] %vm534_vm3, %v6527_v21  ;;  %v6401_v45 = vld [vmem:[%s8751_s3 + $0x20] sm:$0xff]  ;;  %vm6741_vm5 = vmand %vm534_vm3, %vm947_vm4  ;;  %v949_v48 = vld [vmem:[#allocation2 + $0xc] sm:$0xf]  ;;  %v1123_v49 = vshrl.u32 %v1063_v40, 16 }
  0x18   : > { %5720 = vmatmul.msk.bf16.vlgmr.msra.gmra.mxu0 %vm357_vm2, %v6363_v8  ;;  %5729 = vmatmul.msk.bf16.vlgmr.msra.gmra.mxu3 %vm357_vm2, %v6372_v9  ;;  %551 = vst.msk [vmem:[#allocation2 + $0x3c] sm:$0xf] %vm534_vm3, %v6527_v21  ;;  %v8761_v47 = vsel %vm6741_vm5, 4294967295, %v8760_v47  ;;  %v1126_v50 = vshll.u32 %v1063_v40, 16  ;;  %v6751_v53 = vld [vmem:[#allocation2 + $0x4] sm:$0xf]  ;;  %vm6796_vm14 = vmor %vm2014_vm10, %vm2015_vm11 }
  0x19   : > { %552 = vst.msk [vmem:[#allocation2 + $0x40] sm:$0xf] %vm534_vm3, %v6527_v21  ;;  %2262 = vmatpush.bf16.msrb.mxu3 %v6408_v24  ;;  %2576 = vmatpush.bf16.msrb.mxu0 %v6428_v33  ;;  %vm622_vm6 = vsmask.f32 256  ;;  %v6425_v56 = vld [vmem:[%s8751_s3 + $0x60] sm:$0xff]  ;;  %v1125_v57 = vrot.slane %v1123_v49, 4 }
  0x1a   : > { %554 = vst.msk [vmem:[#allocation2 + $0x48] sm:$0xf] %vm534_vm3, %v6527_v21  ;;  %1643 = vmatpush.bf16.msra.mxu1 %v6401_v45  ;;  %6470 = vmatpush.bf16.msra.mxu2 %v6401_v45  ;;  %v1128_v58 = vrot.slane %v1126_v50, 5  ;;  %v1132_v59 = vshll.u32 %v6751_v53, 16  ;;  %vm623_vm7 = vsmask.f32 4368  ;;  %vm6808_vm0 = vmand %vm537_vm8, %vm622_vm6 }
  0x1b   : > { %555 = vst.msk [vmem:[#allocation2 + $0x4c] sm:$0xf] %vm534_vm3, %v6527_v21  ;;  %v1136_v61 = vshrl.u32 %v6751_v53, 16  ;;  %v1966_v2 = vld [vmem:[#allocation2] sm:$0xe]  ;;  %vm6780_vm9 = vmor %vm622_vm6, %vm623_vm7 }
  0x1c   : > { %557 = vst.msk [vmem:[#allocation2 + $0x54] sm:$0xf] %vm534_vm3, %v6527_v21  ;;  %v1129_v4 = vor.u32 %v1128_v58, %v1125_v57  ;;  %v1134_v5 = vrot.slane %v1132_v59, 5  ;;  %vm1119_vm12 = vsmask.f32 3328 }
  0x1d   : > { %558 = vst.msk [vmem:[#allocation2 + $0x58] sm:$0xf] %vm534_vm3, %v6527_v21  ;;  %2263 = vmatpush.bf16.msrb.mxu3 %v6407_v26  ;;  %2577 = vmatpush.bf16.msrb.mxu0 %v6427_v38  ;;  %v1138_v9 = vrot.slane %v1136_v61, 4  ;;  %vm1120_vm13 = vsmask.f32 7440 }
  0x1e   : > { %560 = vst.msk [vmem:[#allocation2 + $0x60] sm:$0xf] %vm534_vm3, %v6527_v21  ;;  %vm6802_vm15 = vmor %vm1119_vm12, %vm1120_vm13 }
  0x1f   : > { %561 = vst.msk [vmem:[#allocation2 + $0x64] sm:$0xf] %vm534_vm3, %v6527_v21 }
  0x20   : > { %563 = vst.msk [vmem:[#allocation2 + $0x6c] sm:$0xf] %vm534_vm3, %v6527_v21 }
  0x21   : > { %564 = vst.msk [vmem:[#allocation2 + $0x70] sm:$0xf] %vm534_vm3, %v6527_v21  ;;  %2264 = vmatpush.bf16.msrb.mxu3 %v6406_v32  ;;  %2578 = vmatpush.bf16.msrb.mxu0 %v6426_v46 }
  0x22   : > { %566 = vst.msk [vmem:[#allocation2 + $0x78] sm:$0xf] %vm534_vm3, %v6527_v21 }
  0x23   : > { %567 = vst.msk [vmem:[#allocation2 + $0x7c] sm:$0xf] %vm534_vm3, %v6527_v21 }
  0x24   : > { %569 = vst.msk [vmem:[#allocation2 + $0x84] sm:$0xf] %vm534_vm3, %v6527_v21 }
  0x25   : > { %570 = vst.msk [vmem:[#allocation2 + $0x88] sm:$0xf] %vm534_vm3, %v6527_v21  ;;  %2265 = vmatpush.bf16.msrb.mxu3 %v6405_v37  ;;  %2579 = vmatpush.bf16.msrb.mxu0 %v6425_v56 }
  0x26   : > { %572 = vst.msk [vmem:[#allocation2 + $0x90] sm:$0xf] %vm534_vm3, %v6527_v21 }
  0x27   : > { %573 = vst.msk [vmem:[#allocation2 + $0x94] sm:$0xf] %vm534_vm3, %v6527_v21 }
  0x28   : > { %5721 = vmatmul.msk.bf16.gmra.mxu0 %vm357_vm2, %v6364_v10  ;;  %5730 = vmatmul.msk.bf16.gmra.mxu3 %vm357_vm2, %v6373_v11  ;;  %575 = vst.msk [vmem:[#allocation2 + $0x9c] sm:$0xf] %vm534_vm3, %v6527_v21 }
  0x29   : > { %576 = vst.msk [vmem:[#allocation2 + $0xa0] sm:$0xf] %vm534_vm3, %v6527_v21 }
  0x2a   : > { %578 = vst.msk [vmem:[#allocation2 + $0xa8] sm:$0xf] %vm534_vm3, %v6527_v21 }
  0x2b   : > { %579 = vst.msk [vmem:[#allocation2 + $0xac] sm:$0xf] %vm534_vm3, %v6527_v21 }
  0x2c   : > { %581 = vst.msk [vmem:[#allocation2 + $0xb4] sm:$0xf] %vm534_vm3, %v6527_v21 }
  0x2d   : > { %582 = vst.msk [vmem:[#allocation2 + $0xb8] sm:$0xf] %vm534_vm3, %v6527_v21 }
  0x2e   : > { %584 = vst.msk [vmem:[#allocation2 + $0xc0] sm:$0xf] %vm534_vm3, %v6527_v21 }
  0x2f   : > { %585 = vst.msk [vmem:[#allocation2 + $0xc4] sm:$0xf] %vm534_vm3, %v6527_v21 }
  0x30   : > { %587 = vst.msk [vmem:[#allocation2 + $0xcc] sm:$0xf] %vm534_vm3, %v6527_v21 }
  0x31   : > { %588 = vst.msk [vmem:[#allocation2 + $0xd0] sm:$0xf] %vm534_vm3, %v6527_v21 }
  0x32   : > { %5428 = vst.msk [vmem:[%s6720_s29] sm:$0xf] %vm534_vm3, %v6527_v21 }
  0x33   : > { %5430 = vst.msk [vmem:[%s6720_s29 + $0x8] sm:$0xf] %vm534_vm3, %v6527_v21 }
  0x34   : > { %8762 = vst [vmem:[#allocation5_spill] sm:$0xff] %v8761_v47 }
  0x35   : > { %5432 = vst.msk [vmem:[%s6720_s29 + $0x10] sm:$0xf] %vm534_vm3, %v6527_v21 }
  0x36   : > { %5434 = vst.msk [vmem:[%s6720_s29 + $0x18] sm:$0xf] %vm534_vm3, %v6527_v21 }
  0x37   : > { %5436 = vst.msk [vmem:[%s6720_s29 + $0x20] sm:$0xf] %vm534_vm3, %v6527_v21 }
  0x38   : > { %5722 = vmatmul.msk.bf16.gmra.mxu0 %vm357_vm2, %v6365_v12  ;;  %5731 = vmatmul.msk.bf16.gmra.mxu3 %vm357_vm2, %v6374_v13  ;;  %5438 = vst.msk [vmem:[%s6720_s29 + $0x28] sm:$0xf] %vm534_vm3, %v6527_v21  ;;  %v2019_v12 = vrot.slane %v6751_v53, 5 }
  0x39   : > { %5440 = vst.msk [vmem:[%s6720_s29 + $0x30] sm:$0xf] %vm534_vm3, %v6527_v21 }
  0x3a   : > { %5442 = vst.msk [vmem:[%s6720_s29 + $0x38] sm:$0xf] %vm534_vm3, %v6527_v21 }
  0x3b   : > { %5444 = vst.msk [vmem:[%s6720_s29 + $0x40] sm:$0xf] %vm534_vm3, %v6527_v21 }
  0x3c   : > { %5446 = vst.msk [vmem:[%s6720_s29 + $0x48] sm:$0xf] %vm534_vm3, %v6527_v21 }
  0x3d   : > { %541 = vst.msk [vmem:[#allocation2 + $0x14] sm:$0x1] %vm537_vm8, %v6527_v21 }
  0x3e   : > { %538 = vst.msk [vmem:[#allocation2 + $0x8] sm:$0x1] %vm537_vm8, %v6527_v21 }
  0x3f   : > { %544 = vst.msk [vmem:[#allocation2 + $0x20] sm:$0x1] %vm537_vm8, %v6527_v21 }
  0x40   : > { %547 = vst.msk [vmem:[#allocation2 + $0x2c] sm:$0x1] %vm537_vm8, %v6527_v21 }
  0x41   : > { %550 = vst.msk [vmem:[#allocation2 + $0x38] sm:$0x1] %vm537_vm8, %v6527_v21 }
  0x42   : > { %553 = vst.msk [vmem:[#allocation2 + $0x44] sm:$0x1] %vm537_vm8, %v6527_v21 }
  0x43   : > { %556 = vst.msk [vmem:[#allocation2 + $0x50] sm:$0x1] %vm537_vm8, %v6527_v21 }
  0x44   : > { %v955_v31 = vld [vmem:[#allocation2 + $0x14] sm:$0x1]  ;;  %559 = vst.msk [vmem:[#allocation2 + $0x5c] sm:$0x1] %vm537_vm8, %v6527_v21 }
  0x45   : > { %v1103_v38 = vld [vmem:[#allocation2 + $0x8] sm:$0x1]  ;;  %562 = vst.msk [vmem:[#allocation2 + $0x68] sm:$0x1] %vm537_vm8, %v6527_v21 }
  0x46   : > { %565 = vst.msk [vmem:[#allocation2 + $0x74] sm:$0x1] %vm537_vm8, %v6527_v21 }
  0x47   : > { %568 = vst.msk [vmem:[#allocation2 + $0x80] sm:$0x1] %vm537_vm8, %v6527_v21 }
  0x48   : > { %5723 = vmatmul.msk.bf16.gmra.mxu0 %vm357_vm2, %v6366_v14  ;;  %5732 = vmatmul.msk.bf16.gmra.mxu3 %vm357_vm2, %v6375_v15  ;;  %v5872_v15 = vrot.slane %v1966_v2, 9  ;;  %571 = vst.msk [vmem:[#allocation2 + $0x8c] sm:$0x1] %vm537_vm8, %v6527_v21  ;;  %v6854_v2 = vld [vmem:[#allocation2 + $0x18] sm:$0xf] }
  0x49   : > { %574 = vst.msk [vmem:[#allocation2 + $0x98] sm:$0x1] %vm537_vm8, %v6527_v21 }
  0x4a   : > { %v2020_v32 = vsel %vm6796_vm14, %v5872_v15, %v2019_v12  ;;  %577 = vst.msk [vmem:[#allocation2 + $0xa4] sm:$0x1] %vm537_vm8, %v6527_v21 }
  0x4b   : > { %v2138_v45 = vunpack.c.l.b16 %v2020_v32  ;;  %580 = vst.msk [vmem:[#allocation2 + $0xb0] sm:$0x1] %vm537_vm8, %v6527_v21 }
  0x4c   : > { %583 = vst.msk [vmem:[#allocation2 + $0xbc] sm:$0x1] %vm537_vm8, %v6527_v21 }
  0x4d   : > { %586 = vst.msk [vmem:[#allocation2 + $0xc8] sm:$0x1] %vm537_vm8, %v6527_v21 }
  0x4e   : > { %589 = vst.msk [vmem:[#allocation2 + $0xd4] sm:$0x1] %vm537_vm8, %v6527_v21 }
  0x4f   : > { %5429 = vst.msk [vmem:[%s6720_s29 + $0x4] sm:$0x1] %vm537_vm8, %v6527_v21 }
  0x50   : > { %5431 = vst.msk [vmem:[%s6720_s29 + $0xc] sm:$0x1] %vm537_vm8, %v6527_v21 }
  0x51   : > { %5433 = vst.msk [vmem:[%s6720_s29 + $0x14] sm:$0x1] %vm537_vm8, %v6527_v21 }
  0x52   : > { %5435 = vst.msk [vmem:[%s6720_s29 + $0x1c] sm:$0x1] %vm537_vm8, %v6527_v21 }
  0x53   : > { %5437 = vst.msk [vmem:[%s6720_s29 + $0x24] sm:$0x1] %vm537_vm8, %v6527_v21 }
  0x54   : > { %5439 = vst.msk [vmem:[%s6720_s29 + $0x2c] sm:$0x1] %vm537_vm8, %v6527_v21 }
  0x55   : > { %5441 = vst.msk [vmem:[%s6720_s29 + $0x34] sm:$0x1] %vm537_vm8, %v6527_v21 }
  0x56   : > { %5443 = vst.msk [vmem:[%s6720_s29 + $0x3c] sm:$0x1] %vm537_vm8, %v6527_v21 }
  0x57   : > { %5445 = vst.msk [vmem:[%s6720_s29 + $0x44] sm:$0x1] %vm537_vm8, %v6527_v21 }
  0x58   : > { %5724 = vmatmul.msk.bf16.gmra.mxu0 %vm357_vm2, %v6367_v16  ;;  %5733 = vmatmul.msk.bf16.gmra.mxu3 %vm357_vm2, %v6376_v17  ;;  %v1130_v16 = vrot.slane %v1129_v4, 4  ;;  %5447 = vst.msk [vmem:[%s6720_s29 + $0x4c] sm:$0x1] %vm537_vm8, %v6527_v21 }
  0x5a   : > { %v1135_v33 = vsel %vm6802_vm15, %v1130_v16, %v1134_v5 }
  0x68   : > { %5725 = vmatmul.msk.bf16.gmra.mxu0 %vm357_vm2, %v6368_v18  ;;  %5734 = vmatmul.msk.bf16.gmra.mxu3 %vm357_vm2, %v6377_v19  ;;  %v8767_v18 = vmov 0  ;;  %v1139_v19 = vor.u32 %v1138_v9, %v1134_v5 }
  0x69   : > { %v8768_v18 = vsel %vm6802_vm15, 4294967295, %v8767_v18 }
  0x6a   : > { %8769 = vst [vmem:[#allocation6_spill] sm:$0xff] %v8768_v18  ;;  %v1140_v40 = vrot.slane %v1139_v19, 4 }
  0x78   : > { %5726 = vmatmul.msk.bf16.gmra.mxu0 %vm357_vm2, %v6369_v20  ;;  %5735 = vmatmul.msk.bf16.gmra.mxu3 %vm357_vm2, %v6378_v22  ;;  %v8770_v22 = vmov 0 }
  0x79   : > { %v8771_v22 = vsel %vm6808_vm0, 4294967295, %v8770_v22 }
  0x7a   : > { %8772 = vst [vmem:[#allocation7_spill] sm:$0xff] %v8771_v22 }
  0x88   : > { %5727 = vmatmul.msk.bf16.gmra.mxu0 %vm357_vm2, %v6370_v23 }
  0x95   : > { %v422_v29 = vpop.f32.mrf.mxu0 }
  0x96   : > { %v423_v30 = vadd.f32 %v6675_v27, %v422_v29 }
  0x98   : > { %v502_v34 = vmax.f32 %v423_v30, 0.0  ;;  %5728 = vmatmul.msk.bf16.gmra.mxu0 %vm357_vm2, %v6371_v28  ;;  %v2021_v28 = vrot.slane %v2019_v12, 4 }
  0x9a   : > { %v590_v35 = vpack.c.bf16 %v502_v34, %v502_v34 }
  0x9b   : > { %v467_v20 = vpop.f32.mrf.mxu3 }
  0x9c   : > { %v626_v39 = vshrl.u32 %v590_v35, 16  ;;  %v629_v43 = vshll.u32 %v590_v35, 16  ;;  %v468_v25 = vadd.f32 %v6675_v27, %v467_v20 }
  0x9d   : > { %v424_v41 = vpop.f32.mrf.mxu0 }
  0x9e   : > { %v628_v42 = vrot.slane %v626_v39, 7  ;;  %v425_v44 = vadd.f32 %v6675_v27, %v424_v41  ;;  %v520_v35 = vmax.f32 %v468_v25, 0.0 }
  0xa0   : > { %v631_v51 = vor.u32 %v629_v43, %v628_v42  ;;  %v503_v52 = vmax.f32 %v425_v44, 0.0  ;;  %v632_v6 = vrot.slane %v628_v42, 4  ;;  %v2022_v42 = vrot.slane %v1103_v38, 5 }
  0xa1   : > { %v1142_v43 = vshll.u32 %v1103_v38, 16 }
  0xa2   : > { %v950_v54 = vsel %vm6741_vm5, %v631_v51, %v949_v48  ;;  %v591_v55 = vpack.c.bf16 %v503_v52, %v503_v52  ;;  %v1515_v48 = vunpack.c.l.b16 %v1135_v33  ;;  %v2023_v53 = vsel %vm6796_vm14, %v2021_v28, %v2022_v42 }
  0xa3   : > { %951 = vst [vmem:[#allocation2 + $0xc] sm:$0xf] %v950_v54  ;;  %v1144_v54 = vrot.slane %v1142_v43, 5  ;;  %v2139_v56 = vunpack.c.l.b16 %v2023_v53  ;;  %v469_v59 = vpop.f32.mrf.mxu3 }
  0xa4   : > { %v634_v60 = vshrl.u32 %v591_v55, 16  ;;  %v637_v0 = vshll.u32 %v591_v55, 16  ;;  %v6838_v55 = vpack.c.bf16 %v520_v35, %v520_v35  ;;  %v470_v43 = vadd.f32 %v6675_v27, %v469_v59 }
  0xa5   : > { %v427_v62 = vpop.f32.mrf.mxu0  ;;  %v2170_v4 = vpack.c.b16 %v2139_v56, %v2138_v45 }
  0xa6   : > { %v636_v63 = vrot.slane %v634_v60, 7  ;;  %v428_v1 = vadd.f32 %v6675_v27, %v427_v62  ;;  %v1145_v62 = vsel %vm6802_vm15, %v1140_v40, %v1144_v54  ;;  %v779_v9 = vshrl.u32 %v6838_v55, 16  ;;  %v962_v40 = vld [vmem:[#allocation2 + $0x20] sm:$0x1] }
  0xa7   : > { %v1516_v5 = vunpack.c.l.b16 %v1145_v62  ;;  %5912 = vmatmul.msk.bf16.vlgmr.msrb.gmra.mxu3 %vm1587_vm1, %v2170_v4 }
  0xa8   : > { %v639_v7 = vor.u32 %v637_v0, %v636_v63  ;;  %v504_v8 = vmax.f32 %v428_v1, 0.0  ;;  %v641_v17 = vrot.slane %v636_v63, 4 }
  0xaa   : > { %v640_v10 = vsel %vm6780_vm9, %v632_v6, %v639_v7  ;;  %v592_v11 = vpack.c.bf16 %v504_v8, %v504_v8  ;;  %v1065_v13 = vld [vmem:[#allocation2 + $0xc] sm:$0xf]  ;;  %v956_v37 = vsel %vm6808_vm0, %v641_v17, %v955_v31  ;;  %v782_v31 = vshll.u32 %v6838_v55, 16 }
  0xab   : > { %952 = vst.msk [vmem:[#allocation2 + $0x10] sm:$0xf] %vm534_vm3, %v640_v10  ;;  %v1147_v26 = vshrl.u32 %v1065_v13, 16  ;;  %v1150_v30 = vshll.u32 %v1065_v13, 16  ;;  %v1967_v34 = vld [vmem:[#allocation2 + $0xc] sm:$0xe]  ;;  %v1547_v13 = vpack.c.b16 %v1516_v5, %v1515_v48  ;;  %v472_v38 = vpop.f32.mrf.mxu3 }
  0xac   : > { %v643_v23 = vshrl.u32 %v592_v11, 16  ;;  %v6824_v36 = vld [vmem:[#allocation2 + $0xc] sm:$0xf]  ;;  %957 = vst [vmem:[#allocation2 + $0x14] sm:$0x1] %v956_v37  ;;  %v646_v52 = vshll.u32 %v592_v11, 16 }
  0xad   : > { %v429_v24 = vpop.f32.mrf.mxu0  ;;  %v1149_v44 = vrot.slane %v1147_v26, 4  ;;  %v1152_v51 = vrot.slane %v1150_v30, 5  ;;  %v5873_v58 = vrot.slane %v1967_v34, 9  ;;  %v2742_v60 = vshrl.u32 %v6824_v36, 16  ;;  %5760 = vmatmul.msk.bf16.vlgmr.msra.gmra.mxu1 %vm1587_vm1, %v1547_v13 }
  0xae   : > { %v430_v29 = vadd.f32 %v6675_v27, %v429_v24  ;;  %v6830_v41 = vrot.slane %v643_v23, 7  ;;  %v2745_v1 = vshll.u32 %v6824_v36, 16  ;;  %v6877_v30 = vrot.slane %v779_v9, 7 }
  0xaf   : > { %v1153_v7 = vor.u32 %v1152_v51, %v1149_v44  ;;  %v473_v44 = vadd.f32 %v6675_v27, %v472_v38 }
  0xb0   : > { %v505_v39 = vmax.f32 %v430_v29, 0.0  ;;  %v6847_v61 = vor.u32 %v646_v52, %v6830_v41  ;;  %v649_v8 = vrot.slane %v6830_v41, 4  ;;  %v6900_v51 = vor.u32 %v782_v31, %v6877_v30 }
  0xb1   : > { %v1154_v26 = vrot.slane %v1153_v7, 4  ;;  %v521_v52 = vmax.f32 %v470_v43, 0.0  ;;  %v522_v53 = vmax.f32 %v473_v44, 0.0  ;;  %v785_v56 = vrot.slane %v6877_v30, 4 }
  0xb2   : > { %v593_v46 = vpack.c.bf16 %v505_v39, %v505_v39  ;;  %v6409_v49 = vld [vmem:[#allocation2 + $0xc] sm:$0xff]  ;;  %v959_v17 = vsel %vm6741_vm5, %v6847_v61, %v6854_v2  ;;  %v6955_v43 = vrot.slane %v2742_v60, 4 }
  0xb3   : > { %v1066_v50 = vld [vmem:[#allocation2 + $0x10] sm:$0xf]  ;;  %6016 = vmatmul.msk.bf16.vlgmr.msrb.gmra.mxu0 %vm1587_vm1, %v6409_v49  ;;  %v1104_v16 = vld [vmem:[#allocation2 + $0x14] sm:$0x1]  ;;  %960 = vst [vmem:[#allocation2 + $0x18] sm:$0xf] %v959_v17 }
  0xb4   : > { %v651_v57 = vshrl.u32 %v593_v46, 16  ;;  %v2026_v0 = vrot.slane %v1066_v50, 5  ;;  %v1156_v10 = vshll.u32 %v1066_v50, 16  ;;  %v1160_v11 = vshrl.u32 %v1066_v50, 16  ;;  %v1018_v17 = vld [vmem:[#allocation2 + $0x80] sm:$0x1] }
  0xb5   : > { %v432_v63 = vpop.f32.mrf.mxu0  ;;  %v654_v24 = vshll.u32 %v593_v46, 16  ;;  %v2029_v29 = vrot.slane %v1104_v16, 5  ;;  %v1166_v32 = vshll.u32 %v1104_v16, 16 }
  0xb6   : > { %v433_v6 = vadd.f32 %v6675_v27, %v432_v63  ;;  %v653_v12 = vrot.slane %v651_v57, 7  ;;  %v2027_v19 = vsel %vm6796_vm14, %v5873_v58, %v2026_v0  ;;  %v2028_v20 = vrot.slane %v2026_v0, 4  ;;  %v1014_v57 = vld [vmem:[#allocation2 + $0x78] sm:$0xf] }
  0xb7   : > { %v1158_v23 = vrot.slane %v1156_v10, 5  ;;  %v1162_v28 = vrot.slane %v1160_v11, 4  ;;  %v2140_v35 = vunpack.c.l.b16 %v2027_v19  ;;  %v1168_v49 = vrot.slane %v1166_v32, 5 }
  0xb8   : > { %v506_v15 = vmax.f32 %v433_v6, 0.0  ;;  %v656_v33 = vor.u32 %v654_v24, %v653_v12  ;;  %v658_v39 = vrot.slane %v653_v12, 4  ;;  %v2030_v41 = vsel %vm6796_vm14, %v2028_v20, %v2029_v29  ;;  %v965_v6 = vld [vmem:[#allocation2 + $0x24] sm:$0xf]  ;;  %v474_v20 = vpop.f32.mrf.mxu3 }
  0xb9   : > { %v1163_v37 = vor.u32 %v1162_v28, %v1158_v23  ;;  %v2141_v54 = vunpack.c.l.b16 %v2030_v41  ;;  %v1159_v62 = vsel %vm6802_vm15, %v1154_v26, %v1158_v23  ;;  %v609_v63 = vpack.c.bf16 %v521_v52, %v521_v52  ;;  %v6930_v23 = vld [vmem:[#allocation2 + $0x10] sm:$0xf] }
  0xba   : > { %v594_v25 = vpack.c.bf16 %v506_v15, %v506_v15  ;;  %v610_v0 = vpack.c.bf16 %v522_v53, %v522_v53  ;;  %v657_v4 = vsel %vm6780_vm9, %v649_v8, %v656_v33  ;;  %v963_v5 = vsel %vm6808_vm0, %v658_v39, %v962_v40  ;;  %v969_v33 = vld [vmem:[#allocation2 + $0x2c] sm:$0x1] }
  0xbb   : > { %v1164_v48 = vrot.slane %v1163_v37, 4  ;;  %v1015_v10 = vsel %vm6741_vm5, %v6900_v51, %v1014_v57  ;;  %v787_v11 = vshrl.u32 %v609_v63, 16  ;;  %v790_v12 = vshll.u32 %v609_v63, 16  ;;  %961 = vst.msk [vmem:[#allocation2 + $0x1c] sm:$0xf] %vm534_vm3, %v657_v4 }
  0xbc   : > { %v660_v34 = vshrl.u32 %v594_v25, 16  ;;  %v663_v50 = vshll.u32 %v594_v25, 16  ;;  %v796_v13 = vshrl.u32 %v610_v0, 16  ;;  %v2171_v8 = vpack.c.b16 %v2141_v54, %v2140_v35  ;;  %964 = vst [vmem:[#allocation2 + $0x20] sm:$0x1] %v963_v5 }
  0xbd   : > { %v434_v42 = vpop.f32.mrf.mxu0  ;;  %v1169_v58 = vsel %vm6802_vm15, %v1164_v48, %v1168_v49  ;;  %v1517_v16 = vunpack.c.l.b16 %v1159_v62  ;;  %v799_v19 = vshll.u32 %v610_v0, 16  ;;  %v789_v28 = vrot.slane %v787_v11, 7  ;;  %1016 = vst [vmem:[#allocation2 + $0x78] sm:$0xf] %v1015_v10 }
  0xbe   : > { %v6893_v45 = vrot.slane %v660_v34, 7  ;;  %v435_v46 = vadd.f32 %v6675_v27, %v434_v42  ;;  %v1518_v9 = vunpack.c.l.b16 %v1169_v58  ;;  %v6938_v29 = vrot.slane %v796_v13, 7  ;;  %5913 = vmatmul.msk.bf16.gmra.mxu3 %vm1587_vm1, %v2171_v8  ;;  %v1021_v42 = vld [vmem:[#allocation2 + $0x84] sm:$0xf]  ;;  %v1067_v58 = vld [vmem:[#allocation2 + $0x18] sm:$0xf] }
  0xbf   : > { %v792_v34 = vor.u32 %v790_v12, %v789_v28  ;;  %v794_v35 = vrot.slane %v789_v28, 4  ;;  %v475_v37 = vadd.f32 %v6675_v27, %v474_v20  ;;  %v2751_v38 = vshll.u32 %v6930_v23, 16 }
  0xc0   : > { %v507_v55 = vmax.f32 %v435_v46, 0.0  ;;  %v665_v59 = vor.u32 %v663_v50, %v6893_v45  ;;  %v666_v24 = vrot.slane %v6893_v45, 4  ;;  %v1548_v32 = vpack.c.b16 %v1518_v9, %v1517_v16 }
  0xc1   : > { %v801_v40 = vor.u32 %v799_v19, %v6938_v29  ;;  %v793_v41 = vsel %vm6780_vm9, %v785_v56, %v792_v34  ;;  %v6964_v48 = vrot.slane %v2745_v1, 5  ;;  %v1019_v60 = vsel %vm6808_vm0, %v794_v35, %v1018_v17  ;;  %v477_v1 = vpop.f32.mrf.mxu3  ;;  %v1968_v56 = vld [vmem:[#allocation2 + $0x18] sm:$0xe] }
  0xc2   : > { %v595_v7 = vpack.c.bf16 %v507_v55, %v507_v55  ;;  %v966_v25 = vsel %vm6741_vm5, %v665_v59, %v965_v6  ;;  %5761 = vmatmul.msk.bf16.gmra.mxu1 %vm1587_vm1, %v1548_v32  ;;  %v523_v49 = vmax.f32 %v475_v37, 0.0  ;;  %v6969_v50 = vrot.slane %v2751_v38, 5  ;;  %v972_v55 = vld [vmem:[#allocation2 + $0x30] sm:$0xf]  ;;  %1017 = vst.msk [vmem:[#allocation2 + $0x7c] sm:$0xf] %vm534_vm3, %v793_v41 }
  0xc3   : > { %967 = vst [vmem:[#allocation2 + $0x24] sm:$0xf] %v966_v25  ;;  %v2755_v51 = vshrl.u32 %v6930_v23, 16  ;;  %v802_v54 = vrot.slane %v6938_v29, 4  ;;  %v1022_v36 = vsel %vm6741_vm5, %v801_v40, %v1021_v42  ;;  %v6410_v62 = vld [vmem:[#allocation2 + $0x18] sm:$0xff]  ;;  %v5874_v5 = vrot.slane %v1968_v56, 9 }
  0xc4   : > { %v668_v15 = vshrl.u32 %v595_v7, 16  ;;  %v671_v31 = vshll.u32 %v595_v7, 16  ;;  %1020 = vst [vmem:[#allocation2 + $0x80] sm:$0x1] %v1019_v60  ;;  %v1068_v63 = vld [vmem:[#allocation2 + $0x1c] sm:$0xf]  ;;  %v611_v7 = vpack.c.bf16 %v523_v49, %v523_v49  ;;  %v6980_v9 = vadd.f32 %v6675_v27, %v477_v1  ;;  %6017 = vmatmul.msk.bf16.gmra.mxu0 %vm1587_vm1, %v6410_v62 }
  0xc5   : > { %v437_v26 = vpop.f32.mrf.mxu0  ;;  %v1105_v4 = vld [vmem:[#allocation2 + $0x20] sm:$0x1]  ;;  %v2033_v6 = vrot.slane %v1068_v63, 5  ;;  %1023 = vst [vmem:[#allocation2 + $0x84] sm:$0xf] %v1022_v36  ;;  %v1171_v16 = vshrl.u32 %v1067_v58, 16 }
  0xc6   : > { %v670_v30 = vrot.slane %v668_v15, 7  ;;  %v438_v21 = vadd.f32 %v6675_v27, %v437_v26  ;;  %v2036_v12 = vrot.slane %v1105_v4, 5  ;;  %v1174_v19 = vshll.u32 %v1067_v58, 16  ;;  %v1025_v36 = vld [vmem:[#allocation2 + $0x8c] sm:$0x1] }
  0xc7   : > { %v2034_v8 = vsel %vm6796_vm14, %v5874_v5, %v2033_v6  ;;  %v2035_v15 = vrot.slane %v2033_v6, 4  ;;  %v1180_v26 = vshll.u32 %v1068_v63, 16  ;;  %v1184_v32 = vshrl.u32 %v1068_v63, 16 }
  0xc8   : > { %v673_v39 = vor.u32 %v671_v31, %v670_v30  ;;  %v675_v61 = vrot.slane %v670_v30, 4  ;;  %v508_v2 = vmax.f32 %v438_v21, 0.0  ;;  %v1173_v30 = vrot.slane %v1171_v16, 4 }
  0xc9   : > { %v2037_v28 = vsel %vm6796_vm14, %v2035_v15, %v2036_v12  ;;  %v1176_v31 = vrot.slane %v1174_v19, 5  ;;  %v1182_v35 = vrot.slane %v1180_v26, 5  ;;  %v1186_v38 = vrot.slane %v1184_v32, 4  ;;  %v6991_v40 = vpop.f32.mrf.mxu3 }
  0xca   : > { %v674_v44 = vsel %vm6780_vm9, %v666_v24, %v673_v39  ;;  %v970_v45 = vsel %vm6808_vm0, %v675_v61, %v969_v33  ;;  %v596_v46 = vpack.c.bf16 %v508_v2, %v508_v2  ;;  %v2142_v24 = vunpack.c.l.b16 %v2034_v8  ;;  %v1969_v17 = vld [vmem:[#allocation2 + $0x24] sm:$0xe] }
  0xcb   : > { %968 = vst.msk [vmem:[#allocation2 + $0x28] sm:$0xf] %vm534_vm3, %v674_v44  ;;  %v2143_v21 = vunpack.c.l.b16 %v2037_v28  ;;  %v1177_v37 = vor.u32 %v1176_v31, %v1173_v30  ;;  %v1190_v39 = vshll.u32 %v1105_v4, 16  ;;  %v804_v2 = vshrl.u32 %v611_v7, 16  ;;  %v976_v44 = vld [vmem:[#allocation2 + $0x38] sm:$0x1] }
  0xcc   : > { %971 = vst [vmem:[#allocation2 + $0x2c] sm:$0x1] %v970_v45  ;;  %v677_v52 = vshrl.u32 %v596_v46, 16  ;;  %v680_v53 = vshll.u32 %v596_v46, 16  ;;  %v807_v46 = vshll.u32 %v611_v7, 16  ;;  %v1187_v49 = vor.u32 %v1186_v38, %v1182_v35 }
  0xcd   : > { %v439_v57 = vpop.f32.mrf.mxu0  ;;  %v2172_v41 = vpack.c.b16 %v2143_v21, %v2142_v24  ;;  %v1178_v60 = vrot.slane %v1177_v37, 4  ;;  %v5875_v58 = vrot.slane %v1969_v17, 9  ;;  %v1069_v12 = vld [vmem:[#allocation2 + $0x24] sm:$0xf] }
  0xce   : > { %v6976_v59 = vrot.slane %v677_v52, 7  ;;  %v440_v0 = vadd.f32 %v6675_v27, %v439_v57  ;;  %v1192_v52 = vrot.slane %v1190_v39, 5  ;;  %v1188_v62 = vrot.slane %v1187_v49, 4 }
  0xcf   : > { %5914 = vmatmul.msk.bf16.gmra.mxu3 %vm1587_vm1, %v2172_v41  ;;  %v1195_v30 = vshrl.u32 %v1069_v12, 16  ;;  %v1198_v39 = vshll.u32 %v1069_v12, 16 }
  0xd0   : > { %v682_v10 = vor.u32 %v680_v53, %v6976_v59  ;;  %v683_v11 = vrot.slane %v6976_v59, 4  ;;  %v509_v13 = vmax.f32 %v440_v0, 0.0  ;;  %v806_v53 = vrot.slane %v804_v2, 7 }
  0xd1   : > { %v1183_v59 = vsel %vm6802_vm15, %v1178_v60, %v1182_v35  ;;  %v1197_v38 = vrot.slane %v1195_v30, 4 }
  0xd2   : > { %v973_v20 = vsel %vm6741_vm5, %v682_v10, %v972_v55  ;;  %v597_v25 = vpack.c.bf16 %v509_v13, %v509_v13  ;;  %v6995_v57 = vld [vmem:[#allocation2 + $0x28] sm:$0xf]  ;;  %v809_v63 = vor.u32 %v807_v46, %v806_v53  ;;  %v811_v0 = vrot.slane %v806_v53, 4  ;;  %v1028_v53 = vld [vmem:[#allocation2 + $0x90] sm:$0xf] }
  0xd3   : > { %974 = vst [vmem:[#allocation2 + $0x30] sm:$0xf] %v973_v20  ;;  %v6999_v4 = vld [vmem:[#allocation2 + $0x2c] sm:$0x1]  ;;  %v1519_v7 = vunpack.c.l.b16 %v1183_v59  ;;  %v1193_v13 = vsel %vm6802_vm15, %v1188_v62, %v1192_v52  ;;  %v6411_v24 = vld [vmem:[#allocation2 + $0x24] sm:$0xff]  ;;  %v1204_v46 = vshll.u32 %v6995_v57, 16 }
  0xd4   : > { %v685_v33 = vshrl.u32 %v597_v25, 16  ;;  %v688_v34 = vshll.u32 %v597_v25, 16  ;;  %v810_v8 = vsel %vm6780_vm9, %v802_v54, %v809_v63  ;;  %v1026_v15 = vsel %vm6808_vm0, %v811_v0, %v1025_v36  ;;  %6018 = vmatmul.msk.bf16.gmra.mxu0 %vm1587_vm1, %v6411_v24 }
  0xd5   : > { %v442_v61 = vpop.f32.mrf.mxu0  ;;  %v1520_v16 = vunpack.c.l.b16 %v1193_v13  ;;  %v2043_v25 = vrot.slane %v6999_v4, 5  ;;  %1024 = vst.msk [vmem:[#allocation2 + $0x88] sm:$0xf] %vm534_vm3, %v810_v8  ;;  %v524_v54 = vmax.f32 %v6980_v9, 0.0  ;;  %v1208_v36 = vshrl.u32 %v6995_v57, 16 }
  0xd6   : > { %v687_v42 = vrot.slane %v685_v33, 7  ;;  %v443_v45 = vadd.f32 %v6675_v27, %v442_v61  ;;  %1027 = vst [vmem:[#allocation2 + $0x8c] sm:$0x1] %v1026_v15  ;;  %v7025_v61 = vpop.f32.mrf.mxu3  ;;  %v1214_v59 = vshll.u32 %v6999_v4, 16 }
  0xd7   : > { %v1549_v31 = vpack.c.b16 %v1520_v16, %v1519_v7  ;;  %v612_v37 = vpack.c.bf16 %v524_v54, %v524_v54  ;;  %v1210_v0 = vrot.slane %v1208_v36, 4  ;;  %v983_v16 = vld [vmem:[#allocation2 + $0x44] sm:$0x1] }
  0xd8   : > { %v690_v1 = vor.u32 %v688_v34, %v687_v42  ;;  %v692_v55 = vrot.slane %v687_v42, 4  ;;  %v510_v56 = vmax.f32 %v443_v45, 0.0  ;;  %v979_v34 = vld [vmem:[#allocation2 + $0x3c] sm:$0xf]  ;;  %v1200_v45 = vrot.slane %v1198_v39, 5 }
  0xd9   : > { %5762 = vmatmul.msk.bf16.gmra.mxu1 %vm1587_vm1, %v1549_v31  ;;  %v813_v42 = vshrl.u32 %v612_v37, 16  ;;  %v1216_v12 = vrot.slane %v1214_v59, 5 }
  0xda   : > { %v691_v5 = vsel %vm6780_vm9, %v683_v11, %v690_v1  ;;  %v977_v6 = vsel %vm6808_vm0, %v692_v55, %v976_v44  ;;  %v598_v10 = vpack.c.bf16 %v510_v56, %v510_v56  ;;  %v2040_v11 = vrot.slane %v6995_v57, 5  ;;  %v1970_v1 = vld [vmem:[#allocation2 + $0x30] sm:$0xe] }
  0xdb   : > { %975 = vst.msk [vmem:[#allocation2 + $0x34] sm:$0xf] %vm534_vm3, %v691_v5  ;;  %v816_v44 = vshll.u32 %v612_v37, 16  ;;  %v7035_v55 = vrot.slane %v813_v42, 7  ;;  %v1201_v56 = vor.u32 %v1200_v45, %v1197_v38  ;;  %v480_v5 = vadd.f32 %v6675_v27, %v6991_v40 }
  0xdc   : > { %978 = vst [vmem:[#allocation2 + $0x38] sm:$0x1] %v977_v6  ;;  %v694_v19 = vshrl.u32 %v598_v10, 16  ;;  %v697_v20 = vshll.u32 %v598_v10, 16  ;;  %v2041_v29 = vsel %vm6796_vm14, %v5875_v58, %v2040_v11  ;;  %v2042_v26 = vrot.slane %v2040_v11, 4 }
  0xdd   : > { %v444_v28 = vpop.f32.mrf.mxu0  ;;  %v2144_v21 = vunpack.c.l.b16 %v2041_v29  ;;  %v1206_v58 = vrot.slane %v1204_v46, 5  ;;  %v818_v7 = vor.u32 %v816_v44, %v7035_v55  ;;  %v819_v57 = vrot.slane %v7035_v55, 4 }
  0xde   : > { %v7020_v32 = vrot.slane %v694_v19, 7  ;;  %v445_v33 = vadd.f32 %v6675_v27, %v444_v28  ;;  %v2044_v35 = vsel %vm6796_vm14, %v2042_v26, %v2043_v25  ;;  %v1202_v10 = vrot.slane %v1201_v56, 4  ;;  %v1032_v56 = vld [vmem:[#allocation2 + $0x98] sm:$0x1] }
  0xdf   : > { %v2145_v17 = vunpack.c.l.b16 %v2044_v35  ;;  %v1211_v15 = vor.u32 %v1210_v0, %v1206_v58  ;;  %v525_v4 = vmax.f32 %v480_v5, 0.0  ;;  %v1029_v19 = vsel %vm6741_vm5, %v818_v7, %v1028_v53 }
  0xe0   : > { %v699_v9 = vor.u32 %v697_v20, %v7020_v32  ;;  %v700_v2 = vrot.slane %v7020_v32, 4  ;;  %v511_v41 = vmax.f32 %v445_v33, 0.0  ;;  %v1207_v40 = vsel %vm6802_vm15, %v1202_v10, %v1206_v58  ;;  %1030 = vst [vmem:[#allocation2 + $0x90] sm:$0xf] %v1029_v19  ;;  %v1071_v33 = vld [vmem:[#allocation2 + $0x30] sm:$0xf] }
  0xe1   : > { %v2173_v49 = vpack.c.b16 %v2145_v17, %v2144_v21  ;;  %v5876_v24 = vrot.slane %v1970_v1, 9  ;;  %v1212_v28 = vrot.slane %v1211_v15, 4  ;;  %v1521_v54 = vunpack.c.l.b16 %v1207_v40 }
  0xe2   : > { %v980_v60 = vsel %vm6741_vm5, %v699_v9, %v979_v34  ;;  %v599_v52 = vpack.c.bf16 %v511_v41, %v511_v41  ;;  %v7040_v6 = vld [vmem:[#allocation2 + $0x34] sm:$0xf]  ;;  %v613_v31 = vpack.c.bf16 %v525_v4, %v525_v4  ;;  %v484_v34 = vpop.f32.mrf.mxu3  ;;  %v483_v46 = vadd.f32 %v6675_v27, %v7025_v61 }
  0xe3   : > { %981 = vst [vmem:[#allocation2 + $0x3c] sm:$0xf] %v980_v60  ;;  %v7049_v20 = vld [vmem:[#allocation2 + $0x38] sm:$0x1]  ;;  %v2047_v25 = vrot.slane %v7040_v6, 5  ;;  %5915 = vmatmul.msk.bf16.gmra.mxu3 %vm1587_vm1, %v2173_v49  ;;  %v1217_v38 = vsel %vm6802_vm15, %v1212_v28, %v1216_v12  ;;  %v6412_v44 = vld [vmem:[#allocation2 + $0x30] sm:$0xff] }
  0xe4   : > { %v702_v62 = vshrl.u32 %v599_v52, 16  ;;  %v705_v63 = vshll.u32 %v599_v52, 16  ;;  %v2050_v39 = vrot.slane %v7049_v20, 5  ;;  %v1522_v9 = vunpack.c.l.b16 %v1217_v38  ;;  %v986_v12 = vld [vmem:[#allocation2 + $0x48] sm:$0xf]  ;;  %6019 = vmatmul.msk.bf16.gmra.mxu0 %vm1587_vm1, %v6412_v44 }
  0xe5   : > { %v447_v13 = vpop.f32.mrf.mxu0  ;;  %v2048_v32 = vsel %vm6796_vm14, %v5876_v24, %v2047_v25  ;;  %v2049_v21 = vrot.slane %v2047_v25, 4  ;;  %v821_v41 = vshrl.u32 %v613_v31, 16  ;;  %v824_v42 = vshll.u32 %v613_v31, 16 }
  0xe6   : > { %v704_v8 = vrot.slane %v702_v62, 7  ;;  %v448_v11 = vadd.f32 %v6675_v27, %v447_v13  ;;  %v1219_v60 = vshrl.u32 %v1071_v33, 16  ;;  %v1550_v49 = vpack.c.b16 %v1522_v9, %v1521_v54 }
  0xe7   : > { %v2051_v45 = vsel %vm6796_vm14, %v2049_v21, %v2050_v39  ;;  %v823_v36 = vrot.slane %v821_v41, 7  ;;  %v526_v62 = vmax.f32 %v483_v46, 0.0  ;;  %v1222_v10 = vshll.u32 %v1071_v33, 16 }
  0xe8   : > { %v707_v29 = vor.u32 %v705_v63, %v704_v8  ;;  %v709_v26 = vrot.slane %v704_v8, 4  ;;  %v512_v30 = vmax.f32 %v448_v11, 0.0  ;;  %v2147_v58 = vunpack.c.l.b16 %v2051_v45 }
  0xe9   : > { %v1221_v63 = vrot.slane %v1219_v60, 4  ;;  %v826_v5 = vor.u32 %v824_v42, %v823_v36  ;;  %v828_v7 = vrot.slane %v823_v36, 4  ;;  %5763 = vmatmul.msk.bf16.gmra.mxu1 %vm1587_vm1, %v1550_v49  ;;  %v614_v8 = vpack.c.bf16 %v526_v62, %v526_v62  ;;  %v990_v42 = vld [vmem:[#allocation2 + $0x50] sm:$0x1] }
  0xea   : > { %v708_v35 = vsel %vm6780_vm9, %v700_v2, %v707_v29  ;;  %v984_v37 = vsel %vm6808_vm0, %v709_v26, %v983_v16  ;;  %v600_v17 = vpack.c.bf16 %v512_v30, %v512_v30  ;;  %v2146_v2 = vunpack.c.l.b16 %v2048_v32  ;;  %v1971_v26 = vld [vmem:[#allocation2 + $0x3c] sm:$0xe] }
  0xeb   : > { %982 = vst.msk [vmem:[#allocation2 + $0x40] sm:$0xf] %vm534_vm3, %v708_v35  ;;  %v1228_v15 = vshll.u32 %v7040_v6, 16  ;;  %v827_v16 = vsel %vm6780_vm9, %v819_v57, %v826_v5  ;;  %v1033_v19 = vsel %vm6808_vm0, %v828_v7, %v1032_v56  ;;  %v830_v24 = vshrl.u32 %v614_v8, 16  ;;  %v487_v57 = vpop.f32.mrf.mxu3  ;;  %v1035_v35 = vld [vmem:[#allocation2 + $0x9c] sm:$0xf] }
  0xec   : > { %985 = vst [vmem:[#allocation2 + $0x44] sm:$0x1] %v984_v37  ;;  %v711_v52 = vshrl.u32 %v600_v17, 16  ;;  %v714_v53 = vshll.u32 %v600_v17, 16  ;;  %v2174_v61 = vpack.c.b16 %v2147_v58, %v2146_v2  ;;  %v833_v25 = vshll.u32 %v614_v8, 16 }
  0xed   : > { %v449_v1 = vpop.f32.mrf.mxu0  ;;  %1031 = vst.msk [vmem:[#allocation2 + $0x94] sm:$0xf] %vm534_vm3, %v827_v16  ;;  %v1224_v29 = vrot.slane %v1222_v10, 5  ;;  %v1230_v54 = vrot.slane %v1228_v15, 5  ;;  %v1232_v55 = vshrl.u32 %v7040_v6, 16  ;;  %v1238_v30 = vshll.u32 %v7049_v20, 16 }
  0xee   : > { %v450_v59 = vadd.f32 %v6675_v27, %v449_v1  ;;  %v713_v0 = vrot.slane %v711_v52, 7  ;;  %1034 = vst [vmem:[#allocation2 + $0x98] sm:$0x1] %v1033_v19  ;;  %v7082_v21 = vrot.slane %v830_v24, 7  ;;  %v485_v9 = vadd.f32 %v6675_v27, %v484_v34  ;;  %v7091_v2 = vld [vmem:[%s8750_s2] ss:$0 sm:$0xff] }
  0xef   : > { %v1225_v33 = vor.u32 %v1224_v29, %v1221_v63  ;;  %v1234_v37 = vrot.slane %v1232_v55, 4  ;;  %v1240_v38 = vrot.slane %v1238_v30, 5  ;;  %v488_v17 = vadd.f32 %v6675_v27, %v487_v57  ;;  %v1039_v55 = vld [vmem:[#allocation2 + $0xa4] sm:$0x1] }
  0xf0   : > { %v513_v13 = vmax.f32 %v450_v59, 0.0  ;;  %v716_v11 = vor.u32 %v714_v53, %v713_v0  ;;  %v717_v4 = vrot.slane %v713_v0, 4  ;;  %v835_v6 = vor.u32 %v833_v25, %v7082_v21 }
  0xf1   : > { %v836_v20 = vrot.slane %v7082_v21, 4  ;;  %v1226_v44 = vrot.slane %v1225_v33, 4  ;;  %v1235_v45 = vor.u32 %v1234_v37, %v1230_v54  ;;  %v527_v60 = vmax.f32 %v485_v9, 0.0  ;;  %v993_v37 = vld [vmem:[#allocation2 + $0x54] sm:$0xf] }
  0xf2   : > { %v601_v40 = vpack.c.bf16 %v513_v13, %v513_v13  ;;  %v987_v28 = vsel %vm6741_vm5, %v716_v11, %v986_v12  ;;  %v7094_v49 = vld [vmem:[#allocation2 + $0x40] sm:$0xf]  ;;  %v5877_v27 = vrot.slane %v1971_v26, 9  ;;  %v1036_v36 = vsel %vm6741_vm5, %v835_v6, %v1035_v35  ;;  %v1073_v26 = vld [vmem:[#allocation2 + $0x3c] sm:$0xf] }
  0xf3   : > { %988 = vst [vmem:[#allocation2 + $0x48] sm:$0xf] %v987_v28  ;;  %v7096_v34 = vld [vmem:[#allocation2 + $0x44] sm:$0x1]  ;;  %5916 = vmatmul.msk.bf16.gmra.mxu3 %vm1587_vm1, %v2174_v61  ;;  %v1231_v1 = vsel %vm6802_vm15, %v1226_v44, %v1230_v54  ;;  %v1236_v56 = vrot.slane %v1235_v45, 4  ;;  %v615_v62 = vpack.c.bf16 %v527_v60, %v527_v60  ;;  %v2054_v5 = vrot.slane %v7094_v49, 5  ;;  %v489_v28 = vpop.f32.mrf.mxu3 }
  0xf4   : > { %v719_v31 = vshrl.u32 %v601_v40, 16  ;;  %v722_v32 = vshll.u32 %v601_v40, 16  ;;  %1037 = vst [vmem:[#allocation2 + $0x9c] sm:$0xf] %v1036_v36  ;;  %v1523_v58 = vunpack.c.l.b16 %v1231_v1  ;;  %v2057_v7 = vrot.slane %v7096_v34, 5  ;;  %v6413_v15 = vld [vmem:[#allocation2 + $0x3c] sm:$0xff] }
  0xf5   : > { %v452_v39 = vpop.f32.mrf.mxu0  ;;  %v1241_v10 = vsel %vm6802_vm15, %v1236_v56, %v1240_v38  ;;  %v838_v61 = vshrl.u32 %v615_v62, 16  ;;  %v841_v13 = vshll.u32 %v615_v62, 16  ;;  %v2055_v11 = vsel %vm6796_vm14, %v5877_v27, %v2054_v5  ;;  %6020 = vmatmul.msk.bf16.gmra.mxu0 %vm1587_vm1, %v6413_v15  ;;  %v1042_v45 = vld [vmem:[#allocation2 + $0xa8] sm:$0xf] }
  0xf6   : > { %v721_v41 = vrot.slane %v719_v31, 7  ;;  %v453_v46 = vadd.f32 %v7091_v2, %v452_v39  ;;  %v1524_v8 = vunpack.c.l.b16 %v1241_v10  ;;  %v528_v16 = vmax.f32 %v488_v17, 0.0 }
  0xf7   : > { %v840_v24 = vrot.slane %v838_v61, 7  ;;  %v2148_v25 = vunpack.c.l.b16 %v2055_v11  ;;  %v1243_v17 = vshrl.u32 %v1073_v26, 16  ;;  %v1246_v1 = vshll.u32 %v1073_v26, 16 }
  0xf8   : > { %v724_v52 = vor.u32 %v722_v32, %v721_v41  ;;  %v726_v53 = vrot.slane %v721_v41, 4  ;;  %v514_v59 = vmax.f32 %v453_v46, 0.0  ;;  %v1551_v54 = vpack.c.b16 %v1524_v8, %v1523_v58 }
  0xf9   : > { %v616_v31 = vpack.c.bf16 %v528_v16, %v528_v16  ;;  %v843_v21 = vor.u32 %v841_v13, %v840_v24  ;;  %v845_v33 = vrot.slane %v840_v24, 4  ;;  %v1252_v56 = vshll.u32 %v7094_v49, 16 }
  0xfa   : > { %v725_v63 = vsel %vm6780_vm9, %v717_v4, %v724_v52  ;;  %v991_v0 = vsel %vm6808_vm0, %v726_v53, %v990_v42  ;;  %v602_v12 = vpack.c.bf16 %v514_v59, %v514_v59  ;;  %v2056_v4 = vrot.slane %v2054_v5, 4  ;;  %5764 = vmatmul.msk.bf16.gmra.mxu1 %vm1587_vm1, %v1551_v54  ;;  %v1972_v53 = vld [vmem:[#allocation2 + $0x48] sm:$0xe] }
  0xfb   : > { %989 = vst.msk [vmem:[#allocation2 + $0x4c] sm:$0xf] %vm534_vm3, %v725_v63  ;;  %v847_v39 = vshrl.u32 %v616_v31, 16  ;;  %v850_v9 = vshll.u32 %v616_v31, 16  ;;  %v844_v6 = vsel %vm6780_vm9, %v836_v20, %v843_v21  ;;  %v1040_v44 = vsel %vm6808_vm0, %v845_v33, %v1039_v55 }
  0xfc   : > { %992 = vst [vmem:[#allocation2 + $0x50] sm:$0x1] %v991_v0  ;;  %v728_v19 = vshrl.u32 %v602_v12, 16  ;;  %v731_v40 = vshll.u32 %v602_v12, 16  ;;  %v2058_v30 = vsel %vm6796_vm14, %v2056_v4, %v2057_v7  ;;  %v1245_v52 = vrot.slane %v1243_v17, 4 }
  0xfd   : > { %v454_v29 = vpop.f32.mrf.mxu0  ;;  %v2149_v35 = vunpack.c.l.b16 %v2058_v30  ;;  %1038 = vst.msk [vmem:[#allocation2 + $0xa0] sm:$0xf] %vm534_vm3, %v844_v6  ;;  %v7124_v27 = vrot.slane %v847_v39, 7  ;;  %v1256_v20 = vshrl.u32 %v7094_v49, 16  ;;  %v1248_v0 = vrot.slane %v1246_v1, 5 }
  0xfe   : > { %v455_v57 = vadd.f32 %v7091_v2, %v454_v29  ;;  %v730_v32 = vrot.slane %v728_v19, 7  ;;  %1041 = vst [vmem:[#allocation2 + $0xa4] sm:$0x1] %v1040_v44  ;;  %v1254_v5 = vrot.slane %v1252_v56, 5  ;;  %v1262_v10 = vshll.u32 %v7096_v34, 16  ;;  %v492_v34 = vpop.f32.mrf.mxu3 }
  0xff   : > { %v2175_v46 = vpack.c.b16 %v2149_v35, %v2148_v25  ;;  %v852_v62 = vor.u32 %v850_v9, %v7124_v27  ;;  %v853_v63 = vrot.slane %v7124_v27, 4  ;;  %v1258_v7 = vrot.slane %v1256_v20, 4  ;;  %v997_v4 = vld [vmem:[#allocation2 + $0x5c] sm:$0x1]  ;;  %v1075_v9 = vld [vmem:[#allocation2 + $0x48] sm:$0xf] }
 0x100   : > { %v515_v38 = vmax.f32 %v455_v57, 0.0  ;;  %v733_v41 = vor.u32 %v731_v40, %v730_v32  ;;  %v734_v42 = vrot.slane %v730_v32, 4  ;;  %v490_v49 = vadd.f32 %v7091_v2, %v489_v28 }
 0x101   : > { %v1043_v13 = vsel %vm6741_vm5, %v852_v62, %v1042_v45  ;;  %v1249_v16 = vor.u32 %v1248_v0, %v1245_v52  ;;  %v1259_v19 = vor.u32 %v1258_v7, %v1254_v5  ;;  %v1264_v40 = vrot.slane %v1262_v10, 5  ;;  %v1046_v10 = vld [vmem:[#allocation2 + $0xb0] sm:$0x1] }
 0x102   : > { %v603_v60 = vpack.c.bf16 %v515_v38, %v515_v38  ;;  %v994_v36 = vsel %vm6741_vm5, %v733_v41, %v993_v37  ;;  %v7137_v15 = vld [vmem:[#allocation2 + $0x4c] sm:$0xf]  ;;  %1044 = vst [vmem:[#allocation2 + $0xa8] sm:$0xf] %v1043_v13  ;;  %v5878_v24 = vrot.slane %v1972_v53, 9  ;;  %v529_v54 = vmax.f32 %v490_v49, 0.0 }
 0x103   : > { %995 = vst [vmem:[#allocation2 + $0x54] sm:$0xf] %v994_v36  ;;  %v7139_v11 = vld [vmem:[#allocation2 + $0x50] sm:$0x1]  ;;  %5917 = vmatmul.msk.bf16.gmra.mxu3 %vm1587_vm1, %v2175_v46  ;;  %v1250_v55 = vrot.slane %v1249_v16, 4  ;;  %v1260_v30 = vrot.slane %v1259_v19, 4  ;;  %v493_v62 = vadd.f32 %v7091_v2, %v492_v34 }
 0x104   : > { %v736_v58 = vshrl.u32 %v603_v60, 16  ;;  %v739_v59 = vshll.u32 %v603_v60, 16  ;;  %v2061_v28 = vrot.slane %v7137_v15, 5  ;;  %v2064_v57 = vrot.slane %v7139_v11, 5  ;;  %v6414_v44 = vld [vmem:[#allocation2 + $0x48] sm:$0xff] }
 0x105   : > { %v457_v12 = vpop.f32.mrf.mxu0  ;;  %v617_v33 = vpack.c.bf16 %v529_v54, %v529_v54  ;;  %v1255_v35 = vsel %vm6802_vm15, %v1250_v55, %v1254_v5  ;;  %v1265_v37 = vsel %vm6802_vm15, %v1260_v30, %v1264_v40  ;;  %v1267_v0 = vshrl.u32 %v1075_v9, 16  ;;  %6021 = vmatmul.msk.bf16.gmra.mxu0 %vm1587_vm1, %v6414_v44  ;;  %v6432_v40 = vld [vmem:[%s8751_s3 + $0x98] sm:$0xff]  ;;  %v6431_v55 = vld [vmem:[%s8751_s3 + $0x90] sm:$0xff] }
 0x106   : > { %v738_v61 = vrot.slane %v736_v58, 7  ;;  %v458_v8 = vadd.f32 %v7091_v2, %v457_v12  ;;  %v2062_v38 = vsel %vm6796_vm14, %v5878_v24, %v2061_v28  ;;  %v2063_v39 = vrot.slane %v2061_v28, 4  ;;  %v1000_v58 = vld [vmem:[#allocation2 + $0x60] sm:$0xf]  ;;  %v494_v19 = vpop.f32.mrf.mxu3  ;;  %3258 = vmatpush.bf16.msrb.mxu1 %v6432_v40 }
 0x107   : > { %v1525_v17 = vunpack.c.l.b16 %v1255_v35  ;;  %v1526_v41 = vunpack.c.l.b16 %v1265_v37  ;;  %v855_v45 = vshrl.u32 %v617_v33, 16  ;;  %v858_v46 = vshll.u32 %v617_v33, 16 }
 0x108   : > { %v741_v25 = vor.u32 %v739_v59, %v738_v61  ;;  %v743_v29 = vrot.slane %v738_v61, 4  ;;  %v516_v26 = vmax.f32 %v458_v8, 0.0  ;;  %v2065_v60 = vsel %vm6796_vm14, %v2063_v39, %v2064_v57 }
 0x109   : > { %v2150_v52 = vunpack.c.l.b16 %v2062_v38  ;;  %v1552_v36 = vpack.c.b16 %v1526_v41, %v1525_v17  ;;  %v2151_v56 = vunpack.c.l.b16 %v2065_v60  ;;  %v857_v59 = vrot.slane %v855_v45, 7 }
 0x10a   : > { %v742_v31 = vsel %vm6780_vm9, %v734_v42, %v741_v25  ;;  %v998_v32 = vsel %vm6808_vm0, %v743_v29, %v997_v4  ;;  %v604_v21 = vpack.c.bf16 %v516_v26, %v516_v26  ;;  %v1270_v5 = vshll.u32 %v1075_v9, 16  ;;  %v1973_v9 = vld [vmem:[#allocation2 + $0x54] sm:$0xe]  ;;  %3259 = vmatpush.bf16.msrb.mxu1 %v6431_v55 }
 0x10b   : > { %996 = vst.msk [vmem:[#allocation2 + $0x58] sm:$0xf] %vm534_vm3, %v742_v31  ;;  %5765 = vmatmul.msk.bf16.gmra.mxu1 %vm1587_vm1, %v1552_v36  ;;  %v2176_v12 = vpack.c.b16 %v2151_v56, %v2150_v52  ;;  %v7166_v13 = vrot.slane %v2755_v51, 4  ;;  %v860_v8 = vor.u32 %v858_v46, %v857_v59  ;;  %v862_v49 = vrot.slane %v857_v59, 4 }
 0x10c   : > { %999 = vst [vmem:[#allocation2 + $0x5c] sm:$0x1] %v998_v32  ;;  %v745_v42 = vshrl.u32 %v604_v21, 16  ;;  %v748_v6 = vshll.u32 %v604_v21, 16  ;;  %v530_v4 = vmax.f32 %v493_v62, 0.0  ;;  %v1269_v16 = vrot.slane %v1267_v0, 4 }
 0x10d   : > { %v459_v53 = vpop.f32.mrf.mxu0  ;;  %v1272_v25 = vrot.slane %v1270_v5, 5  ;;  %v1276_v29 = vshll.u32 %v7137_v15, 16  ;;  %v861_v23 = vsel %vm6780_vm9, %v853_v63, %v860_v8  ;;  %v1047_v51 = vsel %vm6808_vm0, %v862_v49, %v1046_v10 }
 0x10e   : > { %v7157_v1 = vrot.slane %v745_v42, 7  ;;  %v460_v20 = vadd.f32 %v7091_v2, %v459_v53  ;;  %v618_v26 = vpack.c.bf16 %v530_v4, %v530_v4  ;;  %v1280_v54 = vshrl.u32 %v7137_v15, 16  ;;  %1045 = vst.msk [vmem:[#allocation2 + $0xac] sm:$0xf] %vm534_vm3, %v861_v23  ;;  %v1004_v15 = vld [vmem:[#allocation2 + $0x68] sm:$0x1]  ;;  %v497_v49 = vpop.f32.mrf.mxu3 }
 0x10f   : > { %v1273_v57 = vor.u32 %v1272_v25, %v1269_v16  ;;  %v1278_v27 = vrot.slane %v1276_v29, 5  ;;  %1048 = vst [vmem:[#allocation2 + $0xb0] sm:$0x1] %v1047_v51  ;;  %v1286_v21 = vshll.u32 %v7139_v11, 16  ;;  %v495_v39 = vadd.f32 %v7091_v2, %v494_v19  ;;  %v1049_v42 = vld [vmem:[#allocation2 + $0xb4] sm:$0xf] }
 0x110   : > { %v750_v7 = vor.u32 %v748_v6, %v7157_v1  ;;  %v517_v61 = vmax.f32 %v460_v20, 0.0  ;;  %v864_v31 = vshrl.u32 %v618_v26, 16  ;;  %v867_v63 = vshll.u32 %v618_v26, 16  ;;  %v6430_v11 = vld [vmem:[%s8751_s3 + $0x88] sm:$0xff]  ;;  %v6429_v4 = vld [vmem:[%s8751_s3 + $0x80] sm:$0xff]  ;;  %v6400_v25 = vld [vmem:[%s8751_s3 + $0x18] sm:$0xff] }
 0x111   : > { %v1282_v32 = vrot.slane %v1280_v54, 4  ;;  %v1274_v37 = vrot.slane %v1273_v57, 4  ;;  %v751_v17 = vrot.slane %v7157_v1, 4  ;;  %v1288_v44 = vrot.slane %v1286_v21, 5  ;;  %3260 = vmatpush.bf16.msrb.mxu1 %v6430_v11  ;;  %1881 = vmatpush.bf16.msrb.mxu2 %v6400_v25 }
 0x112   : > { %v1001_v24 = vsel %vm6741_vm5, %v750_v7, %v1000_v58  ;;  %v605_v34 = vpack.c.bf16 %v517_v61, %v517_v61  ;;  %v7189_v41 = vrot.slane %v864_v31, 7  ;;  %v7197_v53 = vld [vmem:[#allocation2 + $0x58] sm:$0xf]  ;;  %v5879_v58 = vrot.slane %v1973_v9, 9  ;;  %v1077_v7 = vld [vmem:[#allocation2 + $0x54] sm:$0xf] }
 0x113   : > { %1002 = vst [vmem:[#allocation2 + $0x60] sm:$0xf] %v1001_v24  ;;  %v1283_v6 = vor.u32 %v1282_v32, %v1278_v27  ;;  %5918 = vmatmul.msk.bf16.gmra.mxu3 %vm1587_vm1, %v2176_v12  ;;  %v1279_v60 = vsel %vm6802_vm15, %v1274_v37, %v1278_v27  ;;  %v7199_v36 = vld [vmem:[#allocation2 + $0x5c] sm:$0x1]  ;;  %v531_v5 = vmax.f32 %v495_v39, 0.0  ;;  %v2068_v61 = vrot.slane %v7197_v53, 5 }
 0x114   : > { %v753_v30 = vshrl.u32 %v605_v34, 16  ;;  %v756_v28 = vshll.u32 %v605_v34, 16  ;;  %v869_v1 = vor.u32 %v867_v63, %v7189_v41  ;;  %v1527_v20 = vunpack.c.l.b16 %v1279_v60  ;;  %v6415_v24 = vld [vmem:[#allocation2 + $0x54] sm:$0xff]  ;;  %v1007_v31 = vld [vmem:[#allocation2 + $0x6c] sm:$0xf] }
 0x115   : > { %v462_v33 = vpop.f32.mrf.mxu0  ;;  %v1284_v56 = vrot.slane %v1283_v6, 4  ;;  %v2071_v8 = vrot.slane %v7199_v36, 5  ;;  %v619_v34 = vpack.c.bf16 %v531_v5, %v531_v5  ;;  %v2069_v29 = vsel %vm6796_vm14, %v5879_v58, %v2068_v61  ;;  %3261 = vmatpush.bf16.msrb.mxu1 %v6429_v4  ;;  %6022 = vmatmul.msk.bf16.gmra.mxu0 %vm1587_vm1, %v6415_v24 }
 0x116   : > { %v755_v35 = vrot.slane %v753_v30, 7  ;;  %v463_v38 = vadd.f32 %v7091_v2, %v462_v33  ;;  %v1050_v10 = vsel %vm6741_vm5, %v869_v1, %v1049_v42  ;;  %v2070_v23 = vrot.slane %v2068_v61, 4 }
 0x117   : > { %v1289_v12 = vsel %vm6802_vm15, %v1284_v56, %v1288_v44  ;;  %1051 = vst [vmem:[#allocation2 + $0xb4] sm:$0xf] %v1050_v10  ;;  %v498_v26 = vadd.f32 %v7091_v2, %v497_v49  ;;  %v1291_v54 = vshrl.u32 %v1077_v7, 16  ;;  %v875_v57 = vshll.u32 %v619_v34, 16 }
 0x118   : > { %v758_v45 = vor.u32 %v756_v28, %v755_v35  ;;  %v760_v46 = vrot.slane %v755_v35, 4  ;;  %v518_v52 = vmax.f32 %v463_v38, 0.0  ;;  %v1528_v16 = vunpack.c.l.b16 %v1289_v12  ;;  %v1053_v38 = vld [vmem:[#allocation2 + $0xbc] sm:$0x1]  ;;  %v1011_v12 = vld [vmem:[#allocation2 + $0x74] sm:$0x1] }
 0x119   : > { %v872_v28 = vshrl.u32 %v619_v34, 16  ;;  %v870_v27 = vrot.slane %v7189_v41, 4  ;;  %v2072_v63 = vsel %vm6796_vm14, %v2070_v23, %v2071_v8  ;;  %v532_v21 = vmax.f32 %v498_v26, 0.0 }
 0x11a   : > { %v759_v59 = vsel %vm6780_vm9, %v751_v17, %v758_v45  ;;  %v1005_v62 = vsel %vm6808_vm0, %v760_v46, %v1004_v15  ;;  %v606_v0 = vpack.c.bf16 %v518_v52, %v518_v52  ;;  %v1553_v55 = vpack.c.b16 %v1528_v16, %v1527_v20  ;;  %v1079_v26 = vld [vmem:[#allocation2 + $0x60] sm:$0xf] }
 0x11b   : > { %1003 = vst.msk [vmem:[#allocation2 + $0x64] sm:$0xf] %vm534_vm3, %v759_v59  ;;  %v874_v35 = vrot.slane %v872_v28, 7  ;;  %v2152_v15 = vunpack.c.l.b16 %v2069_v29  ;;  %v2153_v37 = vunpack.c.l.b16 %v2072_v63  ;;  %v620_v9 = vpack.c.bf16 %v532_v21, %v532_v21 }
 0x11c   : > { %1006 = vst [vmem:[#allocation2 + $0x68] sm:$0x1] %v1005_v62  ;;  %v762_v19 = vshrl.u32 %v606_v0, 16  ;;  %v765_v40 = vshll.u32 %v606_v0, 16  ;;  %5766 = vmatmul.msk.bf16.gmra.mxu1 %vm1587_vm1, %v1553_v55  ;;  %v1293_v17 = vrot.slane %v1291_v54, 4  ;;  %v1294_v41 = vshll.u32 %v1077_v7, 16  ;;  %v499_v7 = vpop.f32.mrf.mxu3 }
 0x11d   : > { %v464_v51 = vpop.f32.mrf.mxu0  ;;  %v877_v6 = vor.u32 %v875_v57, %v874_v35  ;;  %v879_v44 = vrot.slane %v874_v35, 4  ;;  %v2177_v11 = vpack.c.b16 %v2153_v37, %v2152_v15  ;;  %v881_v46 = vshrl.u32 %v620_v9, 16  ;;  %v1056_v0 = vld [vmem:[#allocation2 + $0xc0] sm:$0xf] }
 0x11e   : > { %v7222_v30 = vrot.slane %v762_v19, 7  ;;  %v465_v32 = vadd.f32 %v7091_v2, %v464_v51  ;;  %v884_v60 = vshll.u32 %v620_v9, 16  ;;  %v1296_v52 = vrot.slane %v1294_v41, 5 }
 0x11f   : > { %v878_v1 = vsel %vm6780_vm9, %v870_v27, %v877_v6  ;;  %v1054_v56 = vsel %vm6808_vm0, %v879_v44, %v1053_v38  ;;  %v1300_v20 = vshll.u32 %v7197_v53, 16  ;;  %v1304_v58 = vshrl.u32 %v7197_v53, 16  ;;  %v1974_v53 = vld [vmem:[#allocation2 + $0x60] sm:$0xe] }
 0x120   : > { %v767_v33 = vor.u32 %v765_v40, %v7222_v30  ;;  %v519_v39 = vmax.f32 %v465_v32, 0.0  ;;  %1052 = vst.msk [vmem:[#allocation2 + $0xb8] sm:$0xf] %vm534_vm3, %v878_v1  ;;  %v7240_v62 = vrot.slane %v881_v46, 7  ;;  %v1297_v5 = vor.u32 %v1296_v52, %v1293_v17  ;;  %v2695_v46 = vld [vmem:[#allocation2 + $0x14] sm:$0x1] }
 0x121   : > { %v2748_v10 = vor.u32 %v6964_v48, %v6955_v43  ;;  %1055 = vst [vmem:[#allocation2 + $0xbc] sm:$0x1] %v1054_v56  ;;  %v1302_v61 = vrot.slane %v1300_v20, 5  ;;  %v1306_v8 = vrot.slane %v1304_v58, 4  ;;  %v1310_v49 = vshll.u32 %v7199_v36, 16 }
 0x122   : > { %v1008_v42 = vsel %vm6741_vm5, %v767_v33, %v1007_v31  ;;  %v607_v45 = vpack.c.bf16 %v519_v39, %v519_v39  ;;  %v500_v4 = vadd.f32 %v7091_v2, %v499_v7  ;;  %v886_v40 = vor.u32 %v884_v60, %v7240_v62  ;;  %v1080_v34 = vld [vmem:[#allocation2 + $0x64] sm:$0xf]  ;;  %v1060_v52 = vld [vmem:[#allocation2 + $0xc8] sm:$0x1] }
 0x123   : > { %1009 = vst [vmem:[#allocation2 + $0x6c] sm:$0xf] %v1008_v42  ;;  %v1298_v24 = vrot.slane %v1297_v5, 4  ;;  %v768_v25 = vrot.slane %v7222_v30, 4  ;;  %5919 = vmatmul.msk.bf16.gmra.mxu3 %vm1587_vm1, %v2177_v11  ;;  %v887_v29 = vrot.slane %v7240_v62, 4  ;;  %v1307_v23 = vor.u32 %v1306_v8, %v1302_v61  ;;  %v6416_v37 = vld [vmem:[#allocation2 + $0x60] sm:$0xff] }
 0x124   : > { %v770_v59 = vshrl.u32 %v607_v45, 16  ;;  %v773_v19 = vshll.u32 %v607_v45, 16  ;;  %v533_v51 = vmax.f32 %v500_v4, 0.0  ;;  %v1057_v2 = vsel %vm6741_vm5, %v886_v40, %v1056_v0  ;;  %v1111_v28 = vld [vmem:[#allocation2 + $0x68] sm:$0x1] }
 0x125   : > { %v1303_v55 = vsel %vm6802_vm15, %v1298_v24, %v1302_v61  ;;  %1058 = vst [vmem:[#allocation2 + $0xc0] sm:$0xf] %v1057_v2  ;;  %v1308_v57 = vrot.slane %v1307_v23, 4  ;;  %v1312_v27 = vrot.slane %v1310_v49, 5  ;;  %v2075_v31 = vrot.slane %v1080_v34, 5  ;;  %6023 = vmatmul.msk.bf16.gmra.mxu0 %vm1587_vm1, %v6416_v37 }
 0x126   : > { %v772_v16 = vrot.slane %v770_v59, 7  ;;  %v621_v30 = vpack.c.bf16 %v533_v51, %v533_v51  ;;  %v5880_v21 = vrot.slane %v1974_v53, 9  ;;  %v1315_v33 = vshrl.u32 %v1079_v26, 16 }
 0x127   : > { %v1313_v35 = vsel %vm6802_vm15, %v1308_v57, %v1312_v27  ;;  %v1529_v15 = vunpack.c.l.b16 %v1303_v55  ;;  %v2077_v17 = vrot.slane %v2075_v31, 4  ;;  %v2078_v41 = vrot.slane %v1111_v28, 5 }
 0x128   : > { %v775_v54 = vor.u32 %v773_v19, %v772_v16  ;;  %v777_v36 = vrot.slane %v772_v16, 4  ;;  %v889_v38 = vshrl.u32 %v621_v30, 16  ;;  %v892_v39 = vshll.u32 %v621_v30, 16 }
 0x129   : > { %v1530_v9 = vunpack.c.l.b16 %v1313_v35  ;;  %v1317_v42 = vrot.slane %v1315_v33, 4  ;;  %v1318_v44 = vshll.u32 %v1079_v26, 16  ;;  %v1324_v11 = vshll.u32 %v1080_v34, 16  ;;  %v2697_v33 = vld [vmem:[#allocation2 + $0x1c] sm:$0xf] }
 0x12a   : > { %v776_v63 = vsel %vm6780_vm9, %v768_v25, %v775_v54  ;;  %v1012_v32 = vsel %vm6808_vm0, %v777_v36, %v1011_v12  ;;  %v891_v6 = vrot.slane %v889_v38, 7  ;;  %v1328_v45 = vshrl.u32 %v1080_v34, 16  ;;  %v1081_v19 = vld [vmem:[#allocation2 + $0x6c] sm:$0xf]  ;;  %v7279_v54 = vpop.f32.mrf.mxu1 }
 0x12b   : > { %1010 = vst.msk [vmem:[#allocation2 + $0x70] sm:$0xf] %vm534_vm3, %v776_v63  ;;  %v1554_v60 = vpack.c.b16 %v1530_v9, %v1529_v15  ;;  %v2076_v1 = vsel %vm6796_vm14, %v5880_v21, %v2075_v31  ;;  %v2079_v56 = vsel %vm6796_vm14, %v2077_v17, %v2078_v41  ;;  %v2758_v20 = vor.u32 %v7166_v13, %v6969_v50  ;;  %v1975_v37 = vld [vmem:[#allocation2 + $0x6c] sm:$0xe] }
 0x12c   : > { %1013 = vst [vmem:[#allocation2 + $0x74] sm:$0x1] %v1012_v32  ;;  %v894_v58 = vor.u32 %v892_v39, %v891_v6  ;;  %v896_v59 = vrot.slane %v891_v6, 4  ;;  %v2155_v62 = vunpack.c.l.b16 %v2079_v56  ;;  %v1320_v0 = vrot.slane %v1318_v44, 5  ;;  %v7291_v39 = vpop.f32.mrf.mxu3  ;;  %v6399_v56 = vld [vmem:[%s8751_s3 + $0x10] sm:$0xff] }
 0x12d   : > { %5767 = vmatmul.msk.bf16.gmra.mxu1 %vm1587_vm1, %v1554_v60  ;;  %v1326_v5 = vrot.slane %v1324_v11, 5  ;;  %v1330_v7 = vrot.slane %v1328_v45, 4  ;;  %v1334_v12 = vshll.u32 %v1111_v28, 16  ;;  %v2761_v61 = vshll.u32 %v2695_v46, 16  ;;  %1882 = vmatpush.bf16.msrb.mxu2 %v6399_v56 }
 0x12e   : > { %v895_v8 = vsel %vm6780_vm9, %v887_v29, %v894_v58  ;;  %v1061_v49 = vsel %vm6808_vm0, %v896_v59, %v1060_v52  ;;  %v2154_v4 = vunpack.c.l.b16 %v2076_v1  ;;  %v1321_v13 = vor.u32 %v1320_v0, %v1317_v42 }
 0x12f   : > { %1059 = vst.msk [vmem:[#allocation2 + $0xc4] sm:$0xf] %vm534_vm3, %v895_v8  ;;  %v1331_v53 = vor.u32 %v1330_v7, %v1326_v5  ;;  %v2759_v16 = vrot.slane %v2758_v20, 4  ;;  %v1336_v23 = vrot.slane %v1334_v12, 5  ;;  %v2763_v51 = vrot.slane %v2761_v61, 5 }
 0x130   : > { %1062 = vst [vmem:[#allocation2 + $0xc8] sm:$0x1] %v1061_v49  ;;  %v2178_v40 = vpack.c.b16 %v2155_v62, %v2154_v4  ;;  %v1322_v24 = vrot.slane %v1321_v13, 4  ;;  %v2749_v29 = vrot.slane %v2748_v10, 4  ;;  %v1339_v55 = vshrl.u32 %v1081_v19, 16  ;;  %v7289_v30 = vpop.f32.mrf.mxu0 }
 0x131   : > { %v1332_v25 = vrot.slane %v1331_v53, 4  ;;  %v2764_v2 = vsel %vm6802_vm15, %v2759_v16, %v2763_v51  ;;  %v1342_v28 = vshll.u32 %v1081_v19, 16  ;;  %v2696_v10 = vld [vmem:[#allocation2 + $0x18] sm:$0xf]  ;;  %v2775_v45 = vshll.u32 %v2697_v33, 16 }
 0x132   : > { %v1082_v34 = vld [vmem:[#allocation2 + $0x70] sm:$0xf]  ;;  %v1327_v3 = vsel %vm6802_vm15, %v1322_v24, %v1326_v5  ;;  %v2754_v43 = vsel %vm6802_vm15, %v2749_v29, %v6969_v50  ;;  %v1341_v63 = vrot.slane %v1339_v55, 4  ;;  %v3135_v15 = vunpack.c.l.b16 %v2764_v2  ;;  %v1083_v62 = vld [vmem:[#allocation2 + $0x78] sm:$0xf]  ;;  %v7301_v0 = vpop.f32.mrf.mxu1 }
 0x133   : > { %v2082_v26 = vrot.slane %v1082_v34, 5  ;;  %v1337_v36 = vsel %vm6802_vm15, %v1332_v25, %v1336_v23  ;;  %5920 = vmatmul.msk.bf16.gmra.mxu3 %vm1587_vm1, %v2178_v40  ;;  %v1531_v57 = vunpack.c.l.b16 %v1327_v3  ;;  %v1112_v48 = vld [vmem:[#allocation2 + $0x74] sm:$0x1]  ;;  %v1344_v32 = vrot.slane %v1342_v28, 5  ;;  %v6417_v50 = vld [vmem:[#allocation2 + $0x6c] sm:$0xff] }
 0x134   : > { %v1532_v27 = vunpack.c.l.b16 %v1337_v36  ;;  %v1348_v21 = vshll.u32 %v1082_v34, 16  ;;  %v1352_v38 = vshrl.u32 %v1082_v34, 16  ;;  %v3134_v9 = vunpack.c.l.b16 %v2754_v43  ;;  %v2698_v7 = vld [vmem:[#allocation2 + $0x20] sm:$0x1]  ;;  %v1084_v53 = vld [vmem:[#allocation2 + $0x7c] sm:$0xf]  ;;  %v7310_v51 = vpop.f32.mrf.mxu3 }
 0x135   : > { %v2084_v31 = vrot.slane %v2082_v26, 4  ;;  %v2085_v17 = vrot.slane %v1112_v48, 5  ;;  %v2766_v42 = vshrl.u32 %v2696_v10, 16  ;;  %v1358_v44 = vshll.u32 %v1112_v48, 16  ;;  %6024 = vmatmul.msk.bf16.gmra.mxu0 %vm1587_vm1, %v6417_v50  ;;  %v1976_v36 = vld [vmem:[#allocation2 + $0x78] sm:$0xe] }
 0x136   : > { %v1555_v35 = vpack.c.b16 %v1532_v27, %v1531_v57  ;;  %v1350_v41 = vrot.slane %v1348_v21, 5  ;;  %v1354_v6 = vrot.slane %v1352_v38, 4  ;;  %v2769_v11 = vshll.u32 %v2696_v10, 16  ;;  %v1113_v27 = vld [vmem:[#allocation2 + $0x80] sm:$0x1] }
 0x137   : > { %v5881_v46 = vrot.slane %v1975_v37, 9  ;;  %v2086_v60 = vsel %vm6796_vm14, %v2084_v31, %v2085_v17  ;;  %v1345_v52 = vor.u32 %v1344_v32, %v1341_v63  ;;  %v2779_v1 = vshrl.u32 %v2697_v33, 16  ;;  %v2700_v31 = vld [vmem:[#allocation2 + $0x28] sm:$0xf]  ;;  %v2699_v33 = vld [vmem:[#allocation2 + $0x24] sm:$0xf] }
 0x138   : > { %5768 = vmatmul.msk.bf16.vlgmr.msra.gmra.mxu2 %vm1587_vm1, %v1555_v35  ;;  %v3166_v20 = vpack.c.b16 %v3135_v15, %v3134_v9  ;;  %v1355_v58 = vor.u32 %v1354_v6, %v1350_v41  ;;  %v7299_v59 = vrot.slane %v2775_v45, 5  ;;  %v2768_v12 = vrot.slane %v2766_v42, 4  ;;  %v7312_v3 = vpop.f32.mrf.mxu0 }
 0x139   : > { %v2083_v5 = vsel %vm6796_vm14, %v5881_v46, %v2082_v26  ;;  %v2771_v61 = vrot.slane %v2769_v11, 5  ;;  %v2781_v8 = vrot.slane %v2779_v1, 4  ;;  %v2157_v49 = vunpack.c.l.b16 %v2086_v60 }
 0x13a   : > { %v1356_v4 = vrot.slane %v1355_v58, 4  ;;  %v1360_v13 = vrot.slane %v1358_v44, 5  ;;  %v1346_v16 = vrot.slane %v1345_v52, 4  ;;  %v1363_v40 = vshrl.u32 %v1083_v62, 16 }
 0x13b   : > { %v2782_v19 = vor.u32 %v2781_v8, %v7299_v59  ;;  %v2156_v24 = vunpack.c.l.b16 %v2083_v5  ;;  %v2785_v25 = vshll.u32 %v2698_v7, 16  ;;  %v1366_v23 = vshll.u32 %v1083_v62, 16  ;;  %v2701_v8 = vld [vmem:[#allocation2 + $0x2c] sm:$0x1] }
 0x13c   : > { %v1361_v34 = vsel %vm6802_vm15, %v1356_v4, %v1360_v13  ;;  %v1351_v29 = vsel %vm6802_vm15, %v1346_v16, %v1350_v41  ;;  %v2772_v26 = vor.u32 %v2771_v61, %v2768_v12  ;;  %v1372_v2 = vshll.u32 %v1084_v53, 16  ;;  %v6418_v13 = vld [vmem:[#allocation2 + $0x78] sm:$0xff] }
 0x13d   : > { %6056 = vmatmul.msk.bf16.vlgmr.msrb.gmra.mxu1 %vm1587_vm1, %v3166_v20  ;;  %v2179_v55 = vpack.c.b16 %v2157_v49, %v2156_v24  ;;  %v1534_v28 = vunpack.c.l.b16 %v1361_v34  ;;  %v2783_v57 = vrot.slane %v2782_v19, 4  ;;  %v2089_v43 = vrot.slane %v1084_v53, 5  ;;  %v1085_v19 = vld [vmem:[#allocation2 + $0x84] sm:$0xf] }
 0x13e   : > { %v1365_v48 = vrot.slane %v1363_v40, 4  ;;  %v1368_v10 = vrot.slane %v1366_v23, 5  ;;  %v1533_v63 = vunpack.c.l.b16 %v1351_v29  ;;  %v2787_v32 = vrot.slane %v2785_v25, 5  ;;  %v1086_v25 = vld [vmem:[#allocation2 + $0x88] sm:$0xf] }
 0x13f   : > { %v5882_v21 = vrot.slane %v1976_v36, 9  ;;  %v2773_v35 = vrot.slane %v2772_v26, 4  ;;  %v2092_v15 = vrot.slane %v1113_v27, 5  ;;  %v1374_v37 = vrot.slane %v1372_v2, 5  ;;  %v7319_v50 = vpop.f32.mrf.mxu1 }
 0x140   : > { %v1376_v38 = vshrl.u32 %v1084_v53, 16  ;;  %v1556_v9 = vpack.c.b16 %v1534_v28, %v1533_v63  ;;  %v2788_v17 = vsel %vm6802_vm15, %v2783_v57, %v2787_v32  ;;  %v2091_v41 = vrot.slane %v2089_v43, 4 }
 0x141   : > { %v2799_v42 = vshll.u32 %v2700_v31, 16  ;;  %v1369_v6 = vor.u32 %v1368_v10, %v1365_v48  ;;  %v2790_v11 = vshrl.u32 %v2699_v33, 16  ;;  %v2793_v45 = vshll.u32 %v2699_v33, 16  ;;  %v7324_v1 = vpop.f32.mrf.mxu3  ;;  %v7333_v61 = vpop.f32.mrf.mxu0  ;;  %v1977_v33 = vld [vmem:[#allocation2 + $0x84] sm:$0xe] }
 0x142   : > { %v1378_v44 = vrot.slane %v1376_v38, 4  ;;  %v2778_v46 = vsel %vm6802_vm15, %v2773_v35, %v7299_v59  ;;  %v1382_v60 = vshll.u32 %v1113_v27, 16  ;;  %v2803_v52 = vshrl.u32 %v2700_v31, 16  ;;  %v2703_v31 = vld [vmem:[#allocation2 + $0x34] sm:$0xf] }
 0x143   : > { %5921 = vmatmul.msk.bf16.gmra.mxu3 %vm1587_vm1, %v2179_v55  ;;  %v3137_v56 = vunpack.c.l.b16 %v2788_v17  ;;  %v2090_v58 = vsel %vm6796_vm14, %v5882_v21, %v2089_v43  ;;  %v2093_v62 = vsel %vm6796_vm14, %v2091_v41, %v2092_v15  ;;  %v7331_v5 = vrot.slane %v2799_v42, 5 }
 0x144   : > { %v1379_v20 = vor.u32 %v1378_v44, %v1374_v37  ;;  %v2805_v7 = vrot.slane %v2803_v52, 4  ;;  %v3136_v12 = vunpack.c.l.b16 %v2778_v46  ;;  %v1370_v59 = vrot.slane %v1369_v6, 4  ;;  %v2702_v44 = vld [vmem:[#allocation2 + $0x30] sm:$0xf] }
 0x145   : > { %v2792_v49 = vrot.slane %v2790_v11, 4  ;;  %v2795_v4 = vrot.slane %v2793_v45, 5  ;;  %v1384_v16 = vrot.slane %v1382_v60, 5  ;;  %v2158_v24 = vunpack.c.l.b16 %v2090_v58  ;;  %6025 = vmatmul.msk.bf16.gmra.mxu0 %vm1587_vm1, %v6418_v13 }
 0x146   : > { %v1380_v53 = vrot.slane %v1379_v20, 4  ;;  %v3167_v40 = vpack.c.b16 %v3137_v56, %v3136_v12  ;;  %v2159_v34 = vunpack.c.l.b16 %v2093_v62  ;;  %v2806_v23 = vor.u32 %v2805_v7, %v7331_v5 }
 0x147   : > { %v2809_v29 = vshll.u32 %v2701_v8, 16  ;;  %v1375_v26 = vsel %vm6802_vm15, %v1370_v59, %v1374_v37  ;;  %v2796_v36 = vor.u32 %v2795_v4, %v2792_v49  ;;  %v1387_v2 = vshrl.u32 %v1085_v19, 16  ;;  %v7342_v43 = vpop.f32.mrf.mxu1 }
 0x148   : > { %5769 = vmatmul.msk.bf16.gmra.mxu2 %vm1587_vm1, %v1556_v9  ;;  %v1390_v55 = vshll.u32 %v1085_v19, 16  ;;  %v1385_v28 = vsel %vm6802_vm15, %v1380_v53, %v1384_v16  ;;  %v1396_v57 = vshll.u32 %v1086_v25, 16  ;;  %v1400_v27 = vshrl.u32 %v1086_v25, 16  ;;  %v1114_v9 = vld [vmem:[#allocation2 + $0x8c] sm:$0x1] }
 0x149   : > { %v7344_v48 = vpop.f32.mrf.mxu3  ;;  %v2180_v10 = vpack.c.b16 %v2159_v34, %v2158_v24  ;;  %v1535_v63 = vunpack.c.l.b16 %v1375_v26  ;;  %v2807_v32 = vrot.slane %v2806_v23, 4  ;;  %v2811_v21 = vrot.slane %v2809_v29, 5  ;;  %v7346_v15 = vpop.f32.mrf.mxu0  ;;  %v2704_v34 = vld [vmem:[#allocation2 + $0x38] sm:$0x1]  ;;  %v6398_v29 = vld [vmem:[%s8751_s3 + $0x8] sm:$0xff] }
 0x14a   : > { %v2096_v35 = vrot.slane %v1086_v25, 5  ;;  %v1536_v37 = vunpack.c.l.b16 %v1385_v28  ;;  %v2797_v38 = vrot.slane %v2796_v36, 4  ;;  %v1389_v17 = vrot.slane %v1387_v2, 4  ;;  %v6419_v26 = vld [vmem:[#allocation2 + $0x84] sm:$0xff]  ;;  %1883 = vmatpush.bf16.msrb.mxu2 %v6398_v29 }
 0x14b   : > { %v1392_v41 = vrot.slane %v1390_v55, 5  ;;  %v1398_v42 = vrot.slane %v1396_v57, 5  ;;  %v1402_v6 = vrot.slane %v1400_v27, 4  ;;  %v2823_v11 = vshll.u32 %v2703_v31, 16 }
 0x14c   : > { %v2827_v45 = vshrl.u32 %v2703_v31, 16  ;;  %v5883_v46 = vrot.slane %v1977_v33, 9  ;;  %v2802_v60 = vsel %vm6802_vm15, %v2797_v38, %v7331_v5  ;;  %v2812_v52 = vsel %vm6802_vm15, %v2807_v32, %v2811_v21  ;;  %v1087_v31 = vld [vmem:[#allocation2 + $0x90] sm:$0xf] }
 0x14d   : > { %6057 = vmatmul.msk.bf16.gmra.mxu1 %vm1587_vm1, %v3167_v40  ;;  %v2098_v56 = vrot.slane %v2096_v35, 4  ;;  %v2099_v20 = vrot.slane %v1114_v9, 5  ;;  %v1557_v58 = vpack.c.b16 %v1536_v37, %v1535_v63  ;;  %v1406_v62 = vshll.u32 %v1114_v9, 16 }
 0x14e   : > { %v2814_v7 = vshrl.u32 %v2702_v44, 16  ;;  %v2817_v12 = vshll.u32 %v2702_v44, 16  ;;  %v1393_v59 = vor.u32 %v1392_v41, %v1389_v17  ;;  %v1403_v8 = vor.u32 %v1402_v6, %v1398_v42  ;;  %v2705_v44 = vld [vmem:[#allocation2 + $0x3c] sm:$0xf] }
 0x14f   : > { %v7354_v49 = vrot.slane %v2823_v11, 5  ;;  %v2829_v4 = vrot.slane %v2827_v45, 4  ;;  %v3139_v53 = vunpack.c.l.b16 %v2812_v52  ;;  %v2097_v5 = vsel %vm6796_vm14, %v5883_v46, %v2096_v35 }
 0x150   : > { %v3138_v19 = vunpack.c.l.b16 %v2802_v60  ;;  %v2100_v24 = vsel %vm6796_vm14, %v2098_v56, %v2099_v20  ;;  %v2816_v25 = vrot.slane %v2814_v7, 4  ;;  %v2819_v23 = vrot.slane %v2817_v12, 5  ;;  %v2706_v20 = vld [vmem:[#allocation2 + $0x40] sm:$0xf]  ;;  %v1978_v7 = vld [vmem:[#allocation2 + $0x90] sm:$0xe] }
 0x151   : > { %v7363_v40 = vpop.f32.mrf.mxu0  ;;  %v1394_v36 = vrot.slane %v1393_v59, 4  ;;  %v1404_v2 = vrot.slane %v1403_v8, 4  ;;  %v1408_v55 = vrot.slane %v1406_v62, 5  ;;  %v2830_v28 = vor.u32 %v2829_v4, %v7354_v49  ;;  %v1115_v8 = vld [vmem:[#allocation2 + $0x98] sm:$0x1] }
 0x152   : > { %v7356_v13 = vpop.f32.mrf.mxu3  ;;  %8773 = vst [vmem:[#allocation8_spill] sm:$0xff] %v7363_v40  ;;  %v3168_v57 = vpack.c.b16 %v3139_v53, %v3138_v19  ;;  %v2833_v27 = vshll.u32 %v2704_v34, 16  ;;  %v2160_v63 = vunpack.c.l.b16 %v2097_v5  ;;  %v2161_v32 = vunpack.c.l.b16 %v2100_v24 }
 0x153   : > { %5922 = vmatmul.msk.bf16.gmra.mxu3 %vm1587_vm1, %v2180_v10  ;;  %v1088_v10 = vld [vmem:[#allocation2 + $0x94] sm:$0xf]  ;;  %v2820_v21 = vor.u32 %v2819_v23, %v2816_v25  ;;  %v1399_v33 = vsel %vm6802_vm15, %v1394_v36, %v1398_v42  ;;  %v1409_v35 = vsel %vm6802_vm15, %v1404_v2, %v1408_v55  ;;  %v2831_v37 = vrot.slane %v2830_v28, 4 }
 0x154   : > { %v1411_v9 = vshrl.u32 %v1087_v31, 16  ;;  %v1414_v17 = vshll.u32 %v1087_v31, 16  ;;  %v1420_v41 = vshll.u32 %v1088_v10, 16  ;;  %v1424_v6 = vshrl.u32 %v1088_v10, 16 }
 0x155   : > { %6026 = vmatmul.msk.bf16.gmra.mxu0 %vm1587_vm1, %v6419_v26  ;;  %v2835_v11 = vrot.slane %v2833_v27, 5  ;;  %v2181_v60 = vpack.c.b16 %v2161_v32, %v2160_v63  ;;  %v1537_v52 = vunpack.c.l.b16 %v1399_v33  ;;  %v2821_v56 = vrot.slane %v2820_v21, 4 }
 0x156   : > { %v7361_v16 = vpop.f32.mrf.mxu1  ;;  %v2103_v42 = vrot.slane %v1088_v10, 5  ;;  %v2838_v12 = vshrl.u32 %v2705_v44, 16  ;;  %v2841_v59 = vshll.u32 %v2705_v44, 16  ;;  %v1413_v4 = vrot.slane %v1411_v9, 4 }
 0x157   : > { %v2836_v62 = vsel %vm6802_vm15, %v2831_v37, %v2835_v11  ;;  %v1416_v53 = vrot.slane %v1414_v17, 5  ;;  %v1422_v5 = vrot.slane %v1420_v41, 5  ;;  %v1426_v19 = vrot.slane %v1424_v6, 4  ;;  %v6420_v37 = vld [vmem:[#allocation2 + $0x90] sm:$0xff]  ;;  %v1090_v41 = vld [vmem:[#allocation2 + $0xa0] sm:$0xf] }
 0x158   : > { %5770 = vmatmul.msk.bf16.gmra.mxu2 %vm1587_vm1, %v1557_v58  ;;  %v1538_v58 = vunpack.c.l.b16 %v1409_v35  ;;  %v2847_v24 = vshll.u32 %v2706_v20, 16  ;;  %v2851_v34 = vshrl.u32 %v2706_v20, 16  ;;  %v2826_v25 = vsel %vm6802_vm15, %v2821_v56, %v7354_v49  ;;  %v1089_v6 = vld [vmem:[#allocation2 + $0x9c] sm:$0xf] }
 0x159   : > { %v7381_v46 = vpop.f32.mrf.mxu0  ;;  %v5884_v23 = vrot.slane %v1978_v7, 9  ;;  %v2105_v29 = vrot.slane %v2103_v42, 4  ;;  %v3141_v36 = vunpack.c.l.b16 %v2836_v62  ;;  %v2106_v2 = vrot.slane %v1115_v8, 5 }
 0x15a   : > { %v7377_v38 = vpop.f32.mrf.mxu3  ;;  %8775 = vst [vmem:[#allocation10_spill] sm:$0xff] %v7381_v46  ;;  %v1558_v26 = vpack.c.b16 %v1538_v58, %v1537_v52  ;;  %v2840_v55 = vrot.slane %v2838_v12, 4  ;;  %v1427_v27 = vor.u32 %v1426_v19, %v1422_v5  ;;  %v1430_v10 = vshll.u32 %v1115_v8, 16  ;;  %v2707_v52 = vld [vmem:[#allocation2 + $0x44] sm:$0x1] }
 0x15b   : > { %8774 = vst [vmem:[#allocation9_spill] sm:$0xff] %v7377_v38  ;;  %v2843_v31 = vrot.slane %v2841_v59, 5  ;;  %v3140_v63 = vunpack.c.l.b16 %v2826_v25  ;;  %v2849_v32 = vrot.slane %v2847_v24, 5  ;;  %v2853_v21 = vrot.slane %v2851_v34, 4  ;;  %v2708_v34 = vld [vmem:[#allocation2 + $0x48] sm:$0xf] }
 0x15c   : > { %v2104_v9 = vsel %vm6796_vm14, %v5884_v23, %v2103_v42  ;;  %v2107_v17 = vsel %vm6796_vm14, %v2105_v29, %v2106_v2  ;;  %v1428_v11 = vrot.slane %v1427_v27, 4  ;;  %v1435_v58 = vshrl.u32 %v1089_v6, 16  ;;  %v1116_v23 = vld [vmem:[#allocation2 + $0xa4] sm:$0x1] }
 0x15d   : > { %6058 = vmatmul.msk.bf16.gmra.mxu1 %vm1587_vm1, %v3168_v57  ;;  %v1417_v57 = vor.u32 %v1416_v53, %v1413_v4  ;;  %v3169_v35 = vpack.c.b16 %v3141_v36, %v3140_v63  ;;  %v2844_v56 = vor.u32 %v2843_v31, %v2840_v55  ;;  %v2854_v20 = vor.u32 %v2853_v21, %v2849_v32  ;;  %v1979_v55 = vld [vmem:[#allocation2 + $0x9c] sm:$0xe] }
 0x15e   : > { %v7379_v45 = vpop.f32.mrf.mxu1  ;;  %v1438_v62 = vshll.u32 %v1089_v6, 16  ;;  %v1444_v7 = vshll.u32 %v1090_v41, 16  ;;  %v1448_v12 = vshrl.u32 %v1090_v41, 16  ;;  %v2162_v42 = vunpack.c.l.b16 %v2104_v9 }
 0x15f   : > { %v1418_v44 = vrot.slane %v1417_v57, 4  ;;  %v2163_v59 = vunpack.c.l.b16 %v2107_v17  ;;  %v2857_v8 = vshll.u32 %v2707_v52, 16  ;;  %v2845_v24 = vrot.slane %v2844_v56, 4 }
 0x160   : > { %v2855_v25 = vrot.slane %v2854_v20, 4  ;;  %v2110_v29 = vrot.slane %v1090_v41, 5  ;;  %v1437_v57 = vrot.slane %v1435_v58, 4  ;;  %v1440_v27 = vrot.slane %v1438_v62, 5 }
 0x161   : > { %v7394_v49 = vpop.f32.mrf.mxu0  ;;  %v1423_v53 = vsel %vm6802_vm15, %v1418_v44, %v1422_v5  ;;  %v1450_v31 = vrot.slane %v1448_v12, 4  ;;  %v2182_v5 = vpack.c.b16 %v2163_v59, %v2162_v42  ;;  %v2113_v9 = vrot.slane %v1116_v23, 5 }
 0x162   : > { %8778 = vst [vmem:[#allocation13_spill] sm:$0xff] %v7394_v49  ;;  %v1539_v63 = vunpack.c.l.b16 %v1423_v53  ;;  %v2862_v17 = vshrl.u32 %v2708_v34, 16  ;;  %v2865_v41 = vshll.u32 %v2708_v34, 16  ;;  %v5885_v44 = vrot.slane %v1979_v55, 9 }
 0x163   : > { %5923 = vmatmul.msk.bf16.gmra.mxu3 %vm1587_vm1, %v2181_v60  ;;  %v1432_v60 = vrot.slane %v1430_v10, 5  ;;  %v7412_v10 = vrot.slane %v1444_v7, 5  ;;  %v2112_v52 = vrot.slane %v2110_v29, 4  ;;  %v1441_v56 = vor.u32 %v1440_v27, %v1437_v57  ;;  %v6397_v57 = vld [vmem:[%s8751_s3] sm:$0xff] }
 0x164   : > { %v1454_v58 = vshll.u32 %v1116_v23, 16  ;;  %v2864_v42 = vrot.slane %v2862_v17, 4  ;;  %v2111_v59 = vsel %vm6796_vm14, %v5885_v44, %v2110_v29  ;;  %v2867_v53 = vrot.slane %v2865_v41, 5  ;;  %v6421_v29 = vld [vmem:[#allocation2 + $0x9c] sm:$0xff]  ;;  %1884 = vmatpush.bf16.msrb.mxu2 %v6397_v57  ;;  %v2712_v44 = vld [vmem:[#allocation2 + $0x58] sm:$0xf] }
 0x165   : > { %6027 = vmatmul.msk.bf16.gmra.mxu0 %vm1587_vm1, %v6420_v37  ;;  %v1433_v19 = vsel %vm6802_vm15, %v1428_v11, %v1432_v60  ;;  %v2850_v37 = vsel %vm6802_vm15, %v2845_v24, %v2849_v32  ;;  %v1451_v20 = vor.u32 %v1450_v31, %v7412_v10  ;;  %v1442_v23 = vrot.slane %v1441_v56, 4 }
 0x166   : > { %v7389_v28 = vpop.f32.mrf.mxu3  ;;  %v7392_v33 = vpop.f32.mrf.mxu1  ;;  %v1540_v21 = vunpack.c.l.b16 %v1433_v19  ;;  %v3142_v32 = vunpack.c.l.b16 %v2850_v37  ;;  %v1456_v55 = vrot.slane %v1454_v58, 5 }
 0x167   : > { %8776 = vst [vmem:[#allocation11_spill] sm:$0xff] %v7389_v28  ;;  %v1447_v41 = vsel %vm6802_vm15, %v1442_v23, %v7412_v10  ;;  %v2899_v23 = vshrl.u32 %v2712_v44, 16 }
 0x168   : > { %5771 = vmatmul.msk.bf16.gmra.mxu2 %vm1587_vm1, %v1558_v26  ;;  %8777 = vst [vmem:[#allocation12_spill] sm:$0xff] %v7392_v33  ;;  %v2709_v26 = vld [vmem:[#allocation2 + $0x4c] sm:$0xf]  ;;  %v1559_v62 = vpack.c.b16 %v1540_v21, %v1539_v63  ;;  %v1091_v21 = vld [vmem:[#allocation2 + $0xa8] sm:$0xf] }
 0x169   : > { %v7410_v2 = vpop.f32.mrf.mxu0  ;;  %v2871_v11 = vshll.u32 %v2709_v26, 16  ;;  %v2875_v60 = vshrl.u32 %v2709_v26, 16  ;;  %v1452_v26 = vrot.slane %v1451_v20, 4  ;;  %v1092_v63 = vld [vmem:[#allocation2 + $0xac] sm:$0xf] }
 0x16a   : > { %8781 = vst [vmem:[#allocation16_spill] sm:$0xff] %v7410_v2  ;;  %v1472_v56 = vshrl.u32 %v1092_v63, 16 }
 0x16b   : > { %v7425_v19 = vrot.slane %v2871_v11, 5  ;;  %v2877_v24 = vrot.slane %v2875_v60, 4  ;;  %v1459_v11 = vshrl.u32 %v1091_v21, 16  ;;  %v1462_v60 = vshll.u32 %v1091_v21, 16 }
 0x16d   : > { %6059 = vmatmul.msk.bf16.gmra.mxu1 %vm1587_vm1, %v3169_v35  ;;  %v2859_v35 = vrot.slane %v2857_v8, 5  ;;  %v2710_v8 = vld [vmem:[#allocation2 + $0x50] sm:$0x1]  ;;  %v2878_v17 = vor.u32 %v2877_v24, %v7425_v19  ;;  %v1464_v57 = vrot.slane %v1462_v60, 5 }
 0x16e   : > { %v7402_v4 = vpop.f32.mrf.mxu3  ;;  %v7408_v36 = vpop.f32.mrf.mxu1  ;;  %v1117_v24 = vld [vmem:[#allocation2 + $0xb0] sm:$0x1] }
 0x16f   : > { %8779 = vst [vmem:[#allocation14_spill] sm:$0xff] %v7402_v4  ;;  %v2860_v6 = vsel %vm6802_vm15, %v2855_v25, %v2859_v35  ;;  %v2114_v25 = vsel %vm6796_vm14, %v2112_v52, %v2113_v9  ;;  %v2164_v35 = vunpack.c.l.b16 %v2111_v59  ;;  %v2868_v9 = vor.u32 %v2867_v53, %v2864_v42  ;;  %v2711_v42 = vld [vmem:[#allocation2 + $0x54] sm:$0xf] }
 0x170   : > { %8780 = vst [vmem:[#allocation15_spill] sm:$0xff] %v7408_v36  ;;  %v3143_v12 = vunpack.c.l.b16 %v2860_v6  ;;  %v2165_v37 = vunpack.c.l.b16 %v2114_v25  ;;  %v1457_v6 = vsel %vm6802_vm15, %v1452_v26, %v1456_v55  ;;  %v1468_v52 = vshll.u32 %v1092_v63, 16  ;;  %v1980_v26 = vld [vmem:[#allocation2 + $0xa8] sm:$0xe] }
 0x171   : > { %v2895_v59 = vshll.u32 %v2712_v44, 16  ;;  %v1541_v53 = vunpack.c.l.b16 %v1447_v41  ;;  %v1542_v10 = vunpack.c.l.b16 %v1457_v6  ;;  %v2117_v25 = vrot.slane %v1092_v63, 5 }
 0x172   : > { %v7434_v27 = vpop.f32.mrf.mxu0  ;;  %v3170_v31 = vpack.c.b16 %v3143_v12, %v3142_v32  ;;  %v2869_v32 = vrot.slane %v2868_v9, 4  ;;  %v2879_v12 = vrot.slane %v2878_v17, 4  ;;  %v1461_v55 = vrot.slane %v1459_v11, 4 }
 0x173   : > { %5924 = vmatmul.msk.bf16.gmra.mxu3 %vm1587_vm1, %v2182_v5  ;;  %8784 = vst [vmem:[#allocation19_spill] sm:$0xff] %v7434_v27  ;;  %v2881_v5 = vshll.u32 %v2710_v8, 16  ;;  %v2886_v21 = vshrl.u32 %v2711_v42, 16  ;;  %v2889_v63 = vshll.u32 %v2711_v42, 16  ;;  %v5886_v9 = vrot.slane %v1980_v26, 9 }
 0x174   : > { %v2119_v17 = vrot.slane %v2117_v25, 4  ;;  %v7456_v41 = vrot.slane %v2895_v59, 5  ;;  %v2901_v6 = vrot.slane %v2899_v23, 4  ;;  %v1560_v44 = vpack.c.b16 %v1542_v10, %v1541_v53  ;;  %v2713_v42 = vld [vmem:[#allocation2 + $0x5c] sm:$0x1]  ;;  %v6422_v53 = vld [vmem:[#allocation2 + $0xa8] sm:$0xff] }
 0x175   : > { %6028 = vmatmul.msk.bf16.gmra.mxu0 %vm1587_vm1, %v6421_v29  ;;  %v2883_v58 = vrot.slane %v2881_v5, 5  ;;  %v1470_v29 = vrot.slane %v1468_v52, 5  ;;  %v2874_v5 = vsel %vm6802_vm15, %v2869_v32, %v7425_v19  ;;  %v1465_v11 = vor.u32 %v1464_v57, %v1461_v55  ;;  %v6456_v57 = vld [vmem:[%s8751_s3 + $0xd8] sm:$0xff] }
 0x176   : > { %v7420_v7 = vpop.f32.mrf.mxu3  ;;  %v1478_v52 = vshll.u32 %v1117_v24, 16  ;;  %v2888_v19 = vrot.slane %v2886_v21, 4  ;;  %v2891_v59 = vrot.slane %v2889_v63, 5  ;;  %v2902_v23 = vor.u32 %v2901_v6, %v7456_v41  ;;  %3999 = vmatpush.bf16.msra.mxu3 %v6456_v57 }
 0x177   : > { %8782 = vst [vmem:[#allocation17_spill] sm:$0xff] %v7420_v7  ;;  %v7427_v34 = vpop.f32.mrf.mxu1  ;;  %v2905_v21 = vshll.u32 %v2713_v42, 16 }
 0x178   : > { %5772 = vmatmul.msk.bf16.gmra.mxu2 %vm1587_vm1, %v1559_v62  ;;  %8783 = vst [vmem:[#allocation18_spill] sm:$0xff] %v7427_v34  ;;  %v2183_v62 = vpack.c.b16 %v2165_v37, %v2164_v35  ;;  %v2884_v35 = vsel %vm6802_vm15, %v2879_v12, %v2883_v58  ;;  %v2120_v37 = vrot.slane %v1117_v24, 5  ;;  %v3144_v58 = vunpack.c.l.b16 %v2874_v5  ;;  %v1093_v5 = vld [vmem:[#allocation2 + $0xb4] sm:$0xf] }
 0x179   : > { %v2118_v12 = vsel %vm6796_vm14, %v5886_v9, %v2117_v25  ;;  %v1466_v24 = vrot.slane %v1465_v11, 4  ;;  %v1480_v55 = vrot.slane %v1478_v52, 5  ;;  %v7472_v25 = vld [vmem:[#allocation2 + $0xb8] sm:$0xf]  ;;  %v6455_v9 = vld [vmem:[%s8751_s3 + $0xd0] sm:$0xff]  ;;  %v2903_v11 = vrot.slane %v2902_v23, 4 }
 0x17a   : > { %v2121_v10 = vsel %vm6796_vm14, %v2119_v17, %v2120_v37  ;;  %v2892_v37 = vor.u32 %v2891_v59, %v2888_v19  ;;  %v1483_v52 = vshrl.u32 %v1093_v5, 16  ;;  %v1496_v19 = vshrl.u32 %v7472_v25, 16  ;;  %4000 = vmatpush.bf16.msra.mxu3 %v6455_v9 }
 0x17b   : > { %v2167_v63 = vunpack.c.l.b16 %v2121_v10  ;;  %v1471_v6 = vsel %vm6802_vm15, %v1466_v24, %v1470_v29  ;;  %v2907_v42 = vrot.slane %v2905_v21, 5  ;;  %v6454_v21 = vld [vmem:[%s8751_s3 + $0xc8] sm:$0xff] }
 0x17c   : > { %v2893_v10 = vrot.slane %v2892_v37, 4  ;;  %v1485_v37 = vrot.slane %v1483_v52, 4 }
 0x17d   : > { %6060 = vmatmul.msk.bf16.gmra.mxu1 %vm1587_vm1, %v3170_v31  ;;  %v1474_v31 = vrot.slane %v1472_v56, 4 }
 0x17e   : > { %v7444_v20 = vpop.f32.mrf.mxu3  ;;  %4001 = vmatpush.bf16.msra.mxu3 %v6454_v21 }
 0x17f   : > { %8785 = vst [vmem:[#allocation20_spill] sm:$0xff] %v7444_v20  ;;  %v7446_v8 = vpop.f32.mrf.mxu1  ;;  %v7448_v20 = vpop.f32.mrf.mxu0  ;;  %v1475_v60 = vor.u32 %v1474_v31, %v1470_v29  ;;  %v2714_v29 = vld [vmem:[#allocation2 + $0x60] sm:$0xf] }
 0x180   : > { %8786 = vst [vmem:[#allocation21_spill] sm:$0xff] %v7446_v8  ;;  %v7630_v8 = vld [vmem:[#allocation2 + $0x44] sm:$0x1] }
 0x181   : > { %8787 = vst [vmem:[#allocation22_spill] sm:$0xff] %v7448_v20  ;;  %v1476_v26 = vrot.slane %v1475_v60, 4  ;;  %v2715_v60 = vld [vmem:[#allocation2 + $0x64] sm:$0xf]  ;;  %v4888_v7 = vrot.slane %v7630_v8, 5 }
 0x182   : > { %v2919_v24 = vshll.u32 %v2715_v60, 16  ;;  %v2923_v57 = vshrl.u32 %v2715_v60, 16 }
 0x183   : > { %5925 = vmatmul.msk.bf16.gmra.mxu3 %vm1587_vm1, %v2183_v62  ;;  %v3145_v62 = vunpack.c.l.b16 %v2884_v35  ;;  %v2166_v35 = vunpack.c.l.b16 %v2118_v12 }
 0x184   : > { %v2925_v52 = vrot.slane %v2923_v57, 4 }
 0x185   : > { %v3171_v31 = vpack.c.b16 %v3145_v62, %v3144_v58  ;;  %6029 = vmatmul.msk.bf16.gmra.mxu0 %vm1587_vm1, %v6422_v53  ;;  %v1486_v62 = vshll.u32 %v1093_v5, 16  ;;  %v1492_v58 = vshll.u32 %v7472_v25, 16  ;;  %v2184_v53 = vpack.c.b16 %v2167_v63, %v2166_v35  ;;  %v6460_v35 = vld [vmem:[%s8751_s3 + $0xf8] sm:$0xff]  ;;  %v1981_v63 = vld [vmem:[#allocation2 + $0xb4] sm:$0xe] }
 0x186   : > { %v7458_v56 = vpop.f32.mrf.mxu3  ;;  %v2124_v5 = vrot.slane %v7472_v25, 5  ;;  %v2898_v25 = vsel %vm6802_vm15, %v2893_v10, %v7456_v41  ;;  %4681 = vmatpush.bf16.msra.mxu0 %v6460_v35 }
 0x187   : > { %8788 = vst [vmem:[#allocation23_spill] sm:$0xff] %v7458_v56  ;;  %v7478_v17 = vpop.f32.mrf.mxu0  ;;  %v1488_v9 = vrot.slane %v1486_v62, 5  ;;  %v7499_v60 = vrot.slane %v1492_v58, 5  ;;  %v6453_v62 = vld [vmem:[%s8751_s3 + $0xc0] sm:$0xff] }
 0x188   : > { %5773 = vmatmul.msk.bf16.gmra.mxu2 %vm1587_vm1, %v1560_v44  ;;  %v7461_v32 = vpop.f32.mrf.mxu1  ;;  %8790 = vst [vmem:[#allocation25_spill] sm:$0xff] %v7478_v17  ;;  %v1481_v44 = vsel %vm6802_vm15, %v1476_v26, %v1480_v55  ;;  %v1543_v26 = vunpack.c.l.b16 %v1471_v6  ;;  %v2908_v55 = vsel %vm6802_vm15, %v2903_v11, %v2907_v42  ;;  %v1498_v6 = vrot.slane %v1496_v19, 4  ;;  %v6459_v11 = vld [vmem:[%s8751_s3 + $0xf0] sm:$0xff]  ;;  %4002 = vmatpush.bf16.msra.mxu3 %v6453_v62 }
 0x189   : > { %8789 = vst [vmem:[#allocation24_spill] sm:$0xff] %v7461_v32  ;;  %v1544_v23 = vunpack.c.l.b16 %v1481_v44  ;;  %v2910_v44 = vshrl.u32 %v2714_v29, 16  ;;  %v3147_v42 = vunpack.c.l.b16 %v2908_v55  ;;  %v7508_v17 = vrot.slane %v2919_v24, 5  ;;  %v2716_v24 = vld [vmem:[#allocation2 + $0x68] sm:$0x1] }
 0x18a   : > { %v5887_v19 = vrot.slane %v1981_v63, 9  ;;  %v1489_v10 = vor.u32 %v1488_v9, %v1485_v37  ;;  %v1499_v35 = vor.u32 %v1498_v6, %v7499_v60  ;;  %4682 = vmatpush.bf16.msra.mxu0 %v6459_v11  ;;  %v4117_v63 = vld [vmem:[#allocation2 + $0x1c] sm:$0xf]  ;;  %v2929_v62 = vshll.u32 %v2716_v24, 16 }
 0x18b   : > { %v1561_v58 = vpack.c.b16 %v1544_v23, %v1543_v26  ;;  %v2912_v55 = vrot.slane %v2910_v44, 4  ;;  %v2926_v26 = vor.u32 %v2925_v52, %v7508_v17  ;;  %v4116_v23 = vld [vmem:[#allocation2 + $0x18] sm:$0xf]  ;;  %v6458_v44 = vld [vmem:[%s8751_s3 + $0xe8] sm:$0xff] }
 0x18c   : > { %v2125_v6 = vsel %vm6796_vm14, %v5887_v19, %v2124_v5  ;;  %v1500_v11 = vrot.slane %v1499_v35, 4  ;;  %v2931_v24 = vrot.slane %v2929_v62, 5 }
 0x18d   : > { %6061 = vmatmul.msk.bf16.gmra.mxu1 %vm1587_vm1, %v3171_v31  ;;  %v1118_v31 = vld [vmem:[#allocation2 + $0xbc] sm:$0x1] }
 0x18e   : > { %v7486_v12 = vpop.f32.mrf.mxu3  ;;  %v2127_v41 = vrot.slane %v1118_v31, 5  ;;  %4683 = vmatpush.bf16.msra.mxu0 %v6458_v44 }
 0x18f   : > { %8791 = vst [vmem:[#allocation26_spill] sm:$0xff] %v7486_v12  ;;  %v2913_v12 = vshll.u32 %v2714_v29, 16  ;;  %v7514_v56 = vpop.f32.mrf.mxu0  ;;  %v3146_v29 = vunpack.c.l.b16 %v2898_v25 }
 0x190   : > { %v7488_v59 = vpop.f32.mrf.mxu1  ;;  %8793 = vst [vmem:[#allocation28_spill] sm:$0xff] %v7514_v56  ;;  %v4799_v56 = vld [vmem:[#allocation2 + $0x24] sm:$0xe] }
 0x191   : > { %8792 = vst [vmem:[#allocation27_spill] sm:$0xff] %v7488_v59  ;;  %v1502_v59 = vshll.u32 %v1118_v31, 16  ;;  %v2915_v21 = vrot.slane %v2913_v12, 5  ;;  %v3172_v9 = vpack.c.b16 %v3147_v42, %v3146_v29  ;;  %v6423_v31 = vld [vmem:[#allocation2 + $0xb4] sm:$0xff]  ;;  %v1490_v12 = vrot.slane %v1489_v10, 4 }
 0x192   : > { %v4174_v42 = vshll.u32 %v4117_v63, 16  ;;  %v2168_v29 = vunpack.c.l.b16 %v2125_v6 }
 0x193   : > { %5926 = vmatmul.msk.bf16.gmra.mxu3 %vm1587_vm1, %v2184_v53  ;;  %v2126_v53 = vrot.slane %v2124_v5, 4  ;;  %v1504_v52 = vrot.slane %v1502_v59, 5  ;;  %v2916_v19 = vor.u32 %v2915_v21, %v2912_v55  ;;  %v6457_v59 = vld [vmem:[%s8751_s3 + $0xe0] sm:$0xff]  ;;  %v1495_v10 = vsel %vm6802_vm15, %v1490_v12, %v7499_v60  ;;  %v4798_v21 = vld [vmem:[#allocation2 + $0x18] sm:$0xe] }
 0x194   : > { %v4178_v55 = vshrl.u32 %v4117_v63, 16  ;;  %4684 = vmatpush.bf16.msra.mxu0 %v6457_v59 }
 0x195   : > { %v2128_v25 = vsel %vm6796_vm14, %v2126_v53, %v2127_v41  ;;  %6030 = vmatmul.msk.bf16.gmra.mxu0 %vm1587_vm1, %v6423_v31  ;;  %v6436_v53 = vld [vmem:[%s8751_s3 + $0xb8] sm:$0xff]  ;;  %v2718_v41 = vld [vmem:[#allocation2 + $0x70] sm:$0xf]  ;;  %v1505_v35 = vsel %vm6802_vm15, %v1500_v11, %v1504_v52  ;;  %v7546_v31 = vrot.slane %v4174_v42, 5  ;;  %v2917_v44 = vrot.slane %v2916_v19, 4 }
 0x196   : > { %v7520_v37 = vpop.f32.mrf.mxu3  ;;  %v2169_v5 = vunpack.c.l.b16 %v2128_v25  ;;  %3684 = vmatpush.bf16.msra.mxu2 %v6436_v53  ;;  %v2943_v12 = vshll.u32 %v2718_v41, 16  ;;  %v7552_v11 = vld [vmem:[#allocation2 + $0x20] sm:$0x1]  ;;  %v7554_v52 = vld [vmem:[#allocation2 + $0x28] sm:$0xf]  ;;  %v6272_v53 = vrot.slane %v4798_v21, 9 }
 0x197   : > { %8795 = vst [vmem:[#allocation30_spill] sm:$0xff] %v7520_v37  ;;  %v4168_v37 = vshll.u32 %v4116_v23, 16  ;;  %v7556_v62 = vpop.f32.mrf.mxu0  ;;  %v4864_v42 = vrot.slane %v4117_v63, 5  ;;  %v2947_v19 = vshrl.u32 %v2718_v41, 16  ;;  %v4867_v21 = vrot.slane %v7552_v11, 5 }
 0x198   : > { %5774 = vmatmul.msk.bf16.gmra.mxu2 %vm1587_vm1, %v1561_v58  ;;  %v4165_v58 = vshrl.u32 %v4116_v23, 16  ;;  %v2185_v25 = vpack.c.b16 %v2169_v5, %v2168_v29  ;;  %8797 = vst [vmem:[#allocation32_spill] sm:$0xff] %v7556_v62  ;;  %v2922_v29 = vsel %vm6802_vm15, %v2917_v44, %v7508_v17  ;;  %v4871_v17 = vrot.slane %v7554_v52, 5 }
 0x199   : > { %v7517_v57 = vpop.f32.mrf.mxu1  ;;  %v4865_v63 = vsel %vm6796_vm14, %v6272_v53, %v4864_v42  ;;  %v7573_v44 = vrot.slane %v2943_v12, 5  ;;  %v6273_v62 = vrot.slane %v4799_v56, 9  ;;  %v2949_v32 = vrot.slane %v2947_v19, 4 }
 0x19a   : > { %8794 = vst [vmem:[#allocation29_spill] sm:$0xff] %v7517_v57  ;;  %v2927_v57 = vrot.slane %v2926_v26, 4  ;;  %v2717_v26 = vld [vmem:[#allocation2 + $0x6c] sm:$0xf]  ;;  %v7542_v23 = vrot.slane %v4165_v58, 4  ;;  %v1545_v58 = vunpack.c.l.b16 %v1495_v10  ;;  %v6464_v10 = vld [vmem:[%s8751_s3 + $0x118] sm:$0xff]  ;;  %v4983_v53 = vunpack.c.l.b16 %v4865_v63 }
 0x19b   : > { %v2934_v5 = vshrl.u32 %v2717_v26, 16  ;;  %5107 = vmatpush.bf16.msra.mxu1 %v6464_v10  ;;  %v4872_v27 = vsel %vm6796_vm14, %v6273_v62, %v4871_v17  ;;  %v7584_v10 = vld [vmem:[#allocation2 + $0x34] sm:$0xf] }
 0x19c   : > { %v2932_v60 = vsel %vm6802_vm15, %v2927_v57, %v2931_v24  ;;  %v4180_v57 = vrot.slane %v4178_v55, 4  ;;  %v7561_v24 = vld [vmem:[#allocation2 + $0x2c] sm:$0x1]  ;;  %v2937_v55 = vshll.u32 %v2717_v26, 16  ;;  %v3148_v26 = vunpack.c.l.b16 %v2922_v29 }
 0x19d   : > { %6062 = vmatmul.msk.bf16.gmra.mxu1 %vm1587_vm1, %v3172_v9  ;;  %v7544_v9 = vrot.slane %v4168_v37, 5  ;;  %v1546_v37 = vunpack.c.l.b16 %v1505_v35  ;;  %v4866_v35 = vrot.slane %v4864_v42, 4  ;;  %v3149_v41 = vunpack.c.l.b16 %v2932_v60  ;;  %v6424_v60 = vld [vmem:[#allocation2 + $0xc0] sm:$0xff] }
 0x19e   : > { %v7563_v59 = vpop.f32.mrf.mxu3  ;;  %v4874_v20 = vrot.slane %v7561_v24, 5  ;;  %v4181_v56 = vor.u32 %v4180_v57, %v7546_v31  ;;  %v4184_v29 = vshll.u32 %v7552_v11, 16 }
 0x19f   : > { %8798 = vst [vmem:[#allocation33_spill] sm:$0xff] %v7563_v59  ;;  %v1562_v59 = vpack.c.b16 %v1546_v37, %v1545_v58  ;;  %v2936_v58 = vrot.slane %v2934_v5, 4  ;;  %v2939_v37 = vrot.slane %v2937_v55, 5  ;;  %v4171_v62 = vor.u32 %v7544_v9, %v7542_v23  ;;  %v7596_v5 = vpop.f32.mrf.mxu0 }
 0x1a0   : > { %v3173_v57 = vpack.c.b16 %v3149_v41, %v3148_v26  ;;  %8800 = vst [vmem:[#allocation35_spill] sm:$0xff] %v7596_v5  ;;  %v4182_v11 = vrot.slane %v4181_v56, 4  ;;  %v4202_v5 = vshrl.u32 %v7554_v52, 16 }
 0x1a1   : > { %v7548_v6 = vpop.f32.mrf.mxu1  ;;  %v2940_v23 = vor.u32 %v2939_v37, %v2936_v58 }
 0x1a2   : > { %8796 = vst [vmem:[#allocation31_spill] sm:$0xff] %v7548_v6  ;;  %v4873_v6 = vrot.slane %v4871_v17, 4  ;;  %v2950_v17 = vor.u32 %v2949_v32, %v7573_v44  ;;  %v4172_v32 = vrot.slane %v4171_v62, 4 }
 0x1a3   : > { %5927 = vmatmul.msk.bf16.gmra.mxu3 %vm1587_vm1, %v2185_v25  ;;  %v4868_v25 = vsel %vm6796_vm14, %v4866_v35, %v4867_v21  ;;  %v2719_v21 = vld [vmem:[#allocation2 + $0x74] sm:$0x1] }
 0x1a4   : > { %v4984_v42 = vunpack.c.l.b16 %v4868_v25  ;;  %v4875_v12 = vsel %vm6796_vm14, %v4873_v6, %v4874_v20  ;;  %v7594_v20 = vld [vmem:[#allocation2 + $0x24] sm:$0xf]  ;;  %v4800_v6 = vld [vmem:[#allocation2 + $0x30] sm:$0xe]  ;;  %v4878_v25 = vrot.slane %v7584_v10, 5  ;;  %v2953_v9 = vshll.u32 %v2719_v21, 16 }
 0x1a5   : > { %v4986_v19 = vunpack.c.l.b16 %v4875_v12  ;;  %6031 = vmatmul.msk.bf16.gmra.mxu0 %vm1587_vm1, %v6424_v60  ;;  %v6274_v26 = vrot.slane %v4800_v6, 9  ;;  %v2951_v12 = vrot.slane %v2950_v17, 4  ;;  %v2720_v60 = vld [vmem:[#allocation2 + $0x78] sm:$0xf]  ;;  %v2941_v21 = vrot.slane %v2940_v23, 4 }
 0x1a6   : > { %v7586_v35 = vpack.c.b16 %v4984_v42, %v4983_v53  ;;  %v7605_v41 = vpop.f32.mrf.mxu3  ;;  %v4186_v53 = vrot.slane %v4184_v29, 5  ;;  %v4189_v42 = vshrl.u32 %v7594_v20, 16  ;;  %v4880_v56 = vrot.slane %v4878_v25, 4  ;;  %v7618_v17 = vld [vmem:[#allocation2 + $0x40] sm:$0xf] }
 0x1a7   : > { %8801 = vst [vmem:[#allocation36_spill] sm:$0xff] %v7605_v41  ;;  %v4879_v58 = vsel %vm6796_vm14, %v6274_v26, %v4878_v25  ;;  %v4177_v62 = vsel %vm6802_vm15, %v4172_v32, %v7546_v31  ;;  %v2958_v41 = vshrl.u32 %v2720_v60, 16  ;;  %v4801_v23 = vld [vmem:[#allocation2 + $0x3c] sm:$0xe] }
 0x1a8   : > { %5775 = vmatmul.msk.bf16.gmra.mxu2 %vm1587_vm1, %v1562_v59  ;;  %v4985_v59 = vunpack.c.l.b16 %v4872_v27  ;;  %v7603_v27 = vld [vmem:[#allocation2 + $0x38] sm:$0x1]  ;;  %v4187_v29 = vsel %vm6802_vm15, %v4182_v11, %v4186_v53  ;;  %v4987_v31 = vunpack.c.l.b16 %v4879_v58  ;;  %v6381_v11 = vld [vmem:[#allocation2] sm:$0xff]  ;;  %v7638_v58 = vpop.f32.mrf.mxu0 }
 0x1a9   : > { %v4881_v37 = vrot.slane %v7603_v27, 5  ;;  %v4558_v53 = vunpack.c.l.b16 %v4187_v29  ;;  %8803 = vst [vmem:[#allocation38_spill] sm:$0xff] %v7638_v58  ;;  %v2960_v29 = vrot.slane %v2958_v41, 4 }
 0x1aa   : > { %v7588_v63 = vpop.f32.mrf.mxu1  ;;  %v7599_v55 = vpack.c.b16 %v4986_v19, %v4985_v59  ;;  %v2721_v19 = vld [vmem:[#allocation2 + $0x7c] sm:$0xf]  ;;  %v4198_v59 = vshll.u32 %v7554_v52, 16 }
 0x1ab   : > { %8799 = vst [vmem:[#allocation34_spill] sm:$0xff] %v7588_v63  ;;  %v6437_v52 = vld [vmem:[#allocation2 + $0x18] sm:$0xff]  ;;  %v2961_v63 = vshll.u32 %v2720_v60, 16  ;;  %v2967_v26 = vshll.u32 %v2721_v19, 16  ;;  %v4882_v25 = vsel %vm6796_vm14, %v4880_v56, %v4881_v37  ;;  %v2971_v22 = vshrl.u32 %v2721_v19, 16 }
 0x1ac   : > { %v4988_v32 = vunpack.c.l.b16 %v4882_v25  ;;  %v7628_v47 = vrot.slane %v4198_v59, 5  ;;  %v4204_v60 = vrot.slane %v4202_v5, 4  ;;  %v2946_v56 = vsel %vm6802_vm15, %v2941_v21, %v7573_v44 }
 0x1ad   : > { %6063 = vmatmul.msk.bf16.gmra.mxu1 %vm1587_vm1, %v3173_v57  ;;  %v2955_v57 = vrot.slane %v2953_v9, 5  ;;  %v4885_v19 = vrot.slane %v7618_v17, 5  ;;  %v2973_v59 = vrot.slane %v2971_v22, 4  ;;  %v4557_v21 = vunpack.c.l.b16 %v4177_v62 }
 0x1ae   : > { %v7635_v37 = vpack.c.b16 %v4988_v32, %v4987_v31  ;;  %v7645_v44 = vpop.f32.mrf.mxu3  ;;  %v3150_v31 = vunpack.c.l.b16 %v2946_v56  ;;  %v4191_v32 = vrot.slane %v4189_v42, 4  ;;  %v4208_v42 = vshll.u32 %v7561_v24, 16 }
 0x1af   : > { %v2956_v9 = vsel %vm6802_vm15, %v2951_v12, %v2955_v57  ;;  %v6275_v12 = vrot.slane %v4801_v23, 9  ;;  %v4887_v25 = vrot.slane %v4885_v19, 4  ;;  %8804 = vst [vmem:[#allocation39_spill] sm:$0xff] %v7645_v44  ;;  %v2722_v23 = vld [vmem:[#allocation2 + $0x80] sm:$0x1]  ;;  %v4589_v22 = vpack.c.b16 %v4558_v53, %v4557_v21 }
 0x1b0   : > { %v3151_v57 = vunpack.c.l.b16 %v2956_v9 }
 0x1b1   : > { %v4886_v5 = vsel %vm6796_vm14, %v6275_v12, %v4885_v19 }
 0x1b2   : > { %v7620_v6 = vpop.f32.mrf.mxu1  ;;  %v4989_v12 = vunpack.c.l.b16 %v4886_v5  ;;  %v3174_v58 = vpack.c.b16 %v3151_v57, %v3150_v31  ;;  %v2723_v57 = vld [vmem:[#allocation2 + $0x84] sm:$0xf]  ;;  %v4222_v31 = vshll.u32 %v7584_v10, 16 }
 0x1b3   : > { %8802 = vst [vmem:[#allocation37_spill] sm:$0xff] %v7620_v6  ;;  %6216 = vmatmul.msk.bf16.vlgmr.msra.gmra.mxu3 %vm1587_vm1, %v6437_v52  ;;  %v4192_v6 = vshll.u32 %v7594_v20, 16  ;;  %v2963_v52 = vrot.slane %v2961_v63, 5  ;;  %v7640_v20 = vrot.slane %v2967_v26, 5  ;;  %v4889_v63 = vsel %vm6796_vm14, %v4887_v25, %v4888_v7  ;;  %v7661_v25 = vpop.f32.mrf.mxu0 }
 0x1b4   : > { %v4205_v26 = vor.u32 %v4204_v60, %v7628_v47  ;;  %v4990_v19 = vunpack.c.l.b16 %v4889_v63  ;;  %8806 = vst [vmem:[#allocation41_spill] sm:$0xff] %v7661_v25 }
 0x1b5   : > { %v4194_v9 = vrot.slane %v4192_v6, 5  ;;  %v2964_v44 = vor.u32 %v2963_v52, %v2960_v29  ;;  %v2974_v62 = vor.u32 %v2973_v59, %v7640_v20  ;;  %6256 = vmatmul.msk.bf16.vlgmr.msra.gmra.mxu0 %vm1587_vm1, %v4589_v22  ;;  %v4210_v29 = vrot.slane %v4208_v42, 5  ;;  %v4122_v52 = vld [vmem:[#allocation2 + $0x30] sm:$0xf]  ;;  %v6438_v59 = vld [vmem:[#allocation2 + $0x24] sm:$0xff] }
 0x1b6   : > { %v7658_v6 = vpack.c.b16 %v4990_v19, %v4989_v12  ;;  %v4206_v53 = vrot.slane %v4205_v26, 4  ;;  %v7664_v24 = vpop.f32.mrf.mxu3  ;;  %v4802_v22 = vld [vmem:[#allocation2 + $0x48] sm:$0xe] }
 0x1b7   : > { %v4195_v7 = vor.u32 %v4194_v9, %v4191_v32  ;;  %v2965_v60 = vrot.slane %v2964_v44, 4  ;;  %v2975_v56 = vrot.slane %v2974_v62, 4  ;;  %8807 = vst [vmem:[#allocation42_spill] sm:$0xff] %v7664_v24  ;;  %v2982_v44 = vshrl.u32 %v2723_v57, 16  ;;  %v7671_v9 = vld [vmem:[#allocation2 + $0x4c] sm:$0xf] }
 0x1b8   : > { %5856 = vmatmul.msk.bf16.vlgmr.msrb.gmra.mxu2 %vm1587_vm1, %v6381_v11  ;;  %v2977_v11 = vshll.u32 %v2722_v23, 16  ;;  %v2724_v23 = vld [vmem:[#allocation2 + $0x88] sm:$0xf]  ;;  %v4226_v32 = vshrl.u32 %v7584_v10, 16  ;;  %v2985_v62 = vshll.u32 %v2723_v57, 16  ;;  %v7686_v24 = vrot.slane %v4222_v31, 5 }
 0x1b9   : > { %v4196_v21 = vrot.slane %v4195_v7, 4  ;;  %v2970_v12 = vsel %vm6802_vm15, %v2965_v60, %v7640_v20  ;;  %v2991_v42 = vshll.u32 %v2724_v23, 16  ;;  %v2995_v7 = vshrl.u32 %v2724_v23, 16 }
 0x1ba   : > { %v7650_v41 = vpop.f32.mrf.mxu1  ;;  %v2979_v5 = vrot.slane %v2977_v11, 5  ;;  %v4213_v11 = vshrl.u32 %v4122_v52, 16  ;;  %v6276_v20 = vrot.slane %v4802_v22, 9  ;;  %v4892_v60 = vrot.slane %v7671_v9, 5  ;;  %v2725_v22 = vld [vmem:[#allocation2 + $0x8c] sm:$0x1] }
 0x1bb   : > { %v7653_v34 = vpop.f32.mrf.mxu2  ;;  %v4201_v10 = vsel %vm6802_vm15, %v4196_v21, %v7628_v47  ;;  %v2987_v25 = vrot.slane %v2985_v62, 5  ;;  %v2993_v31 = vrot.slane %v2991_v42, 5 }
 0x1bc   : > { %8805 = vst [vmem:[#allocation40_spill] sm:$0xff] %v7653_v34  ;;  %v2980_v19 = vsel %vm6802_vm15, %v2975_v56, %v2979_v5  ;;  %v6382_v56 = vld [vmem:[#allocation2 + $0xc] sm:$0xff]  ;;  %v3152_v5 = vunpack.c.l.b16 %v2970_v12  ;;  %v2984_v34 = vrot.slane %v2982_v44, 4  ;;  %v4893_v47 = vsel %vm6796_vm14, %v6276_v20, %v4892_v60  ;;  %v7695_v44 = vpop.f32.mrf.mxu0 }
 0x1bd   : > { %6064 = vmatmul.msk.bf16.gmra.mxu1 %vm1587_vm1, %v3174_v58  ;;  %v4211_v58 = vsel %vm6802_vm15, %v4206_v53, %v4210_v29  ;;  %v4216_v53 = vshll.u32 %v4122_v52, 16  ;;  %v7684_v29 = vld [vmem:[#allocation2 + $0x50] sm:$0x1]  ;;  %v3153_v57 = vunpack.c.l.b16 %v2980_v19  ;;  %v4894_v21 = vrot.slane %v4892_v60, 4  ;;  %8809 = vst [vmem:[#allocation44_spill] sm:$0xff] %v7695_v44 }
 0x1be   : > { %v4895_v52 = vrot.slane %v7684_v29, 5  ;;  %v4559_v23 = vunpack.c.l.b16 %v4201_v10  ;;  %v4215_v2 = vrot.slane %v4213_v11, 4  ;;  %v4991_v62 = vunpack.c.l.b16 %v4893_v47  ;;  %v7702_v42 = vpop.f32.mrf.mxu3  ;;  %v2726_v47 = vld [vmem:[#allocation2 + $0x90] sm:$0xf] }
 0x1bf   : > { %v4218_v4 = vrot.slane %v4216_v53, 5  ;;  %v3175_v60 = vpack.c.b16 %v3153_v57, %v3152_v5  ;;  %8811 = vst [vmem:[#allocation46_spill] sm:$0xff] %v7702_v42 }
 0x1c0   : > { %v4896_v12 = vsel %vm6796_vm14, %v4894_v21, %v4895_v52  ;;  %v4125_v52 = vld [vmem:[#allocation2 + $0x3c] sm:$0xf] }
 0x1c1   : > { %v4992_v20 = vunpack.c.l.b16 %v4896_v12  ;;  %v4219_v21 = vor.u32 %v4218_v4, %v4215_v2  ;;  %v4250_v12 = vshrl.u32 %v7618_v17, 16  ;;  %v4237_v4 = vshrl.u32 %v4125_v52, 16 }
 0x1c2   : > { %v7666_v63 = vpop.f32.mrf.mxu1  ;;  %v4240_v2 = vshll.u32 %v4125_v52, 16 }
 0x1c3   : > { %v7673_v26 = vpop.f32.mrf.mxu2  ;;  %6217 = vmatmul.msk.bf16.gmra.mxu3 %vm1587_vm1, %v6438_v59  ;;  %v4228_v59 = vrot.slane %v4226_v32, 4  ;;  %v7705_v53 = vpack.c.b16 %v4992_v20, %v4991_v62  ;;  %v3006_v62 = vshrl.u32 %v2726_v47, 16  ;;  %v3009_v20 = vshll.u32 %v2726_v47, 16 }
 0x1c4   : > { %8808 = vst [vmem:[#allocation43_spill] sm:$0xff] %v7673_v26  ;;  %v4560_v26 = vunpack.c.l.b16 %v4211_v58  ;;  %v2997_v58 = vrot.slane %v2995_v7, 4  ;;  %v3001_v7 = vshll.u32 %v2725_v22, 16  ;;  %v4239_v44 = vrot.slane %v4237_v4, 4 }
 0x1c5   : > { %v4229_v10 = vor.u32 %v4228_v59, %v7686_v24  ;;  %v3011_v42 = vrot.slane %v3009_v20, 5 }
 0x1c6   : > { %v4590_v19 = vpack.c.b16 %v4560_v26, %v4559_v23  ;;  %v2998_v11 = vor.u32 %v2997_v58, %v2993_v31  ;;  %v4232_v26 = vshll.u32 %v7603_v27, 16  ;;  %v3003_v23 = vrot.slane %v3001_v7, 5  ;;  %v7713_v27 = vld [vmem:[#allocation2 + $0x58] sm:$0xf] }
 0x1c7   : > { %v4230_v57 = vrot.slane %v4229_v10, 4  ;;  %v4220_v58 = vrot.slane %v4219_v21, 4 }
 0x1c8   : > { %5857 = vmatmul.msk.bf16.gmra.mxu2 %vm1587_vm1, %v6382_v56  ;;  %v2988_v56 = vor.u32 %v2987_v25, %v2984_v34  ;;  %6257 = vmatmul.msk.bf16.gmra.mxu0 %vm1587_vm1, %v4590_v19  ;;  %v4246_v34 = vshll.u32 %v7618_v17, 16  ;;  %v6439_v25 = vld [vmem:[#allocation2 + $0x30] sm:$0xff]  ;;  %v2999_v59 = vrot.slane %v2998_v11, 4  ;;  %v4234_v22 = vrot.slane %v4232_v26, 5  ;;  %v7726_v26 = vpop.f32.mrf.mxu0 }
 0x1c9   : > { %v2727_v19 = vld [vmem:[#allocation2 + $0x94] sm:$0xf]  ;;  %v4225_v17 = vsel %vm6802_vm15, %v4220_v58, %v7686_v24  ;;  %8813 = vst [vmem:[#allocation48_spill] sm:$0xff] %v7726_v26  ;;  %v4899_v58 = vrot.slane %v7713_v27, 5 }
 0x1ca   : > { %v7697_v32 = vpop.f32.mrf.mxu1  ;;  %v2989_v5 = vrot.slane %v2988_v56, 4  ;;  %v4803_v56 = vld [vmem:[#allocation2 + $0x54] sm:$0xe]  ;;  %v4235_v7 = vsel %vm6802_vm15, %v4230_v57, %v4234_v22  ;;  %v7724_v21 = vrot.slane %v4246_v34, 5  ;;  %v3004_v47 = vsel %vm6802_vm15, %v2999_v59, %v3003_v23  ;;  %v7734_v57 = vpop.f32.mrf.mxu3  ;;  %v6383_v34 = vld [vmem:[#allocation2 + $0x18] sm:$0xff] }
 0x1cb   : > { %v7699_v49 = vpop.f32.mrf.mxu2  ;;  %v3015_v52 = vshll.u32 %v2727_v19, 16  ;;  %v6277_v24 = vrot.slane %v4803_v56, 9  ;;  %8814 = vst [vmem:[#allocation49_spill] sm:$0xff] %v7734_v57  ;;  %v4562_v26 = vunpack.c.l.b16 %v4235_v7  ;;  %v3155_v36 = vunpack.c.l.b16 %v3004_v47  ;;  %v2728_v56 = vld [vmem:[#allocation2 + $0x98] sm:$0x1] }
 0x1cc   : > { %8810 = vst [vmem:[#allocation45_spill] sm:$0xff] %v7699_v49  ;;  %v2994_v11 = vsel %vm6802_vm15, %v2989_v5, %v2993_v31  ;;  %v4252_v49 = vrot.slane %v4250_v12, 4  ;;  %v7731_v31 = vld [vmem:[#allocation2 + $0x5c] sm:$0x1]  ;;  %v3008_v5 = vrot.slane %v3006_v62, 4  ;;  %v4901_v23 = vrot.slane %v4899_v58, 4 }
 0x1cd   : > { %6065 = vmatmul.msk.bf16.gmra.mxu1 %vm1587_vm1, %v3175_v60  ;;  %v3154_v22 = vunpack.c.l.b16 %v2994_v11  ;;  %v4900_v59 = vsel %vm6796_vm14, %v6277_v24, %v4899_v58  ;;  %v4902_v12 = vrot.slane %v7731_v31, 5  ;;  %v3017_v62 = vrot.slane %v3015_v52, 5 }
 0x1ce   : > { %v3012_v28 = vor.u32 %v3011_v42, %v3008_v5  ;;  %v4253_v57 = vor.u32 %v4252_v49, %v7724_v21  ;;  %v4993_v7 = vunpack.c.l.b16 %v4900_v59  ;;  %v3025_v42 = vshll.u32 %v2728_v56, 16 }
 0x1cf   : > { %v4903_v4 = vsel %vm6796_vm14, %v4901_v23, %v4902_v12  ;;  %v3176_v24 = vpack.c.b16 %v3155_v36, %v3154_v22  ;;  %v2729_v22 = vld [vmem:[#allocation2 + $0x9c] sm:$0xf]  ;;  %v4128_v12 = vld [vmem:[#allocation2 + $0x48] sm:$0xf] }
 0x1d0   : > { %v4994_v47 = vunpack.c.l.b16 %v4903_v4  ;;  %v3013_v49 = vrot.slane %v3012_v28, 4  ;;  %v4254_v5 = vrot.slane %v4253_v57, 4  ;;  %v7755_v36 = vpop.f32.mrf.mxu0  ;;  %v3027_v23 = vrot.slane %v3025_v42, 5  ;;  %v6440_v57 = vld [vmem:[#allocation2 + $0x3c] sm:$0xff]  ;;  %v7768_v4 = vld [vmem:[#allocation2 + $0x64] sm:$0xf] }
 0x1d1   : > { %8817 = vst [vmem:[#allocation52_spill] sm:$0xff] %v7755_v36  ;;  %v4274_v28 = vshrl.u32 %v7671_v9, 16  ;;  %v4261_v42 = vshrl.u32 %v4128_v12, 16 }
 0x1d2   : > { %v7711_v60 = vpop.f32.mrf.mxu1  ;;  %v7749_v52 = vpack.c.b16 %v4994_v47, %v4993_v7  ;;  %v3030_v7 = vshrl.u32 %v2729_v22, 16  ;;  %v3033_v47 = vshll.u32 %v2729_v22, 16  ;;  %v6384_v22 = vld [vmem:[#allocation2 + $0x24] sm:$0xff] }
 0x1d3   : > { %v7715_v10 = vpop.f32.mrf.mxu2  ;;  %6218 = vmatmul.msk.bf16.gmra.mxu3 %vm1587_vm1, %v6439_v25  ;;  %v4242_v25 = vrot.slane %v4240_v2, 5 }
 0x1d4   : > { %8812 = vst [vmem:[#allocation47_spill] sm:$0xff] %v7715_v10  ;;  %v3019_v10 = vshrl.u32 %v2727_v19, 16  ;;  %v4561_v19 = vunpack.c.l.b16 %v4225_v17  ;;  %v4256_v17 = vshll.u32 %v7630_v8, 16  ;;  %v2730_v8 = vld [vmem:[#allocation2 + $0xa0] sm:$0xf]  ;;  %v3035_v36 = vrot.slane %v3033_v47, 5 }
 0x1d5   : > { %v4243_v46 = vor.u32 %v4242_v25, %v4239_v44  ;;  %v7757_v25 = vpop.f32.mrf.mxu3 }
 0x1d6   : > { %v3021_v20 = vrot.slane %v3019_v10, 4  ;;  %v4591_v11 = vpack.c.b16 %v4562_v26, %v4561_v19  ;;  %v6435_v26 = vld [vmem:[%s8751_s3 + $0xb0] sm:$0xff]  ;;  %v4258_v44 = vrot.slane %v4256_v17, 5  ;;  %8818 = vst [vmem:[#allocation53_spill] sm:$0xff] %v7757_v25  ;;  %v4270_v19 = vshll.u32 %v7671_v9, 16 }
 0x1d7   : > { %3685 = vmatpush.bf16.msra.mxu2 %v6435_v26  ;;  %v3043_v17 = vshrl.u32 %v2730_v8, 16  ;;  %v4804_v9 = vld [vmem:[#allocation2 + $0x60] sm:$0xe]  ;;  %v4276_v26 = vrot.slane %v4274_v28, 4  ;;  %v3032_v25 = vrot.slane %v3030_v7, 4 }
 0x1d8   : > { %5858 = vmatmul.msk.bf16.gmra.mxu2 %vm1587_vm1, %v6383_v34  ;;  %6258 = vmatmul.msk.bf16.gmra.mxu0 %vm1587_vm1, %v4591_v11  ;;  %v3022_v10 = vor.u32 %v3021_v20, %v3017_v62  ;;  %v4244_v34 = vrot.slane %v4243_v46, 4  ;;  %v3018_v20 = vsel %vm6802_vm15, %v3013_v49, %v3017_v62  ;;  %v4259_v56 = vsel %vm6802_vm15, %v4254_v5, %v4258_v44  ;;  %v7782_v44 = vld [vmem:[#allocation2 + $0x68] sm:$0x1]  ;;  %v7788_v33 = vpop.f32.mrf.mxu0 }
 0x1d9   : > { %v4264_v62 = vshll.u32 %v4128_v12, 16  ;;  %v7777_v5 = vrot.slane %v4270_v19, 5  ;;  %v4906_v12 = vrot.slane %v7768_v4, 5  ;;  %8821 = vst [vmem:[#allocation56_spill] sm:$0xff] %v7788_v33 }
 0x1da   : > { %v7743_v2 = vpop.f32.mrf.mxu1  ;;  %v3023_v59 = vrot.slane %v3022_v10, 4  ;;  %v4249_v46 = vsel %vm6802_vm15, %v4244_v34, %v7724_v21  ;;  %v6463_v34 = vld [vmem:[%s8751_s3 + $0x110] sm:$0xff] }
 0x1db   : > { %8815 = vst [vmem:[#allocation50_spill] sm:$0xff] %v7743_v2  ;;  %v7745_v58 = vpop.f32.mrf.mxu2  ;;  %v4563_v49 = vunpack.c.l.b16 %v4249_v46  ;;  %5108 = vmatpush.bf16.msra.mxu1 %v6463_v34  ;;  %v4908_v46 = vrot.slane %v4906_v12, 4  ;;  %v4277_v7 = vor.u32 %v4276_v26, %v7777_v5 }
 0x1dc   : > { %8816 = vst [vmem:[#allocation51_spill] sm:$0xff] %v7745_v58  ;;  %v3028_v21 = vsel %vm6802_vm15, %v3023_v59, %v3027_v23  ;;  %v6278_v58 = vrot.slane %v4804_v9, 9  ;;  %v3045_v23 = vrot.slane %v3043_v17, 4 }
 0x1dd   : > { %6066 = vmatmul.msk.bf16.gmra.mxu1 %vm1587_vm1, %v3176_v24  ;;  %v3039_v24 = vshll.u32 %v2730_v8, 16  ;;  %v3156_v8 = vunpack.c.l.b16 %v3018_v20  ;;  %v3157_v19 = vunpack.c.l.b16 %v3028_v21  ;;  %v4263_v20 = vrot.slane %v4261_v42, 4 }
 0x1de   : > { %v4907_v28 = vsel %vm6796_vm14, %v6278_v58, %v4906_v12  ;;  %v3036_v58 = vor.u32 %v3035_v36, %v3032_v25  ;;  %v4280_v42 = vshll.u32 %v7684_v29, 16  ;;  %v4131_v36 = vld [vmem:[#allocation2 + $0x54] sm:$0xf] }
 0x1df   : > { %v3041_v59 = vrot.slane %v3039_v24, 5  ;;  %v7794_v24 = vpop.f32.mrf.mxu3  ;;  %v4995_v34 = vunpack.c.l.b16 %v4907_v28  ;;  %v3177_v33 = vpack.c.b16 %v3157_v19, %v3156_v8  ;;  %v4285_v29 = vshrl.u32 %v4131_v36, 16 }
 0x1e0   : > { %8822 = vst [vmem:[#allocation57_spill] sm:$0xff] %v7794_v24  ;;  %v4282_v25 = vrot.slane %v4280_v42, 5  ;;  %v4288_v28 = vshll.u32 %v4131_v36, 16  ;;  %v6385_v36 = vld [vmem:[#allocation2 + $0x30] sm:$0xff] }
 0x1e1   : > { %v3046_v21 = vor.u32 %v3045_v23, %v3041_v59  ;;  %v2733_v23 = vld [vmem:[#allocation2 + $0xac] sm:$0xf] }
 0x1e2   : > { %v7770_v11 = vpop.f32.mrf.mxu1  ;;  %v3067_v42 = vshrl.u32 %v2733_v23, 16 }
 0x1e3   : > { %8819 = vst [vmem:[#allocation54_spill] sm:$0xff] %v7770_v11  ;;  %v7772_v10 = vpop.f32.mrf.mxu2  ;;  %6219 = vmatmul.msk.bf16.gmra.mxu3 %vm1587_vm1, %v6440_v57  ;;  %v2731_v57 = vld [vmem:[#allocation2 + $0xa4] sm:$0x1]  ;;  %v4909_v11 = vrot.slane %v7782_v44, 5  ;;  %v3047_v26 = vrot.slane %v3046_v21, 4 }
 0x1e4   : > { %8820 = vst [vmem:[#allocation55_spill] sm:$0xff] %v7772_v10  ;;  %v4564_v10 = vunpack.c.l.b16 %v4259_v56  ;;  %v4266_v56 = vrot.slane %v4264_v62, 5  ;;  %v3049_v2 = vshll.u32 %v2731_v57, 16  ;;  %v4278_v62 = vrot.slane %v4277_v7, 4  ;;  %v2732_v57 = vld [vmem:[#allocation2 + $0xa8] sm:$0xf] }
 0x1e5   : > { %v4910_v47 = vsel %vm6796_vm14, %v4908_v46, %v4909_v11  ;;  %v7807_v46 = vpop.f32.mrf.mxu0  ;;  %v4298_v7 = vshrl.u32 %v7713_v27, 16  ;;  %v3054_v21 = vshrl.u32 %v2732_v57, 16 }
 0x1e6   : > { %v4592_v9 = vpack.c.b16 %v4564_v10, %v4563_v49  ;;  %v4996_v12 = vunpack.c.l.b16 %v4910_v47  ;;  %v4267_v11 = vor.u32 %v4266_v56, %v4263_v20  ;;  %v3037_v49 = vrot.slane %v3036_v58, 4  ;;  %8825 = vst [vmem:[#allocation60_spill] sm:$0xff] %v7807_v46  ;;  %v7817_v47 = vld [vmem:[#allocation2 + $0x70] sm:$0xf] }
 0x1e7   : > { %v4283_v19 = vsel %vm6802_vm15, %v4278_v62, %v4282_v25  ;;  %v4294_v56 = vshll.u32 %v7713_v27, 16  ;;  %v7827_v27 = vld [vmem:[#allocation2 + $0x74] sm:$0x1]  ;;  %v3069_v46 = vrot.slane %v3067_v42, 4 }
 0x1e8   : > { %5859 = vmatmul.msk.bf16.gmra.mxu2 %vm1587_vm1, %v6384_v22  ;;  %6259 = vmatmul.msk.bf16.gmra.mxu0 %vm1587_vm1, %v4592_v9  ;;  %v7802_v10 = vpack.c.b16 %v4996_v12, %v4995_v34  ;;  %v3051_v22 = vrot.slane %v3049_v2, 5  ;;  %v4268_v8 = vrot.slane %v4267_v11, 4  ;;  %v3042_v20 = vsel %vm6802_vm15, %v3037_v49, %v3041_v59  ;;  %v7821_v11 = vpop.f32.mrf.mxu3 }
 0x1e9   : > { %v3057_v34 = vshll.u32 %v2732_v57, 16  ;;  %v3063_v12 = vshll.u32 %v2733_v23, 16  ;;  %8828 = vst [vmem:[#allocation63_spill] sm:$0xff] %v7821_v11  ;;  %v4566_v62 = vunpack.c.l.b16 %v4283_v19  ;;  %v4287_v49 = vrot.slane %v4285_v29, 4  ;;  %v4805_v19 = vld [vmem:[#allocation2 + $0x6c] sm:$0xe] }
 0x1ea   : > { %v7796_v17 = vpop.f32.mrf.mxu1  ;;  %v3052_v2 = vsel %vm6802_vm15, %v3047_v26, %v3051_v22  ;;  %v4273_v59 = vsel %vm6802_vm15, %v4268_v8, %v7777_v5  ;;  %v4290_v26 = vrot.slane %v4288_v28, 5  ;;  %v4913_v22 = vrot.slane %v7817_v47, 5  ;;  %v2734_v8 = vld [vmem:[#allocation2 + $0xb0] sm:$0x1] }
 0x1eb   : > { %8823 = vst [vmem:[#allocation58_spill] sm:$0xff] %v7796_v17  ;;  %v7798_v38 = vpop.f32.mrf.mxu2  ;;  %v3158_v25 = vunpack.c.l.b16 %v3042_v20  ;;  %v3159_v57 = vunpack.c.l.b16 %v3052_v2  ;;  %v4300_v23 = vrot.slane %v4298_v7, 4  ;;  %v3059_v11 = vrot.slane %v3057_v34, 5  ;;  %v6393_v17 = vld [vmem:[#allocation2 + $0x90] sm:$0xff] }
 0x1ec   : > { %8824 = vst [vmem:[#allocation59_spill] sm:$0xff] %v7798_v38  ;;  %v3056_v38 = vrot.slane %v3054_v21, 4  ;;  %v4565_v5 = vunpack.c.l.b16 %v4273_v59  ;;  %v4915_v29 = vrot.slane %v4913_v22, 4  ;;  %v4916_v28 = vrot.slane %v7827_v27, 5 }
 0x1ed   : > { %6067 = vmatmul.msk.bf16.gmra.mxu1 %vm1587_vm1, %v3177_v33  ;;  %v6441_v33 = vld [vmem:[#allocation2 + $0x48] sm:$0xff]  ;;  %v3178_v24 = vpack.c.b16 %v3159_v57, %v3158_v25  ;;  %v6279_v42 = vrot.slane %v4805_v19, 9  ;;  %v7841_v59 = vpop.f32.mrf.mxu0 }
 0x1ee   : > { %v4917_v2 = vsel %vm6796_vm14, %v4915_v29, %v4916_v28  ;;  %v3060_v21 = vor.u32 %v3059_v11, %v3056_v38  ;;  %8831 = vst [vmem:[#allocation66_spill] sm:$0xff] %v7841_v59  ;;  %v2735_v28 = vld [vmem:[#allocation2 + $0xb4] sm:$0xf] }
 0x1ef   : > { %v4914_v25 = vsel %vm6796_vm14, %v6279_v42, %v4913_v22  ;;  %v4998_v11 = vunpack.c.l.b16 %v4917_v2 }
 0x1f0   : > { %v7848_v57 = vpop.f32.mrf.mxu3  ;;  %v4997_v29 = vunpack.c.l.b16 %v4914_v25 }
 0x1f1   : > { %8832 = vst [vmem:[#allocation67_spill] sm:$0xff] %v7848_v57  ;;  %v2737_v57 = vld [vmem:[#allocation2 + $0xbc] sm:$0x1] }
 0x1f2   : > { %v7809_v9 = vpop.f32.mrf.mxu1 }
 0x1f3   : > { %8826 = vst [vmem:[#allocation61_spill] sm:$0xff] %v7809_v9  ;;  %v7819_v58 = vpop.f32.mrf.mxu2  ;;  %6220 = vmatmul.msk.bf16.gmra.mxu3 %vm1587_vm1, %v6441_v33  ;;  %v3065_v33 = vrot.slane %v3063_v12, 5  ;;  %v4593_v9 = vpack.c.b16 %v4566_v62, %v4565_v5  ;;  %v3073_v12 = vshll.u32 %v2734_v8, 16  ;;  %v4304_v62 = vshll.u32 %v7731_v31, 16 }
 0x1f4   : > { %8827 = vst [vmem:[#allocation62_spill] sm:$0xff] %v7819_v58  ;;  %v7830_v58 = vrot.slane %v4294_v56, 5  ;;  %v3061_v5 = vrot.slane %v3060_v21, 4  ;;  %v4322_v31 = vshrl.u32 %v7768_v4, 16 }
 0x1f5   : > { %v3070_v34 = vor.u32 %v3069_v46, %v3065_v33  ;;  %v3075_v46 = vrot.slane %v3073_v12, 5  ;;  %v4306_v19 = vrot.slane %v4304_v62, 5  ;;  %v3081_v12 = vshll.u32 %v2735_v28, 16 }
 0x1f6   : > { %v4301_v20 = vor.u32 %v4300_v23, %v7830_v58 }
 0x1f7   : > { %v3071_v38 = vrot.slane %v3070_v34, 4 }
 0x1f8   : > { %5860 = vmatmul.msk.bf16.gmra.mxu2 %vm1587_vm1, %v6385_v36  ;;  %6260 = vmatmul.msk.bf16.gmra.mxu0 %vm1587_vm1, %v4593_v9  ;;  %v4291_v36 = vor.u32 %v4290_v26, %v4287_v49  ;;  %v4302_v23 = vrot.slane %v4301_v20, 4  ;;  %v2736_v9 = vld [vmem:[#allocation2 + $0xb8] sm:$0xf]  ;;  %v4318_v49 = vshll.u32 %v7768_v4, 16  ;;  %v4134_v26 = vld [vmem:[#allocation2 + $0x60] sm:$0xf]  ;;  %v3066_v20 = vsel %vm6802_vm15, %v3061_v5, %v3065_v33 }
 0x1f9   : > { %v3076_v2 = vsel %vm6802_vm15, %v3071_v38, %v3075_v46  ;;  %v3078_v4 = vshrl.u32 %v2735_v28, 16  ;;  %v3087_v42 = vshll.u32 %v2736_v9, 16  ;;  %v4309_v25 = vshrl.u32 %v4134_v26, 16  ;;  %v7870_v46 = vpop.f32.mrf.mxu0 }
 0x1fa   : > { %v7837_v56 = vpop.f32.mrf.mxu1  ;;  %v4292_v8 = vrot.slane %v4291_v36, 4  ;;  %v4307_v34 = vsel %vm6802_vm15, %v4302_v23, %v4306_v19  ;;  %v3091_v36 = vshrl.u32 %v2736_v9, 16  ;;  %v4312_v33 = vshll.u32 %v4134_v26, 16  ;;  %8835 = vst [vmem:[#allocation70_spill] sm:$0xff] %v7870_v46  ;;  %v7872_v19 = vpop.f32.mrf.mxu3 }
 0x1fb   : > { %8829 = vst [vmem:[#allocation64_spill] sm:$0xff] %v7837_v56  ;;  %v7839_v7 = vpop.f32.mrf.mxu2  ;;  %v7868_v5 = vrot.slane %v4318_v49, 5  ;;  %v4324_v38 = vrot.slane %v4322_v31, 4  ;;  %v3080_v28 = vrot.slane %v3078_v4, 4  ;;  %v3083_v9 = vrot.slane %v3081_v12, 5 }
 0x1fc   : > { %8830 = vst [vmem:[#allocation65_spill] sm:$0xff] %v7839_v7  ;;  %v7852_v7 = vpack.c.b16 %v4998_v11, %v4997_v29  ;;  %v4297_v21 = vsel %vm6802_vm15, %v4292_v8, %v7830_v58  ;;  %v6386_v11 = vld [vmem:[#allocation2 + $0x3c] sm:$0xff]  ;;  %v4568_v58 = vunpack.c.l.b16 %v4307_v34  ;;  %v3160_v8 = vunpack.c.l.b16 %v3066_v20 }
 0x1fd   : > { %6068 = vmatmul.msk.bf16.gmra.mxu1 %vm1587_vm1, %v3178_v24  ;;  %v6442_v24 = vld [vmem:[#allocation2 + $0x54] sm:$0xff]  ;;  %v3161_v29 = vunpack.c.l.b16 %v3076_v2  ;;  %v4567_v23 = vunpack.c.l.b16 %v4297_v21  ;;  %8836 = vst [vmem:[#allocation71_spill] sm:$0xff] %v7872_v19  ;;  %v4311_v26 = vrot.slane %v4309_v25, 4  ;;  %v4314_v49 = vrot.slane %v4312_v33, 5  ;;  %v2738_v25 = vld [vmem:[#allocation2 + $0xc0] sm:$0xf] }
 0x1fe   : > { %v4325_v31 = vor.u32 %v4324_v38, %v7868_v5  ;;  %v4328_v20 = vshll.u32 %v7782_v44, 16  ;;  %v3084_v2 = vor.u32 %v3083_v9, %v3080_v28  ;;  %v3097_v34 = vshll.u32 %v2737_v57, 16  ;;  %v2739_v33 = vld [vmem:[#allocation2 + $0xc4] sm:$0xf] }
 0x1ff   : > { %v4594_v59 = vpack.c.b16 %v4568_v58, %v4567_v23  ;;  %v3179_v46 = vpack.c.b16 %v3161_v29, %v3160_v8  ;;  %v4315_v4 = vor.u32 %v4314_v49, %v4311_v26  ;;  %v4342_v57 = vshll.u32 %v7817_v47, 16  ;;  %v6443_v23 = vld [vmem:[#allocation2 + $0x60] sm:$0xff] }
 0x200   : > { %v4326_v12 = vrot.slane %v4325_v31, 4  ;;  %v3099_v8 = vrot.slane %v3097_v34, 5  ;;  %v3102_v28 = vshrl.u32 %v2738_v25, 16  ;;  %v3105_v9 = vshll.u32 %v2738_v25, 16  ;;  %v6462_v31 = vld [vmem:[%s8751_s3 + $0x108] sm:$0xff] }
 0x201   : > { %v7883_v38 = vpop.f32.mrf.mxu0  ;;  %v4316_v44 = vrot.slane %v4315_v4, 4  ;;  %v3111_v26 = vshll.u32 %v2739_v33, 16  ;;  %v3115_v49 = vshrl.u32 %v2739_v33, 16  ;;  %5109 = vmatpush.bf16.msra.mxu1 %v6462_v31  ;;  %v6387_v33 = vld [vmem:[#allocation2 + $0x48] sm:$0xff] }
 0x202   : > { %v7866_v62 = vpop.f32.mrf.mxu1  ;;  %8839 = vst [vmem:[#allocation74_spill] sm:$0xff] %v7883_v38  ;;  %v7889_v29 = vpop.f32.mrf.mxu3  ;;  %v2740_v38 = vld [vmem:[#allocation2 + $0xc8] sm:$0x1] }
 0x203   : > { %v7854_v22 = vpop.f32.mrf.mxu2  ;;  %6221 = vmatmul.msk.bf16.gmra.mxu3 %vm1587_vm1, %v6442_v24  ;;  %8834 = vst [vmem:[#allocation69_spill] sm:$0xff] %v7866_v62  ;;  %v3089_v24 = vrot.slane %v3087_v42, 5 }
 0x204   : > { %8833 = vst [vmem:[#allocation68_spill] sm:$0xff] %v7854_v22  ;;  %v3093_v22 = vrot.slane %v3091_v36, 4  ;;  %v4330_v36 = vrot.slane %v4328_v20, 5 }
 0x205   : > { %8840 = vst [vmem:[#allocation75_spill] sm:$0xff] %v7889_v29  ;;  %v3117_v29 = vrot.slane %v3115_v49, 4  ;;  %v6434_v49 = vld [vmem:[%s8751_s3 + $0xa8] sm:$0xff] }
 0x206   : > { %v3094_v21 = vor.u32 %v3093_v22, %v3089_v24  ;;  %v4137_v22 = vld [vmem:[#allocation2 + $0x6c] sm:$0xf]  ;;  %3686 = vmatpush.bf16.msra.mxu2 %v6434_v49 }
 0x207   : > { %v4333_v34 = vshrl.u32 %v4137_v22, 16 }
 0x208   : > { %5861 = vmatmul.msk.bf16.gmra.mxu2 %vm1587_vm1, %v6386_v11  ;;  %6261 = vmatmul.msk.bf16.gmra.mxu0 %vm1587_vm1, %v4594_v59  ;;  %v3085_v11 = vrot.slane %v3084_v2, 4  ;;  %v3095_v58 = vrot.slane %v3094_v21, 4  ;;  %v4331_v59 = vsel %vm6802_vm15, %v4326_v12, %v4330_v36  ;;  %v4321_v21 = vsel %vm6802_vm15, %v4316_v44, %v7868_v5 }
 0x209   : > { %v4570_v4 = vunpack.c.l.b16 %v4331_v59  ;;  %v4336_v12 = vshll.u32 %v4137_v22, 16  ;;  %v7904_v36 = vrot.slane %v4342_v57, 5  ;;  %v4335_v5 = vrot.slane %v4333_v34, 4  ;;  %v7910_v22 = vpop.f32.mrf.mxu0 }
 0x20a   : > { %v7881_v42 = vpop.f32.mrf.mxu1  ;;  %v3090_v2 = vsel %vm6802_vm15, %v3085_v11, %v3089_v24  ;;  %8843 = vst [vmem:[#allocation78_spill] sm:$0xff] %v7910_v22 }
 0x20b   : > { %v7876_v62 = vpop.f32.mrf.mxu2  ;;  %8838 = vst [vmem:[#allocation73_spill] sm:$0xff] %v7881_v42  ;;  %v3162_v24 = vunpack.c.l.b16 %v3090_v2  ;;  %v4338_v44 = vrot.slane %v4336_v12, 5  ;;  %v4140_v12 = vld [vmem:[#allocation2 + $0x78] sm:$0xf] }
 0x20c   : > { %8837 = vst [vmem:[#allocation72_spill] sm:$0xff] %v7876_v62  ;;  %v3113_v62 = vrot.slane %v3111_v26, 5  ;;  %v6461_v26 = vld [vmem:[%s8751_s3 + $0x100] sm:$0xff] }
 0x20d   : > { %6069 = vmatmul.msk.bf16.gmra.mxu1 %vm1587_vm1, %v3179_v46  ;;  %v4346_v46 = vshrl.u32 %v7817_v47, 16  ;;  %v3100_v47 = vsel %vm6802_vm15, %v3095_v58, %v3099_v8  ;;  %v4569_v58 = vunpack.c.l.b16 %v4321_v21  ;;  %v7921_v21 = vpop.f32.mrf.mxu3 }
 0x20e   : > { %v3163_v11 = vunpack.c.l.b16 %v3100_v47  ;;  %v4352_v47 = vshll.u32 %v7827_v27, 16  ;;  %8845 = vst [vmem:[#allocation80_spill] sm:$0xff] %v7921_v21  ;;  %5110 = vmatpush.bf16.msra.mxu1 %v6461_v26 }
 0x20f   : > { %v4348_v25 = vrot.slane %v4346_v46, 4  ;;  %v4595_v57 = vpack.c.b16 %v4570_v4, %v4569_v58 }
 0x210   : > { %v3180_v31 = vpack.c.b16 %v3163_v11, %v3162_v24  ;;  %v4357_v11 = vshrl.u32 %v4140_v12, 16 }
 0x211   : > { %v4349_v59 = vor.u32 %v4348_v25, %v7904_v36  ;;  %v4354_v25 = vrot.slane %v4352_v47, 5 }
 0x212   : > { %v7907_v8 = vpop.f32.mrf.mxu1 }
 0x213   : > { %v7894_v20 = vpop.f32.mrf.mxu2  ;;  %6222 = vmatmul.msk.bf16.gmra.mxu3 %vm1587_vm1, %v6443_v23  ;;  %v3107_v23 = vrot.slane %v3105_v9, 5  ;;  %8842 = vst [vmem:[#allocation77_spill] sm:$0xff] %v7907_v8  ;;  %v3121_v9 = vshll.u32 %v2740_v38, 16  ;;  %v4339_v38 = vor.u32 %v4338_v44, %v4335_v5  ;;  %v4360_v44 = vshll.u32 %v4140_v12, 16 }
 0x214   : > { %8841 = vst [vmem:[#allocation76_spill] sm:$0xff] %v7894_v20  ;;  %v3104_v20 = vrot.slane %v3102_v28, 4  ;;  %v3118_v28 = vor.u32 %v3117_v29, %v3113_v62  ;;  %v4350_v29 = vrot.slane %v4349_v59, 4 }
 0x215   : > { %v3123_v4 = vrot.slane %v3121_v9, 5  ;;  %v4340_v24 = vrot.slane %v4339_v38, 4 }
 0x216   : > { %v3108_v46 = vor.u32 %v3107_v23, %v3104_v20  ;;  %v3119_v34 = vrot.slane %v3118_v28, 4  ;;  %v4142_v23 = vld [vmem:[#allocation2 + $0x80] sm:$0x1]  ;;  %v4355_v27 = vsel %vm6802_vm15, %v4350_v29, %v4354_v25  ;;  %v7935_v29 = vpop.f32.mrf.mxu0 }
 0x217   : > { %v4923_v38 = vrot.slane %v4142_v23, 5  ;;  %8848 = vst [vmem:[#allocation83_spill] sm:$0xff] %v7935_v29 }
 0x218   : > { %5862 = vmatmul.msk.bf16.gmra.mxu2 %vm1587_vm1, %v6387_v33  ;;  %6262 = vmatmul.msk.bf16.gmra.mxu0 %vm1587_vm1, %v4595_v57  ;;  %v3109_v20 = vrot.slane %v3108_v46, 4  ;;  %v4141_v33 = vld [vmem:[#allocation2 + $0x7c] sm:$0xf]  ;;  %v6444_v57 = vld [vmem:[#allocation2 + $0x6c] sm:$0xff]  ;;  %v3124_v5 = vsel %vm6802_vm15, %v3119_v34, %v3123_v4  ;;  %v4806_v46 = vld [vmem:[#allocation2 + $0x78] sm:$0xe] }
 0x219   : > { %v4920_v58 = vrot.slane %v4141_v33, 5  ;;  %v4366_v59 = vshll.u32 %v4141_v33, 16  ;;  %v4370_v49 = vshrl.u32 %v4141_v33, 16  ;;  %v3165_v4 = vunpack.c.l.b16 %v3124_v5  ;;  %v7945_v33 = vpop.f32.mrf.mxu3 }
 0x21a   : > { %v3114_v26 = vsel %vm6802_vm15, %v3109_v20, %v3113_v62  ;;  %v7931_v28 = vpop.f32.mrf.mxu1  ;;  %v4345_v62 = vsel %vm6802_vm15, %v4340_v24, %v7904_v36  ;;  %v4572_v20 = vunpack.c.l.b16 %v4355_v27  ;;  %8849 = vst [vmem:[#allocation84_spill] sm:$0xff] %v7945_v33 }
 0x21b   : > { %v7918_v2 = vpop.f32.mrf.mxu2  ;;  %8846 = vst [vmem:[#allocation81_spill] sm:$0xff] %v7931_v28  ;;  %v4922_v47 = vrot.slane %v4920_v58, 4  ;;  %v3164_v34 = vunpack.c.l.b16 %v3114_v26  ;;  %v4368_v21 = vrot.slane %v4366_v59, 5  ;;  %v4372_v22 = vrot.slane %v4370_v49, 4 }
 0x21c   : > { %8844 = vst [vmem:[#allocation79_spill] sm:$0xff] %v7918_v2  ;;  %v4362_v2 = vrot.slane %v4360_v44, 5  ;;  %v4571_v36 = vunpack.c.l.b16 %v4345_v62  ;;  %v4143_v44 = vld [vmem:[#allocation2 + $0x84] sm:$0xf] }
 0x21d   : > { %6070 = vmatmul.msk.bf16.gmra.mxu1 %vm1587_vm1, %v3180_v31  ;;  %v6280_v31 = vrot.slane %v4806_v46, 9  ;;  %v4924_v25 = vsel %vm6796_vm14, %v4922_v47, %v4923_v38  ;;  %v6388_v46 = vld [vmem:[#allocation2 + $0x54] sm:$0xff]  ;;  %v3181_v27 = vpack.c.b16 %v3165_v4, %v3164_v34  ;;  %v4376_v47 = vshll.u32 %v4142_v23, 16  ;;  %v4144_v38 = vld [vmem:[#allocation2 + $0x88] sm:$0xf] }
 0x21e   : > { %v4596_v26 = vpack.c.b16 %v4572_v20, %v4571_v36  ;;  %v7956_v59 = vpop.f32.mrf.mxu0  ;;  %v4384_v20 = vshll.u32 %v4143_v44, 16  ;;  %v4394_v23 = vshrl.u32 %v4144_v38, 16  ;;  %v4927_v4 = vrot.slane %v4144_v38, 5 }
 0x21f   : > { %v4921_v12 = vsel %vm6796_vm14, %v6280_v31, %v4920_v58  ;;  %v4373_v31 = vor.u32 %v4372_v22, %v4368_v21  ;;  %8852 = vst [vmem:[#allocation87_spill] sm:$0xff] %v7956_v59  ;;  %v4378_v62 = vrot.slane %v4376_v47, 5  ;;  %v4390_v22 = vshll.u32 %v4144_v38, 16 }
 0x220   : > { %v4999_v29 = vunpack.c.l.b16 %v4921_v12  ;;  %v6445_v12 = vld [vmem:[#allocation2 + $0x78] sm:$0xff]  ;;  %v4386_v47 = vrot.slane %v4384_v20, 5 }
 0x221   : > { %v7958_v34 = vpop.f32.mrf.mxu3 }
 0x222   : > { %8853 = vst [vmem:[#allocation88_spill] sm:$0xff] %v7958_v34 }
 0x223   : > { %v7933_v9 = vpop.f32.mrf.mxu2  ;;  %6223 = vmatmul.msk.bf16.gmra.mxu3 %vm1587_vm1, %v6444_v57  ;;  %v5000_v57 = vunpack.c.l.b16 %v4924_v25 }
 0x224   : > { %8847 = vst [vmem:[#allocation82_spill] sm:$0xff] %v7933_v9  ;;  %v4359_v9 = vrot.slane %v4357_v11, 4  ;;  %v7953_v11 = vpop.f32.mrf.mxu1 }
 0x225   : > { %v7948_v24 = vpack.c.b16 %v5000_v57, %v4999_v29  ;;  %8851 = vst [vmem:[#allocation86_spill] sm:$0xff] %v7953_v11  ;;  %v4374_v29 = vrot.slane %v4373_v31, 4 }
 0x226   : > { %v4363_v58 = vor.u32 %v4362_v2, %v4359_v9  ;;  %v4145_v2 = vld [vmem:[#allocation2 + $0x8c] sm:$0x1]  ;;  %v4381_v9 = vshrl.u32 %v4143_v44, 16  ;;  %v4392_v44 = vrot.slane %v4390_v22, 5 }
 0x227   : > { %v4379_v36 = vsel %vm6802_vm15, %v4374_v29, %v4378_v62 }
 0x228   : > { %5863 = vmatmul.msk.bf16.gmra.mxu2 %vm1587_vm1, %v6388_v46  ;;  %6263 = vmatmul.msk.bf16.gmra.mxu0 %vm1587_vm1, %v4596_v26  ;;  %v4364_v49 = vrot.slane %v4363_v58, 4  ;;  %v4807_v46 = vld [vmem:[#allocation2 + $0x84] sm:$0xe]  ;;  %v4929_v26 = vrot.slane %v4927_v4, 4  ;;  %v4930_v58 = vrot.slane %v4145_v2, 5  ;;  %v4383_v31 = vrot.slane %v4381_v9, 4 }
 0x229   : > { %v4574_v34 = vunpack.c.l.b16 %v4379_v36 }
 0x22a   : > { %v4369_v25 = vsel %vm6802_vm15, %v4364_v49, %v4368_v21  ;;  %v4931_v21 = vsel %vm6796_vm14, %v4929_v26, %v4930_v58  ;;  %v6389_v49 = vld [vmem:[#allocation2 + $0x60] sm:$0xff]  ;;  %v4387_v9 = vor.u32 %v4386_v47, %v4383_v31  ;;  %v4146_v58 = vld [vmem:[#allocation2 + $0x90] sm:$0xf] }
 0x22b   : > { %v7950_v5 = vpop.f32.mrf.mxu2  ;;  %v5002_v29 = vunpack.c.l.b16 %v4931_v21  ;;  %v4408_v31 = vshll.u32 %v4146_v58, 16 }
 0x22c   : > { %8850 = vst [vmem:[#allocation85_spill] sm:$0xff] %v7950_v5  ;;  %v4396_v5 = vrot.slane %v4394_v23, 4  ;;  %v7971_v62 = vpop.f32.mrf.mxu1  ;;  %v4400_v23 = vshll.u32 %v4145_v2, 16 }
 0x22d   : > { %6071 = vmatmul.msk.bf16.gmra.mxu1 %vm1587_vm1, %v3181_v27  ;;  %v6281_v27 = vrot.slane %v4807_v46, 9  ;;  %8855 = vst [vmem:[#allocation90_spill] sm:$0xff] %v7971_v62  ;;  %v7973_v46 = vpop.f32.mrf.mxu0 }
 0x22e   : > { %8856 = vst [vmem:[#allocation91_spill] sm:$0xff] %v7973_v46  ;;  %v4397_v22 = vor.u32 %v4396_v5, %v4392_v44  ;;  %v4402_v26 = vrot.slane %v4400_v23, 5  ;;  %v4148_v5 = vld [vmem:[#allocation2 + $0x98] sm:$0x1]  ;;  %v6390_v46 = vld [vmem:[#allocation2 + $0x6c] sm:$0xff] }
 0x22f   : > { %v4928_v38 = vsel %vm6796_vm14, %v6281_v27, %v4927_v4  ;;  %v7978_v4 = vpop.f32.mrf.mxu3 }
 0x230   : > { %v5001_v59 = vunpack.c.l.b16 %v4928_v38  ;;  %8857 = vst [vmem:[#allocation92_spill] sm:$0xff] %v7978_v4  ;;  %v4398_v36 = vrot.slane %v4397_v22, 4  ;;  %v4147_v38 = vld [vmem:[#allocation2 + $0x94] sm:$0xf] }
 0x231   : > { %v4934_v47 = vrot.slane %v4147_v38, 5 }
 0x232   : > { %v7976_v20 = vpack.c.b16 %v5002_v29, %v5001_v59  ;;  %v4418_v29 = vshrl.u32 %v4147_v38, 16 }
 0x233   : > { %v7962_v57 = vpop.f32.mrf.mxu2  ;;  %6224 = vmatmul.msk.bf16.gmra.mxu3 %vm1587_vm1, %v6445_v12 }
 0x234   : > { %8854 = vst [vmem:[#allocation89_spill] sm:$0xff] %v7962_v57  ;;  %v4573_v57 = vunpack.c.l.b16 %v4369_v25  ;;  %v4388_v25 = vrot.slane %v4387_v9, 4  ;;  %v7987_v2 = vpop.f32.mrf.mxu1  ;;  %v4808_v9 = vld [vmem:[#allocation2 + $0x90] sm:$0xe]  ;;  %v4420_v19 = vrot.slane %v4418_v29, 4 }
 0x235   : > { %8858 = vst [vmem:[#allocation93_spill] sm:$0xff] %v7987_v2  ;;  %v7991_v21 = vpop.f32.mrf.mxu0  ;;  %v6282_v23 = vrot.slane %v4808_v9, 9  ;;  %v4149_v29 = vld [vmem:[#allocation2 + $0x9c] sm:$0xf] }
 0x236   : > { %v4597_v12 = vpack.c.b16 %v4574_v34, %v4573_v57  ;;  %v4393_v59 = vsel %vm6802_vm15, %v4388_v25, %v4392_v44  ;;  %v4403_v34 = vsel %vm6802_vm15, %v4398_v36, %v4402_v26  ;;  %v4405_v57 = vshrl.u32 %v4146_v58, 16  ;;  %8859 = vst [vmem:[#allocation94_spill] sm:$0xff] %v7991_v21 }
 0x237   : > { %v4937_v44 = vrot.slane %v4148_v5, 5  ;;  %v7995_v25 = vpop.f32.mrf.mxu3  ;;  %v4575_v4 = vunpack.c.l.b16 %v4393_v59  ;;  %v4576_v36 = vunpack.c.l.b16 %v4403_v34  ;;  %v4410_v58 = vrot.slane %v4408_v31, 5 }
 0x238   : > { %5864 = vmatmul.msk.bf16.gmra.mxu2 %vm1587_vm1, %v6389_v49  ;;  %6264 = vmatmul.msk.bf16.gmra.mxu0 %vm1587_vm1, %v4597_v12  ;;  %v6446_v49 = vld [vmem:[#allocation2 + $0x84] sm:$0xff]  ;;  %v4936_v12 = vrot.slane %v4934_v47, 4  ;;  %8860 = vst [vmem:[#allocation95_spill] sm:$0xff] %v7995_v25  ;;  %v4407_v26 = vrot.slane %v4405_v57, 4  ;;  %v4935_v21 = vsel %vm6796_vm14, %v6282_v23, %v4934_v47  ;;  %v4424_v57 = vshll.u32 %v4148_v5, 16 }
 0x239   : > { %v5003_v9 = vunpack.c.l.b16 %v4935_v21  ;;  %v4598_v59 = vpack.c.b16 %v4576_v36, %v4575_v4  ;;  %v4150_v4 = vld [vmem:[#allocation2 + $0xa0] sm:$0xf]  ;;  %v4429_v36 = vshrl.u32 %v4149_v29, 16 }
 0x23a   : > { %v4941_v23 = vrot.slane %v4150_v4, 5 }
 0x23b   : > { %v7980_v27 = vpop.f32.mrf.mxu2 }
 0x23c   : > { %v8005_v31 = vpop.f32.mrf.mxu1 }
 0x23d   : > { %6312 = vmatmul.msk.bf16.vlgmr.msra.gmra.mxu1 %vm1587_vm1, %v7586_v35  ;;  %v4414_v35 = vshll.u32 %v4147_v38, 16  ;;  %v4938_v38 = vsel %vm6796_vm14, %v4936_v12, %v4937_v44  ;;  %8861 = vst [vmem:[#allocation96_spill] sm:$0xff] %v8005_v31  ;;  %v8009_v47 = vpop.f32.mrf.mxu0  ;;  %v6447_v12 = vld [vmem:[#allocation2 + $0x90] sm:$0xff] }
 0x23e   : > { %v5004_v2 = vunpack.c.l.b16 %v4938_v38  ;;  %8862 = vst [vmem:[#allocation97_spill] sm:$0xff] %v8009_v47  ;;  %v4431_v47 = vrot.slane %v4429_v36, 4 }
 0x23f   : > { %v4416_v33 = vrot.slane %v4414_v35, 5  ;;  %v8014_v35 = vpop.f32.mrf.mxu3 }
 0x240   : > { %v8003_v25 = vpack.c.b16 %v5004_v2, %v5003_v9  ;;  %8863 = vst [vmem:[#allocation98_spill] sm:$0xff] %v8014_v35  ;;  %v4426_v2 = vrot.slane %v4424_v57, 5  ;;  %v4442_v9 = vshrl.u32 %v4150_v4, 16 }
 0x241   : > { %v4421_v34 = vor.u32 %v4420_v19, %v4416_v33  ;;  %v4151_v19 = vld [vmem:[#allocation2 + $0xa4] sm:$0x1] }
 0x242   : > { %v4444_v28 = vrot.slane %v4442_v9, 4 }
 0x243   : > { %v7993_v22 = vpop.f32.mrf.mxu2  ;;  %6225 = vmatmul.msk.bf16.gmra.mxu3 %vm1587_vm1, %v6446_v49  ;;  %v4411_v49 = vor.u32 %v4410_v58, %v4407_v26  ;;  %v4432_v26 = vshll.u32 %v4149_v29, 16  ;;  %v4438_v58 = vshll.u32 %v4150_v4, 16  ;;  %v6391_v29 = vld [vmem:[#allocation2 + $0x78] sm:$0xff] }
 0x244   : > { %v8023_v57 = vpop.f32.mrf.mxu1 }
 0x245   : > { %v4412_v21 = vrot.slane %v4411_v49, 4  ;;  %8864 = vst [vmem:[#allocation99_spill] sm:$0xff] %v8023_v57  ;;  %v4434_v4 = vrot.slane %v4432_v26, 5  ;;  %v4440_v11 = vrot.slane %v4438_v58, 5  ;;  %v4448_v26 = vshll.u32 %v4151_v19, 16 }
 0x247   : > { %v4417_v5 = vsel %vm6802_vm15, %v4412_v21, %v4416_v33  ;;  %v4445_v36 = vor.u32 %v4444_v28, %v4440_v11 }
 0x248   : > { %5865 = vmatmul.msk.bf16.gmra.mxu2 %vm1587_vm1, %v6390_v46  ;;  %6265 = vmatmul.msk.bf16.gmra.mxu0 %vm1587_vm1, %v4598_v59  ;;  %v4422_v46 = vrot.slane %v4421_v34, 4  ;;  %v4943_v59 = vrot.slane %v4941_v23, 4  ;;  %v4944_v34 = vrot.slane %v4151_v19, 5  ;;  %v4577_v33 = vunpack.c.l.b16 %v4417_v5 }
 0x24a   : > { %v4427_v44 = vsel %vm6802_vm15, %v4422_v46, %v4426_v2  ;;  %v4945_v46 = vsel %vm6796_vm14, %v4943_v59, %v4944_v34  ;;  %v8029_v2 = vpop.f32.mrf.mxu0  ;;  %v4450_v34 = vrot.slane %v4448_v26, 5 }
 0x24b   : > { %v8007_v62 = vpop.f32.mrf.mxu2  ;;  %v4578_v21 = vunpack.c.l.b16 %v4427_v44  ;;  %8865 = vst [vmem:[#allocation100_spill] sm:$0xff] %v8029_v2  ;;  %v5006_v31 = vunpack.c.l.b16 %v4945_v46 }
 0x24c   : > { %v8044_v9 = vpop.f32.mrf.mxu1 }
 0x24d   : > { %6313 = vmatmul.msk.bf16.gmra.mxu1 %vm1587_vm1, %v7599_v55  ;;  %v4809_v55 = vld [vmem:[#allocation2 + $0x9c] sm:$0xe]  ;;  %v4599_v44 = vpack.c.b16 %v4578_v21, %v4577_v33  ;;  %8867 = vst [vmem:[#allocation102_spill] sm:$0xff] %v8044_v9  ;;  %v4154_v21 = vld [vmem:[#allocation2 + $0xb0] sm:$0x1] }
 0x24e   : > { %v6283_v49 = vrot.slane %v4809_v55, 9 }
 0x250   : > { %v4942_v35 = vsel %vm6796_vm14, %v6283_v49, %v4941_v23  ;;  %v4435_v23 = vor.u32 %v4434_v4, %v4431_v47  ;;  %v6433_v49 = vld [vmem:[%s8751_s3 + $0xa0] sm:$0xff]  ;;  %v4446_v47 = vrot.slane %v4445_v36, 4 }
 0x251   : > { %v5005_v55 = vunpack.c.l.b16 %v4942_v35  ;;  %3687 = vmatpush.bf16.msra.mxu2 %v6433_v49  ;;  %v4152_v35 = vld [vmem:[#allocation2 + $0xa8] sm:$0xf] }
 0x252   : > { %v4436_v58 = vrot.slane %v4435_v23, 4  ;;  %v8046_v33 = vpop.f32.mrf.mxu0  ;;  %v4453_v46 = vshrl.u32 %v4152_v35, 16  ;;  %v4810_v23 = vld [vmem:[#allocation2 + $0xa8] sm:$0xe]  ;;  %v4451_v36 = vsel %vm6802_vm15, %v4446_v47, %v4450_v34 }
 0x253   : > { %v8020_v38 = vpop.f32.mrf.mxu2  ;;  %6226 = vmatmul.msk.bf16.gmra.mxu3 %vm1587_vm1, %v6447_v12  ;;  %v8031_v12 = vpop.f32.mrf.mxu3  ;;  %v8034_v5 = vpack.c.b16 %v5006_v31, %v5005_v55  ;;  %v4153_v31 = vld [vmem:[#allocation2 + $0xac] sm:$0xf]  ;;  %8868 = vst [vmem:[#allocation103_spill] sm:$0xff] %v8046_v33  ;;  %v6284_v26 = vrot.slane %v4810_v23, 9  ;;  %v4580_v42 = vunpack.c.l.b16 %v4451_v36 }
 0x254   : > { %8866 = vst [vmem:[#allocation101_spill] sm:$0xff] %v8031_v12  ;;  %v4462_v28 = vshll.u32 %v4153_v31, 16  ;;  %v4466_v19 = vshrl.u32 %v4153_v31, 16  ;;  %v4948_v4 = vrot.slane %v4153_v31, 5  ;;  %v4951_v12 = vrot.slane %v4154_v21, 5 }
 0x256   : > { %v4950_v33 = vrot.slane %v4948_v4, 4  ;;  %v4464_v31 = vrot.slane %v4462_v28, 5  ;;  %v4468_v9 = vrot.slane %v4466_v19, 4  ;;  %v4949_v57 = vsel %vm6796_vm14, %v6284_v26, %v4948_v4 }
 0x257   : > { %v5007_v56 = vunpack.c.l.b16 %v4949_v57  ;;  %v4472_v28 = vshll.u32 %v4154_v21, 16  ;;  %v4157_v21 = vld [vmem:[#allocation2 + $0xbc] sm:$0x1] }
 0x258   : > { %5866 = vmatmul.msk.bf16.gmra.mxu2 %vm1587_vm1, %v6391_v29  ;;  %6266 = vmatmul.msk.bf16.gmra.mxu0 %vm1587_vm1, %v4599_v44  ;;  %v4456_v29 = vshll.u32 %v4152_v35, 16  ;;  %v6448_v44 = vld [vmem:[#allocation2 + $0x9c] sm:$0xff]  ;;  %v4455_v35 = vrot.slane %v4453_v46, 4  ;;  %v8064_v46 = vpop.f32.mrf.mxu1 }
 0x259   : > { %8870 = vst [vmem:[#allocation105_spill] sm:$0xff] %v8064_v46 }
 0x25a   : > { %v4458_v2 = vrot.slane %v4456_v29, 5  ;;  %v4469_v29 = vor.u32 %v4468_v9, %v4464_v31  ;;  %v8066_v19 = vpop.f32.mrf.mxu0 }
 0x25b   : > { %v8039_v59 = vpop.f32.mrf.mxu2  ;;  %v8048_v55 = vpop.f32.mrf.mxu3 }
 0x25c   : > { %v4459_v34 = vor.u32 %v4458_v2, %v4455_v35  ;;  %v4470_v2 = vrot.slane %v4469_v29, 4  ;;  %v6449_v35 = vld [vmem:[#allocation2 + $0xa8] sm:$0xff] }
 0x25d   : > { %6314 = vmatmul.msk.bf16.gmra.mxu1 %vm1587_vm1, %v7635_v37  ;;  %v4441_v37 = vsel %vm6802_vm15, %v4436_v58, %v4440_v11  ;;  %v4952_v11 = vsel %vm6796_vm14, %v4950_v33, %v4951_v12  ;;  %v6392_v58 = vld [vmem:[#allocation2 + $0x84] sm:$0xff]  ;;  %v4155_v33 = vld [vmem:[#allocation2 + $0xb4] sm:$0xf] }
 0x25e   : > { %v4579_v8 = vunpack.c.l.b16 %v4441_v37  ;;  %v5008_v47 = vunpack.c.l.b16 %v4952_v11  ;;  %v4460_v57 = vrot.slane %v4459_v34, 4  ;;  %v4156_v37 = vld [vmem:[#allocation2 + $0xb8] sm:$0xf]  ;;  %v4480_v36 = vshll.u32 %v4155_v33, 16 }
 0x25f   : > { %v4955_v26 = vrot.slane %v4156_v37, 5  ;;  %v4486_v11 = vshll.u32 %v4156_v37, 16 }
 0x260   : > { %v8062_v23 = vpack.c.b16 %v5008_v47, %v5007_v56  ;;  %v4600_v4 = vpack.c.b16 %v4580_v42, %v4579_v8  ;;  %v4474_v56 = vrot.slane %v4472_v28, 5  ;;  %v4465_v9 = vsel %vm6802_vm15, %v4460_v57, %v4464_v31  ;;  %v4811_v47 = vld [vmem:[#allocation2 + $0xb4] sm:$0xe]  ;;  %v8079_v34 = vpop.f32.mrf.mxu1 }
 0x261   : > { %v4477_v8 = vshrl.u32 %v4155_v33, 16  ;;  %8872 = vst [vmem:[#allocation107_spill] sm:$0xff] %v8079_v34  ;;  %v6285_v29 = vrot.slane %v4811_v47, 9  ;;  %v4957_v28 = vrot.slane %v4955_v26, 4  ;;  %v4581_v31 = vunpack.c.l.b16 %v4465_v9 }
 0x262   : > { %v4475_v42 = vsel %vm6802_vm15, %v4470_v2, %v4474_v56  ;;  %v8083_v46 = vpop.f32.mrf.mxu0  ;;  %v4482_v56 = vrot.slane %v4480_v36, 5  ;;  %v4488_v47 = vrot.slane %v4486_v11, 5  ;;  %v4496_v36 = vshll.u32 %v4157_v21, 16 }
 0x263   : > { %v8052_v49 = vpop.f32.mrf.mxu2  ;;  %6227 = vmatmul.msk.bf16.gmra.mxu3 %vm1587_vm1, %v6448_v44  ;;  %v8070_v12 = vpop.f32.mrf.mxu3  ;;  %v4582_v57 = vunpack.c.l.b16 %v4475_v42  ;;  %v4479_v2 = vrot.slane %v4477_v8, 4  ;;  %v4956_v33 = vsel %vm6796_vm14, %v6285_v29, %v4955_v26 }
 0x264   : > { %8869 = vst [vmem:[#allocation104_spill] sm:$0xff] %v8052_v49 }
 0x265   : > { %v4601_v9 = vpack.c.b16 %v4582_v57, %v4581_v31  ;;  %v4483_v42 = vor.u32 %v4482_v56, %v4479_v2 }
 0x268   : > { %5867 = vmatmul.msk.bf16.gmra.mxu2 %vm1587_vm1, %v6392_v58  ;;  %6267 = vmatmul.msk.bf16.gmra.mxu0 %vm1587_vm1, %v4600_v4  ;;  %v4490_v58 = vshrl.u32 %v4156_v37, 16  ;;  %v4958_v4 = vrot.slane %v4157_v21, 5  ;;  %v8098_v26 = vpop.f32.mrf.mxu1 }
 0x269   : > { %8874 = vst [vmem:[#allocation109_spill] sm:$0xff] %v8098_v26 }
 0x26a   : > { %v4959_v37 = vsel %vm6796_vm14, %v4957_v28, %v4958_v4  ;;  %v8102_v11 = vpop.f32.mrf.mxu0  ;;  %v4158_v28 = vld [vmem:[#allocation2 + $0xc0] sm:$0xf]  ;;  %v8110_v4 = vld [vmem:[#allocation2 + $0xc4] sm:$0xf] }
 0x26b   : > { %v8068_v44 = vpop.f32.mrf.mxu2  ;;  %v8090_v34 = vpop.f32.mrf.mxu3  ;;  %v5010_v40 = vunpack.c.l.b16 %v4959_v37  ;;  %v4504_v57 = vshll.u32 %v4158_v28, 16  ;;  %v4510_v2 = vshll.u32 %v8110_v4, 16  ;;  %v4514_v56 = vshrl.u32 %v8110_v4, 16 }
 0x26c   : > { %8871 = vst [vmem:[#allocation106_spill] sm:$0xff] %v8068_v44  ;;  %v5009_v44 = vunpack.c.l.b16 %v4956_v33  ;;  %v6394_v33 = vld [vmem:[#allocation2 + $0x9c] sm:$0xff] }
 0x26d   : > { %6315 = vmatmul.msk.bf16.gmra.mxu1 %vm1587_vm1, %v7658_v6 }
 0x273   : > { %v8081_v6 = vpop.f32.mrf.mxu2  ;;  %6228 = vmatmul.msk.bf16.gmra.mxu3 %vm1587_vm1, %v6449_v35  ;;  %v8093_v35 = vpack.c.b16 %v5010_v40, %v5009_v44  ;;  %v8104_v40 = vpop.f32.mrf.mxu3  ;;  %v6450_v44 = vld [vmem:[#allocation2 + $0xb4] sm:$0xff] }
 0x274   : > { %8873 = vst [vmem:[#allocation108_spill] sm:$0xff] %v8081_v6  ;;  %v4492_v6 = vrot.slane %v4490_v58, 4  ;;  %v4484_v58 = vrot.slane %v4483_v42, 4 }
 0x276   : > { %v4493_v8 = vor.u32 %v4492_v6, %v4488_v47  ;;  %v4489_v21 = vsel %vm6802_vm15, %v4484_v58, %v4488_v47  ;;  %v8117_v47 = vpop.f32.mrf.mxu1  ;;  %v4516_v58 = vrot.slane %v4514_v56, 4 }
 0x277   : > { %v4583_v37 = vunpack.c.l.b16 %v4489_v21  ;;  %8876 = vst [vmem:[#allocation111_spill] sm:$0xff] %v8117_v47  ;;  %v6451_v47 = vld [vmem:[#allocation2 + $0xc0] sm:$0xff] }
 0x278   : > { %5868 = vmatmul.msk.bf16.gmra.mxu2 %vm1587_vm1, %v6393_v17  ;;  %6268 = vmatmul.msk.bf16.gmra.mxu0 %vm1587_vm1, %v4601_v9  ;;  %v4494_v29 = vrot.slane %v4493_v8, 4  ;;  %v4498_v17 = vrot.slane %v4496_v36, 5  ;;  %v4506_v8 = vrot.slane %v4504_v57, 5  ;;  %v4512_v36 = vrot.slane %v4510_v2, 5 }
 0x27a   : > { %v4499_v6 = vsel %vm6802_vm15, %v4494_v29, %v4498_v17  ;;  %v8119_v29 = vpop.f32.mrf.mxu0  ;;  %v8122_v17 = vld [vmem:[#allocation2 + $0xc8] sm:$0x1]  ;;  %v4517_v21 = vor.u32 %v4516_v58, %v4512_v36 }
 0x27b   : > { %v8095_v49 = vpop.f32.mrf.mxu2  ;;  %v4584_v9 = vunpack.c.l.b16 %v4499_v6  ;;  %v4520_v6 = vshll.u32 %v8122_v17, 16 }
 0x27c   : > { %v4518_v57 = vrot.slane %v4517_v21, 4 }
 0x27d   : > { %6316 = vmatmul.msk.bf16.gmra.mxu1 %vm1587_vm1, %v7705_v53  ;;  %v4501_v53 = vshrl.u32 %v4158_v28, 16  ;;  %v8124_v28 = vpop.f32.mrf.mxu3  ;;  %v4602_v26 = vpack.c.b16 %v4584_v9, %v4583_v37  ;;  %v4522_v2 = vrot.slane %v4520_v6, 5 }
 0x27e   : > { %v8132_v56 = vpop.f32.mrf.mxu1 }
 0x27f   : > { %v4503_v42 = vrot.slane %v4501_v53, 4  ;;  %8877 = vst [vmem:[#allocation112_spill] sm:$0xff] %v8132_v56 }
 0x283   : > { %v8112_v31 = vpop.f32.mrf.mxu2  ;;  %6229 = vmatmul.msk.bf16.gmra.mxu3 %vm1587_vm1, %v6450_v44  ;;  %v4507_v44 = vor.u32 %v4506_v8, %v4503_v42  ;;  %v4523_v42 = vsel %vm6802_vm15, %v4518_v57, %v4522_v2  ;;  %v6485_v57 = vld [vmem:[#allocation2 + $0x10] sm:$0xf] }
 0x284   : > { %8875 = vst [vmem:[#allocation110_spill] sm:$0xff] %v8112_v31  ;;  %v4586_v58 = vunpack.c.l.b16 %v4523_v42  ;;  %v3441_v2 = vrot.slane %v6485_v57, 5 }
 0x285   : > { %v4508_v53 = vrot.slane %v4507_v44, 4 }
 0x286   : > { %v8146_v21 = vpop.f32.mrf.mxu1 }
 0x287   : > { %v4513_v9 = vsel %vm6802_vm15, %v4508_v53, %v4512_v36  ;;  %8879 = vst [vmem:[#allocation114_spill] sm:$0xff] %v8146_v21  ;;  %v6396_v53 = vld [vmem:[#allocation2 + $0xb4] sm:$0xff] }
 0x288   : > { %5869 = vmatmul.msk.bf16.gmra.mxu2 %vm1587_vm1, %v6394_v33  ;;  %6269 = vmatmul.msk.bf16.gmra.mxu0 %vm1587_vm1, %v4602_v26  ;;  %v8134_v33 = vpop.f32.mrf.mxu0  ;;  %v8142_v26 = vpop.f32.mrf.mxu3  ;;  %v4585_v8 = vunpack.c.l.b16 %v4513_v9  ;;  %v3443_v9 = vrot.slane %v3441_v2, 4 }
 0x28a   : > { %v4603_v44 = vpack.c.b16 %v4586_v58, %v4585_v8  ;;  %v6486_v8 = vld [vmem:[#allocation2 + $0x14] sm:$0x1] }
 0x28b   : > { %v8126_v31 = vpop.f32.mrf.mxu2  ;;  %v3444_v58 = vrot.slane %v6486_v8, 5 }
 0x28d   : > { %6317 = vmatmul.msk.bf16.gmra.mxu1 %vm1587_vm1, %v7749_v52  ;;  %v6395_v52 = vld [vmem:[#allocation2 + $0xa8] sm:$0xff] }
 0x290   : > { %v8150_v56 = vpop.f32.mrf.mxu0 }
 0x293   : > { %v8136_v37 = vpop.f32.mrf.mxu2  ;;  %6230 = vmatmul.msk.bf16.gmra.mxu3 %vm1587_vm1, %v6451_v47  ;;  %v8157_v47 = vpop.f32.mrf.mxu1 }
 0x294   : > { %8878 = vst [vmem:[#allocation113_spill] sm:$0xff] %v8136_v37  ;;  %v6488_v37 = vld [vmem:[#allocation2 + $0x20] sm:$0x1] }
 0x295   : > { %8882 = vst [vmem:[#allocation117_spill] sm:$0xff] %v8157_v47  ;;  %v3445_v47 = vsel %vm6796_vm14, %v3443_v9, %v3444_v58  ;;  %v3451_v9 = vrot.slane %v6488_v37, 5 }
 0x296   : > { %v3561_v21 = vunpack.c.l.b16 %v3445_v47 }
 0x298   : > { %5870 = vmatmul.msk.bf16.gmra.mxu2 %vm1587_vm1, %v6395_v52  ;;  %6270 = vmatmul.msk.bf16.gmra.mxu0 %vm1587_vm1, %v4603_v44  ;;  %v3375_v52 = vld [vmem:[#allocation2 + $0xc] sm:$0xe] }
 0x29b   : > { %v8148_v6 = vpop.f32.mrf.mxu2  ;;  %v8164_v44 = vpop.f32.mrf.mxu1 }
 0x29c   : > { %8880 = vst [vmem:[#allocation115_spill] sm:$0xff] %v8148_v6 }
 0x29d   : > { %6318 = vmatmul.msk.bf16.gmra.mxu1 %vm1587_vm1, %v7802_v10  ;;  %8884 = vst [vmem:[#allocation119_spill] sm:$0xff] %v8164_v44  ;;  %v6072_v10 = vrot.slane %v3375_v52, 9  ;;  %v3376_v44 = vld [vmem:[#allocation2 + $0x18] sm:$0xe] }
 0x29e   : > { %v6073_v47 = vrot.slane %v3376_v44, 9  ;;  %v3377_v44 = vld [vmem:[#allocation2 + $0x24] sm:$0xe] }
 0x29f   : > { %v3442_v57 = vsel %vm6796_vm14, %v6072_v10, %v3441_v2 }
 0x2a0   : > { %v3560_v18 = vunpack.c.l.b16 %v3442_v57  ;;  %v6489_v57 = vld [vmem:[#allocation2 + $0x28] sm:$0xf] }
 0x2a3   : > { %v8155_v36 = vpop.f32.mrf.mxu2  ;;  %v8173_v8 = vpop.f32.mrf.mxu1 }
 0x2a4   : > { %8881 = vst [vmem:[#allocation116_spill] sm:$0xff] %v8155_v36  ;;  %v6487_v36 = vld [vmem:[#allocation2 + $0x1c] sm:$0xf] }
 0x2a5   : > { %v3448_v6 = vrot.slane %v6487_v36, 5  ;;  %8885 = vst [vmem:[#allocation120_spill] sm:$0xff] %v8173_v8  ;;  %v3455_v8 = vrot.slane %v6489_v57, 5 }
 0x2a7   : > { %v3450_v52 = vrot.slane %v3448_v6, 4 }
 0x2a8   : > { %5871 = vmatmul.msk.bf16.gmra.mxu2 %vm1587_vm1, %v6396_v53 }
 0x2a9   : > { %v3452_v2 = vsel %vm6796_vm14, %v3450_v52, %v3451_v9 }
 0x2ab   : > { %v8160_v42 = vpop.f32.mrf.mxu2  ;;  %v8183_v36 = vpop.f32.mrf.mxu1 }
 0x2ac   : > { %8883 = vst [vmem:[#allocation118_spill] sm:$0xff] %v8160_v42  ;;  %v3592_v42 = vpack.c.b16 %v3561_v21, %v3560_v18  ;;  %v3449_v18 = vsel %vm6796_vm14, %v6073_v47, %v3448_v6  ;;  %v3563_v21 = vunpack.c.l.b16 %v3452_v2  ;;  %v6074_v6 = vrot.slane %v3377_v44, 9  ;;  %v3378_v44 = vld [vmem:[#allocation2 + $0x30] sm:$0xe] }
 0x2ad   : > { %6319 = vmatmul.msk.bf16.gmra.mxu1 %vm1587_vm1, %v7852_v7  ;;  %8887 = vst [vmem:[#allocation122_spill] sm:$0xff] %v8183_v36  ;;  %v3562_v58 = vunpack.c.l.b16 %v3449_v18 }
 0x2ae   : > { %v3456_v2 = vsel %vm6796_vm14, %v6074_v6, %v3455_v8 }
 0x2af   : > { %v3593_v10 = vpack.c.b16 %v3563_v21, %v3562_v58  ;;  %v3564_v58 = vunpack.c.l.b16 %v3456_v2 }
 0x2b3   : > { %v8170_v53 = vpop.f32.mrf.mxu2  ;;  %v8190_v9 = vpop.f32.mrf.mxu1 }
 0x2b4   : > { %8890 = vst [vmem:[#allocation125_spill] sm:$0xff] %v8190_v9 }
 0x2b8   : > { %6112 = vmatmul.msk.bf16.vlgmr.msra.gmra.mxu2 %vm1587_vm1, %v3592_v42 }
 0x2bb   : > { %v8175_v7 = vpop.f32.mrf.mxu2  ;;  %v8200_v57 = vpop.f32.mrf.mxu1 }
 0x2bc   : > { %8886 = vst [vmem:[#allocation121_spill] sm:$0xff] %v8175_v7  ;;  %v6490_v7 = vld [vmem:[#allocation2 + $0x2c] sm:$0x1] }
 0x2bd   : > { %6320 = vmatmul.msk.bf16.gmra.mxu1 %vm1587_vm1, %v7948_v24  ;;  %v3457_v24 = vrot.slane %v3455_v8, 4  ;;  %v3458_v52 = vrot.slane %v6490_v7, 5  ;;  %8892 = vst [vmem:[#allocation127_spill] sm:$0xff] %v8200_v57  ;;  %v6491_v7 = vld [vmem:[#allocation2 + $0x34] sm:$0xf]  ;;  %v6075_v8 = vrot.slane %v3378_v44, 9 }
 0x2be   : > { %v3462_v36 = vrot.slane %v6491_v7, 5  ;;  %v6493_v7 = vld [vmem:[#allocation2 + $0x40] sm:$0xf] }
 0x2bf   : > { %v3459_v47 = vsel %vm6796_vm14, %v3457_v24, %v3458_v52  ;;  %v3469_v57 = vrot.slane %v6493_v7, 5 }
 0x2c0   : > { %v3565_v18 = vunpack.c.l.b16 %v3459_v47  ;;  %v3463_v47 = vsel %vm6796_vm14, %v6075_v8, %v3462_v36 }
 0x2c1   : > { %v3471_v44 = vrot.slane %v3469_v57, 4 }
 0x2c3   : > { %v8185_v42 = vpop.f32.mrf.mxu2  ;;  %v8209_v6 = vpop.f32.mrf.mxu1 }
 0x2c4   : > { %8888 = vst [vmem:[#allocation123_spill] sm:$0xff] %v8185_v42  ;;  %v3382_v42 = vld [vmem:[#allocation2 + $0x60] sm:$0xe] }
 0x2c5   : > { %8894 = vst [vmem:[#allocation129_spill] sm:$0xff] %v8209_v6 }
 0x2c8   : > { %6113 = vmatmul.msk.bf16.gmra.mxu2 %vm1587_vm1, %v3593_v10  ;;  %v3594_v10 = vpack.c.b16 %v3565_v18, %v3564_v58  ;;  %v3566_v58 = vunpack.c.l.b16 %v3463_v47 }
 0x2cb   : > { %v8188_v37 = vpop.f32.mrf.mxu2 }
 0x2cc   : > { %8889 = vst [vmem:[#allocation124_spill] sm:$0xff] %v8188_v37  ;;  %v6492_v37 = vld [vmem:[#allocation2 + $0x38] sm:$0x1] }
 0x2cd   : > { %6321 = vmatmul.msk.bf16.gmra.mxu1 %vm1587_vm1, %v7976_v20  ;;  %v3464_v20 = vrot.slane %v3462_v36, 4  ;;  %v3465_v24 = vrot.slane %v6492_v37, 5  ;;  %v8216_v37 = vpop.f32.mrf.mxu1 }
 0x2cf   : > { %v3466_v52 = vsel %vm6796_vm14, %v3464_v20, %v3465_v24  ;;  %v3379_v20 = vld [vmem:[#allocation2 + $0x3c] sm:$0xe]  ;;  %v6494_v24 = vld [vmem:[#allocation2 + $0x44] sm:$0x1] }
 0x2d0   : > { %v3567_v2 = vunpack.c.l.b16 %v3466_v52  ;;  %v3472_v36 = vrot.slane %v6494_v24, 5  ;;  %v6076_v8 = vrot.slane %v3379_v20, 9  ;;  %v3380_v24 = vld [vmem:[#allocation2 + $0x48] sm:$0xe] }
 0x2d2   : > { %v3473_v52 = vsel %vm6796_vm14, %v3471_v44, %v3472_v36  ;;  %v3470_v47 = vsel %vm6796_vm14, %v6076_v8, %v3469_v57  ;;  %v6496_v44 = vld [vmem:[#allocation2 + $0x50] sm:$0x1]  ;;  %v6077_v8 = vrot.slane %v3380_v24, 9 }
 0x2d3   : > { %v8198_v21 = vpop.f32.mrf.mxu2  ;;  %v3479_v57 = vrot.slane %v6496_v44, 5 }
 0x2d4   : > { %8891 = vst [vmem:[#allocation126_spill] sm:$0xff] %v8198_v21  ;;  %v6499_v21 = vld [vmem:[#allocation2 + $0x64] sm:$0xf] }
 0x2d5   : > { %v8228_v7 = vpop.f32.mrf.mxu1 }
 0x2d8   : > { %6114 = vmatmul.msk.bf16.gmra.mxu2 %vm1587_vm1, %v3594_v10  ;;  %v3595_v10 = vpack.c.b16 %v3567_v2, %v3566_v58  ;;  %v3569_v2 = vunpack.c.l.b16 %v3473_v52 }
 0x2db   : > { %v8203_v9 = vpop.f32.mrf.mxu2 }
 0x2dc   : > { %8893 = vst [vmem:[#allocation128_spill] sm:$0xff] %v8203_v9  ;;  %v3381_v9 = vld [vmem:[#allocation2 + $0x54] sm:$0xe] }
 0x2dd   : > { %6322 = vmatmul.msk.bf16.gmra.mxu1 %vm1587_vm1, %v8003_v25  ;;  %v8235_v36 = vpop.f32.mrf.mxu1 }
 0x2e3   : > { %v8213_v18 = vpop.f32.mrf.mxu2 }
 0x2e4   : > { %8895 = vst [vmem:[#allocation130_spill] sm:$0xff] %v8213_v18 }
 0x2e8   : > { %6115 = vmatmul.msk.bf16.gmra.mxu2 %vm1587_vm1, %v3595_v10  ;;  %v3568_v10 = vunpack.c.l.b16 %v3470_v47 }
 0x2ea   : > { %v3596_v6 = vpack.c.b16 %v3569_v2, %v3568_v10 }
 0x2eb   : > { %v8218_v25 = vpop.f32.mrf.mxu2 }
 0x2ec   : > { %8896 = vst [vmem:[#allocation131_spill] sm:$0xff] %v8218_v25  ;;  %v6495_v25 = vld [vmem:[#allocation2 + $0x4c] sm:$0xf] }
 0x2ed   : > { %6323 = vmatmul.msk.bf16.gmra.mxu1 %vm1587_vm1, %v8034_v5  ;;  %v3476_v18 = vrot.slane %v6495_v25, 5 }
 0x2ef   : > { %v3478_v20 = vrot.slane %v3476_v18, 4  ;;  %v3477_v25 = vsel %vm6796_vm14, %v6077_v8, %v3476_v18  ;;  %v6498_v18 = vld [vmem:[#allocation2 + $0x5c] sm:$0x1]  ;;  %v4812_v8 = vld [vmem:[#allocation2 + $0xc0] sm:$0xe] }
 0x2f0   : > { %v3570_v2 = vunpack.c.l.b16 %v3477_v25  ;;  %v6286_v25 = vrot.slane %v4812_v8, 9 }
 0x2f1   : > { %v3480_v52 = vsel %vm6796_vm14, %v3478_v20, %v3479_v57  ;;  %v4962_v20 = vrot.slane %v8110_v4, 5  ;;  %v3486_v57 = vrot.slane %v6498_v18, 5 }
 0x2f2   : > { %v3571_v47 = vunpack.c.l.b16 %v3480_v52  ;;  %v6078_v52 = vrot.slane %v3381_v9, 9 }
 0x2f3   : > { %v8226_v58 = vpop.f32.mrf.mxu2  ;;  %v4963_v18 = vsel %vm6796_vm14, %v6286_v25, %v4962_v20 }
 0x2f4   : > { %8897 = vst [vmem:[#allocation132_spill] sm:$0xff] %v8226_v58  ;;  %v3597_v10 = vpack.c.b16 %v3571_v47, %v3570_v2  ;;  %v4964_v47 = vrot.slane %v4962_v20, 4  ;;  %v4965_v2 = vrot.slane %v8122_v17, 5  ;;  %v3490_v17 = vrot.slane %v6499_v21, 5  ;;  %v6500_v20 = vld [vmem:[#allocation2 + $0x68] sm:$0x1] }
 0x2f5   : > { %v3493_v25 = vrot.slane %v6500_v20, 5 }
 0x2f6   : > { %v4966_v9 = vsel %vm6796_vm14, %v4964_v47, %v4965_v2 }
 0x2f7   : > { %v5012_v8 = vunpack.c.l.b16 %v4966_v9  ;;  %v6501_v9 = vld [vmem:[#allocation2 + $0x70] sm:$0xf] }
 0x2f8   : > { %6116 = vmatmul.msk.bf16.gmra.mxu2 %vm1587_vm1, %v3596_v6 }
 0x2fb   : > { %v8231_v5 = vpop.f32.mrf.mxu2 }
 0x2fc   : > { %8898 = vst [vmem:[#allocation133_spill] sm:$0xff] %v8231_v5  ;;  %v6497_v5 = vld [vmem:[#allocation2 + $0x58] sm:$0xf] }
 0x2fd   : > { %6324 = vmatmul.msk.bf16.gmra.mxu1 %vm1587_vm1, %v8062_v23  ;;  %v3483_v58 = vrot.slane %v6497_v5, 5  ;;  %v8244_v23 = vpop.f32.mrf.mxu1 }
 0x2ff   : > { %v3485_v24 = vrot.slane %v3483_v58, 4 }
 0x301   : > { %v3487_v5 = vsel %vm6796_vm14, %v3485_v24, %v3486_v57  ;;  %v5011_v57 = vunpack.c.l.b16 %v4963_v18 }
 0x303   : > { %v8241_v6 = vpop.f32.mrf.mxu2 }
 0x304   : > { %8899 = vst [vmem:[#allocation134_spill] sm:$0xff] %v8241_v6 }
 0x305   : > { %v8256_v6 = vpop.f32.mrf.mxu1 }
 0x308   : > { %6117 = vmatmul.msk.bf16.gmra.mxu2 %vm1587_vm1, %v3597_v10  ;;  %v3484_v10 = vsel %vm6796_vm14, %v6078_v52, %v3483_v58  ;;  %v5029_v58 = vpack.c.b16 %v5012_v8, %v5011_v57 }
 0x30b   : > { %v8246_v44 = vpop.f32.mrf.mxu2 }
 0x30c   : > { %8900 = vst [vmem:[#allocation135_spill] sm:$0xff] %v8246_v44  ;;  %v3573_v44 = vunpack.c.l.b16 %v3487_v5  ;;  %v3492_v5 = vrot.slane %v3490_v17, 4 }
 0x30d   : > { %6325 = vmatmul.msk.bf16.gmra.mxu1 %vm1587_vm1, %v8093_v35  ;;  %v3572_v35 = vunpack.c.l.b16 %v3484_v10  ;;  %v6079_v10 = vrot.slane %v3382_v42, 9  ;;  %v6502_v42 = vld [vmem:[#allocation2 + $0x74] sm:$0x1] }
 0x30e   : > { %v3500_v20 = vrot.slane %v6502_v42, 5 }
 0x30f   : > { %v3598_v24 = vpack.c.b16 %v3573_v44, %v3572_v35  ;;  %v3494_v44 = vsel %vm6796_vm14, %v3492_v5, %v3493_v25  ;;  %v3491_v21 = vsel %vm6796_vm14, %v6079_v10, %v3490_v17  ;;  %v1887_v5 = vadd.f32 %v7980_v27, %v7279_v54  ;;  %v3384_v54 = vld [vmem:[#allocation2 + $0x78] sm:$0xe]  ;;  %v6503_v27 = vld [vmem:[#allocation2 + $0x7c] sm:$0xf] }
 0x310   : > { %v3575_v47 = vunpack.c.l.b16 %v3494_v44  ;;  %v3574_v35 = vunpack.c.l.b16 %v3491_v21 }
 0x311   : > { %v2347_v44 = vadd.f32 %v7291_v39, %v1887_v5  ;;  %v6504_v5 = vld [vmem:[#allocation2 + $0x80] sm:$0x1] }
 0x312   : > { %v3599_v18 = vpack.c.b16 %v3575_v47, %v3574_v35 }
 0x313   : > { %v8258_v4 = vpop.f32.mrf.mxu2  ;;  %v2661_v42 = vadd.f32 %v7289_v30, %v2347_v44  ;;  %v1892_v30 = vadd.f32 %v8007_v62, %v7319_v50 }
 0x314   : > { %8901 = vst [vmem:[#allocation136_spill] sm:$0xff] %v8258_v4  ;;  %v8267_v4 = vpop.f32.mrf.mxu1 }
 0x315   : > { %v3343_v39 = vadd.f32 %v7650_v41, %v2661_v42 }
 0x318   : > { %6118 = vmatmul.msk.bf16.gmra.mxu2 %vm1587_vm1, %v3598_v24  ;;  %v3497_v24 = vrot.slane %v6501_v9, 5 }
 0x31a   : > { %v3499_v8 = vrot.slane %v3497_v24, 4 }
 0x31b   : > { %v8265_v52 = vpop.f32.mrf.mxu2 }
 0x31c   : > { %v3501_v17 = vsel %vm6796_vm14, %v3499_v8, %v3500_v20  ;;  %v6081_v8 = vrot.slane %v3384_v54, 9 }
 0x31d   : > { %6326 = vmatmul.msk.bf16.gmra.mxu1 %vm1587_vm1, %v5029_v58  ;;  %v3383_v58 = vld [vmem:[#allocation2 + $0x6c] sm:$0xe]  ;;  %v3577_v21 = vunpack.c.l.b16 %v3501_v17 }
 0x31e   : > { %v6080_v25 = vrot.slane %v3383_v58, 9  ;;  %v3504_v58 = vrot.slane %v6503_v27, 5 }
 0x320   : > { %v3498_v10 = vsel %vm6796_vm14, %v6080_v25, %v3497_v24  ;;  %v3506_v20 = vrot.slane %v3504_v58, 4  ;;  %v3507_v25 = vrot.slane %v6504_v5, 5 }
 0x321   : > { %v3576_v35 = vunpack.c.l.b16 %v3498_v10 }
 0x323   : > { %v8274_v2 = vpop.f32.mrf.mxu2  ;;  %v3600_v9 = vpack.c.b16 %v3577_v21, %v3576_v35  ;;  %v8306_v21 = vld [vmem:[%s8752_s4] ss:$0 sm:$0xff] }
 0x328   : > { %6119 = vmatmul.msk.bf16.gmra.mxu2 %vm1587_vm1, %v3599_v18  ;;  %v1889_v18 = vadd.f32 %v7993_v22, %v7301_v0  ;;  %v3505_v0 = vsel %vm6796_vm14, %v6081_v8, %v3504_v58 }
 0x329   : > { %v3578_v35 = vunpack.c.l.b16 %v3505_v0 }
 0x32a   : > { %v2348_v24 = vadd.f32 %v7310_v51, %v1889_v18  ;;  %v3508_v51 = vsel %vm6796_vm14, %v3506_v20, %v3507_v25  ;;  %v6506_v25 = vld [vmem:[#allocation2 + $0x8c] sm:$0x1] }
 0x32b   : > { %v8277_v57 = vpop.f32.mrf.mxu2  ;;  %v3579_v18 = vunpack.c.l.b16 %v3508_v51 }
 0x32c   : > { %v2662_v44 = vadd.f32 %v7312_v3, %v2348_v24  ;;  %v6505_v24 = vld [vmem:[#allocation2 + $0x88] sm:$0xf] }
 0x32d   : > { %v3601_v54 = vpack.c.b16 %v3579_v18, %v3578_v35  ;;  %v8337_v18 = vpop.f32.mrf.mxu0 }
 0x32e   : > { %v3344_v62 = vadd.f32 %v7666_v63, %v2662_v44  ;;  %v3385_v63 = vld [vmem:[#allocation2 + $0x84] sm:$0xe]  ;;  %v8333_v44 = vpop.f32.mrf.mxu3 }
 0x32f   : > { %v6082_v5 = vrot.slane %v3385_v63, 9 }
 0x333   : > { %v8286_v47 = vpop.f32.mrf.mxu2 }
 0x338   : > { %6120 = vmatmul.msk.bf16.gmra.mxu2 %vm1587_vm1, %v3600_v9  ;;  %v2349_v9 = vadd.f32 %v7324_v1, %v1892_v30 }
 0x33a   : > { %v2663_v8 = vadd.f32 %v7333_v61, %v2349_v9  ;;  %v3514_v61 = vrot.slane %v6506_v25, 5 }
 0x33b   : > { %v3689_v17 = vpop.f32.mrf.mxu2 }
 0x33c   : > { %v3769_v10 = vadd.f32 %v3689_v17, %v3343_v39  ;;  %v3511_v39 = vrot.slane %v6505_v24, 5 }
 0x33e   : > { %v4084_v22 = vadd.f32 %v8048_v55, %v3769_v10 }
 0x340   : > { %v4766_v41 = vadd.f32 %v8066_v19, %v4084_v22  ;;  %v1894_v19 = vadd.f32 %v8020_v38, %v7342_v43  ;;  %v3345_v43 = vadd.f32 %v7697_v32, %v2663_v8  ;;  %v1897_v22 = vadd.f32 %v8039_v59, %v7361_v16 }
 0x342   : > { %v5192_v50 = vadd.f32 %v8216_v37, %v4766_v41  ;;  %v2350_v37 = vadd.f32 %v7344_v48, %v1894_v19  ;;  %v3512_v48 = vsel %vm6796_vm14, %v6082_v5, %v3511_v39 }
 0x343   : > { %v3691_v55 = vpop.f32.mrf.mxu2 }
 0x344   : > { %v5228_v3 = vadd.f32 %v8306_v21, %v5192_v50  ;;  %v3770_v42 = vadd.f32 %v3691_v55, %v3344_v62  ;;  %v2664_v30 = vadd.f32 %v7346_v15, %v2350_v37  ;;  %v3580_v15 = vunpack.c.l.b16 %v3512_v48  ;;  %v8904_v37 = vld [vmem:[#allocation9_spill] sm:$0xff] }
 0x345   : > { %v2351_v62 = vadd.f32 %v7356_v13, %v1897_v22 }
 0x346   : > { %v5260_v27 = vmax.f32 %v5228_v3, 0.0  ;;  %v4085_v58 = vadd.f32 %v8070_v12, %v3770_v42  ;;  %v3513_v12 = vrot.slane %v3511_v39, 4  ;;  %v6507_v3 = vld [vmem:[#allocation2 + $0x94] sm:$0xf]  ;;  %v3386_v42 = vld [vmem:[#allocation2 + $0x90] sm:$0xe] }
 0x347   : > { %v6083_v8 = vrot.slane %v3386_v42, 9  ;;  %v6509_v42 = vld [vmem:[#allocation2 + $0xa0] sm:$0xf] }
 0x348   : > { %5292 = vst.msk [vmem:[#allocation3] sm:$0xff] %vm1587_vm1, %v5260_v27  ;;  %v4767_v1 = vadd.f32 %v8083_v46, %v4085_v58  ;;  %6121 = vmatmul.msk.bf16.gmra.mxu2 %vm1587_vm1, %v3601_v54  ;;  %v8902_v54 = vld [vmem:[#allocation104_spill] sm:$0xff] }
 0x349   : > { %v1899_v19 = vadd.f32 %v8902_v54, %v7379_v45  ;;  %v8903_v27 = vld [vmem:[#allocation8_spill] sm:$0xff]  ;;  %v3525_v54 = vrot.slane %v6509_v42, 5 }
 0x34a   : > { %v5193_v20 = vadd.f32 %v8228_v7, %v4767_v1  ;;  %v3515_v7 = vsel %vm6796_vm14, %v3513_v12, %v3514_v61  ;;  %v2665_v13 = vadd.f32 %v8903_v27, %v2351_v62  ;;  %v8351_v1 = vpop.f32.mrf.mxu3  ;;  %v3387_v27 = vld [vmem:[#allocation2 + $0x9c] sm:$0xe] }
 0x34b   : > { %v3694_v38 = vpop.f32.mrf.mxu2  ;;  %v3581_v41 = vunpack.c.l.b16 %v3515_v7 }
 0x34c   : > { %v5229_v17 = vadd.f32 %v8306_v21, %v5193_v20  ;;  %v3771_v10 = vadd.f32 %v3694_v38, %v3345_v43  ;;  %v8905_v20 = vld [vmem:[#allocation50_spill] sm:$0xff]  ;;  %v8356_v38 = vpop.f32.mrf.mxu0 }
 0x34d   : > { %v3602_v59 = vpack.c.b16 %v3581_v41, %v3580_v15  ;;  %v3347_v43 = vadd.f32 %v8905_v20, %v2665_v13  ;;  %v8909_v41 = vld [vmem:[#allocation11_spill] sm:$0xff]  ;;  %v8912_v13 = vld [vmem:[#allocation108_spill] sm:$0xff]  ;;  %v3527_v20 = vrot.slane %v3525_v54, 4 }
 0x34e   : > { %v5261_v0 = vmax.f32 %v5229_v17, 0.0  ;;  %v4086_v46 = vadd.f32 %v8090_v34, %v3771_v10  ;;  %v3346_v34 = vadd.f32 %v7711_v60, %v2664_v30  ;;  %v8907_v30 = vld [vmem:[#allocation106_spill] sm:$0xff] }
 0x34f   : > { %v5324_v12 = vld [vmem:[#allocation3] sm:$0xff] }
 0x350   : > { %5293 = vst.msk [vmem:[#allocation3 + $0x8] sm:$0xff] %vm1587_vm1, %v5261_v0  ;;  %v4768_v32 = vadd.f32 %v8102_v11, %v4086_v46  ;;  %v8341_v11 = vpop.f32.mrf.mxu1  ;;  %v8906_v46 = vld [vmem:[#allocation12_spill] sm:$0xff] }
 0x351   : > { %v1902_v48 = vadd.f32 %v8907_v30, %v8906_v46 }
 0x352   : > { %v5194_v51 = vadd.f32 %v8235_v36, %v4768_v32  ;;  %v3518_v36 = vrot.slane %v6507_v3, 5  ;;  %v8908_v32 = vld [vmem:[#allocation10_spill] sm:$0xff] }
 0x353   : > { %v3696_v35 = vpop.f32.mrf.mxu2 }
 0x354   : > { %v5230_v9 = vadd.f32 %v8306_v21, %v5194_v51  ;;  %v3772_v50 = vadd.f32 %v3696_v35, %v3346_v34  ;;  %v3520_v24 = vrot.slane %v3518_v36, 4  ;;  %v2353_v35 = vadd.f32 %v8909_v41, %v1902_v48 }
 0x356   : > { %v5262_v55 = vmax.f32 %v5230_v9, 0.0  ;;  %v4087_v16 = vadd.f32 %v8104_v40, %v3772_v50  ;;  %v6508_v40 = vld [vmem:[#allocation2 + $0x98] sm:$0x1]  ;;  %v8910_v50 = vld [vmem:[#allocation54_spill] sm:$0xff] }
 0x357   : > { %v3521_v39 = vrot.slane %v6508_v40, 5  ;;  %v5325_v3 = vld [vmem:[#allocation3 + $0x8] sm:$0xff]  ;;  %v8913_v40 = vld [vmem:[#allocation13_spill] sm:$0xff] }
 0x358   : > { %5294 = vst.msk [vmem:[#allocation3 + $0x10] sm:$0xff] %vm1587_vm1, %v5262_v55  ;;  %v4769_v60 = vadd.f32 %v8119_v29, %v4087_v16  ;;  %6122 = vmatmul.msk.bf16.gmra.mxu2 %vm1587_vm1, %v3602_v59  ;;  %v2352_v29 = vadd.f32 %v8904_v37, %v1899_v19  ;;  %v8362_v10 = vpop.f32.mrf.mxu1  ;;  %v8374_v55 = vpop.f32.mrf.mxu3 }
 0x359   : > { %v3522_v17 = vsel %vm6796_vm14, %v3520_v24, %v3521_v39  ;;  %v8377_v19 = vpop.f32.mrf.mxu0  ;;  %v2667_v39 = vadd.f32 %v8913_v40, %v2353_v35  ;;  %v6330_v40 = vld [vmem:[%s6720_s29 + $0xc] sm:$0x1] }
 0x35a   : > { %v5195_v58 = vadd.f32 %v8244_v23, %v4769_v60  ;;  %v3519_v23 = vsel %vm6796_vm14, %v6083_v8, %v3518_v36  ;;  %v2666_v22 = vadd.f32 %v8908_v32, %v2352_v29  ;;  %v3583_v34 = vunpack.c.l.b16 %v3522_v17 }
 0x35b   : > { %v3699_v45 = vpop.f32.mrf.mxu2  ;;  %v3582_v51 = vunpack.c.l.b16 %v3519_v23  ;;  %v6084_v29 = vrot.slane %v3387_v27, 9  ;;  %v6511_v27 = vld [vmem:[#allocation2 + $0xac] sm:$0xf] }
 0x35c   : > { %v5231_v63 = vadd.f32 %v8306_v21, %v5195_v58  ;;  %v3773_v61 = vadd.f32 %v3699_v45, %v3347_v43  ;;  %v3348_v62 = vadd.f32 %v8910_v50, %v2666_v22  ;;  %v6510_v43 = vld [vmem:[#allocation2 + $0xa4] sm:$0x1] }
 0x35d   : > { %v3603_v59 = vpack.c.b16 %v3583_v34, %v3582_v51  ;;  %v8914_v45 = vld [vmem:[#allocation14_spill] sm:$0xff]  ;;  %v3526_v46 = vsel %vm6796_vm14, %v6084_v29, %v3525_v54 }
 0x35e   : > { %v5263_v5 = vmax.f32 %v5231_v63, 0.0  ;;  %v4088_v7 = vadd.f32 %v8124_v28, %v3773_v61  ;;  %v8915_v61 = vld [vmem:[#allocation58_spill] sm:$0xff]  ;;  %v3584_v41 = vunpack.c.l.b16 %v3526_v46 }
 0x35f   : > { %v5341_v25 = vld [vmem:[#allocation3 + $0x10] sm:$0xff]  ;;  %v8917_v50 = vld [vmem:[#allocation18_spill] sm:$0xff] }
 0x360   : > { %v5357_v0 = vmax.f32 %v5324_v12, %v5341_v25  ;;  %5295 = vst.msk [vmem:[#allocation3 + $0x18] sm:$0xff] %vm1587_vm1, %v5263_v5  ;;  %v4770_v15 = vadd.f32 %v8134_v33, %v4088_v7  ;;  %v8384_v63 = vpop.f32.mrf.mxu1  ;;  %v3528_v5 = vrot.slane %v6510_v43, 5  ;;  %v8397_v30 = vpop.f32.mrf.mxu3 }
 0x361   : > { %v8401_v34 = vpop.f32.mrf.mxu0 }
 0x362   : > { %5373 = vst.msk [vmem:[#allocation4] sm:$0xff] %vm1587_vm1, %v5357_v0  ;;  %v5196_v9 = vadd.f32 %v8256_v6, %v4770_v15  ;;  %v8911_v6 = vld [vmem:[#allocation15_spill] sm:$0xff] }
 0x363   : > { %v3701_v16 = vpop.f32.mrf.mxu2  ;;  %v1904_v58 = vadd.f32 %v8912_v13, %v8911_v6  ;;  %v8919_v6 = vld [vmem:[#allocation17_spill] sm:$0xff] }
 0x364   : > { %v5232_v36 = vadd.f32 %v8306_v21, %v5196_v9  ;;  %v3774_v60 = vadd.f32 %v3701_v16, %v3348_v62  ;;  %v1907_v62 = vadd.f32 %v8095_v49, %v8917_v50 }
 0x365   : > { %v2354_v12 = vadd.f32 %v8914_v45, %v1904_v58 }
 0x366   : > { %v5264_v8 = vmax.f32 %v5232_v36, 0.0  ;;  %v4089_v24 = vadd.f32 %v8142_v26, %v3774_v60  ;;  %v3349_v26 = vadd.f32 %v8915_v61, %v2667_v39  ;;  %v2355_v13 = vadd.f32 %v8919_v6, %v1907_v62  ;;  %v8920_v61 = vld [vmem:[#allocation21_spill] sm:$0xff] }
 0x367   : > { %v5342_v28 = vld [vmem:[#allocation3 + $0x18] sm:$0xff] }
 0x368   : > { %v5358_v33 = vmax.f32 %v5325_v3, %v5342_v28  ;;  %6123 = vmatmul.msk.bf16.gmra.mxu2 %vm1587_vm1, %v3603_v59  ;;  %5296 = vst.msk [vmem:[#allocation3 + $0x20] sm:$0xff] %vm1587_vm1, %v5264_v8  ;;  %v4771_v37 = vadd.f32 %v8150_v56, %v4089_v24  ;;  %v3529_v56 = vsel %vm6796_vm14, %v3527_v20, %v3528_v5  ;;  %v8407_v16 = vpop.f32.mrf.mxu1  ;;  %v8918_v3 = vld [vmem:[#allocation61_spill] sm:$0xff]  ;;  %v3388_v8 = vld [vmem:[#allocation2 + $0xa8] sm:$0xe] }
 0x369   : > { %v3585_v35 = vunpack.c.l.b16 %v3529_v56  ;;  %v6328_v24 = vld [vmem:[%s6720_s29 + $0x8] sm:$0xf]  ;;  %v6085_v5 = vrot.slane %v3388_v8, 9 }
 0x36a   : > { %5374 = vst.msk [vmem:[#allocation4 + $0x8] sm:$0xff] %vm1587_vm1, %v5358_v33  ;;  %v5197_v25 = vadd.f32 %v8267_v4, %v4771_v37  ;;  %v8916_v4 = vld [vmem:[#allocation16_spill] sm:$0xff]  ;;  %v8417_v37 = vpop.f32.mrf.mxu3 }
 0x36b   : > { %v3704_v23 = vpop.f32.mrf.mxu2  ;;  %v2668_v51 = vadd.f32 %v8916_v4, %v2354_v12  ;;  %v3604_v42 = vpack.c.b16 %v3585_v35, %v3584_v41  ;;  %v6512_v12 = vld [vmem:[#allocation2 + $0xb0] sm:$0x1] }
 0x36c   : > { %v5233_v17 = vadd.f32 %v8306_v21, %v5197_v25  ;;  %v3775_v0 = vadd.f32 %v3704_v23, %v3349_v26  ;;  %v3535_v25 = vrot.slane %v6512_v12, 5  ;;  %v8921_v26 = vld [vmem:[#allocation110_spill] sm:$0xff]  ;;  %v8926_v35 = vld [vmem:[#allocation64_spill] sm:$0xff] }
 0x36d   : > { %v3350_v28 = vadd.f32 %v8918_v3, %v2668_v51  ;;  %v1909_v23 = vadd.f32 %v8921_v26, %v8920_v61  ;;  %v6514_v26 = vld [vmem:[#allocation2 + $0xbc] sm:$0x1] }
 0x36e   : > { %v5265_v32 = vmax.f32 %v5233_v17, 0.0  ;;  %v4090_v22 = vadd.f32 %v8333_v44, %v3775_v0  ;;  %v8423_v17 = vpop.f32.mrf.mxu0 }
 0x370   : > { %5297 = vst.msk [vmem:[#allocation3 + $0x28] sm:$0xff] %vm1587_vm1, %v5265_v32  ;;  %v4772_v9 = vadd.f32 %v8337_v18, %v4090_v22  ;;  %v3532_v18 = vrot.slane %v6511_v27, 5  ;;  %v8432_v32 = vpop.f32.mrf.mxu1  ;;  %v8928_v27 = vld [vmem:[#allocation22_spill] sm:$0xff] }
 0x371   : > { %v5389_v48 = vld [vmem:[#allocation4] ss:$2 sm:$0xff]  ;;  %v5405_v7 = vld [vmem:[#allocation4 + $0x1] ss:$2 sm:$0xff] }
 0x372   : > { %v5420_v15 = vmax.f32 %v5389_v48, %v5405_v7  ;;  %v5198_v44 = vadd.f32 %v8341_v11, %v4772_v9  ;;  %v3534_v45 = vrot.slane %v3532_v18, 4  ;;  %v8924_v48 = vld [vmem:[#allocation19_spill] sm:$0xff]  ;;  %v3533_v4 = vsel %vm6796_vm14, %v6085_v5, %v3532_v18 }
 0x373   : > { %v3706_v60 = vpop.f32.mrf.mxu2  ;;  %v2669_v7 = vadd.f32 %v8924_v48, %v2355_v13  ;;  %v3586_v3 = vunpack.c.l.b16 %v3533_v4 }
 0x374   : > { %v5448_v59 = vpack.c.bf16 %v5420_v15, %v5420_v15  ;;  %v5234_v54 = vadd.f32 %v8306_v21, %v5198_v44  ;;  %v3776_v33 = vadd.f32 %v3706_v60, %v3350_v28  ;;  %v3536_v51 = vsel %vm6796_vm14, %v3534_v45, %v3535_v25  ;;  %v8925_v15 = vld [vmem:[#allocation20_spill] sm:$0xff] }
 0x375   : > { %v2356_v41 = vadd.f32 %v8925_v15, %v1909_v23  ;;  %v3351_v9 = vadd.f32 %v8926_v35, %v2669_v7  ;;  %v3587_v28 = vunpack.c.l.b16 %v3536_v51  ;;  %v8927_v60 = vld [vmem:[#allocation24_spill] sm:$0xff]  ;;  %v3542_v23 = vrot.slane %v6514_v26, 5  ;;  %v8934_v35 = vld [vmem:[#allocation26_spill] sm:$0xff] }
 0x376   : > { %v5457_v36 = vshrl.u32 %v5448_v59, 16  ;;  %v5460_v58 = vshll.u32 %v5448_v59, 16  ;;  %v5266_v11 = vmax.f32 %v5234_v54, 0.0  ;;  %v4091_v39 = vadd.f32 %v8351_v1, %v3776_v33  ;;  %v5326_v59 = vld [vmem:[#allocation3 + $0x20] sm:$0xff]  ;;  %v8445_v54 = vpop.f32.mrf.mxu3  ;;  %v8450_v6 = vpop.f32.mrf.mxu0 }
 0x377   : > { %v2670_v18 = vadd.f32 %v8928_v27, %v2356_v41 }
 0x378   : > { %v5459_v49 = vrot.slane %v5457_v36, 7  ;;  %6124 = vmatmul.msk.bf16.gmra.mxu2 %vm1587_vm1, %v3604_v42  ;;  %5298 = vst.msk [vmem:[#allocation3 + $0x30] sm:$0xff] %vm1587_vm1, %v5266_v11  ;;  %v4773_v43 = vadd.f32 %v8356_v38, %v4091_v39  ;;  %v1912_v42 = vadd.f32 %v8126_v31, %v8927_v60  ;;  %v8454_v11 = vpop.f32.mrf.mxu1  ;;  %v8930_v39 = vld [vmem:[#allocation69_spill] sm:$0xff] }
 0x37a   : > { %v5462_v29 = vor.u32 %v5460_v58, %v5459_v49  ;;  %v5463_v20 = vrot.slane %v5459_v49, 4  ;;  %v5199_v38 = vadd.f32 %v8362_v10, %v4773_v43  ;;  %v3605_v49 = vpack.c.b16 %v3587_v28, %v3586_v3  ;;  %v6513_v58 = vld [vmem:[#allocation2 + $0xb8] sm:$0xf]  ;;  %v5327_v43 = vld [vmem:[#allocation3 + $0x28] sm:$0xff] }
 0x37b   : > { %v3709_v62 = vpop.f32.mrf.mxu2  ;;  %v3539_v8 = vrot.slane %v6513_v58, 5  ;;  %v6515_v58 = vld [vmem:[#allocation2 + $0xc4] sm:$0xf] }
 0x37c   : > { %v5538_v1 = vsel %vm6741_vm5, %v5462_v29, %v6328_v24  ;;  %v5541_v56 = vsel %vm6808_vm0, %v5463_v20, %v6330_v40  ;;  %v5235_v22 = vadd.f32 %v8306_v21, %v5199_v38  ;;  %v3777_v10 = vadd.f32 %v3709_v62, %v3351_v9  ;;  %v8929_v24 = vld [vmem:[#allocation23_spill] sm:$0xff]  ;;  %v8933_v38 = vld [vmem:[#allocation25_spill] sm:$0xff] }
 0x37d   : > { %6329 = vst [vmem:[%s6720_s29 + $0x8] sm:$0xf] %v5538_v1  ;;  %v2357_v40 = vadd.f32 %v8929_v24, %v1912_v42  ;;  %v3352_v29 = vadd.f32 %v8930_v39, %v2670_v18  ;;  %v3541_v61 = vrot.slane %v3539_v8, 4  ;;  %v8931_v1 = vld [vmem:[#allocation27_spill] sm:$0xff]  ;;  %v8935_v62 = vld [vmem:[#allocation73_spill] sm:$0xff]  ;;  %v8936_v18 = vld [vmem:[#allocation28_spill] sm:$0xff] }
 0x37e   : > { %6331 = vst [vmem:[%s6720_s29 + $0xc] sm:$0x1] %v5541_v56  ;;  %v5267_v50 = vmax.f32 %v5235_v22, 0.0  ;;  %v4092_v33 = vadd.f32 %v8374_v55, %v3777_v10  ;;  %v3389_v55 = vld [vmem:[#allocation2 + $0xb4] sm:$0xe]  ;;  %v8932_v56 = vld [vmem:[#allocation113_spill] sm:$0xff]  ;;  %v8465_v4 = vpop.f32.mrf.mxu3 }
 0x37f   : > { %v5343_v44 = vld [vmem:[#allocation3 + $0x30] sm:$0xff]  ;;  %v6086_v25 = vrot.slane %v3389_v55, 9  ;;  %v1914_v48 = vadd.f32 %v8932_v56, %v8931_v1  ;;  %v2671_v22 = vadd.f32 %v8933_v38, %v2357_v40  ;;  %v3543_v41 = vsel %vm6796_vm14, %v3541_v61, %v3542_v23  ;;  %v3390_v40 = vld [vmem:[#allocation2 + $0xc0] sm:$0xe]  ;;  %v6332_v38 = vld [vmem:[%s6720_s29 + $0x10] sm:$0xf] }
 0x380   : > { %v5359_v36 = vmax.f32 %v5326_v59, %v5343_v44  ;;  %5299 = vst.msk [vmem:[#allocation3 + $0x38] sm:$0xff] %vm1587_vm1, %v5267_v50  ;;  %v4774_v13 = vadd.f32 %v8377_v19, %v4092_v33  ;;  %v8474_v50 = vpop.f32.mrf.mxu0  ;;  %v8478_v10 = vpop.f32.mrf.mxu1  ;;  %v8938_v39 = vld [vmem:[#allocation115_spill] sm:$0xff]  ;;  %v8940_v56 = vld [vmem:[#allocation30_spill] sm:$0xff] }
 0x381   : > { %v3540_v15 = vsel %vm6796_vm14, %v6086_v25, %v3539_v8  ;;  %v2358_v9 = vadd.f32 %v8934_v35, %v1914_v48  ;;  %v3353_v59 = vadd.f32 %v8935_v62, %v2671_v22  ;;  %v6516_v25 = vld [vmem:[#allocation2 + $0xc8] sm:$0x1]  ;;  %v6334_v22 = vld [vmem:[%s6720_s29 + $0x14] sm:$0x1] }
 0x382   : > { %5375 = vst.msk [vmem:[#allocation4 + $0x10] sm:$0xff] %vm1587_vm1, %v5359_v36  ;;  %v5200_v31 = vadd.f32 %v8384_v63, %v4774_v13  ;;  %v3588_v28 = vunpack.c.l.b16 %v3540_v15  ;;  %v3589_v36 = vunpack.c.l.b16 %v3543_v41  ;;  %v3549_v61 = vrot.slane %v6516_v25, 5  ;;  %v8941_v62 = vld [vmem:[#allocation31_spill] sm:$0xff] }
 0x383   : > { %v3711_v20 = vpop.f32.mrf.mxu2  ;;  %v2672_v13 = vadd.f32 %v8936_v18, %v2358_v9 }
 0x384   : > { %v5236_v45 = vadd.f32 %v8306_v21, %v5200_v31  ;;  %v3778_v19 = vadd.f32 %v3711_v20, %v3352_v29  ;;  %v3606_v24 = vpack.c.b16 %v3589_v36, %v3588_v28  ;;  %v8937_v31 = vld [vmem:[#allocation29_spill] sm:$0xff]  ;;  %v8943_v28 = vld [vmem:[#allocation32_spill] sm:$0xff] }
 0x385   : > { %v1917_v29 = vadd.f32 %v8938_v39, %v8937_v31 }
 0x386   : > { %v5268_v63 = vmax.f32 %v5236_v45, 0.0  ;;  %v4093_v7 = vadd.f32 %v8397_v30, %v3778_v19  ;;  %v8487_v20 = vpop.f32.mrf.mxu3 }
 0x387   : > { %v5344_v5 = vld [vmem:[#allocation3 + $0x38] sm:$0xff]  ;;  %v2359_v48 = vadd.f32 %v8940_v56, %v1917_v29 }
 0x388   : > { %6125 = vmatmul.msk.bf16.gmra.mxu2 %vm1587_vm1, %v3605_v49  ;;  %v5360_v12 = vmax.f32 %v5327_v43, %v5344_v5  ;;  %5300 = vst.msk [vmem:[#allocation3 + $0x40] sm:$0xff] %vm1587_vm1, %v5268_v63  ;;  %v4775_v51 = vadd.f32 %v8401_v34, %v4093_v7  ;;  %v8492_v26 = vpop.f32.mrf.mxu0  ;;  %v8496_v7 = vpop.f32.mrf.mxu1 }
 0x389   : > { %v2673_v36 = vadd.f32 %v8943_v28, %v2359_v48 }
 0x38a   : > { %5376 = vst.msk [vmem:[#allocation4 + $0x18] sm:$0xff] %vm1587_vm1, %v5360_v12  ;;  %v5201_v30 = vadd.f32 %v8407_v16, %v4775_v51  ;;  %v3546_v16 = vrot.slane %v6515_v58, 5  ;;  %v6087_v12 = vrot.slane %v3390_v40, 9  ;;  %v8945_v58 = vld [vmem:[#allocation81_spill] sm:$0xff]  ;;  %v8947_v40 = vld [vmem:[#allocation118_spill] sm:$0xff] }
 0x38b   : > { %v3714_v44 = vpop.f32.mrf.mxu2 }
 0x38c   : > { %v5237_v3 = vadd.f32 %v8306_v21, %v5201_v30  ;;  %v3779_v34 = vadd.f32 %v3714_v44, %v3353_v59  ;;  %v3547_v9 = vsel %vm6796_vm14, %v6087_v12, %v3546_v16  ;;  %v8942_v59 = vld [vmem:[#allocation116_spill] sm:$0xff] }
 0x38d   : > { %v1919_v44 = vadd.f32 %v8942_v59, %v8941_v62  ;;  %v8950_v62 = vld [vmem:[#allocation86_spill] sm:$0xff] }
 0x38e   : > { %v5269_v33 = vmax.f32 %v5237_v3, 0.0  ;;  %v4094_v27 = vadd.f32 %v8417_v37, %v3779_v34  ;;  %v8939_v37 = vld [vmem:[#allocation77_spill] sm:$0xff] }
 0x38f   : > { %v3354_v5 = vadd.f32 %v8939_v37, %v2672_v13  ;;  %v8518_v13 = vpop.f32.mrf.mxu3  ;;  %v4162_v37 = vld [vmem:[#allocation2 + $0xd0] sm:$0xf] }
 0x390   : > { %5301 = vst.msk [vmem:[#allocation3 + $0x48] sm:$0xff] %vm1587_vm1, %v5269_v33  ;;  %v4776_v8 = vadd.f32 %v8423_v17, %v4094_v27  ;;  %v3548_v17 = vrot.slane %v3546_v16, 4  ;;  %v8944_v27 = vld [vmem:[#allocation33_spill] sm:$0xff]  ;;  %v3355_v16 = vadd.f32 %v8945_v58, %v2673_v36  ;;  %v4534_v25 = vshll.u32 %v4162_v37, 16 }
 0x391   : > { %v5391_v60 = vld [vmem:[#allocation4 + $0x10] ss:$2 sm:$0xff]  ;;  %v5407_v42 = vld [vmem:[#allocation4 + $0x11] ss:$2 sm:$0xff]  ;;  %v2360_v18 = vadd.f32 %v8944_v27, %v1919_v44  ;;  %v4538_v48 = vshrl.u32 %v4162_v37, 16  ;;  %v4969_v28 = vrot.slane %v4162_v37, 5 }
 0x392   : > { %v5421_v49 = vmax.f32 %v5391_v60, %v5407_v42  ;;  %v5202_v43 = vadd.f32 %v8432_v32, %v4776_v8  ;;  %v3550_v30 = vsel %vm6796_vm14, %v3548_v17, %v3549_v61  ;;  %v3590_v42 = vunpack.c.l.b16 %v3547_v9  ;;  %v8522_v8 = vpop.f32.mrf.mxu0  ;;  %v8526_v61 = vpop.f32.mrf.mxu1 }
 0x393   : > { %v3716_v19 = vpop.f32.mrf.mxu2  ;;  %v3591_v33 = vunpack.c.l.b16 %v3550_v30 }
 0x394   : > { %v5449_v55 = vpack.c.bf16 %v5421_v49, %v5421_v49  ;;  %v5238_v23 = vadd.f32 %v8306_v21, %v5202_v43  ;;  %v3780_v1 = vadd.f32 %v3716_v19, %v3354_v5  ;;  %v5328_v49 = vld [vmem:[#allocation3 + $0x40] sm:$0xff]  ;;  %v4161_v43 = vld [vmem:[#allocation2 + $0xcc] sm:$0xf]  ;;  %v4163_v19 = vld [vmem:[#allocation2 + $0xd4] sm:$0x1] }
 0x395   : > { %v4525_v12 = vshrl.u32 %v4161_v43, 16  ;;  %v4528_v17 = vshll.u32 %v4161_v43, 16  ;;  %v4972_v36 = vrot.slane %v4163_v19, 5 }
 0x396   : > { %v5465_v45 = vshrl.u32 %v5449_v55, 16  ;;  %v5468_v63 = vshll.u32 %v5449_v55, 16  ;;  %v5270_v51 = vmax.f32 %v5238_v23, 0.0  ;;  %v4095_v15 = vadd.f32 %v8445_v54, %v3780_v1  ;;  %v8948_v1 = vld [vmem:[#allocation35_spill] sm:$0xff] }
 0x397   : > { %v3607_v55 = vpack.c.b16 %v3591_v33, %v3590_v42  ;;  %v2674_v56 = vadd.f32 %v8948_v1, %v2360_v18  ;;  %v8951_v42 = vld [vmem:[#allocation37_spill] sm:$0xff]  ;;  %v5329_v58 = vld [vmem:[#allocation3 + $0x48] sm:$0xff] }
 0x398   : > { %6126 = vmatmul.msk.bf16.gmra.mxu2 %vm1587_vm1, %v3606_v24  ;;  %v5467_v32 = vrot.slane %v5465_v45, 7  ;;  %5302 = vst.msk [vmem:[#allocation3 + $0x50] sm:$0xff] %vm1587_vm1, %v5270_v51  ;;  %v4777_v3 = vadd.f32 %v8450_v6, %v4095_v15  ;;  %v8946_v24 = vld [vmem:[#allocation34_spill] sm:$0xff]  ;;  %v4536_v51 = vrot.slane %v4534_v25, 5  ;;  %v8949_v15 = vld [vmem:[#allocation36_spill] sm:$0xff]  ;;  %v1924_v33 = vadd.f32 %v8170_v53, %v8951_v42  ;;  %v8959_v42 = vld [vmem:[#allocation93_spill] sm:$0xff] }
 0x399   : > { %v1922_v31 = vadd.f32 %v8947_v40, %v8946_v24  ;;  %v3356_v59 = vadd.f32 %v8950_v62, %v2674_v56 }
 0x39a   : > { %v5470_v41 = vor.u32 %v5468_v63, %v5467_v32  ;;  %v5471_v35 = vrot.slane %v5467_v32, 4  ;;  %v5203_v60 = vadd.f32 %v8454_v11, %v4777_v3  ;;  %v6452_v11 = vld [vmem:[#allocation2 + $0xcc] sm:$0xff]  ;;  %v4544_v32 = vshll.u32 %v4163_v19, 16 }
 0x39b   : > { %v3719_v29 = vpop.f32.mrf.mxu2  ;;  %6231 = vmatmul.msk.bf16.gmra.mxu3 %vm1587_vm1, %v6452_v11 }
 0x39c   : > { %v5544_v34 = vsel %vm6741_vm5, %v5470_v41, %v6332_v38  ;;  %v5547_v54 = vsel %vm6808_vm0, %v5471_v35, %v6334_v22  ;;  %v5239_v6 = vadd.f32 %v8306_v21, %v5203_v60  ;;  %v3781_v45 = vadd.f32 %v3719_v29, %v3355_v16  ;;  %v4041_v60 = vpop.f32.mrf.mxu3  ;;  %v4723_v29 = vpop.f32.mrf.mxu0 }
 0x39d   : > { %6333 = vst [vmem:[%s6720_s29 + $0x10] sm:$0xf] %v5544_v34  ;;  %v4527_v38 = vrot.slane %v4525_v12, 4  ;;  %v4530_v22 = vrot.slane %v4528_v17, 5  ;;  %v2361_v41 = vadd.f32 %v8949_v15, %v1922_v31  ;;  %v4540_v35 = vrot.slane %v4538_v48, 4  ;;  %v5149_v12 = vpop.f32.mrf.mxu1  ;;  %v8954_v48 = vld [vmem:[#allocation39_spill] sm:$0xff] }
 0x39e   : > { %6335 = vst [vmem:[%s6720_s29 + $0x14] sm:$0x1] %v5547_v54  ;;  %v5271_v39 = vmax.f32 %v5239_v6, 0.0  ;;  %v4096_v63 = vadd.f32 %v8465_v4, %v3781_v45  ;;  %v4546_v3 = vrot.slane %v4544_v32, 5  ;;  %v4813_v54 = vld [vmem:[#allocation2 + $0xcc] sm:$0xe]  ;;  %v2362_v32 = vadd.f32 %v8954_v48, %v1924_v33 }
 0x39f   : > { %v5345_v5 = vld [vmem:[#allocation3 + $0x50] sm:$0xff]  ;;  %v4531_v30 = vor.u32 %v4530_v22, %v4527_v38  ;;  %v4541_v44 = vor.u32 %v4540_v35, %v4536_v51  ;;  %v8952_v6 = vld [vmem:[#allocation38_spill] sm:$0xff] }
 0x3a0   : > { %v5361_v23 = vmax.f32 %v5328_v49, %v5345_v5  ;;  %5303 = vst.msk [vmem:[#allocation3 + $0x58] sm:$0xff] %vm1587_vm1, %v5271_v39  ;;  %v4778_v9 = vadd.f32 %v8474_v50, %v4096_v63  ;;  %v2675_v49 = vadd.f32 %v8952_v6, %v2361_v41  ;;  %v6287_v50 = vrot.slane %v4813_v54, 9 }
 0x3a1   : > { %v4532_v4 = vrot.slane %v4531_v30, 4  ;;  %v4542_v18 = vrot.slane %v4541_v44, 4  ;;  %v4971_v39 = vrot.slane %v4969_v28, 4  ;;  %v8956_v30 = vld [vmem:[#allocation41_spill] sm:$0xff] }
 0x3a2   : > { %5377 = vst.msk [vmem:[#allocation4 + $0x20] sm:$0xff] %vm1587_vm1, %v5361_v23  ;;  %v5204_v34 = vadd.f32 %v8478_v10, %v4778_v9  ;;  %v4970_v43 = vsel %vm6796_vm14, %v6287_v50, %v4969_v28  ;;  %v2676_v62 = vadd.f32 %v8956_v30, %v2362_v32 }
 0x3a3   : > { %v3721_v27 = vpop.f32.mrf.mxu2  ;;  %v4537_v10 = vsel %vm6802_vm15, %v4532_v4, %v4536_v51  ;;  %v4973_v19 = vsel %vm6796_vm14, %v4971_v39, %v4972_v36  ;;  %v5013_v17 = vunpack.c.l.b16 %v4970_v43  ;;  %v8962_v43 = vld [vmem:[#allocation123_spill] sm:$0xff] }
 0x3a4   : > { %v5240_v24 = vadd.f32 %v8306_v21, %v5204_v34  ;;  %v3782_v40 = vadd.f32 %v3721_v27, %v3356_v59  ;;  %v4587_v53 = vunpack.c.l.b16 %v4537_v10  ;;  %v5014_v25 = vunpack.c.l.b16 %v4973_v19  ;;  %v4044_v15 = vpop.f32.mrf.mxu3  ;;  %v4726_v59 = vpop.f32.mrf.mxu0  ;;  %v8958_v34 = vld [vmem:[#allocation121_spill] sm:$0xff]  ;;  %v8963_v19 = vld [vmem:[#allocation44_spill] sm:$0xff] }
 0x3a5   : > { %v5152_v54 = vpop.f32.mrf.mxu1  ;;  %v3358_v33 = vadd.f32 %v8959_v42, %v2676_v62 }
 0x3a6   : > { %v5272_v37 = vmax.f32 %v5240_v24, 0.0  ;;  %v4097_v5 = vadd.f32 %v8487_v20, %v3782_v40  ;;  %v5030_v56 = vpack.c.b16 %v5014_v25, %v5013_v17  ;;  %v8955_v20 = vld [vmem:[#allocation90_spill] sm:$0xff]  ;;  %v6338_v24 = vld [vmem:[%s6720_s29 + $0x1c] sm:$0x1] }
 0x3a7   : > { %v5346_v16 = vld [vmem:[#allocation3 + $0x58] sm:$0xff]  ;;  %v3357_v14 = vadd.f32 %v8955_v20, %v2675_v49  ;;  %v8960_v49 = vld [vmem:[#allocation42_spill] sm:$0xff] }
 0x3a8   : > { %6127 = vmatmul.msk.bf16.gmra.mxu2 %vm1587_vm1, %v3607_v55  ;;  %v5362_v11 = vmax.f32 %v5329_v58, %v5346_v16  ;;  %v4547_v55 = vsel %vm6802_vm15, %v4542_v18, %v4546_v3  ;;  %5304 = vst.msk [vmem:[#allocation3 + $0x60] sm:$0xff] %vm1587_vm1, %v5272_v37  ;;  %v4779_v23 = vadd.f32 %v8492_v26, %v4097_v5  ;;  %v8957_v3 = vld [vmem:[#allocation40_spill] sm:$0xff] }
 0x3a9   : > { %v4588_v45 = vunpack.c.l.b16 %v4547_v55  ;;  %6327 = vmatmul.msk.bf16.gmra.mxu1 %vm1587_vm1, %v5030_v56  ;;  %v1927_v4 = vadd.f32 %v8958_v34, %v8957_v3  ;;  %v8965_v56 = vld [vmem:[#allocation96_spill] sm:$0xff] }
 0x3aa   : > { %5378 = vst.msk [vmem:[#allocation4 + $0x28] sm:$0xff] %vm1587_vm1, %v5362_v11  ;;  %v5205_v63 = vadd.f32 %v8496_v7, %v4779_v23 }
 0x3ab   : > { %v4604_v1 = vpack.c.b16 %v4588_v45, %v4587_v53  ;;  %v3724_v38 = vpop.f32.mrf.mxu2  ;;  %v2363_v50 = vadd.f32 %v8960_v49, %v1927_v4  ;;  %v8961_v53 = vld [vmem:[#allocation43_spill] sm:$0xff]  ;;  %v8972_v49 = vld [vmem:[#allocation126_spill] sm:$0xff] }
 0x3ac   : > { %v5241_v22 = vadd.f32 %v8306_v21, %v5205_v63  ;;  %v3783_v51 = vadd.f32 %v3724_v38, %v3357_v14  ;;  %v4046_v10 = vpop.f32.mrf.mxu3  ;;  %v4728_v55 = vpop.f32.mrf.mxu0  ;;  %v1929_v37 = vadd.f32 %v8962_v43, %v8961_v53 }
 0x3ad   : > { %6271 = vmatmul.msk.bf16.gmra.mxu0 %vm1587_vm1, %v4604_v1  ;;  %v2677_v17 = vadd.f32 %v8963_v19, %v2363_v50  ;;  %v5154_v25 = vpop.f32.mrf.mxu1  ;;  %v8964_v1 = vld [vmem:[#allocation46_spill] sm:$0xff] }
 0x3ae   : > { %v5273_v26 = vmax.f32 %v5241_v22, 0.0  ;;  %v4098_v9 = vadd.f32 %v8518_v13, %v3783_v51 }
 0x3af   : > { %v3359_v48 = vadd.f32 %v8965_v56, %v2677_v17  ;;  %v5330_v20 = vld [vmem:[#allocation3 + $0x60] sm:$0xff]  ;;  %v8977_v56 = vld [vmem:[#allocation51_spill] sm:$0xff] }
 0x3b0   : > { %5305 = vst.msk [vmem:[#allocation3 + $0x68] sm:$0xff] %vm1587_vm1, %v5273_v26  ;;  %v4780_v44 = vadd.f32 %v8522_v8, %v4098_v9  ;;  %v6336_v8 = vld [vmem:[%s6720_s29 + $0x18] sm:$0xf]  ;;  %v8968_v9 = vld [vmem:[#allocation48_spill] sm:$0xff] }
 0x3b1   : > { %v5393_v41 = vld [vmem:[#allocation4 + $0x20] ss:$2 sm:$0xff]  ;;  %v5409_v35 = vld [vmem:[#allocation4 + $0x21] ss:$2 sm:$0xff] }
 0x3b2   : > { %v5422_v7 = vmax.f32 %v5393_v41, %v5409_v35  ;;  %v5206_v36 = vadd.f32 %v8526_v61, %v4780_v44  ;;  %v8966_v41 = vld [vmem:[#allocation45_spill] sm:$0xff]  ;;  %v8967_v35 = vld [vmem:[#allocation124_spill] sm:$0xff] }
 0x3b3   : > { %v3726_v27 = vpop.f32.mrf.mxu2  ;;  %v8969_v44 = vld [vmem:[#allocation49_spill] sm:$0xff] }
 0x3b4   : > { %v5450_v28 = vpack.c.bf16 %v5422_v7, %v5422_v7  ;;  %v5242_v18 = vadd.f32 %v8306_v21, %v5206_v36  ;;  %v3784_v6 = vadd.f32 %v3726_v27, %v3358_v33  ;;  %v4049_v51 = vpop.f32.mrf.mxu3  ;;  %v4731_v62 = vpop.f32.mrf.mxu0 }
 0x3b5   : > { %v5157_v34 = vpop.f32.mrf.mxu1 }
 0x3b6   : > { %v5473_v13 = vshrl.u32 %v5450_v28, 16  ;;  %v5476_v16 = vshll.u32 %v5450_v28, 16  ;;  %v5274_v40 = vmax.f32 %v5242_v18, 0.0  ;;  %v4099_v31 = vadd.f32 %v4041_v60, %v3784_v6  ;;  %v8970_v28 = vld [vmem:[#allocation99_spill] sm:$0xff] }
 0x3b7   : > { %v5331_v33 = vld [vmem:[#allocation3 + $0x68] sm:$0xff] }
 0x3b8   : > { %v5475_v58 = vrot.slane %v5473_v13, 7  ;;  %5306 = vst.msk [vmem:[#allocation3 + $0x70] sm:$0xff] %vm1587_vm1, %v5274_v40  ;;  %v4781_v11 = vadd.f32 %v4723_v29, %v4099_v31  ;;  %v2364_v29 = vadd.f32 %v8964_v1, %v1929_v37  ;;  %v8974_v31 = vld [vmem:[#allocation53_spill] sm:$0xff] }
 0x3ba   : > { %v5478_v39 = vor.u32 %v5476_v16, %v5475_v58  ;;  %v5479_v61 = vrot.slane %v5475_v58, 4  ;;  %v5207_v60 = vadd.f32 %v5149_v12, %v4781_v11  ;;  %v1932_v12 = vadd.f32 %v8967_v35, %v8966_v41  ;;  %v8975_v11 = vld [vmem:[#allocation102_spill] sm:$0xff] }
 0x3bb   : > { %v3729_v63 = vpop.f32.mrf.mxu2  ;;  %v2678_v30 = vadd.f32 %v8968_v9, %v2364_v29 }
 0x3bc   : > { %v5550_v5 = vsel %vm6741_vm5, %v5478_v39, %v6336_v8  ;;  %v5553_v45 = vsel %vm6808_vm0, %v5479_v61, %v6338_v24  ;;  %v5243_v23 = vadd.f32 %v8306_v21, %v5207_v60  ;;  %v3785_v38 = vadd.f32 %v3729_v63, %v3359_v48  ;;  %v8973_v8 = vld [vmem:[#allocation52_spill] sm:$0xff]  ;;  %v4051_v24 = vpop.f32.mrf.mxu3  ;;  %v4733_v40 = vpop.f32.mrf.mxu0 }
 0x3bd   : > { %6337 = vst [vmem:[%s6720_s29 + $0x18] sm:$0xf] %v5550_v5  ;;  %v2365_v3 = vadd.f32 %v8969_v44, %v1932_v12  ;;  %v3360_v36 = vadd.f32 %v8970_v28, %v2678_v30  ;;  %v5159_v37 = vpop.f32.mrf.mxu1  ;;  %v6340_v44 = vld [vmem:[%s6720_s29 + $0x20] sm:$0xf] }
 0x3be   : > { %6339 = vst [vmem:[%s6720_s29 + $0x1c] sm:$0x1] %v5553_v45  ;;  %v5275_v32 = vmax.f32 %v5243_v23, 0.0  ;;  %v4100_v26 = vadd.f32 %v4044_v15, %v3785_v38  ;;  %v8971_v15 = vld [vmem:[#allocation47_spill] sm:$0xff]  ;;  %v8976_v23 = vld [vmem:[#allocation56_spill] sm:$0xff] }
 0x3bf   : > { %v5347_v14 = vld [vmem:[#allocation3 + $0x70] sm:$0xff]  ;;  %v1934_v50 = vadd.f32 %v8972_v49, %v8971_v15  ;;  %v8983_v15 = vld [vmem:[#allocation60_spill] sm:$0xff] }
 0x3c0   : > { %v5363_v22 = vmax.f32 %v5330_v20, %v5347_v14  ;;  %5307 = vst.msk [vmem:[#allocation3 + $0x78] sm:$0xff] %vm1587_vm1, %v5275_v32  ;;  %v4782_v7 = vadd.f32 %v4726_v59, %v4100_v26  ;;  %v2679_v59 = vadd.f32 %v8973_v8, %v2365_v3  ;;  %v8979_v14 = vld [vmem:[#allocation105_spill] sm:$0xff]  ;;  %v6342_v3 = vld [vmem:[%s6720_s29 + $0x24] sm:$0x1]  ;;  %v8984_v8 = vld [vmem:[#allocation63_spill] sm:$0xff] }
 0x3c1   : > { %v2366_v39 = vadd.f32 %v8974_v31, %v1934_v50  ;;  %v8980_v26 = vld [vmem:[#allocation57_spill] sm:$0xff] }
 0x3c2   : > { %5379 = vst.msk [vmem:[#allocation4 + $0x30] sm:$0xff] %vm1587_vm1, %v5363_v22  ;;  %v5208_v4 = vadd.f32 %v5152_v54, %v4782_v7  ;;  %v3361_v53 = vadd.f32 %v8975_v11, %v2679_v59 }
 0x3c3   : > { %v3731_v42 = vpop.f32.mrf.mxu2  ;;  %v2680_v1 = vadd.f32 %v8976_v23, %v2366_v39 }
 0x3c4   : > { %v5244_v27 = vadd.f32 %v8306_v21, %v5208_v4  ;;  %v3786_v18 = vadd.f32 %v3731_v42, %v3360_v36  ;;  %v4054_v63 = vpop.f32.mrf.mxu3  ;;  %v4736_v35 = vpop.f32.mrf.mxu0 }
 0x3c5   : > { %v3362_v38 = vadd.f32 %v8979_v14, %v2680_v1  ;;  %v5162_v7 = vpop.f32.mrf.mxu1  ;;  %v8989_v1 = vld [vmem:[#allocation67_spill] sm:$0xff] }
 0x3c6   : > { %v5276_v58 = vmax.f32 %v5244_v27, 0.0  ;;  %v4101_v16 = vadd.f32 %v4046_v10, %v3786_v18 }
 0x3c7   : > { %v5348_v13 = vld [vmem:[#allocation3 + $0x78] sm:$0xff] }
 0x3c8   : > { %v5364_v6 = vmax.f32 %v5331_v33, %v5348_v13  ;;  %5308 = vst.msk [vmem:[#allocation3 + $0x80] sm:$0xff] %vm1587_vm1, %v5276_v58  ;;  %v4783_v54 = vadd.f32 %v4728_v55, %v4101_v16  ;;  %v8981_v33 = vld [vmem:[#allocation55_spill] sm:$0xff]  ;;  %v8982_v13 = vld [vmem:[#allocation130_spill] sm:$0xff] }
 0x3c9   : > { %v1939_v27 = vadd.f32 %v8982_v13, %v8981_v33 }
 0x3ca   : > { %5380 = vst.msk [vmem:[#allocation4 + $0x38] sm:$0xff] %vm1587_vm1, %v5364_v6  ;;  %v5209_v61 = vadd.f32 %v5154_v25, %v4783_v54  ;;  %v8978_v25 = vld [vmem:[#allocation128_spill] sm:$0xff] }
 0x3cb   : > { %v3734_v43 = vpop.f32.mrf.mxu2  ;;  %v1937_v48 = vadd.f32 %v8978_v25, %v8977_v56  ;;  %v2368_v59 = vadd.f32 %v8984_v8, %v1939_v27  ;;  %v8990_v56 = vld [vmem:[#allocation109_spill] sm:$0xff] }
 0x3cc   : > { %v5245_v5 = vadd.f32 %v8306_v21, %v5209_v61  ;;  %v3787_v45 = vadd.f32 %v3734_v43, %v3361_v53  ;;  %v4056_v58 = vpop.f32.mrf.mxu3 }
 0x3cd   : > { %v2367_v9 = vadd.f32 %v8980_v26, %v1937_v48  ;;  %v5164_v43 = vpop.f32.mrf.mxu1 }
 0x3ce   : > { %v5277_v17 = vmax.f32 %v5245_v5, 0.0  ;;  %v4102_v60 = vadd.f32 %v4049_v51, %v3787_v45  ;;  %v8986_v45 = vld [vmem:[#allocation59_spill] sm:$0xff] }
 0x3cf   : > { %v2681_v49 = vadd.f32 %v8983_v15, %v2367_v9  ;;  %v5332_v61 = vld [vmem:[#allocation3 + $0x80] sm:$0xff] }
 0x3d0   : > { %5309 = vst.msk [vmem:[#allocation3 + $0x88] sm:$0xff] %vm1587_vm1, %v5277_v17  ;;  %v4784_v55 = vadd.f32 %v4731_v62, %v4102_v60  ;;  %v8988_v17 = vld [vmem:[#allocation66_spill] sm:$0xff] }
 0x3d1   : > { %v5395_v10 = vld [vmem:[#allocation4 + $0x30] ss:$2 sm:$0xff]  ;;  %v5411_v19 = vld [vmem:[#allocation4 + $0x31] ss:$2 sm:$0xff]  ;;  %v2682_v60 = vadd.f32 %v8988_v17, %v2368_v59 }
 0x3d2   : > { %v5423_v29 = vmax.f32 %v5395_v10, %v5411_v19  ;;  %v5210_v20 = vadd.f32 %v5157_v34, %v4784_v55 }
 0x3d3   : > { %v3736_v41 = vpop.f32.mrf.mxu2  ;;  %v3364_v25 = vadd.f32 %v8990_v56, %v2682_v60 }
 0x3d4   : > { %v5451_v32 = vpack.c.bf16 %v5423_v29, %v5423_v29  ;;  %v5246_v51 = vadd.f32 %v8306_v21, %v5210_v20  ;;  %v3788_v12 = vadd.f32 %v3736_v41, %v3362_v38  ;;  %v4059_v48 = vpop.f32.mrf.mxu3 }
 0x3d6   : > { %v5481_v22 = vshrl.u32 %v5451_v32, 16  ;;  %v5484_v62 = vshll.u32 %v5451_v32, 16  ;;  %v5278_v4 = vmax.f32 %v5246_v51, 0.0  ;;  %v4103_v28 = vadd.f32 %v4051_v24, %v3788_v12  ;;  %v8985_v24 = vld [vmem:[#allocation107_spill] sm:$0xff]  ;;  %v8992_v12 = vld [vmem:[#allocation132_spill] sm:$0xff] }
 0x3d7   : > { %v3363_v54 = vadd.f32 %v8985_v24, %v2681_v49  ;;  %v5333_v20 = vld [vmem:[#allocation3 + $0x88] sm:$0xff]  ;;  %v8997_v24 = vld [vmem:[#allocation65_spill] sm:$0xff] }
 0x3d8   : > { %v5483_v30 = vrot.slane %v5481_v22, 7  ;;  %5310 = vst.msk [vmem:[#allocation3 + $0x90] sm:$0xff] %vm1587_vm1, %v5278_v4  ;;  %v4785_v42 = vadd.f32 %v4733_v40, %v4103_v28  ;;  %v4738_v40 = vpop.f32.mrf.mxu0 }
 0x3da   : > { %v5486_v34 = vor.u32 %v5484_v62, %v5483_v30  ;;  %v5487_v36 = vrot.slane %v5483_v30, 4  ;;  %v5211_v50 = vadd.f32 %v5159_v37, %v4785_v42  ;;  %v8987_v37 = vld [vmem:[#allocation131_spill] sm:$0xff]  ;;  %v8641_v42 = vld [vmem:[%s8752_s4] ss:$0 sm:$0xff] }
 0x3db   : > { %v3739_v39 = vpop.f32.mrf.mxu2  ;;  %v1942_v10 = vadd.f32 %v8987_v37, %v8986_v45 }
 0x3dc   : > { %v5556_v18 = vsel %vm6741_vm5, %v5486_v34, %v6340_v44  ;;  %v5559_v6 = vsel %vm6808_vm0, %v5487_v36, %v6342_v3  ;;  %v5247_v16 = vadd.f32 %v8306_v21, %v5211_v50  ;;  %v3789_v53 = vadd.f32 %v3739_v39, %v3363_v54  ;;  %v5167_v44 = vpop.f32.mrf.mxu1  ;;  %v8994_v3 = vld [vmem:[#allocation71_spill] sm:$0xff]  ;;  %v4061_v27 = vpop.f32.mrf.mxu3  ;;  %v8996_v50 = vld [vmem:[#allocation74_spill] sm:$0xff]  ;;  %v8998_v54 = vld [vmem:[#allocation133_spill] sm:$0xff] }
 0x3dd   : > { %6341 = vst [vmem:[%s6720_s29 + $0x20] sm:$0xf] %v5556_v18  ;;  %v2369_v29 = vadd.f32 %v8989_v1, %v1942_v10  ;;  %v9000_v10 = vld [vmem:[#allocation75_spill] sm:$0xff] }
 0x3de   : > { %6343 = vst [vmem:[%s6720_s29 + $0x24] sm:$0x1] %v5559_v6  ;;  %v5279_v31 = vmax.f32 %v5247_v16, 0.0  ;;  %v4104_v19 = vadd.f32 %v4054_v63, %v3789_v53  ;;  %v8991_v63 = vld [vmem:[#allocation62_spill] sm:$0xff]  ;;  %v6346_v1 = vld [vmem:[%s6720_s29 + $0x2c] sm:$0x1] }
 0x3df   : > { %v5349_v11 = vld [vmem:[#allocation3 + $0x90] sm:$0xff]  ;;  %v1944_v26 = vadd.f32 %v8992_v12, %v8991_v63  ;;  %v9003_v63 = vld [vmem:[#allocation78_spill] sm:$0xff] }
 0x3e0   : > { %v5365_v5 = vmax.f32 %v5332_v61, %v5349_v11  ;;  %5311 = vst.msk [vmem:[#allocation3 + $0x98] sm:$0xff] %vm1587_vm1, %v5279_v31  ;;  %v4786_v23 = vadd.f32 %v4736_v35, %v4104_v19  ;;  %v4741_v41 = vpop.f32.mrf.mxu0  ;;  %v8993_v35 = vld [vmem:[#allocation70_spill] sm:$0xff]  ;;  %v8999_v11 = vld [vmem:[#allocation112_spill] sm:$0xff] }
 0x3e1   : > { %v2683_v62 = vadd.f32 %v8993_v35, %v2369_v29  ;;  %v2370_v4 = vadd.f32 %v8994_v3, %v1944_v26  ;;  %v9004_v35 = vld [vmem:[#allocation80_spill] sm:$0xff] }
 0x3e2   : > { %5381 = vst.msk [vmem:[#allocation4 + $0x40] sm:$0xff] %vm1587_vm1, %v5365_v5  ;;  %v5212_v55 = vadd.f32 %v5162_v7, %v4786_v23  ;;  %v6344_v23 = vld [vmem:[%s6720_s29 + $0x28] sm:$0xf] }
 0x3e3   : > { %v3741_v32 = vpop.f32.mrf.mxu2 }
 0x3e4   : > { %v5248_v38 = vadd.f32 %v8306_v21, %v5212_v55  ;;  %v3790_v22 = vadd.f32 %v3741_v32, %v3364_v25  ;;  %v8995_v21 = vld [vmem:[#allocation111_spill] sm:$0xff]  ;;  %v5169_v31 = vpop.f32.mrf.mxu1  ;;  %v4064_v56 = vpop.f32.mrf.mxu3 }
 0x3e5   : > { %v3365_v34 = vadd.f32 %v8995_v21, %v2683_v62 }
 0x3e6   : > { %v5280_v9 = vmax.f32 %v5248_v38, 0.0  ;;  %v4105_v30 = vadd.f32 %v4056_v58, %v3790_v22  ;;  %v2684_v58 = vadd.f32 %v8996_v50, %v2370_v4  ;;  %v9002_v38 = vld [vmem:[#allocation134_spill] sm:$0xff] }
 0x3e7   : > { %v5350_v14 = vld [vmem:[#allocation3 + $0x98] sm:$0xff] }
 0x3e8   : > { %v5366_v51 = vmax.f32 %v5333_v20, %v5350_v14  ;;  %5312 = vst.msk [vmem:[#allocation3 + $0xa0] sm:$0xff] %vm1587_vm1, %v5280_v9  ;;  %v4787_v7 = vadd.f32 %v4738_v40, %v4105_v30  ;;  %v4743_v16 = vpop.f32.mrf.mxu0  ;;  %v1947_v40 = vadd.f32 %v8998_v54, %v8997_v24  ;;  %v3366_v53 = vadd.f32 %v8999_v11, %v2684_v58  ;;  %v9001_v14 = vld [vmem:[#allocation68_spill] sm:$0xff]  ;;  %v9010_v54 = vld [vmem:[#allocation117_spill] sm:$0xff] }
 0x3e9   : > { %v1949_v22 = vadd.f32 %v9002_v38, %v9001_v14 }
 0x3ea   : > { %5382 = vst.msk [vmem:[#allocation4 + $0x48] sm:$0xff] %vm1587_vm1, %v5366_v51  ;;  %v5213_v28 = vadd.f32 %v5164_v43, %v4787_v7  ;;  %v2371_v19 = vadd.f32 %v9000_v10, %v1947_v40 }
 0x3eb   : > { %v3744_v36 = vpop.f32.mrf.mxu2  ;;  %v2372_v62 = vadd.f32 %v9004_v35, %v1949_v22 }
 0x3ec   : > { %v5249_v33 = vadd.f32 %v8641_v42, %v5213_v28  ;;  %v3791_v13 = vadd.f32 %v3744_v36, %v3365_v34  ;;  %v2685_v12 = vadd.f32 %v9003_v63, %v2371_v19  ;;  %v5172_v9 = vpop.f32.mrf.mxu1 }
 0x3ee   : > { %v5281_v15 = vmax.f32 %v5249_v33, 0.0  ;;  %v4106_v49 = vadd.f32 %v4059_v48, %v3791_v13  ;;  %v4066_v33 = vpop.f32.mrf.mxu3  ;;  %v9006_v13 = vld [vmem:[#allocation72_spill] sm:$0xff] }
 0x3ef   : > { %v5334_v28 = vld [vmem:[#allocation3 + $0xa0] sm:$0xff] }
 0x3f0   : > { %5313 = vst.msk [vmem:[#allocation3 + $0xa8] sm:$0xff] %vm1587_vm1, %v5281_v15  ;;  %v4788_v59 = vadd.f32 %v4741_v41, %v4106_v49  ;;  %v4746_v20 = vpop.f32.mrf.mxu0  ;;  %v9008_v15 = vld [vmem:[#allocation83_spill] sm:$0xff] }
 0x3f1   : > { %v5397_v18 = vld [vmem:[#allocation4 + $0x40] ss:$2 sm:$0xff]  ;;  %v5413_v6 = vld [vmem:[#allocation4 + $0x41] ss:$2 sm:$0xff]  ;;  %v2686_v49 = vadd.f32 %v9008_v15, %v2372_v62  ;;  %v9017_v62 = vld [vmem:[#allocation79_spill] sm:$0xff] }
 0x3f2   : > { %v5424_v8 = vmax.f32 %v5397_v18, %v5413_v6  ;;  %v5214_v61 = vadd.f32 %v5167_v44, %v4788_v59  ;;  %v9005_v44 = vld [vmem:[#allocation114_spill] sm:$0xff] }
 0x3f3   : > { %v3746_v5 = vpop.f32.mrf.mxu2  ;;  %v3367_v7 = vadd.f32 %v9005_v44, %v2685_v12  ;;  %v3368_v40 = vadd.f32 %v9010_v54, %v2686_v49  ;;  %v1957_v44 = vadd.f32 %v8265_v52, %v9017_v62  ;;  %v6350_v52 = vld [vmem:[%s6720_s29 + $0x34] sm:$0x1] }
 0x3f4   : > { %v5452_v39 = vpack.c.bf16 %v5424_v8, %v5424_v8  ;;  %v5250_v45 = vadd.f32 %v8641_v42, %v5214_v61  ;;  %v3792_v37 = vadd.f32 %v3746_v5, %v3366_v53  ;;  %v5174_v59 = vpop.f32.mrf.mxu1  ;;  %v9011_v5 = vld [vmem:[#allocation76_spill] sm:$0xff] }
 0x3f6   : > { %v5489_v43 = vshrl.u32 %v5452_v39, 16  ;;  %v5492_v60 = vshll.u32 %v5452_v39, 16  ;;  %v5282_v29 = vmax.f32 %v5250_v45, 0.0  ;;  %v4107_v55 = vadd.f32 %v4061_v27, %v3792_v37  ;;  %v9007_v27 = vld [vmem:[#allocation135_spill] sm:$0xff]  ;;  %v9012_v45 = vld [vmem:[#allocation136_spill] sm:$0xff] }
 0x3f7   : > { %v1952_v18 = vadd.f32 %v9007_v27, %v9006_v13  ;;  %v5335_v39 = vld [vmem:[#allocation3 + $0xa8] sm:$0xff]  ;;  %v1954_v37 = vadd.f32 %v9012_v45, %v9011_v5 }
 0x3f8   : > { %v5491_v17 = vrot.slane %v5489_v43, 7  ;;  %5314 = vst.msk [vmem:[#allocation3 + $0xb0] sm:$0xff] %vm1587_vm1, %v5282_v29  ;;  %v4789_v32 = vadd.f32 %v4743_v16, %v4107_v55  ;;  %v4748_v50 = vpop.f32.mrf.mxu0  ;;  %v9009_v16 = vld [vmem:[#allocation84_spill] sm:$0xff] }
 0x3f9   : > { %v2373_v8 = vadd.f32 %v9009_v16, %v1952_v18  ;;  %v9014_v55 = vld [vmem:[#allocation88_spill] sm:$0xff] }
 0x3fa   : > { %v5494_v25 = vor.u32 %v5492_v60, %v5491_v17  ;;  %v5495_v48 = vrot.slane %v5491_v17, 4  ;;  %v5215_v26 = vadd.f32 %v5169_v31, %v4789_v32  ;;  %v9013_v17 = vld [vmem:[#allocation87_spill] sm:$0xff]  ;;  %v9019_v18 = vld [vmem:[#allocation92_spill] sm:$0xff] }
 0x3fb   : > { %v3749_v4 = vpop.f32.mrf.mxu2  ;;  %v2687_v60 = vadd.f32 %v9013_v17, %v2373_v8 }
 0x3fc   : > { %v5562_v41 = vsel %vm6741_vm5, %v5494_v25, %v6344_v23  ;;  %v5565_v51 = vsel %vm6808_vm0, %v5495_v48, %v6346_v1  ;;  %v5251_v30 = vadd.f32 %v8641_v42, %v5215_v26  ;;  %v3793_v34 = vadd.f32 %v3749_v4, %v3367_v7  ;;  %v4069_v23 = vpop.f32.mrf.mxu3  ;;  %v9015_v48 = vld [vmem:[#allocation119_spill] sm:$0xff]  ;;  %v5177_v14 = vpop.f32.mrf.mxu1 }
 0x3fd   : > { %6345 = vst [vmem:[%s6720_s29 + $0x28] sm:$0xf] %v5562_v41  ;;  %v3369_v32 = vadd.f32 %v9015_v48, %v2687_v60  ;;  %v9016_v26 = vld [vmem:[#allocation91_spill] sm:$0xff]  ;;  %v9024_v48 = vld [vmem:[#allocation85_spill] sm:$0xff] }
 0x3fe   : > { %6347 = vst [vmem:[%s6720_s29 + $0x2c] sm:$0x1] %v5565_v51  ;;  %v5283_v3 = vmax.f32 %v5251_v30, 0.0  ;;  %v4108_v6 = vadd.f32 %v4064_v56, %v3793_v34  ;;  %v2374_v56 = vadd.f32 %v9014_v55, %v1954_v37  ;;  %v9022_v37 = vld [vmem:[#allocation95_spill] sm:$0xff] }
 0x3ff   : > { %v5351_v21 = vld [vmem:[#allocation3 + $0xb0] sm:$0xff] }
 0x400   : > { %v5367_v36 = vmax.f32 %v5334_v28, %v5351_v21  ;;  %5315 = vst.msk [vmem:[#allocation3 + $0xb8] sm:$0xff] %vm1587_vm1, %v5283_v3  ;;  %v4790_v58 = vadd.f32 %v4746_v20, %v4108_v6  ;;  %v4751_v29 = vpop.f32.mrf.mxu0  ;;  %v9018_v28 = vld [vmem:[#allocation120_spill] sm:$0xff]  ;;  %v2375_v6 = vadd.f32 %v9019_v18, %v1957_v44  ;;  %v9030_v18 = vld [vmem:[#allocation101_spill] sm:$0xff] }
 0x402   : > { %5383 = vst.msk [vmem:[#allocation4 + $0x50] sm:$0xff] %vm1587_vm1, %v5367_v36  ;;  %v5216_v24 = vadd.f32 %v5172_v9, %v4790_v58  ;;  %v2688_v9 = vadd.f32 %v9016_v26, %v2374_v56  ;;  %v6348_v58 = vld [vmem:[%s6720_s29 + $0x30] sm:$0xf] }
 0x403   : > { %v3751_v31 = vpop.f32.mrf.mxu2 }
 0x404   : > { %v5252_v11 = vadd.f32 %v8641_v42, %v5216_v24  ;;  %v3794_v53 = vadd.f32 %v3751_v31, %v3368_v40  ;;  %v4071_v3 = vpop.f32.mrf.mxu3  ;;  %v3370_v21 = vadd.f32 %v9018_v28, %v2688_v9  ;;  %v9020_v40 = vld [vmem:[#allocation82_spill] sm:$0xff] }
 0x405   : > { %v1959_v31 = vadd.f32 %v8274_v2, %v9020_v40 }
 0x406   : > { %v5284_v10 = vmax.f32 %v5252_v11, 0.0  ;;  %v4109_v19 = vadd.f32 %v4066_v33, %v3794_v53  ;;  %v9021_v11 = vld [vmem:[#allocation94_spill] sm:$0xff] }
 0x407   : > { %v5352_v61 = vld [vmem:[#allocation3 + $0xb8] sm:$0xff]  ;;  %v2689_v53 = vadd.f32 %v9021_v11, %v2375_v6 }
 0x408   : > { %v5368_v43 = vmax.f32 %v5335_v39, %v5352_v61  ;;  %5316 = vst.msk [vmem:[#allocation3 + $0xc0] sm:$0xff] %vm1587_vm1, %v5284_v10  ;;  %v4791_v1 = vadd.f32 %v4748_v50, %v4109_v19  ;;  %v4753_v33 = vpop.f32.mrf.mxu0  ;;  %v5179_v50 = vpop.f32.mrf.mxu1  ;;  %v2376_v10 = vadd.f32 %v9022_v37, %v1959_v31  ;;  %v9023_v19 = vld [vmem:[#allocation122_spill] sm:$0xff]  ;;  %v9032_v31 = vld [vmem:[#allocation103_spill] sm:$0xff] }
 0x409   : > { %v3371_v17 = vadd.f32 %v9023_v19, %v2689_v53 }
 0x40a   : > { %5384 = vst.msk [vmem:[#allocation4 + $0x58] sm:$0xff] %vm1587_vm1, %v5368_v43  ;;  %v5217_v25 = vadd.f32 %v5174_v59, %v4791_v1 }
 0x40b   : > { %v3754_v20 = vpop.f32.mrf.mxu2 }
 0x40c   : > { %v5253_v38 = vadd.f32 %v8641_v42, %v5217_v25  ;;  %v3795_v22 = vadd.f32 %v3754_v20, %v3369_v32  ;;  %v4074_v5 = vpop.f32.mrf.mxu3  ;;  %v1962_v32 = vadd.f32 %v8277_v57, %v9024_v48 }
 0x40e   : > { %v5285_v63 = vmax.f32 %v5253_v38, 0.0  ;;  %v4110_v12 = vadd.f32 %v4069_v23, %v3795_v22 }
 0x40f   : > { %v5336_v1 = vld [vmem:[#allocation3 + $0xc0] sm:$0xff] }
 0x410   : > { %5317 = vst.msk [vmem:[#allocation3 + $0xc8] sm:$0xff] %vm1587_vm1, %v5285_v63  ;;  %v4792_v35 = vadd.f32 %v4751_v29, %v4110_v12  ;;  %v4756_v60 = vpop.f32.mrf.mxu0  ;;  %v5182_v56 = vpop.f32.mrf.mxu1  ;;  %v9027_v12 = vld [vmem:[#allocation125_spill] sm:$0xff] }
 0x411   : > { %v5399_v41 = vld [vmem:[#allocation4 + $0x50] ss:$2 sm:$0xff]  ;;  %v5415_v51 = vld [vmem:[#allocation4 + $0x51] ss:$2 sm:$0xff] }
 0x412   : > { %v5425_v30 = vmax.f32 %v5399_v41, %v5415_v51  ;;  %v5218_v4 = vadd.f32 %v5177_v14, %v4792_v35  ;;  %v9025_v14 = vld [vmem:[#allocation97_spill] sm:$0xff]  ;;  %v9026_v41 = vld [vmem:[#allocation98_spill] sm:$0xff] }
 0x413   : > { %v3756_v36 = vpop.f32.mrf.mxu2  ;;  %v2690_v38 = vadd.f32 %v9025_v14, %v2376_v10  ;;  %v2377_v51 = vadd.f32 %v9026_v41, %v1962_v32 }
 0x414   : > { %v5453_v7 = vpack.c.bf16 %v5425_v30, %v5425_v30  ;;  %v5254_v13 = vadd.f32 %v8641_v42, %v5218_v4  ;;  %v3796_v27 = vadd.f32 %v3756_v36, %v3370_v21  ;;  %v4076_v9 = vpop.f32.mrf.mxu3  ;;  %v9028_v4 = vld [vmem:[#allocation89_spill] sm:$0xff]  ;;  %v9029_v36 = vld [vmem:[#allocation100_spill] sm:$0xff] }
 0x415   : > { %v3372_v26 = vadd.f32 %v9027_v12, %v2690_v38  ;;  %v1964_v28 = vadd.f32 %v8286_v47, %v9028_v4 }
 0x416   : > { %v5497_v34 = vshrl.u32 %v5453_v7, 16  ;;  %v5500_v49 = vshll.u32 %v5453_v7, 16  ;;  %v5286_v16 = vmax.f32 %v5254_v13, 0.0  ;;  %v4111_v8 = vadd.f32 %v4071_v3, %v3796_v27 }
 0x417   : > { %v5337_v35 = vld [vmem:[#allocation3 + $0xc8] sm:$0xff]  ;;  %v2378_v6 = vadd.f32 %v9030_v18, %v1964_v28 }
 0x418   : > { %v5499_v15 = vrot.slane %v5497_v34, 7  ;;  %5318 = vst.msk [vmem:[#allocation3 + $0xd0] sm:$0xff] %vm1587_vm1, %v5286_v16  ;;  %v4793_v54 = vadd.f32 %v4753_v33, %v4111_v8  ;;  %v4758_v3 = vpop.f32.mrf.mxu0  ;;  %v2691_v33 = vadd.f32 %v9029_v36, %v2377_v51  ;;  %v5184_v13 = vpop.f32.mrf.mxu1  ;;  %v6358_v36 = vld [vmem:[%s6720_s29 + $0x44] sm:$0x1] }
 0x41a   : > { %v5502_v59 = vor.u32 %v5500_v49, %v5499_v15  ;;  %v5503_v24 = vrot.slane %v5499_v15, 4  ;;  %v5219_v43 = vadd.f32 %v5179_v50, %v4793_v54  ;;  %v9031_v49 = vld [vmem:[#allocation127_spill] sm:$0xff] }
 0x41b   : > { %v3759_v23 = vpop.f32.mrf.mxu2  ;;  %v3373_v50 = vadd.f32 %v9031_v49, %v2691_v33 }
 0x41c   : > { %v5568_v39 = vsel %vm6741_vm5, %v5502_v59, %v6348_v58  ;;  %v5571_v61 = vsel %vm6808_vm0, %v5503_v24, %v6350_v52  ;;  %v5255_v45 = vadd.f32 %v8641_v42, %v5219_v43  ;;  %v3797_v55 = vadd.f32 %v3759_v23, %v3371_v17 }
 0x41d   : > { %6349 = vst [vmem:[%s6720_s29 + $0x30] sm:$0xf] %v5568_v39  ;;  %v2692_v39 = vadd.f32 %v9032_v31, %v2378_v6 }
 0x41e   : > { %6351 = vst [vmem:[%s6720_s29 + $0x34] sm:$0x1] %v5571_v61  ;;  %v5287_v2 = vmax.f32 %v5255_v45, 0.0  ;;  %v4112_v20 = vadd.f32 %v4074_v5, %v3797_v55  ;;  %v4079_v58 = vpop.f32.mrf.mxu3  ;;  %v9033_v45 = vld [vmem:[#allocation129_spill] sm:$0xff] }
 0x41f   : > { %v5353_v29 = vld [vmem:[#allocation3 + $0xd0] sm:$0xff]  ;;  %v3374_v37 = vadd.f32 %v9033_v45, %v2692_v39  ;;  %v6354_v55 = vld [vmem:[%s6720_s29 + $0x3c] sm:$0x1] }
 0x420   : > { %v5369_v25 = vmax.f32 %v5336_v1, %v5353_v29  ;;  %5319 = vst.msk [vmem:[#allocation3 + $0xd8] sm:$0xff] %vm1587_vm1, %v5287_v2  ;;  %v4794_v22 = vadd.f32 %v4756_v60, %v4112_v20  ;;  %v6352_v29 = vld [vmem:[%s6720_s29 + $0x38] sm:$0xf] }
 0x422   : > { %5385 = vst.msk [vmem:[#allocation4 + $0x60] sm:$0xff] %vm1587_vm1, %v5369_v25  ;;  %v5220_v63 = vadd.f32 %v5182_v56, %v4794_v22 }
 0x423   : > { %v3761_v30 = vpop.f32.mrf.mxu2 }
 0x424   : > { %v5256_v44 = vadd.f32 %v8641_v42, %v5220_v63  ;;  %v3798_v7 = vadd.f32 %v3761_v30, %v3372_v26 }
 0x426   : > { %v5288_v21 = vmax.f32 %v5256_v44, 0.0  ;;  %v4113_v34 = vadd.f32 %v4076_v9, %v3798_v7  ;;  %v5187_v11 = vpop.f32.mrf.mxu1  ;;  %v4081_v1 = vpop.f32.mrf.mxu3 }
 0x427   : > { %v5354_v62 = vld [vmem:[#allocation3 + $0xd8] sm:$0xff] }
 0x428   : > { %v5370_v57 = vmax.f32 %v5337_v35, %v5354_v62  ;;  %5320 = vst.msk [vmem:[#allocation3 + $0xe0] sm:$0xff] %vm1587_vm1, %v5288_v21  ;;  %v4795_v27 = vadd.f32 %v4758_v3, %v4113_v34  ;;  %v6356_v34 = vld [vmem:[%s6720_s29 + $0x40] sm:$0xf] }
 0x42a   : > { %5386 = vst.msk [vmem:[#allocation4 + $0x68] sm:$0xff] %vm1587_vm1, %v5370_v57  ;;  %v5221_v15 = vadd.f32 %v5184_v13, %v4795_v27  ;;  %v4761_v8 = vpop.f32.mrf.mxu0 }
 0x42b   : > { %v3764_v52 = vpop.f32.mrf.mxu2 }
 0x42c   : > { %v5257_v16 = vadd.f32 %v8641_v42, %v5221_v15  ;;  %v3799_v47 = vadd.f32 %v3764_v52, %v3373_v50 }
 0x42e   : > { %v5289_v54 = vmax.f32 %v5257_v16, 0.0  ;;  %v4114_v40 = vadd.f32 %v4079_v58, %v3799_v47  ;;  %v5189_v41 = vpop.f32.mrf.mxu1 }
 0x42f   : > { %v5338_v26 = vld [vmem:[#allocation3 + $0xe0] sm:$0xff] }
 0x430   : > { %5321 = vst.msk [vmem:[#allocation3 + $0xe8] sm:$0xff] %vm1587_vm1, %v5289_v54  ;;  %v4796_v53 = vadd.f32 %v4761_v8, %v4114_v40 }
 0x431   : > { %v5401_v59 = vld [vmem:[#allocation4 + $0x60] ss:$2 sm:$0xff]  ;;  %v5417_v24 = vld [vmem:[#allocation4 + $0x61] ss:$2 sm:$0xff] }
 0x432   : > { %v5426_v61 = vmax.f32 %v5401_v59, %v5417_v24  ;;  %v5222_v5 = vadd.f32 %v5187_v11, %v4796_v53  ;;  %v4763_v20 = vpop.f32.mrf.mxu0 }
 0x433   : > { %v3766_v19 = vpop.f32.mrf.mxu2 }
 0x434   : > { %v5454_v43 = vpack.c.bf16 %v5426_v61, %v5426_v61  ;;  %v5258_v17 = vadd.f32 %v8641_v42, %v5222_v5  ;;  %v3800_v60 = vadd.f32 %v3766_v19, %v3374_v37 }
 0x436   : > { %v5505_v10 = vshrl.u32 %v5454_v43, 16  ;;  %v5508_v23 = vshll.u32 %v5454_v43, 16  ;;  %v5290_v56 = vmax.f32 %v5258_v17, 0.0  ;;  %v4115_v25 = vadd.f32 %v4081_v1, %v3800_v60 }
 0x437   : > { %v5339_v35 = vld [vmem:[#allocation3 + $0xe8] sm:$0xff] }
 0x438   : > { %v5507_v2 = vrot.slane %v5505_v10, 7  ;;  %5322 = vst.msk [vmem:[#allocation3 + $0xf0] sm:$0xff] %vm1587_vm1, %v5290_v56  ;;  %v4797_v14 = vadd.f32 %v4763_v20, %v4115_v25 }
 0x43a   : > { %v5510_v48 = vor.u32 %v5508_v23, %v5507_v2  ;;  %v5511_v32 = vrot.slane %v5507_v2, 4  ;;  %v5223_v51 = vadd.f32 %v5189_v41, %v4797_v14 }
 0x43c   : > { %v5574_v38 = vsel %vm6741_vm5, %v5510_v48, %v6352_v29  ;;  %v5577_v22 = vsel %vm6808_vm0, %v5511_v32, %v6354_v55  ;;  %v5259_v63 = vadd.f32 %v8641_v42, %v5223_v51 }
 0x43d   : > { %6353 = vst [vmem:[%s6720_s29 + $0x38] sm:$0xf] %v5574_v38 }
 0x43e   : > { %6355 = vst [vmem:[%s6720_s29 + $0x3c] sm:$0x1] %v5577_v22  ;;  %v5291_v12 = vmax.f32 %v5259_v63, 0.0 }
 0x43f   : > { %v5355_v9 = vld [vmem:[#allocation3 + $0xf0] sm:$0xff] }
 0x440   : > { %v5371_v30 = vmax.f32 %v5338_v26, %v5355_v9  ;;  %5323 = vst.msk [vmem:[#allocation3 + $0xf8] sm:$0xff] %vm1587_vm1, %v5291_v12 }
 0x442   : > { %5387 = vst.msk [vmem:[#allocation4 + $0x70] sm:$0xff] %vm1587_vm1, %v5371_v30 }
 0x447   : > { %v5356_v62 = vld [vmem:[#allocation3 + $0xf8] sm:$0xff] }
 0x448   : > { %v5372_v44 = vmax.f32 %v5339_v35, %v5356_v62 }
 0x44a   : > { %5388 = vst.msk [vmem:[#allocation4 + $0x78] sm:$0xff] %vm1587_vm1, %v5372_v44 }
 0x451   : > { %v5403_v7 = vld [vmem:[#allocation4 + $0x70] ss:$2 sm:$0xff]  ;;  %v5419_v3 = vld [vmem:[#allocation4 + $0x71] ss:$2 sm:$0xff] }
 0x452   : > { %v5427_v42 = vmax.f32 %v5403_v7, %v5419_v3 }
 0x454   : > { %v5455_v57 = vpack.c.bf16 %v5427_v42, %v5427_v42 }
 0x456   : > { %v5513_v4 = vshrl.u32 %v5455_v57, 16  ;;  %v5516_v21 = vshll.u32 %v5455_v57, 16 }
 0x458   : > { %v5515_v28 = vrot.slane %v5513_v4, 7 }
 0x45a   : > { %v5518_v33 = vor.u32 %v5516_v21, %v5515_v28  ;;  %v5519_v13 = vrot.slane %v5515_v28, 4 }
 0x45c   : > { %v5580_v27 = vsel %vm6741_vm5, %v5518_v33, %v6356_v34  ;;  %v5583_v18 = vsel %vm6808_vm0, %v5519_v13, %v6358_v36 }
 0x45d   : > { %6357 = vst [vmem:[%s6720_s29 + $0x40] sm:$0xf] %v5580_v27 }
 0x45e   : > { %6359 = vst [vmem:[%s6720_s29 + $0x44] sm:$0x1] %v5583_v18 }
 0x45f PF: > { %s15_s18 = sadd.s32 1, %s6524_s18  }
 0x460   : > { %p12_p4 = scmp.ge.s32.totalorder %s15_s18, 6  }
 0x462   :  { %14 = sbr.rel (!%p12_p4) target bundleno = 1 (0x1), region = 97 }

</bundles_post_ra>
